<compile_context>
chip_gen: v5e
topology: v5e:2x2
jax: 0.10.0
libtpu: 0.0.40
codegen_flags: <defaults>
</compile_context>

<pallas_src>
import numpy as np
import jax
import jax.numpy as jnp
from jax.experimental import pallas as pl
from jax.experimental.pallas import tpu as pltpu

LATENT_DIM = 512
BN_EPS = 1e-5
LN_EPS = 1e-5
L2_EPS = 1e-12


# --------------------------------------------------------------------------
# Fused Pallas kernel
# --------------------------------------------------------------------------
def _make_fused_kernel(B):
    RM0 = B * 256 - 17          # rows of conv0 pool candidates (valid span)
    RZ1 = B * 100 - 22          # rows of conv1 full-res output
    RM1 = B * 100 - 33          # rows of conv1 pool candidates
    RZ2 = B * 36 - 14           # rows of conv2 output

    def kernel(p0_ref, w0_ref, s0_ref, tgt1_ref, w1_ref, s1_ref,
               tgt2_ref, w2_ref, s2_ref, tgts_ref,
               fc1w_hbm, fc1b_ref, lng_ref, lnb_ref, fc2w_hbm, fc2b_ref,
               o_ref,
               a1_ref, a2_ref, sel_ref, fc1w_vmem, fc2w_vmem, dma_sem):
        f32, bf16 = jnp.float32, jnp.bfloat16

        # ---- kick off the FC-head weight DMAs first: they overlap the conv stack
        cp1 = pltpu.make_async_copy(fc1w_hbm, fc1w_vmem, dma_sem.at[0])
        cp2 = pltpu.make_async_copy(fc2w_hbm, fc2w_vmem, dma_sem.at[1])
        cp1.start()
        cp2.start()

        def select_matrix(tgt_ref, n_rows, n_cols):
            """0/1 row->col selection matrix built from a lane iota (no HBM DMA).

            tgt_ref: (n_rows, 1) int32; -1 (or any out-of-range value) => all-zero
            row.  1.0/0.0 entries are exact in bf16, so the following MXU dot is an
            exact row gather of its (bf16) RHS.
            """
            cols = jax.lax.broadcasted_iota(jnp.int32, (n_rows, n_cols), 1)
            return jnp.where(cols == tgt_ref[...], 1.0, 0.0).astype(bf16)

        def conv_taps(a_ref_, w_ref_, wp, cin, rz):
            """3x3 'same' conv on a zero-padded activation staged in VMEM.

            a_ref_: (B*Hp*Wp, cin) bf16 ref, rows ordered (b, y, x) over the padded
            grid; tap (ky, kx) is a contiguous row-slice at offset ky*wp+kx.  Nine
            bf16 MXU dots accumulated in f32; slicing the Ref (not a register
            value) avoids per-tap sublane relayouts.
            """
            z = None
            for k in range(9):
                ky, kx = k // 3, k % 3
                off = ky * wp + kx
                zk = jnp.dot(a_ref_[off:off + rz, :],
                             w_ref_[k * cin:(k + 1) * cin, :],
                             preferred_element_type=f32)
                z = zk if z is None else z + zk
            return z

        def pool_shift_relu(z, row_stride, shift):
            """MaxPool2d(2) + BN shift + ReLU on full-resolution conv values.

            BN scale is already folded into the conv weights, so max-per-slot is
            exact for any scale sign; the constant shift and ReLU commute with max.
            Rows that straddle batch / odd offsets are never selected downstream
            (the tgt vectors only point at valid pooled positions).
            """
            rm = z.shape[0] - row_stride - 1
            m = jnp.maximum(
                jnp.maximum(z[0:rm, :], z[1:rm + 1, :]),
                jnp.maximum(z[row_stride:row_stride + rm, :],
                            z[row_stride + 1:row_stride + 1 + rm, :]))
            return jnp.maximum(m + shift, 0.0)

        # ---- conv0 (1 -> 32) on 16x16: one GEMM over the im2col patch matrix ----
        z0 = jnp.dot(p0_ref[...], w0_ref[...],
                     preferred_element_type=f32)                      # (B*256, 32)
        h0 = pool_shift_relu(z0, 16, s0_ref[...])                     # (RM0, 32)
        # pooled-slot select + zero-pad embed into the 10x10 padded grid of layer 1
        P1 = select_matrix(tgt1_ref, B * 100, RM0)
        a1_ref[...] = jnp.dot(P1, h0.astype(bf16),
                              preferred_element_type=f32).astype(bf16)

        # ---- conv1 (32 -> 64) on 8x8 (padded 10x10 grid) ----
        z1 = conv_taps(a1_ref, w1_ref, 10, 32, RZ1)                   # (RZ1, 64)
        h1 = pool_shift_relu(z1, 10, s1_ref[...])                     # (RM1, 64)
        P2 = select_matrix(tgt2_ref, B * 36, RM1)
        a2_ref[...] = jnp.dot(P2, h1.astype(bf16),
                              preferred_element_type=f32).astype(bf16)

        # ---- conv2 (64 -> 128) on 4x4 (padded 6x6 grid), no pool ----
        z2 = conv_taps(a2_ref, w2_ref, 6, 64, RZ2)                    # (RZ2, 128)
        h2 = jnp.maximum(z2 + s2_ref[...], 0.0)

        # AdaptiveAvgPool2d((4,4)) == identity (feature map already 4x4).
        # Gather the 16 spatial slots slot-major via ONE MXU dot, store once
        # (unmasked) into the (16B, 128) bf16 scratch.
        S = select_matrix(tgts_ref, 16 * B, RZ2)
        sel_ref[...] = jnp.dot(S, h2.astype(bf16),
                               preferred_element_type=f32).astype(bf16)

        # ---- FC head: Linear -> LayerNorm -> SiLU -> (Dropout: eval identity)
        #              -> Linear -> Tanh -> L2 normalize (F.normalize, dim=1) ----
        cp1.wait()                                                    # fc1 weights ready
        acc = jnp.zeros((B, 512), f32)
        for s in range(16):                                           # fc1 as 16 per-slot dots
            acc = acc + jnp.dot(sel_ref[s * B:(s + 1) * B, :],
                                fc1w_vmem[s * 128:(s + 1) * 128, :],
                                preferred_element_type=f32)
        hfc = acc + fc1b_ref[...]                                     # (B, 512)
        mu = jnp.mean(hfc, axis=-1, keepdims=True)
        var = jnp.mean((hfc - mu) * (hfc - mu), axis=-1, keepdims=True)
        hn = (hfc - mu) * jax.lax.rsqrt(var + LN_EPS) * lng_ref[...] + lnb_ref[...]
        sact = hn * jax.nn.sigmoid(hn)                                # SiLU

        cp2.wait()                                                    # fc2 weights ready
        zf = jnp.dot(sact.astype(bf16), fc2w_vmem[...],
                     preferred_element_type=f32) + fc2b_ref[...]
        t = jnp.tanh(zf)
        nrm = jnp.sqrt(jnp.sum(t * t, axis=-1, keepdims=True))
        o_ref[...] = t / jnp.maximum(nrm, L2_EPS)

    return kernel


# --------------------------------------------------------------------------
# Host-side tiny int32 target vectors (replace the old 0/1 matrices; <2 KB total)
# --------------------------------------------------------------------------
def _pool_targets(B):
    # tgt1: row of layer-1 padded 10x10 grid -> source column in h0 (else -1)
    tgt1 = np.full((B * 100, 1), -1, np.int32)
    for b in range(B):
        for i in range(8):
            for j in range(8):
                tgt1[b * 100 + (i + 1) * 10 + (j + 1), 0] = b * 256 + 32 * i + 2 * j
    # tgt2: row of layer-2 padded 6x6 grid -> source column in h1 (else -1)
    tgt2 = np.full((B * 36, 1), -1, np.int32)
    for b in range(B):
        for i in range(4):
            for j in range(4):
                tgt2[b * 36 + (i + 1) * 6 + (j + 1), 0] = b * 100 + 20 * i + 2 * j
    # tgts: slot-major (s, b) feature gather -> source row in h2
    tgts = np.zeros((16 * B, 1), np.int32)
    for s in range(16):
        hh, ww = s // 4, s % 4
        for b in range(B):
            tgts[s * B + b, 0] = b * 36 + 6 * hh + ww
    return jnp.asarray(tgt1), jnp.asarray(tgt2), jnp.asarray(tgts)


def _im2col_conv0(x):
    """x: (B, 1, 16, 16) -> (B*256, 9) bf16 patch matrix; column order (ky, kx)."""
    B = x.shape[0]
    img = x[:, 0, :, :].astype(jnp.float32)                 # (B, 16, 16)
    xp = jnp.pad(img, ((0, 0), (1, 1), (1, 1)))
    cols = [xp[:, dy:dy + 16, dx:dx + 16] for dy in range(3) for dx in range(3)]
    return jnp.stack(cols, axis=-1).reshape(B * 256, 9).astype(jnp.bfloat16)


# --------------------------------------------------------------------------
# One-time parameter preparation (fold BN, permute fc1 rows, cast weights bf16)
# --------------------------------------------------------------------------
def prepare_params(p):
    prep = {}
    for idx in range(3):
        w = p[f"conv{idx}_w"]                                # (3, 3, cin, cout)
        cin, cout = w.shape[2], w.shape[3]
        scale = p[f"bn{idx}_gamma"] / jnp.sqrt(p[f"bn{idx}_var"] + BN_EPS)
        shift = (p[f"conv{idx}_b"] - p[f"bn{idx}_mean"]) * scale + p[f"bn{idx}_beta"]
        wf = (w * scale[None, None, None, :]).reshape(9 * cin, cout)
        prep[f"w{idx}"] = wf.astype(jnp.bfloat16)
        prep[f"s{idx}"] = shift.reshape(1, cout).astype(jnp.float32)
    # fc1 rows: PyTorch NCHW-flatten index is c*16 + (h*4+w); kernel slot-major
    # layout needs row (s*128 + c) with s = h*4+w  ->  permute weight rows once.
    d = np.arange(128 * 16)
    src = (d % 128) * 16 + (d // 128)
    prep["fc1_w"] = p["fc1_w"][src, :].astype(jnp.bfloat16)
    prep["fc1_b"] = p["fc1_b"].reshape(1, -1).astype(jnp.float32)
    prep["ln_g"] = p["ln_gamma"].reshape(1, -1).astype(jnp.float32)
    prep["ln_b"] = p["ln_beta"].reshape(1, -1).astype(jnp.float32)
    prep["fc2_w"] = p["fc2_w"].astype(jnp.bfloat16)
    prep["fc2_b"] = p["fc2_b"].reshape(1, -1).astype(jnp.float32)
    return prep


# --------------------------------------------------------------------------
# Forward pass (single fused pallas_call)
# --------------------------------------------------------------------------
def miyawaki_stimulus_encoder_forward(x, prep):
    if x.ndim == 3:                       # matches the torch unsqueeze(1) path
        x = x[:, None, :, :]
    B, C, H, W = x.shape
    assert C == 1 and H == 16 and W == 16  # TODO(synk): general spatial sizes

    p0 = _im2col_conv0(x)                 # (B*256, 9) bf16 -- only XLA glue left
    tgt1, tgt2, tgts = _pool_targets(B)
    latent = prep["fc2_w"].shape[1]

    args = (p0, prep["w0"], prep["s0"], tgt1, prep["w1"], prep["s1"],
            tgt2, prep["w2"], prep["s2"], tgts,
            prep["fc1_w"], prep["fc1_b"], prep["ln_g"], prep["ln_b"],
            prep["fc2_w"], prep["fc2_b"])

    def full_spec(a):
        return pl.BlockSpec(a.shape, lambda i: (0, 0))

    hbm_spec = pl.BlockSpec(memory_space=pl.ANY)   # manual DMA inside the kernel
    in_specs = [full_spec(p0), full_spec(prep["w0"]), full_spec(prep["s0"]),
                full_spec(tgt1), full_spec(prep["w1"]), full_spec(prep["s1"]),
                full_spec(tgt2), full_spec(prep["w2"]), full_spec(prep["s2"]),
                full_spec(tgts),
                hbm_spec, full_spec(prep["fc1_b"]),
                full_spec(prep["ln_g"]), full_spec(prep["ln_b"]),
                hbm_spec, full_spec(prep["fc2_b"])]

    return pl.pallas_call(
        _make_fused_kernel(B),
        grid=(1,),
        in_specs=in_specs,
        out_specs=pl.BlockSpec((B, latent), lambda i: (0, 0)),
        out_shape=jax.ShapeDtypeStruct((B, latent), jnp.float32),
        scratch_shapes=[
            pltpu.VMEM((B * 100, 32), jnp.bfloat16),        # a1: padded 10x10 grid
            pltpu.VMEM((B * 36, 64), jnp.bfloat16),         # a2: padded 6x6 grid
            pltpu.VMEM((16 * B, 128), jnp.bfloat16),        # slot-major 4x4 features
            pltpu.VMEM(prep["fc1_w"].shape, jnp.bfloat16),  # fc1 weights (DMA dst)
            pltpu.VMEM(prep["fc2_w"].shape, jnp.bfloat16),  # fc2 weights (DMA dst)
            pltpu.SemaphoreType.DMA((2,)),
        ],
        compiler_params=pltpu.CompilerParams(dimension_semantics=("arbitrary",)),
    )(*args)


# --------------------------------------------------------------------------
# Pure-JAX reference (for correctness check; f32, highest precision)
# --------------------------------------------------------------------------
def reference_forward(x, p):
    if x.ndim == 3:
        x = x[:, None, :, :]
    h = x.astype(jnp.float32)                                 # NCHW
    for idx, pool in enumerate([True, True, False]):
        w = p[f"conv{idx}_w"]
        w_oihw = jnp.transpose(w, (3, 2, 0, 1))
        h = jax.lax.conv_general_dilated(
            h, w_oihw, (1, 1), "SAME",
            dimension_numbers=("NCHW", "OIHW", "NCHW"),
            precision=jax.lax.Precision.HIGHEST,
        )
        scale = p[f"bn{idx}_gamma"] / jnp.sqrt(p[f"bn{idx}_var"] + BN_EPS)
        shift = (p[f"conv{idx}_b"] - p[f"bn{idx}_mean"]) * scale + p[f"bn{idx}_beta"]
        h = h * scale[None, :, None, None] + shift[None, :, None, None]
        h = jnp.maximum(h, 0.0)
        if pool:
            B, Ch, H_, W_ = h.shape
            h = h.reshape(B, Ch, H_ // 2, 2, W_ // 2, 2).max(axis=(3, 5))
    B = h.shape[0]
    feat = h.reshape(B, -1)
    hfc = jnp.dot(feat, p["fc1_w"], precision=jax.lax.Precision.HIGHEST) + p["fc1_b"]
    mu = hfc.mean(-1, keepdims=True)
    var = ((hfc - mu) ** 2).mean(-1, keepdims=True)
    hn = (hfc - mu) / jnp.sqrt(var + LN_EPS) * p["ln_gamma"] + p["ln_beta"]
    s = hn * jax.nn.sigmoid(hn)
    z = jnp.dot(s, p["fc2_w"], precision=jax.lax.Precision.HIGHEST) + p["fc2_b"]
    t = jnp.tanh(z)
    n = jnp.sqrt(jnp.sum(t * t, -1, keepdims=True))
    return t / jnp.maximum(n, L2_EPS)


# --------------------------------------------------------------------------
# Deterministic parameter init (shapes from MiyawakiStimulusEncoder.__init__)
# --------------------------------------------------------------------------
def init_params(key, latent_dim=LATENT_DIM):
    ks = jax.random.split(key, 20)

    def nrm(k, shape, scale):
        return scale * jax.random.normal(k, shape, dtype=jnp.float32)

    p = {}
    cfg = [(1, 32), (32, 64), (64, 128)]
    for idx, (cin, cout) in enumerate(cfg):
        b = idx * 5
        p[f"conv{idx}_w"] = nrm(ks[b + 0], (3, 3, cin, cout), 0.3)
        p[f"conv{idx}_b"] = nrm(ks[b + 1], (cout,), 0.05)
        p[f"bn{idx}_gamma"] = 1.0 + nrm(ks[b + 2], (cout,), 0.05)
        p[f"bn{idx}_beta"] = nrm(ks[b + 3], (cout,), 0.05)
        p[f"bn{idx}_mean"] = nrm(ks[b + 4], (cout,), 0.05)
        p[f"bn{idx}_var"] = 1.0 + 0.1 * jnp.arange(cout, dtype=jnp.float32) / cout
    p["fc1_w"] = nrm(ks[15], (128 * 4 * 4, 512), 0.05)
    p["fc1_b"] = nrm(ks[16], (512,), 0.05)
    p["ln_gamma"] = jnp.ones((512,), jnp.float32)
    p["ln_beta"] = jnp.zeros((512,), jnp.float32)
    p["fc2_w"] = nrm(ks[17], (512, latent_dim), 0.05)
    p["fc2_b"] = nrm(ks[18], (latent_dim,), 0.05)
    return p


# --------------------------------------------------------------------------
if __name__ == "__main__":
    key = jax.random.PRNGKey(0)
    k_param, k_x = jax.random.split(key)

    params = init_params(k_param)
    prep = prepare_params(params)          # one-time: BN fold, fc1 row permute, bf16

    # Miyawaki-style stimuli, small shapes: (B=2, C=1, 16, 16).
    x = jax.random.uniform(k_x, (2, 1, 16, 16), dtype=jnp.float32)

    fwd = jax.jit(lambda xx: miyawaki_stimulus_encoder_forward(xx, prep))
    out = jax.block_until_ready(fwd(x))

    ref = reference_forward(x, params)
    # Tolerance sized for bf16 matmul operands (single-pass MXU) vs f32-highest ref.
    np.testing.assert_allclose(np.asarray(out), np.asarray(ref), rtol=3e-2, atol=5e-3)
    assert out.shape == (2, LATENT_DIM)

    print("KERNEL_OK")
</pallas_src>

<mosaic_0001>
module attributes {stable_mosaic.version = 11 : i64} {
  func.func @kernel(%arg0: i32, %arg1: memref<512x9xbf16, #tpu.memory_space<vmem>>, %arg2: memref<9x32xbf16, #tpu.memory_space<vmem>>, %arg3: memref<1x32xf32, #tpu.memory_space<vmem>>, %arg4: memref<200x1xi32, #tpu.memory_space<vmem>>, %arg5: memref<288x64xbf16, #tpu.memory_space<vmem>>, %arg6: memref<1x64xf32, #tpu.memory_space<vmem>>, %arg7: memref<72x1xi32, #tpu.memory_space<vmem>>, %arg8: memref<576x128xbf16, #tpu.memory_space<vmem>>, %arg9: memref<1x128xf32, #tpu.memory_space<vmem>>, %arg10: memref<32x1xi32, #tpu.memory_space<vmem>>, %arg11: memref<2048x512xbf16, #tpu.memory_space<any>>, %arg12: memref<1x512xf32, #tpu.memory_space<vmem>>, %arg13: memref<1x512xf32, #tpu.memory_space<vmem>>, %arg14: memref<1x512xf32, #tpu.memory_space<vmem>>, %arg15: memref<512x512xbf16, #tpu.memory_space<any>>, %arg16: memref<1x512xf32, #tpu.memory_space<vmem>>, %arg17: memref<2x512xf32, #tpu.memory_space<vmem>>, %arg18: memref<200x32xbf16, #tpu.memory_space<vmem>>, %arg19: memref<72x64xbf16, #tpu.memory_space<vmem>>, %arg20: memref<32x128xbf16, #tpu.memory_space<vmem>>, %arg21: memref<2048x512xbf16, #tpu.memory_space<vmem>>, %arg22: memref<512x512xbf16, #tpu.memory_space<vmem>>, %arg23: memref<2x!tpu.dma_semaphore, #tpu.memory_space<semaphore_mem>>) attributes {dimension_semantics = [#tpu.dimension_semantics<arbitrary>], iteration_bounds = array<i64: 1>, scalar_prefetch = 0 : i64, scratch_operands = 6 : i64, tpu.core_type = #tpu.core_type<tc>, window_params = [{pipeline_mode = #tpu.pipeline_mode<synchronous>, transform_indices = @transform_0, window_bounds = array<i64: 512, 9>}, {pipeline_mode = #tpu.pipeline_mode<synchronous>, transform_indices = @transform_1, window_bounds = array<i64: 9, 32>}, {pipeline_mode = #tpu.pipeline_mode<synchronous>, transform_indices = @transform_2, window_bounds = array<i64: 1, 32>}, {pipeline_mode = #tpu.pipeline_mode<synchronous>, transform_indices = @transform_3, window_bounds = array<i64: 200, 1>}, {pipeline_mode = #tpu.pipeline_mode<synchronous>, transform_indices = @transform_4, window_bounds = array<i64: 288, 64>}, {pipeline_mode = #tpu.pipeline_mode<synchronous>, transform_indices = @transform_5, window_bounds = array<i64: 1, 64>}, {pipeline_mode = #tpu.pipeline_mode<synchronous>, transform_indices = @transform_6, window_bounds = array<i64: 72, 1>}, {pipeline_mode = #tpu.pipeline_mode<synchronous>, transform_indices = @transform_7, window_bounds = array<i64: 576, 128>}, {pipeline_mode = #tpu.pipeline_mode<synchronous>, transform_indices = @transform_8, window_bounds = array<i64: 1, 128>}, {pipeline_mode = #tpu.pipeline_mode<synchronous>, transform_indices = @transform_9, window_bounds = array<i64: 32, 1>}, {}, {pipeline_mode = #tpu.pipeline_mode<synchronous>, transform_indices = @transform_11, window_bounds = array<i64: 1, 512>}, {pipeline_mode = #tpu.pipeline_mode<synchronous>, transform_indices = @transform_12, window_bounds = array<i64: 1, 512>}, {pipeline_mode = #tpu.pipeline_mode<synchronous>, transform_indices = @transform_13, window_bounds = array<i64: 1, 512>}, {}, {pipeline_mode = #tpu.pipeline_mode<synchronous>, transform_indices = @transform_15, window_bounds = array<i64: 1, 512>}, {pipeline_mode = #tpu.pipeline_mode<synchronous>, transform_indices = @transform_16, window_bounds = array<i64: 2, 512>}]} {
    %c0_i32 = arith.constant 0 : i32
    %0 = tpu.memref_slice %arg23[%c0_i32] : memref<2x!tpu.dma_semaphore, #tpu.memory_space<semaphore_mem>> -> memref<1x!tpu.dma_semaphore, #tpu.memory_space<semaphore_mem>>
    %1 = tpu.memref_squeeze %0 : memref<1x!tpu.dma_semaphore, #tpu.memory_space<semaphore_mem>> -> memref<!tpu.dma_semaphore, #tpu.memory_space<semaphore_mem>>
    tpu.enqueue_dma source(%arg11 : memref<2048x512xbf16, #tpu.memory_space<any>>) target(%arg21 : memref<2048x512xbf16, #tpu.memory_space<vmem>>) target_semaphore(%1 : memref<!tpu.dma_semaphore, #tpu.memory_space<semaphore_mem>>)
    %c1_i32 = arith.constant 1 : i32
    %2 = tpu.memref_slice %arg23[%c1_i32] : memref<2x!tpu.dma_semaphore, #tpu.memory_space<semaphore_mem>> -> memref<1x!tpu.dma_semaphore, #tpu.memory_space<semaphore_mem>>
    %3 = tpu.memref_squeeze %2 : memref<1x!tpu.dma_semaphore, #tpu.memory_space<semaphore_mem>> -> memref<!tpu.dma_semaphore, #tpu.memory_space<semaphore_mem>>
    tpu.enqueue_dma source(%arg15 : memref<512x512xbf16, #tpu.memory_space<any>>) target(%arg22 : memref<512x512xbf16, #tpu.memory_space<vmem>>) target_semaphore(%3 : memref<!tpu.dma_semaphore, #tpu.memory_space<semaphore_mem>>)
    %c0 = arith.constant 0 : index
    %c0_0 = arith.constant 0 : index
    %4 = vector.load %arg1[%c0, %c0_0] : memref<512x9xbf16, #tpu.memory_space<vmem>>, vector<512x9xbf16>
    %c0_1 = arith.constant 0 : index
    %c0_2 = arith.constant 0 : index
    %5 = vector.load %arg2[%c0_1, %c0_2] : memref<9x32xbf16, #tpu.memory_space<vmem>>, vector<9x32xbf16>
    %cst = arith.constant dense<0.000000e+00> : vector<512x32xf32>
    %6 = tpu.matmul %4, %5, %cst {dimension_numbers = #tpu.dot_dimension_numbers<[1], [0], [0], [1], [0, 0, 1, 1], [], []>} : vector<512x9xbf16>, vector<9x32xbf16>, vector<512x32xf32> -> vector<512x32xf32>
    %c0_3 = arith.constant 0 : index
    %c0_4 = arith.constant 0 : index
    %7 = vector.load %arg3[%c0_3, %c0_4] : memref<1x32xf32, #tpu.memory_space<vmem>>, vector<1x32xf32>
    %8 = vector.extract_strided_slice %6 {offsets = [0, 0], sizes = [495, 32], strides = [1, 1]} : vector<512x32xf32> to vector<495x32xf32>
    %9 = vector.extract_strided_slice %6 {offsets = [1, 0], sizes = [495, 32], strides = [1, 1]} : vector<512x32xf32> to vector<495x32xf32>
    %10 = arith.maximumf %8, %9 : vector<495x32xf32>
    %11 = vector.extract_strided_slice %6 {offsets = [16, 0], sizes = [495, 32], strides = [1, 1]} : vector<512x32xf32> to vector<495x32xf32>
    %12 = vector.extract_strided_slice %6 {offsets = [17, 0], sizes = [495, 32], strides = [1, 1]} : vector<512x32xf32> to vector<495x32xf32>
    %13 = arith.maximumf %11, %12 : vector<495x32xf32>
    %14 = arith.maximumf %10, %13 : vector<495x32xf32>
    %15 = vector.broadcast %7 : vector<1x32xf32> to vector<495x32xf32>
    %16 = arith.addf %14, %15 : vector<495x32xf32>
    %cst_5 = arith.constant 0.000000e+00 : f32
    %17 = vector.broadcast %cst_5 : f32 to vector<495x32xf32>
    %18 = arith.maximumf %16, %17 : vector<495x32xf32>
    %19 = tpu.iota {dimensions = array<i32: 1>} : vector<200x495xi32>
    %c0_6 = arith.constant 0 : index
    %c0_7 = arith.constant 0 : index
    %20 = vector.load %arg4[%c0_6, %c0_7] : memref<200x1xi32, #tpu.memory_space<vmem>>, vector<200x1xi32>
    %21 = vector.broadcast %20 : vector<200x1xi32> to vector<200x495xi32>
    %22 = arith.cmpi eq, %19, %21 : vector<200x495xi32>
    %cst_8 = arith.constant 1.000000e+00 : f32
    %cst_9 = arith.constant 0.000000e+00 : f32
    %23 = vector.broadcast %cst_8 : f32 to vector<200x495xf32>
    %24 = vector.broadcast %cst_9 : f32 to vector<200x495xf32>
    %25 = arith.select %22, %23, %24 : vector<200x495xi1>, vector<200x495xf32>
    %26 = arith.truncf %25 : vector<200x495xf32> to vector<200x495xbf16>
    %27 = arith.truncf %18 : vector<495x32xf32> to vector<495x32xbf16>
    %cst_10 = arith.constant dense<0.000000e+00> : vector<200x32xf32>
    %28 = tpu.matmul %26, %27, %cst_10 {dimension_numbers = #tpu.dot_dimension_numbers<[1], [0], [0], [1], [0, 0, 1, 1], [], []>} : vector<200x495xbf16>, vector<495x32xbf16>, vector<200x32xf32> -> vector<200x32xf32>
    %29 = arith.truncf %28 : vector<200x32xf32> to vector<200x32xbf16>
    %c0_11 = arith.constant 0 : index
    %c0_12 = arith.constant 0 : index
    %30 = vector.load %arg18[%c0_11, %c0_12] : memref<200x32xbf16, #tpu.memory_space<vmem>>, vector<200x32xbf16>
    tpu.vector_store %arg18[%c0_11, %c0_12], %29 {strides = array<i32>} : memref<200x32xbf16, #tpu.memory_space<vmem>>, vector<200x32xbf16>,
    %c0_13 = arith.constant 0 : index
    %c0_14 = arith.constant 0 : index
    %31 = vector.load %arg18[%c0_13, %c0_14] : memref<200x32xbf16, #tpu.memory_space<vmem>>, vector<178x32xbf16>
    %c0_15 = arith.constant 0 : index
    %c0_16 = arith.constant 0 : index
    %32 = vector.load %arg5[%c0_15, %c0_16] : memref<288x64xbf16, #tpu.memory_space<vmem>>, vector<32x64xbf16>
    %cst_17 = arith.constant dense<0.000000e+00> : vector<178x64xf32>
    %33 = tpu.matmul %31, %32, %cst_17 {dimension_numbers = #tpu.dot_dimension_numbers<[1], [0], [0], [1], [0, 0, 1, 1], [], []>} : vector<178x32xbf16>, vector<32x64xbf16>, vector<178x64xf32> -> vector<178x64xf32>
    %c1 = arith.constant 1 : index
    %c0_18 = arith.constant 0 : index
    %34 = vector.load %arg18[%c1, %c0_18] : memref<200x32xbf16, #tpu.memory_space<vmem>>, vector<178x32xbf16>
    %c32 = arith.constant 32 : index
    %c0_19 = arith.constant 0 : index
    %35 = vector.load %arg5[%c32, %c0_19] : memref<288x64xbf16, #tpu.memory_space<vmem>>, vector<32x64xbf16>
    %cst_20 = arith.constant dense<0.000000e+00> : vector<178x64xf32>
    %36 = tpu.matmul %34, %35, %cst_20 {dimension_numbers = #tpu.dot_dimension_numbers<[1], [0], [0], [1], [0, 0, 1, 1], [], []>} : vector<178x32xbf16>, vector<32x64xbf16>, vector<178x64xf32> -> vector<178x64xf32>
    %37 = arith.addf %33, %36 : vector<178x64xf32>
    %c2 = arith.constant 2 : index
    %c0_21 = arith.constant 0 : index
    %38 = vector.load %arg18[%c2, %c0_21] : memref<200x32xbf16, #tpu.memory_space<vmem>>, vector<178x32xbf16>
    %c64 = arith.constant 64 : index
    %c0_22 = arith.constant 0 : index
    %39 = vector.load %arg5[%c64, %c0_22] : memref<288x64xbf16, #tpu.memory_space<vmem>>, vector<32x64xbf16>
    %cst_23 = arith.constant dense<0.000000e+00> : vector<178x64xf32>
    %40 = tpu.matmul %38, %39, %cst_23 {dimension_numbers = #tpu.dot_dimension_numbers<[1], [0], [0], [1], [0, 0, 1, 1], [], []>} : vector<178x32xbf16>, vector<32x64xbf16>, vector<178x64xf32> -> vector<178x64xf32>
    %41 = arith.addf %37, %40 : vector<178x64xf32>
    %c10 = arith.constant 10 : index
    %c0_24 = arith.constant 0 : index
    %42 = vector.load %arg18[%c10, %c0_24] : memref<200x32xbf16, #tpu.memory_space<vmem>>, vector<178x32xbf16>
    %c96 = arith.constant 96 : index
    %c0_25 = arith.constant 0 : index
    %43 = vector.load %arg5[%c96, %c0_25] : memref<288x64xbf16, #tpu.memory_space<vmem>>, vector<32x64xbf16>
    %cst_26 = arith.constant dense<0.000000e+00> : vector<178x64xf32>
    %44 = tpu.matmul %42, %43, %cst_26 {dimension_numbers = #tpu.dot_dimension_numbers<[1], [0], [0], [1], [0, 0, 1, 1], [], []>} : vector<178x32xbf16>, vector<32x64xbf16>, vector<178x64xf32> -> vector<178x64xf32>
    %45 = arith.addf %41, %44 : vector<178x64xf32>
    %c11 = arith.constant 11 : index
    %c0_27 = arith.constant 0 : index
    %46 = vector.load %arg18[%c11, %c0_27] : memref<200x32xbf16, #tpu.memory_space<vmem>>, vector<178x32xbf16>
    %c128 = arith.constant 128 : index
    %c0_28 = arith.constant 0 : index
    %47 = vector.load %arg5[%c128, %c0_28] : memref<288x64xbf16, #tpu.memory_space<vmem>>, vector<32x64xbf16>
    %cst_29 = arith.constant dense<0.000000e+00> : vector<178x64xf32>
    %48 = tpu.matmul %46, %47, %cst_29 {dimension_numbers = #tpu.dot_dimension_numbers<[1], [0], [0], [1], [0, 0, 1, 1], [], []>} : vector<178x32xbf16>, vector<32x64xbf16>, vector<178x64xf32> -> vector<178x64xf32>
    %49 = arith.addf %45, %48 : vector<178x64xf32>
    %c12 = arith.constant 12 : index
    %c0_30 = arith.constant 0 : index
    %50 = vector.load %arg18[%c12, %c0_30] : memref<200x32xbf16, #tpu.memory_space<vmem>>, vector<178x32xbf16>
    %c160 = arith.constant 160 : index
    %c0_31 = arith.constant 0 : index
    %51 = vector.load %arg5[%c160, %c0_31] : memref<288x64xbf16, #tpu.memory_space<vmem>>, vector<32x64xbf16>
    %cst_32 = arith.constant dense<0.000000e+00> : vector<178x64xf32>
    %52 = tpu.matmul %50, %51, %cst_32 {dimension_numbers = #tpu.dot_dimension_numbers<[1], [0], [0], [1], [0, 0, 1, 1], [], []>} : vector<178x32xbf16>, vector<32x64xbf16>, vector<178x64xf32> -> vector<178x64xf32>
    %53 = arith.addf %49, %52 : vector<178x64xf32>
    %c20 = arith.constant 20 : index
    %c0_33 = arith.constant 0 : index
    %54 = vector.load %arg18[%c20, %c0_33] : memref<200x32xbf16, #tpu.memory_space<vmem>>, vector<178x32xbf16>
    %c192 = arith.constant 192 : index
    %c0_34 = arith.constant 0 : index
    %55 = vector.load %arg5[%c192, %c0_34] : memref<288x64xbf16, #tpu.memory_space<vmem>>, vector<32x64xbf16>
    %cst_35 = arith.constant dense<0.000000e+00> : vector<178x64xf32>
    %56 = tpu.matmul %54, %55, %cst_35 {dimension_numbers = #tpu.dot_dimension_numbers<[1], [0], [0], [1], [0, 0, 1, 1], [], []>} : vector<178x32xbf16>, vector<32x64xbf16>, vector<178x64xf32> -> vector<178x64xf32>
    %57 = arith.addf %53, %56 : vector<178x64xf32>
    %c21 = arith.constant 21 : index
    %c0_36 = arith.constant 0 : index
    %58 = vector.load %arg18[%c21, %c0_36] : memref<200x32xbf16, #tpu.memory_space<vmem>>, vector<178x32xbf16>
    %c224 = arith.constant 224 : index
    %c0_37 = arith.constant 0 : index
    %59 = vector.load %arg5[%c224, %c0_37] : memref<288x64xbf16, #tpu.memory_space<vmem>>, vector<32x64xbf16>
    %cst_38 = arith.constant dense<0.000000e+00> : vector<178x64xf32>
    %60 = tpu.matmul %58, %59, %cst_38 {dimension_numbers = #tpu.dot_dimension_numbers<[1], [0], [0], [1], [0, 0, 1, 1], [], []>} : vector<178x32xbf16>, vector<32x64xbf16>, vector<178x64xf32> -> vector<178x64xf32>
    %61 = arith.addf %57, %60 : vector<178x64xf32>
    %c22 = arith.constant 22 : index
    %c0_39 = arith.constant 0 : index
    %62 = vector.load %arg18[%c22, %c0_39] : memref<200x32xbf16, #tpu.memory_space<vmem>>, vector<178x32xbf16>
    %c256 = arith.constant 256 : index
    %c0_40 = arith.constant 0 : index
    %63 = vector.load %arg5[%c256, %c0_40] : memref<288x64xbf16, #tpu.memory_space<vmem>>, vector<32x64xbf16>
    %cst_41 = arith.constant dense<0.000000e+00> : vector<178x64xf32>
    %64 = tpu.matmul %62, %63, %cst_41 {dimension_numbers = #tpu.dot_dimension_numbers<[1], [0], [0], [1], [0, 0, 1, 1], [], []>} : vector<178x32xbf16>, vector<32x64xbf16>, vector<178x64xf32> -> vector<178x64xf32>
    %65 = arith.addf %61, %64 : vector<178x64xf32>
    %c0_42 = arith.constant 0 : index
    %c0_43 = arith.constant 0 : index
    %66 = vector.load %arg6[%c0_42, %c0_43] : memref<1x64xf32, #tpu.memory_space<vmem>>, vector<1x64xf32>
    %67 = vector.extract_strided_slice %65 {offsets = [0, 0], sizes = [167, 64], strides = [1, 1]} : vector<178x64xf32> to vector<167x64xf32>
    %68 = vector.extract_strided_slice %65 {offsets = [1, 0], sizes = [167, 64], strides = [1, 1]} : vector<178x64xf32> to vector<167x64xf32>
    %69 = arith.maximumf %67, %68 : vector<167x64xf32>
    %70 = vector.extract_strided_slice %65 {offsets = [10, 0], sizes = [167, 64], strides = [1, 1]} : vector<178x64xf32> to vector<167x64xf32>
    %71 = vector.extract_strided_slice %65 {offsets = [11, 0], sizes = [167, 64], strides = [1, 1]} : vector<178x64xf32> to vector<167x64xf32>
    %72 = arith.maximumf %70, %71 : vector<167x64xf32>
    %73 = arith.maximumf %69, %72 : vector<167x64xf32>
    %74 = vector.broadcast %66 : vector<1x64xf32> to vector<167x64xf32>
    %75 = arith.addf %73, %74 : vector<167x64xf32>
    %cst_44 = arith.constant 0.000000e+00 : f32
    %76 = vector.broadcast %cst_44 : f32 to vector<167x64xf32>
    %77 = arith.maximumf %75, %76 : vector<167x64xf32>
    %78 = tpu.iota {dimensions = array<i32: 1>} : vector<72x167xi32>
    %c0_45 = arith.constant 0 : index
    %c0_46 = arith.constant 0 : index
    %79 = vector.load %arg7[%c0_45, %c0_46] : memref<72x1xi32, #tpu.memory_space<vmem>>, vector<72x1xi32>
    %80 = vector.broadcast %79 : vector<72x1xi32> to vector<72x167xi32>
    %81 = arith.cmpi eq, %78, %80 : vector<72x167xi32>
    %cst_47 = arith.constant 1.000000e+00 : f32
    %cst_48 = arith.constant 0.000000e+00 : f32
    %82 = vector.broadcast %cst_47 : f32 to vector<72x167xf32>
    %83 = vector.broadcast %cst_48 : f32 to vector<72x167xf32>
    %84 = arith.select %81, %82, %83 : vector<72x167xi1>, vector<72x167xf32>
    %85 = arith.truncf %84 : vector<72x167xf32> to vector<72x167xbf16>
    %86 = arith.truncf %77 : vector<167x64xf32> to vector<167x64xbf16>
    %cst_49 = arith.constant dense<0.000000e+00> : vector<72x64xf32>
    %87 = tpu.matmul %85, %86, %cst_49 {dimension_numbers = #tpu.dot_dimension_numbers<[1], [0], [0], [1], [0, 0, 1, 1], [], []>} : vector<72x167xbf16>, vector<167x64xbf16>, vector<72x64xf32> -> vector<72x64xf32>
    %88 = arith.truncf %87 : vector<72x64xf32> to vector<72x64xbf16>
    %c0_50 = arith.constant 0 : index
    %c0_51 = arith.constant 0 : index
    %89 = vector.load %arg19[%c0_50, %c0_51] : memref<72x64xbf16, #tpu.memory_space<vmem>>, vector<72x64xbf16>
    tpu.vector_store %arg19[%c0_50, %c0_51], %88 {strides = array<i32>} : memref<72x64xbf16, #tpu.memory_space<vmem>>, vector<72x64xbf16>,
    %c0_52 = arith.constant 0 : index
    %c0_53 = arith.constant 0 : index
    %90 = vector.load %arg19[%c0_52, %c0_53] : memref<72x64xbf16, #tpu.memory_space<vmem>>, vector<58x64xbf16>
    %c0_54 = arith.constant 0 : index
    %c0_55 = arith.constant 0 : index
    %91 = vector.load %arg8[%c0_54, %c0_55] : memref<576x128xbf16, #tpu.memory_space<vmem>>, vector<64x128xbf16>
    %cst_56 = arith.constant dense<0.000000e+00> : vector<58x128xf32>
    %92 = tpu.matmul %90, %91, %cst_56 {dimension_numbers = #tpu.dot_dimension_numbers<[1], [0], [0], [1], [0, 0, 1, 1], [], []>} : vector<58x64xbf16>, vector<64x128xbf16>, vector<58x128xf32> -> vector<58x128xf32>
    %c1_57 = arith.constant 1 : index
    %c0_58 = arith.constant 0 : index
    %93 = vector.load %arg19[%c1_57, %c0_58] : memref<72x64xbf16, #tpu.memory_space<vmem>>, vector<58x64xbf16>
    %c64_59 = arith.constant 64 : index
    %c0_60 = arith.constant 0 : index
    %94 = vector.load %arg8[%c64_59, %c0_60] : memref<576x128xbf16, #tpu.memory_space<vmem>>, vector<64x128xbf16>
    %cst_61 = arith.constant dense<0.000000e+00> : vector<58x128xf32>
    %95 = tpu.matmul %93, %94, %cst_61 {dimension_numbers = #tpu.dot_dimension_numbers<[1], [0], [0], [1], [0, 0, 1, 1], [], []>} : vector<58x64xbf16>, vector<64x128xbf16>, vector<58x128xf32> -> vector<58x128xf32>
    %96 = arith.addf %92, %95 : vector<58x128xf32>
    %c2_62 = arith.constant 2 : index
    %c0_63 = arith.constant 0 : index
    %97 = vector.load %arg19[%c2_62, %c0_63] : memref<72x64xbf16, #tpu.memory_space<vmem>>, vector<58x64xbf16>
    %c128_64 = arith.constant 128 : index
    %c0_65 = arith.constant 0 : index
    %98 = vector.load %arg8[%c128_64, %c0_65] : memref<576x128xbf16, #tpu.memory_space<vmem>>, vector<64x128xbf16>
    %cst_66 = arith.constant dense<0.000000e+00> : vector<58x128xf32>
    %99 = tpu.matmul %97, %98, %cst_66 {dimension_numbers = #tpu.dot_dimension_numbers<[1], [0], [0], [1], [0, 0, 1, 1], [], []>} : vector<58x64xbf16>, vector<64x128xbf16>, vector<58x128xf32> -> vector<58x128xf32>
    %100 = arith.addf %96, %99 : vector<58x128xf32>
    %c6 = arith.constant 6 : index
    %c0_67 = arith.constant 0 : index
    %101 = vector.load %arg19[%c6, %c0_67] : memref<72x64xbf16, #tpu.memory_space<vmem>>, vector<58x64xbf16>
    %c192_68 = arith.constant 192 : index
    %c0_69 = arith.constant 0 : index
    %102 = vector.load %arg8[%c192_68, %c0_69] : memref<576x128xbf16, #tpu.memory_space<vmem>>, vector<64x128xbf16>
    %cst_70 = arith.constant dense<0.000000e+00> : vector<58x128xf32>
    %103 = tpu.matmul %101, %102, %cst_70 {dimension_numbers = #tpu.dot_dimension_numbers<[1], [0], [0], [1], [0, 0, 1, 1], [], []>} : vector<58x64xbf16>, vector<64x128xbf16>, vector<58x128xf32> -> vector<58x128xf32>
    %104 = arith.addf %100, %103 : vector<58x128xf32>
    %c7 = arith.constant 7 : index
    %c0_71 = arith.constant 0 : index
    %105 = vector.load %arg19[%c7, %c0_71] : memref<72x64xbf16, #tpu.memory_space<vmem>>, vector<58x64xbf16>
    %c256_72 = arith.constant 256 : index
    %c0_73 = arith.constant 0 : index
    %106 = vector.load %arg8[%c256_72, %c0_73] : memref<576x128xbf16, #tpu.memory_space<vmem>>, vector<64x128xbf16>
    %cst_74 = arith.constant dense<0.000000e+00> : vector<58x128xf32>
    %107 = tpu.matmul %105, %106, %cst_74 {dimension_numbers = #tpu.dot_dimension_numbers<[1], [0], [0], [1], [0, 0, 1, 1], [], []>} : vector<58x64xbf16>, vector<64x128xbf16>, vector<58x128xf32> -> vector<58x128xf32>
    %108 = arith.addf %104, %107 : vector<58x128xf32>
    %c8 = arith.constant 8 : index
    %c0_75 = arith.constant 0 : index
    %109 = vector.load %arg19[%c8, %c0_75] : memref<72x64xbf16, #tpu.memory_space<vmem>>, vector<58x64xbf16>
    %c320 = arith.constant 320 : index
    %c0_76 = arith.constant 0 : index
    %110 = vector.load %arg8[%c320, %c0_76] : memref<576x128xbf16, #tpu.memory_space<vmem>>, vector<64x128xbf16>
    %cst_77 = arith.constant dense<0.000000e+00> : vector<58x128xf32>
    %111 = tpu.matmul %109, %110, %cst_77 {dimension_numbers = #tpu.dot_dimension_numbers<[1], [0], [0], [1], [0, 0, 1, 1], [], []>} : vector<58x64xbf16>, vector<64x128xbf16>, vector<58x128xf32> -> vector<58x128xf32>
    %112 = arith.addf %108, %111 : vector<58x128xf32>
    %c12_78 = arith.constant 12 : index
    %c0_79 = arith.constant 0 : index
    %113 = vector.load %arg19[%c12_78, %c0_79] : memref<72x64xbf16, #tpu.memory_space<vmem>>, vector<58x64xbf16>
    %c384 = arith.constant 384 : index
    %c0_80 = arith.constant 0 : index
    %114 = vector.load %arg8[%c384, %c0_80] : memref<576x128xbf16, #tpu.memory_space<vmem>>, vector<64x128xbf16>
    %cst_81 = arith.constant dense<0.000000e+00> : vector<58x128xf32>
    %115 = tpu.matmul %113, %114, %cst_81 {dimension_numbers = #tpu.dot_dimension_numbers<[1], [0], [0], [1], [0, 0, 1, 1], [], []>} : vector<58x64xbf16>, vector<64x128xbf16>, vector<58x128xf32> -> vector<58x128xf32>
    %116 = arith.addf %112, %115 : vector<58x128xf32>
    %c13 = arith.constant 13 : index
    %c0_82 = arith.constant 0 : index
    %117 = vector.load %arg19[%c13, %c0_82] : memref<72x64xbf16, #tpu.memory_space<vmem>>, vector<58x64xbf16>
    %c448 = arith.constant 448 : index
    %c0_83 = arith.constant 0 : index
    %118 = vector.load %arg8[%c448, %c0_83] : memref<576x128xbf16, #tpu.memory_space<vmem>>, vector<64x128xbf16>
    %cst_84 = arith.constant dense<0.000000e+00> : vector<58x128xf32>
    %119 = tpu.matmul %117, %118, %cst_84 {dimension_numbers = #tpu.dot_dimension_numbers<[1], [0], [0], [1], [0, 0, 1, 1], [], []>} : vector<58x64xbf16>, vector<64x128xbf16>, vector<58x128xf32> -> vector<58x128xf32>
    %120 = arith.addf %116, %119 : vector<58x128xf32>
    %c14 = arith.constant 14 : index
    %c0_85 = arith.constant 0 : index
    %121 = vector.load %arg19[%c14, %c0_85] : memref<72x64xbf16, #tpu.memory_space<vmem>>, vector<58x64xbf16>
    %c512 = arith.constant 512 : index
    %c0_86 = arith.constant 0 : index
    %122 = vector.load %arg8[%c512, %c0_86] : memref<576x128xbf16, #tpu.memory_space<vmem>>, vector<64x128xbf16>
    %cst_87 = arith.constant dense<0.000000e+00> : vector<58x128xf32>
    %123 = tpu.matmul %121, %122, %cst_87 {dimension_numbers = #tpu.dot_dimension_numbers<[1], [0], [0], [1], [0, 0, 1, 1], [], []>} : vector<58x64xbf16>, vector<64x128xbf16>, vector<58x128xf32> -> vector<58x128xf32>
    %124 = arith.addf %120, %123 : vector<58x128xf32>
    %c0_88 = arith.constant 0 : index
    %c0_89 = arith.constant 0 : index
    %125 = vector.load %arg9[%c0_88, %c0_89] : memref<1x128xf32, #tpu.memory_space<vmem>>, vector<1x128xf32>
    %126 = vector.broadcast %125 : vector<1x128xf32> to vector<58x128xf32>
    %127 = arith.addf %124, %126 : vector<58x128xf32>
    %cst_90 = arith.constant 0.000000e+00 : f32
    %128 = vector.broadcast %cst_90 : f32 to vector<58x128xf32>
    %129 = arith.maximumf %127, %128 : vector<58x128xf32>
    %130 = tpu.iota {dimensions = array<i32: 1>} : vector<32x58xi32>
    %c0_91 = arith.constant 0 : index
    %c0_92 = arith.constant 0 : index
    %131 = vector.load %arg10[%c0_91, %c0_92] : memref<32x1xi32, #tpu.memory_space<vmem>>, vector<32x1xi32>
    %132 = vector.broadcast %131 : vector<32x1xi32> to vector<32x58xi32>
    %133 = arith.cmpi eq, %130, %132 : vector<32x58xi32>
    %cst_93 = arith.constant 1.000000e+00 : f32
    %cst_94 = arith.constant 0.000000e+00 : f32
    %134 = vector.broadcast %cst_93 : f32 to vector<32x58xf32>
    %135 = vector.broadcast %cst_94 : f32 to vector<32x58xf32>
    %136 = arith.select %133, %134, %135 : vector<32x58xi1>, vector<32x58xf32>
    %137 = arith.truncf %136 : vector<32x58xf32> to vector<32x58xbf16>
    %138 = arith.truncf %129 : vector<58x128xf32> to vector<58x128xbf16>
    %cst_95 = arith.constant dense<0.000000e+00> : vector<32x128xf32>
    %139 = tpu.matmul %137, %138, %cst_95 {dimension_numbers = #tpu.dot_dimension_numbers<[1], [0], [0], [1], [0, 0, 1, 1], [], []>} : vector<32x58xbf16>, vector<58x128xbf16>, vector<32x128xf32> -> vector<32x128xf32>
    %140 = arith.truncf %139 : vector<32x128xf32> to vector<32x128xbf16>
    %c0_96 = arith.constant 0 : index
    %c0_97 = arith.constant 0 : index
    %141 = vector.load %arg20[%c0_96, %c0_97] : memref<32x128xbf16, #tpu.memory_space<vmem>>, vector<32x128xbf16>
    tpu.vector_store %arg20[%c0_96, %c0_97], %140 {strides = array<i32>} : memref<32x128xbf16, #tpu.memory_space<vmem>>, vector<32x128xbf16>,
    %c0_i32_98 = arith.constant 0 : i32
    %142 = tpu.memref_slice %arg23[%c0_i32_98] : memref<2x!tpu.dma_semaphore, #tpu.memory_space<semaphore_mem>> -> memref<1x!tpu.dma_semaphore, #tpu.memory_space<semaphore_mem>>
    %143 = tpu.memref_squeeze %142 : memref<1x!tpu.dma_semaphore, #tpu.memory_space<semaphore_mem>> -> memref<!tpu.dma_semaphore, #tpu.memory_space<semaphore_mem>>
    tpu.wait_dma2 semaphore(%143 : memref<!tpu.dma_semaphore, #tpu.memory_space<semaphore_mem>>) src(%arg11 : memref<2048x512xbf16, #tpu.memory_space<any>>) dst(%arg21 : memref<2048x512xbf16, #tpu.memory_space<vmem>>)
    %cst_99 = arith.constant 0.000000e+00 : f32
    %144 = vector.broadcast %cst_99 : f32 to vector<2x512xf32>
    %c0_100 = arith.constant 0 : index
    %c0_101 = arith.constant 0 : index
    %145 = vector.load %arg20[%c0_100, %c0_101] : memref<32x128xbf16, #tpu.memory_space<vmem>>, vector<2x128xbf16>
    %c0_102 = arith.constant 0 : index
    %c0_103 = arith.constant 0 : index
    %146 = vector.load %arg21[%c0_102, %c0_103] : memref<2048x512xbf16, #tpu.memory_space<vmem>>, vector<128x512xbf16>
    %cst_104 = arith.constant dense<0.000000e+00> : vector<2x512xf32>
    %147 = tpu.matmul %145, %146, %cst_104 {dimension_numbers = #tpu.dot_dimension_numbers<[1], [0], [0], [1], [0, 0, 1, 1], [], []>} : vector<2x128xbf16>, vector<128x512xbf16>, vector<2x512xf32> -> vector<2x512xf32>
    %148 = arith.addf %144, %147 : vector<2x512xf32>
    %c2_105 = arith.constant 2 : index
    %c0_106 = arith.constant 0 : index
    %149 = vector.load %arg20[%c2_105, %c0_106] : memref<32x128xbf16, #tpu.memory_space<vmem>>, vector<2x128xbf16>
    %c128_107 = arith.constant 128 : index
    %c0_108 = arith.constant 0 : index
    %150 = vector.load %arg21[%c128_107, %c0_108] : memref<2048x512xbf16, #tpu.memory_space<vmem>>, vector<128x512xbf16>
    %cst_109 = arith.constant dense<0.000000e+00> : vector<2x512xf32>
    %151 = tpu.matmul %149, %150, %cst_109 {dimension_numbers = #tpu.dot_dimension_numbers<[1], [0], [0], [1], [0, 0, 1, 1], [], []>} : vector<2x128xbf16>, vector<128x512xbf16>, vector<2x512xf32> -> vector<2x512xf32>
    %152 = arith.addf %148, %151 : vector<2x512xf32>
    %c4 = arith.constant 4 : index
    %c0_110 = arith.constant 0 : index
    %153 = vector.load %arg20[%c4, %c0_110] : memref<32x128xbf16, #tpu.memory_space<vmem>>, vector<2x128xbf16>
    %c256_111 = arith.constant 256 : index
    %c0_112 = arith.constant 0 : index
    %154 = vector.load %arg21[%c256_111, %c0_112] : memref<2048x512xbf16, #tpu.memory_space<vmem>>, vector<128x512xbf16>
    %cst_113 = arith.constant dense<0.000000e+00> : vector<2x512xf32>
    %155 = tpu.matmul %153, %154, %cst_113 {dimension_numbers = #tpu.dot_dimension_numbers<[1], [0], [0], [1], [0, 0, 1, 1], [], []>} : vector<2x128xbf16>, vector<128x512xbf16>, vector<2x512xf32> -> vector<2x512xf32>
    %156 = arith.addf %152, %155 : vector<2x512xf32>
    %c6_114 = arith.constant 6 : index
    %c0_115 = arith.constant 0 : index
    %157 = vector.load %arg20[%c6_114, %c0_115] : memref<32x128xbf16, #tpu.memory_space<vmem>>, vector<2x128xbf16>
    %c384_116 = arith.constant 384 : index
    %c0_117 = arith.constant 0 : index
    %158 = vector.load %arg21[%c384_116, %c0_117] : memref<2048x512xbf16, #tpu.memory_space<vmem>>, vector<128x512xbf16>
    %cst_118 = arith.constant dense<0.000000e+00> : vector<2x512xf32>
    %159 = tpu.matmul %157, %158, %cst_118 {dimension_numbers = #tpu.dot_dimension_numbers<[1], [0], [0], [1], [0, 0, 1, 1], [], []>} : vector<2x128xbf16>, vector<128x512xbf16>, vector<2x512xf32> -> vector<2x512xf32>
    %160 = arith.addf %156, %159 : vector<2x512xf32>
    %c8_119 = arith.constant 8 : index
    %c0_120 = arith.constant 0 : index
    %161 = vector.load %arg20[%c8_119, %c0_120] : memref<32x128xbf16, #tpu.memory_space<vmem>>, vector<2x128xbf16>
    %c512_121 = arith.constant 512 : index
    %c0_122 = arith.constant 0 : index
    %162 = vector.load %arg21[%c512_121, %c0_122] : memref<2048x512xbf16, #tpu.memory_space<vmem>>, vector<128x512xbf16>
    %cst_123 = arith.constant dense<0.000000e+00> : vector<2x512xf32>
    %163 = tpu.matmul %161, %162, %cst_123 {dimension_numbers = #tpu.dot_dimension_numbers<[1], [0], [0], [1], [0, 0, 1, 1], [], []>} : vector<2x128xbf16>, vector<128x512xbf16>, vector<2x512xf32> -> vector<2x512xf32>
    %164 = arith.addf %160, %163 : vector<2x512xf32>
    %c10_124 = arith.constant 10 : index
    %c0_125 = arith.constant 0 : index
    %165 = vector.load %arg20[%c10_124, %c0_125] : memref<32x128xbf16, #tpu.memory_space<vmem>>, vector<2x128xbf16>
    %c640 = arith.constant 640 : index
    %c0_126 = arith.constant 0 : index
    %166 = vector.load %arg21[%c640, %c0_126] : memref<2048x512xbf16, #tpu.memory_space<vmem>>, vector<128x512xbf16>
    %cst_127 = arith.constant dense<0.000000e+00> : vector<2x512xf32>
    %167 = tpu.matmul %165, %166, %cst_127 {dimension_numbers = #tpu.dot_dimension_numbers<[1], [0], [0], [1], [0, 0, 1, 1], [], []>} : vector<2x128xbf16>, vector<128x512xbf16>, vector<2x512xf32> -> vector<2x512xf32>
    %168 = arith.addf %164, %167 : vector<2x512xf32>
    %c12_128 = arith.constant 12 : index
    %c0_129 = arith.constant 0 : index
    %169 = vector.load %arg20[%c12_128, %c0_129] : memref<32x128xbf16, #tpu.memory_space<vmem>>, vector<2x128xbf16>
    %c768 = arith.constant 768 : index
    %c0_130 = arith.constant 0 : index
    %170 = vector.load %arg21[%c768, %c0_130] : memref<2048x512xbf16, #tpu.memory_space<vmem>>, vector<128x512xbf16>
    %cst_131 = arith.constant dense<0.000000e+00> : vector<2x512xf32>
    %171 = tpu.matmul %169, %170, %cst_131 {dimension_numbers = #tpu.dot_dimension_numbers<[1], [0], [0], [1], [0, 0, 1, 1], [], []>} : vector<2x128xbf16>, vector<128x512xbf16>, vector<2x512xf32> -> vector<2x512xf32>
    %172 = arith.addf %168, %171 : vector<2x512xf32>
    %c14_132 = arith.constant 14 : index
    %c0_133 = arith.constant 0 : index
    %173 = vector.load %arg20[%c14_132, %c0_133] : memref<32x128xbf16, #tpu.memory_space<vmem>>, vector<2x128xbf16>
    %c896 = arith.constant 896 : index
    %c0_134 = arith.constant 0 : index
    %174 = vector.load %arg21[%c896, %c0_134] : memref<2048x512xbf16, #tpu.memory_space<vmem>>, vector<128x512xbf16>
    %cst_135 = arith.constant dense<0.000000e+00> : vector<2x512xf32>
    %175 = tpu.matmul %173, %174, %cst_135 {dimension_numbers = #tpu.dot_dimension_numbers<[1], [0], [0], [1], [0, 0, 1, 1], [], []>} : vector<2x128xbf16>, vector<128x512xbf16>, vector<2x512xf32> -> vector<2x512xf32>
    %176 = arith.addf %172, %175 : vector<2x512xf32>
    %c16 = arith.constant 16 : index
    %c0_136 = arith.constant 0 : index
    %177 = vector.load %arg20[%c16, %c0_136] : memref<32x128xbf16, #tpu.memory_space<vmem>>, vector<2x128xbf16>
    %c1024 = arith.constant 1024 : index
    %c0_137 = arith.constant 0 : index
    %178 = vector.load %arg21[%c1024, %c0_137] : memref<2048x512xbf16, #tpu.memory_space<vmem>>, vector<128x512xbf16>
    %cst_138 = arith.constant dense<0.000000e+00> : vector<2x512xf32>
    %179 = tpu.matmul %177, %178, %cst_138 {dimension_numbers = #tpu.dot_dimension_numbers<[1], [0], [0], [1], [0, 0, 1, 1], [], []>} : vector<2x128xbf16>, vector<128x512xbf16>, vector<2x512xf32> -> vector<2x512xf32>
    %180 = arith.addf %176, %179 : vector<2x512xf32>
    %c18 = arith.constant 18 : index
    %c0_139 = arith.constant 0 : index
    %181 = vector.load %arg20[%c18, %c0_139] : memref<32x128xbf16, #tpu.memory_space<vmem>>, vector<2x128xbf16>
    %c1152 = arith.constant 1152 : index
    %c0_140 = arith.constant 0 : index
    %182 = vector.load %arg21[%c1152, %c0_140] : memref<2048x512xbf16, #tpu.memory_space<vmem>>, vector<128x512xbf16>
    %cst_141 = arith.constant dense<0.000000e+00> : vector<2x512xf32>
    %183 = tpu.matmul %181, %182, %cst_141 {dimension_numbers = #tpu.dot_dimension_numbers<[1], [0], [0], [1], [0, 0, 1, 1], [], []>} : vector<2x128xbf16>, vector<128x512xbf16>, vector<2x512xf32> -> vector<2x512xf32>
    %184 = arith.addf %180, %183 : vector<2x512xf32>
    %c20_142 = arith.constant 20 : index
    %c0_143 = arith.constant 0 : index
    %185 = vector.load %arg20[%c20_142, %c0_143] : memref<32x128xbf16, #tpu.memory_space<vmem>>, vector<2x128xbf16>
    %c1280 = arith.constant 1280 : index
    %c0_144 = arith.constant 0 : index
    %186 = vector.load %arg21[%c1280, %c0_144] : memref<2048x512xbf16, #tpu.memory_space<vmem>>, vector<128x512xbf16>
    %cst_145 = arith.constant dense<0.000000e+00> : vector<2x512xf32>
    %187 = tpu.matmul %185, %186, %cst_145 {dimension_numbers = #tpu.dot_dimension_numbers<[1], [0], [0], [1], [0, 0, 1, 1], [], []>} : vector<2x128xbf16>, vector<128x512xbf16>, vector<2x512xf32> -> vector<2x512xf32>
    %188 = arith.addf %184, %187 : vector<2x512xf32>
    %c22_146 = arith.constant 22 : index
    %c0_147 = arith.constant 0 : index
    %189 = vector.load %arg20[%c22_146, %c0_147] : memref<32x128xbf16, #tpu.memory_space<vmem>>, vector<2x128xbf16>
    %c1408 = arith.constant 1408 : index
    %c0_148 = arith.constant 0 : index
    %190 = vector.load %arg21[%c1408, %c0_148] : memref<2048x512xbf16, #tpu.memory_space<vmem>>, vector<128x512xbf16>
    %cst_149 = arith.constant dense<0.000000e+00> : vector<2x512xf32>
    %191 = tpu.matmul %189, %190, %cst_149 {dimension_numbers = #tpu.dot_dimension_numbers<[1], [0], [0], [1], [0, 0, 1, 1], [], []>} : vector<2x128xbf16>, vector<128x512xbf16>, vector<2x512xf32> -> vector<2x512xf32>
    %192 = arith.addf %188, %191 : vector<2x512xf32>
    %c24 = arith.constant 24 : index
    %c0_150 = arith.constant 0 : index
    %193 = vector.load %arg20[%c24, %c0_150] : memref<32x128xbf16, #tpu.memory_space<vmem>>, vector<2x128xbf16>
    %c1536 = arith.constant 1536 : index
    %c0_151 = arith.constant 0 : index
    %194 = vector.load %arg21[%c1536, %c0_151] : memref<2048x512xbf16, #tpu.memory_space<vmem>>, vector<128x512xbf16>
    %cst_152 = arith.constant dense<0.000000e+00> : vector<2x512xf32>
    %195 = tpu.matmul %193, %194, %cst_152 {dimension_numbers = #tpu.dot_dimension_numbers<[1], [0], [0], [1], [0, 0, 1, 1], [], []>} : vector<2x128xbf16>, vector<128x512xbf16>, vector<2x512xf32> -> vector<2x512xf32>
    %196 = arith.addf %192, %195 : vector<2x512xf32>
    %c26 = arith.constant 26 : index
    %c0_153 = arith.constant 0 : index
    %197 = vector.load %arg20[%c26, %c0_153] : memref<32x128xbf16, #tpu.memory_space<vmem>>, vector<2x128xbf16>
    %c1664 = arith.constant 1664 : index
    %c0_154 = arith.constant 0 : index
    %198 = vector.load %arg21[%c1664, %c0_154] : memref<2048x512xbf16, #tpu.memory_space<vmem>>, vector<128x512xbf16>
    %cst_155 = arith.constant dense<0.000000e+00> : vector<2x512xf32>
    %199 = tpu.matmul %197, %198, %cst_155 {dimension_numbers = #tpu.dot_dimension_numbers<[1], [0], [0], [1], [0, 0, 1, 1], [], []>} : vector<2x128xbf16>, vector<128x512xbf16>, vector<2x512xf32> -> vector<2x512xf32>
    %200 = arith.addf %196, %199 : vector<2x512xf32>
    %c28 = arith.constant 28 : index
    %c0_156 = arith.constant 0 : index
    %201 = vector.load %arg20[%c28, %c0_156] : memref<32x128xbf16, #tpu.memory_space<vmem>>, vector<2x128xbf16>
    %c1792 = arith.constant 1792 : index
    %c0_157 = arith.constant 0 : index
    %202 = vector.load %arg21[%c1792, %c0_157] : memref<2048x512xbf16, #tpu.memory_space<vmem>>, vector<128x512xbf16>
    %cst_158 = arith.constant dense<0.000000e+00> : vector<2x512xf32>
    %203 = tpu.matmul %201, %202, %cst_158 {dimension_numbers = #tpu.dot_dimension_numbers<[1], [0], [0], [1], [0, 0, 1, 1], [], []>} : vector<2x128xbf16>, vector<128x512xbf16>, vector<2x512xf32> -> vector<2x512xf32>
    %204 = arith.addf %200, %203 : vector<2x512xf32>
    %c30 = arith.constant 30 : index
    %c0_159 = arith.constant 0 : index
    %205 = vector.load %arg20[%c30, %c0_159] : memref<32x128xbf16, #tpu.memory_space<vmem>>, vector<2x128xbf16>
    %c1920 = arith.constant 1920 : index
    %c0_160 = arith.constant 0 : index
    %206 = vector.load %arg21[%c1920, %c0_160] : memref<2048x512xbf16, #tpu.memory_space<vmem>>, vector<128x512xbf16>
    %cst_161 = arith.constant dense<0.000000e+00> : vector<2x512xf32>
    %207 = tpu.matmul %205, %206, %cst_161 {dimension_numbers = #tpu.dot_dimension_numbers<[1], [0], [0], [1], [0, 0, 1, 1], [], []>} : vector<2x128xbf16>, vector<128x512xbf16>, vector<2x512xf32> -> vector<2x512xf32>
    %208 = arith.addf %204, %207 : vector<2x512xf32>
    %c0_162 = arith.constant 0 : index
    %c0_163 = arith.constant 0 : index
    %209 = vector.load %arg12[%c0_162, %c0_163] : memref<1x512xf32, #tpu.memory_space<vmem>>, vector<1x512xf32>
    %210 = vector.broadcast %209 : vector<1x512xf32> to vector<2x512xf32>
    %211 = arith.addf %208, %210 : vector<2x512xf32>
    %cst_164 = arith.constant dense<0.000000e+00> : vector<2xf32>
    %212 = vector.multi_reduction <add>, %211, %cst_164 [1] : vector<2x512xf32> to vector<2xf32>
    %213 = vector.shape_cast %212 : vector<2xf32> to vector<2x1xf32>
    %cst_165 = arith.constant 5.120000e+02 : f32
    %214 = vector.broadcast %cst_165 : f32 to vector<2x1xf32>
    %215 = arith.divf %213, %214 : vector<2x1xf32>
    %216 = vector.broadcast %215 : vector<2x1xf32> to vector<2x512xf32>
    %217 = arith.subf %211, %216 : vector<2x512xf32>
    %218 = vector.broadcast %215 : vector<2x1xf32> to vector<2x512xf32>
    %219 = arith.subf %211, %218 : vector<2x512xf32>
    %220 = arith.mulf %217, %219 : vector<2x512xf32>
    %cst_166 = arith.constant dense<0.000000e+00> : vector<2xf32>
    %221 = vector.multi_reduction <add>, %220, %cst_166 [1] : vector<2x512xf32> to vector<2xf32>
    %222 = vector.shape_cast %221 : vector<2xf32> to vector<2x1xf32>
    %cst_167 = arith.constant 5.120000e+02 : f32
    %223 = vector.broadcast %cst_167 : f32 to vector<2x1xf32>
    %224 = arith.divf %222, %223 : vector<2x1xf32>
    %225 = vector.broadcast %215 : vector<2x1xf32> to vector<2x512xf32>
    %226 = arith.subf %211, %225 : vector<2x512xf32>
    %cst_168 = arith.constant 9.99999974E-6 : f32
    %227 = vector.broadcast %cst_168 : f32 to vector<2x1xf32>
    %228 = arith.addf %224, %227 : vector<2x1xf32>
    %229 = math.rsqrt %228 : vector<2x1xf32>
    %230 = vector.broadcast %229 : vector<2x1xf32> to vector<2x512xf32>
    %231 = arith.mulf %226, %230 : vector<2x512xf32>
    %c0_169 = arith.constant 0 : index
    %c0_170 = arith.constant 0 : index
    %232 = vector.load %arg13[%c0_169, %c0_170] : memref<1x512xf32, #tpu.memory_space<vmem>>, vector<1x512xf32>
    %233 = vector.broadcast %232 : vector<1x512xf32> to vector<2x512xf32>
    %234 = arith.mulf %231, %233 : vector<2x512xf32>
    %c0_171 = arith.constant 0 : index
    %c0_172 = arith.constant 0 : index
    %235 = vector.load %arg14[%c0_171, %c0_172] : memref<1x512xf32, #tpu.memory_space<vmem>>, vector<1x512xf32>
    %236 = vector.broadcast %235 : vector<1x512xf32> to vector<2x512xf32>
    %237 = arith.addf %234, %236 : vector<2x512xf32>
    %238 = arith.negf %237 : vector<2x512xf32>
    %239 = math.exp %238 : vector<2x512xf32>
    %cst_173 = arith.constant 1.000000e+00 : f32
    %240 = vector.broadcast %cst_173 : f32 to vector<2x512xf32>
    %241 = arith.addf %240, %239 : vector<2x512xf32>
    %242 = arith.divf %240, %241 : vector<2x512xf32>
    %243 = arith.mulf %237, %242 : vector<2x512xf32>
    %c1_i32_174 = arith.constant 1 : i32
    %244 = tpu.memref_slice %arg23[%c1_i32_174] : memref<2x!tpu.dma_semaphore, #tpu.memory_space<semaphore_mem>> -> memref<1x!tpu.dma_semaphore, #tpu.memory_space<semaphore_mem>>
    %245 = tpu.memref_squeeze %244 : memref<1x!tpu.dma_semaphore, #tpu.memory_space<semaphore_mem>> -> memref<!tpu.dma_semaphore, #tpu.memory_space<semaphore_mem>>
    tpu.wait_dma2 semaphore(%245 : memref<!tpu.dma_semaphore, #tpu.memory_space<semaphore_mem>>) src(%arg15 : memref<512x512xbf16, #tpu.memory_space<any>>) dst(%arg22 : memref<512x512xbf16, #tpu.memory_space<vmem>>)
    %246 = arith.truncf %243 : vector<2x512xf32> to vector<2x512xbf16>
    %c0_175 = arith.constant 0 : index
    %c0_176 = arith.constant 0 : index
    %247 = vector.load %arg22[%c0_175, %c0_176] : memref<512x512xbf16, #tpu.memory_space<vmem>>, vector<512x512xbf16>
    %cst_177 = arith.constant dense<0.000000e+00> : vector<2x512xf32>
    %248 = tpu.matmul %246, %247, %cst_177 {dimension_numbers = #tpu.dot_dimension_numbers<[1], [0], [0], [1], [0, 0, 1, 1], [], []>} : vector<2x512xbf16>, vector<512x512xbf16>, vector<2x512xf32> -> vector<2x512xf32>
    %c0_178 = arith.constant 0 : index
    %c0_179 = arith.constant 0 : index
    %249 = vector.load %arg16[%c0_178, %c0_179] : memref<1x512xf32, #tpu.memory_space<vmem>>, vector<1x512xf32>
    %250 = vector.broadcast %249 : vector<1x512xf32> to vector<2x512xf32>
    %251 = arith.addf %248, %250 : vector<2x512xf32>
    %252 = math.tanh %251 : vector<2x512xf32>
    %253 = arith.mulf %252, %252 : vector<2x512xf32>
    %cst_180 = arith.constant dense<0.000000e+00> : vector<2xf32>
    %254 = vector.multi_reduction <add>, %253, %cst_180 [1] : vector<2x512xf32> to vector<2xf32>
    %255 = vector.shape_cast %254 : vector<2xf32> to vector<2x1xf32>
    %256 = math.sqrt %255 : vector<2x1xf32>
    %cst_181 = arith.constant 9.99999996E-13 : f32
    %257 = vector.broadcast %cst_181 : f32 to vector<2x1xf32>
    %258 = arith.maximumf %256, %257 : vector<2x1xf32>
    %259 = vector.broadcast %258 : vector<2x1xf32> to vector<2x512xf32>
    %260 = arith.divf %252, %259 : vector<2x512xf32>
    %c0_182 = arith.constant 0 : index
    %c0_183 = arith.constant 0 : index
    %261 = vector.load %arg17[%c0_182, %c0_183] : memref<2x512xf32, #tpu.memory_space<vmem>>, vector<2x512xf32>
    tpu.vector_store %arg17[%c0_182, %c0_183], %260 {strides = array<i32>} : memref<2x512xf32, #tpu.memory_space<vmem>>, vector<2x512xf32>,
    return
  }
  func.func @transform_0(%arg0: i32) -> (i32, i32) {
    %c0_i32 = arith.constant 0 : i32
    %c0_i32_0 = arith.constant 0 : i32
    %c0_i32_1 = arith.constant 0 : i32
    return %c0_i32, %c0_i32_0 : i32, i32
  }
  func.func @transform_1(%arg0: i32) -> (i32, i32) {
    %c0_i32 = arith.constant 0 : i32
    %c0_i32_0 = arith.constant 0 : i32
    %c0_i32_1 = arith.constant 0 : i32
    return %c0_i32, %c0_i32_0 : i32, i32
  }
  func.func @transform_2(%arg0: i32) -> (i32, i32) {
    %c0_i32 = arith.constant 0 : i32
    %c0_i32_0 = arith.constant 0 : i32
    %c0_i32_1 = arith.constant 0 : i32
    return %c0_i32, %c0_i32_0 : i32, i32
  }
  func.func @transform_3(%arg0: i32) -> (i32, i32) {
    %c0_i32 = arith.constant 0 : i32
    %c0_i32_0 = arith.constant 0 : i32
    %c0_i32_1 = arith.constant 0 : i32
    return %c0_i32, %c0_i32_0 : i32, i32
  }
  func.func @transform_4(%arg0: i32) -> (i32, i32) {
    %c0_i32 = arith.constant 0 : i32
    %c0_i32_0 = arith.constant 0 : i32
    %c0_i32_1 = arith.constant 0 : i32
    return %c0_i32, %c0_i32_0 : i32, i32
  }
  func.func @transform_5(%arg0: i32) -> (i32, i32) {
    %c0_i32 = arith.constant 0 : i32
    %c0_i32_0 = arith.constant 0 : i32
    %c0_i32_1 = arith.constant 0 : i32
    return %c0_i32, %c0_i32_0 : i32, i32
  }
  func.func @transform_6(%arg0: i32) -> (i32, i32) {
    %c0_i32 = arith.constant 0 : i32
    %c0_i32_0 = arith.constant 0 : i32
    %c0_i32_1 = arith.constant 0 : i32
    return %c0_i32, %c0_i32_0 : i32, i32
  }
  func.func @transform_7(%arg0: i32) -> (i32, i32) {
    %c0_i32 = arith.constant 0 : i32
    %c0_i32_0 = arith.constant 0 : i32
    %c0_i32_1 = arith.constant 0 : i32
    return %c0_i32, %c0_i32_0 : i32, i32
  }
  func.func @transform_8(%arg0: i32) -> (i32, i32) {
    %c0_i32 = arith.constant 0 : i32
    %c0_i32_0 = arith.constant 0 : i32
    %c0_i32_1 = arith.constant 0 : i32
    return %c0_i32, %c0_i32_0 : i32, i32
  }
  func.func @transform_9(%arg0: i32) -> (i32, i32) {
    %c0_i32 = arith.constant 0 : i32
    %c0_i32_0 = arith.constant 0 : i32
    %c0_i32_1 = arith.constant 0 : i32
    return %c0_i32, %c0_i32_0 : i32, i32
  }
  func.func @transform_11(%arg0: i32) -> (i32, i32) {
    %c0_i32 = arith.constant 0 : i32
    %c0_i32_0 = arith.constant 0 : i32
    %c0_i32_1 = arith.constant 0 : i32
    return %c0_i32, %c0_i32_0 : i32, i32
  }
  func.func @transform_12(%arg0: i32) -> (i32, i32) {
    %c0_i32 = arith.constant 0 : i32
    %c0_i32_0 = arith.constant 0 : i32
    %c0_i32_1 = arith.constant 0 : i32
    return %c0_i32, %c0_i32_0 : i32, i32
  }
  func.func @transform_13(%arg0: i32) -> (i32, i32) {
    %c0_i32 = arith.constant 0 : i32
    %c0_i32_0 = arith.constant 0 : i32
    %c0_i32_1 = arith.constant 0 : i32
    return %c0_i32, %c0_i32_0 : i32, i32
  }
  func.func @transform_15(%arg0: i32) -> (i32, i32) {
    %c0_i32 = arith.constant 0 : i32
    %c0_i32_0 = arith.constant 0 : i32
    %c0_i32_1 = arith.constant 0 : i32
    return %c0_i32, %c0_i32_0 : i32, i32
  }
  func.func @transform_16(%arg0: i32) -> (i32, i32) {
    %c0_i32 = arith.constant 0 : i32
    %c0_i32_0 = arith.constant 0 : i32
    %c0_i32_1 = arith.constant 0 : i32
    return %c0_i32, %c0_i32_0 : i32, i32
  }
}

</mosaic_0001>

<bundles_post_ra>
// kernel: _lambda_.1
= control target key start
LH: loop header
LB: loop body
LE: loop exit
PB: predicated region body
PF: predicated region fallthrough
CT: control target
= control target key end

     0   :  { %s18213_s0 = inlined_call_operand.vmem [shape: bf16[512,9], index: 0, kind: input, shape index: {}]   ;;  %s18214_s1 = inlined_call_operand.hbm [shape: bf16[9,32], index: 1, kind: input, shape index: {}]   ;;  %s18215_s2 = inlined_call_operand.hbm [shape: f32[1,32], index: 2, kind: input, shape index: {}]   ;;  %s18216_s3 = inlined_call_operand.hbm [shape: s32[200,1], index: 3, kind: input, shape index: {}]   ;;  %s18217_s4 = inlined_call_operand.hbm [shape: bf16[288,64], index: 4, kind: input, shape index: {}]   ;;  %s18218_s5 = inlined_call_operand.hbm [shape: f32[1,64], index: 5, kind: input, shape index: {}]   ;;  %s18219_s6 = inlined_call_operand.hbm [shape: s32[72,1], index: 6, kind: input, shape index: {}]   ;;  %s18220_s7 = inlined_call_operand.hbm [shape: bf16[576,128], index: 7, kind: input, shape index: {}]   ;;  %s18221_s8 = inlined_call_operand.hbm [shape: f32[1,128], index: 8, kind: input, shape index: {}]   ;;  %s18222_s9 = inlined_call_operand.hbm [shape: s32[32,1], index: 9, kind: input, shape index: {}]   ;;  %s18223_s10 = inlined_call_operand.hbm [shape: bf16[2048,512], index: 10, kind: input, shape index: {}]   ;;  %s18224_s11 = inlined_call_operand.hbm [shape: f32[1,512], index: 11, kind: input, shape index: {}]   ;;  %s18225_s12 = inlined_call_operand.vmem [shape: f32[1,512], index: 12, kind: input, shape index: {}]   ;;  %s18226_s13 = inlined_call_operand.vmem [shape: f32[1,512], index: 13, kind: input, shape index: {}]   ;;  %s18227_s14 = inlined_call_operand.hbm [shape: bf16[512,512], index: 14, kind: input, shape index: {}]   ;;  %s18228_s15 = inlined_call_operand.hbm [shape: f32[1,512], index: 15, kind: input, shape index: {}]   ;;  %s18229_s16 = inlined_call_operand.hbm [shape: f32[2,512], index: 16, kind: output, shape index: {}]  }
   0x1   :  { %18288 = sst [smem:[#allocation115_spill]] %s18213_s0 }
   0x2   :  { %21 = vsyncpa [#allocation9], 0 }
   0x3   :  { %22 = vsyncpa [#allocation12], 0 }
   0x4   :  { %23 = vsyncpa [#allocation15], 0 }
   0x5   :  { %24 = vsyncpa [#allocation18], 0 }
   0x6   :  { %25 = vsyncpa [#allocation21], 0 }
   0x7   :  { %26 = vsyncpa [#allocation24], 0  ;;  %s48_s23 = sshll.u32 %s18215_s2, 4  ;;  %s49_s23 = int_to_ptr.hbm [resolvable:$true] %s48_s23 }
   0x8   :  { %27 = vsyncpa [#allocation10], 0  ;;  %s15314_s24 = smov [#allocation11]   ;;  %s71_s28 = sshll.u32 %s18217_s4, 4  ;;  %s72_s28 = int_to_ptr.hbm [resolvable:$true] %s71_s28 }
   0x9   :  { %s50_s25 = sshll.u32 %s15314_s24, 4  ;;  %s15315_s29 = smov [#allocation14]   ;;  %s51_s25 = int_to_ptr.vmem [resolvable:$true] %s50_s25 }
   0xa   :  { %53 = dma.hbm_to_vmem [thread:$0]  %s49_s23, 16, %s51_s25, [#allocation12]  }
   0xb   :  { %s73_s30 = sshll.u32 %s15315_s29, 4  ;;  %s15316_s0 = smov 64   ;;  %s74_s30 = int_to_ptr.vmem [resolvable:$true] %s73_s30 }
   0xc   :  { %s15317_s17 = smov 4   ;;  %s95_s19 = sshll.u32 %s18219_s6, 4  ;;  %s96_s19 = int_to_ptr.hbm [resolvable:$true] %s95_s19 }
   0xd   :  { %79 = dma.hbm_to_vmem [thread:$0]  %s72_s28, 2304, %s74_s30, [#allocation15], %s15316_s0, %s15316_s0, %s15317_s17  }
   0xe   :  { %s15318_s20 = smov [#allocation17]   ;;  %s122_s23 = sshll.u32 %s18221_s8, 4  ;;  %s123_s23 = int_to_ptr.hbm [resolvable:$true] %s122_s23 }
   0xf   :  { %s97_s21 = sshll.u32 %s15318_s20, 4  ;;  %s15319_s24 = smov 128   ;;  %s98_s21 = int_to_ptr.vmem [resolvable:$true] %s97_s21 }
  0x10   :  { %s15320_s25 = smov 8   ;;  %s15321_s26 = smov [#allocation20]  }
  0x11   :  { %103 = dma.hbm_to_vmem [thread:$0]  %s96_s19, 1152, %s98_s21, [#allocation18], %s15319_s24, %s15319_s24, %s15320_s25  }
  0x12   :  { %s124_s27 = sshll.u32 %s15321_s26, 4  ;;  %s146_s6 = sshll.u32 %s18224_s11, 4  ;;  %s125_s27 = int_to_ptr.vmem [resolvable:$true] %s124_s27  ;;  %s147_s6 = int_to_ptr.hbm [resolvable:$true] %s146_s6 }
  0x13   :  { %127 = dma.hbm_to_vmem [thread:$0]  %s123_s23, 16, %s125_s27, [#allocation21]  }
  0x14   :  { %s34_s8 = sshll.u32 %s18214_s1, 4  ;;  %s15322_s18 = smov [#allocation23]   ;;  %s35_s8 = int_to_ptr.hbm [resolvable:$true] %s34_s8 }
  0x15   :  { %s148_s20 = sshll.u32 %s15322_s18, 4  ;;  %s15323_s19 = smov [#allocation8]   ;;  %s149_s20 = int_to_ptr.vmem [resolvable:$true] %s148_s20 }
  0x16   :  { %151 = dma.hbm_to_vmem [thread:$0]  %s147_s6, 64, %s149_s20, [#allocation24]  }
  0x17   :  { %s36_s21 = sshll.u32 %s15323_s19, 4  ;;  %s58_s26 = sshll.u32 %s18216_s3, 4  ;;  %s37_s21 = int_to_ptr.vmem [resolvable:$true] %s36_s21  ;;  %s59_s26 = int_to_ptr.hbm [resolvable:$true] %s58_s26 }
  0x18   :  { %42 = dma.hbm_to_vmem [thread:$0]  %s35_s8, 128, %s37_s21, [#allocation9], %s15316_s0, %s15316_s0, %s15317_s17  }
  0x19   :  { %s85_s1 = sshll.u32 %s18218_s5, 4  ;;  %s15324_s27 = smov [#allocation13]   ;;  %s86_s1 = int_to_ptr.hbm [resolvable:$true] %s85_s1 }
  0x1a   :  { %s60_s28 = sshll.u32 %s15324_s27, 4  ;;  %s15325_s29 = smov [#allocation16]   ;;  %s61_s28 = int_to_ptr.vmem [resolvable:$true] %s60_s28 }
  0x1b   :  { %66 = dma.hbm_to_vmem [thread:$0]  %s59_s26, 3200, %s61_s28, [#allocation12], %s15319_s24, %s15319_s24, %s15320_s25  }
  0x1c   :  { %s87_s3 = sshll.u32 %s15325_s29, 4  ;;  %s108_s2 = sshll.u32 %s18220_s7, 4  ;;  %s88_s3 = int_to_ptr.vmem [resolvable:$true] %s87_s3  ;;  %s109_s2 = int_to_ptr.hbm [resolvable:$true] %s108_s2 }
  0x1d   :  { %90 = dma.hbm_to_vmem [thread:$0]  %s86_s1, 16, %s88_s3, [#allocation15]  }
  0x1e   :  { %s132_s5 = sshll.u32 %s18222_s9, 4  ;;  %s15326_s20 = smov [#allocation19]   ;;  %s133_s5 = int_to_ptr.hbm [resolvable:$true] %s132_s5 }
  0x1f   :  { %s110_s19 = sshll.u32 %s15326_s20, 4  ;;  %s15327_s21 = smov [#allocation22]   ;;  %s111_s19 = int_to_ptr.vmem [resolvable:$true] %s110_s19 }
  0x20   :  { %116 = dma.hbm_to_vmem [thread:$0]  %s109_s2, 4608, %s111_s19, [#allocation18], %s15316_s0, %s15316_s0, %s15317_s17  }
  0x21   :  { %s134_s22 = sshll.u32 %s15327_s21, 4  ;;  %s161_s7 = sshll.u32 %s18228_s15, 4  ;;  %s135_s22 = int_to_ptr.vmem [resolvable:$true] %s134_s22  ;;  %s162_s7 = int_to_ptr.hbm [resolvable:$true] %s161_s7 }
  0x22   :  { %140 = dma.hbm_to_vmem [thread:$0]  %s133_s5, 512, %s135_s22, [#allocation21], %s15319_s24, %s15319_s24, %s15320_s25  }
  0x23   :  { %s15328_s9 = smov [#allocation25]  }
  0x24   :  { %s163_s11 = sshll.u32 %s15328_s9, 4  ;;  %s164_s11 = int_to_ptr.vmem [resolvable:$true] %s163_s11 }
  0x25   :  { %166 = dma.hbm_to_vmem [thread:$0]  %s162_s7, 64, %s164_s11, [#allocation24]  }
  0x26   :  { %15296 = dma.done.wait [#allocation9], 128  }
  0x27   :  { %15297 = vsyncadd [#allocation9], 4294967168 }
  0x28   :  { %15298 = dma.done.wait [#allocation12], 3216  }
  0x29   :  { %15299 = vsyncadd [#allocation12], 4294964080 }
  0x2a   :  { %15300 = dma.done.wait [#allocation15], 2320  }
  0x2b   :  { %15301 = vsyncadd [#allocation15], 4294964976 }
  0x2c   :  { %15302 = dma.done.wait [#allocation18], 5760  }
  0x2d   :  { %15303 = vsyncadd [#allocation18], 4294961536 }
  0x2e   :  { %15304 = dma.done.wait [#allocation21], 528  }
  0x2f   :  { %15305 = vsyncadd [#allocation21], 4294966768 }
  0x30   :  { %15306 = dma.done.wait [#allocation24], 128  }
  0x31   :  { %15307 = vsyncadd [#allocation24], 4294967168  ;;  %vm18242_vm0 = vcmask 1043456   ;;  %vm18243_vm1 = vcmask 1044480   ;;  %v18231_v0 = vmov 65535   ;;  %s18289_s17 = sld [smem:[#allocation115_spill]] }
  0x32   :  { %v569_v1 = vsel %vm18242_vm0, 4294967295, %v18231_v0  ;;  %v10890_v2 = vld [vmem:[#allocation8] sm:$0xf]  ;;  %v14118_v3 = vld [vmem:[#allocation8] sm:$0x10]  ;;  %vm18250_vm2 = vcmask 72704  }
  0x33   :  { %v570_v4 = vsel %vm18243_vm1, %v569_v1, 0  ;;  %v10891_v5 = vor.u32 %v14118_v3, %v10890_v2  ;;  %vm18251_vm3 = vcmask 1046528   ;;  %v1260_v30 = vld [vmem:[#allocation13] sm:$0xff]  ;;  %v15330_v31 = vmov 0   ;;  %v15522_v37 = vld [vmem:[#allocation11] ss:$0 sm:$0xff] }
  0x34   :  { %14919 = vset.pattern.permute.xlu0 %v15330_v31  ;;  %14920 = vset.pattern.permute.xlu1 %v15330_v31  ;;  %v1261_v40 = vld [vmem:[#allocation13 + $0x8] sm:$0xff]  ;;  %v1262_v49 = vld [vmem:[#allocation13 + $0x10] sm:$0xff]  ;;  %v1263_v58 = vld [vmem:[#allocation13 + $0x18] sm:$0xff]  ;;  %s219_s5 = sshll.u32 %s18223_s10, 4  ;;  %s15333_s20 = smov [#allocation5]   ;;  %s220_s5 = int_to_ptr.hbm [resolvable:$true] %s219_s5 }
  0x35   :  { %v572_v6 = vand.u32 %v10891_v5, %v570_v4  ;;  %1286 = vperm.xlu0 %14919, %v1260_v30   ;;  %14921 = vset.pattern.permute.xlu2 %v15330_v31  ;;  %v1266_v30 = vld [vmem:[#allocation13 + $0x30] sm:$0xff]  ;;  %s221_s19 = sshll.u32 %s15333_s20, 4  ;;  %s233_s4 = sshll.u32 %s18227_s14, 4  ;;  %s222_s19 = int_to_ptr.vmem [resolvable:$true] %s221_s19  ;;  %s234_s4 = int_to_ptr.hbm [resolvable:$true] %s233_s4 }
  0x36   :  { %1292 = vperm.xlu1 %14920, %v1262_v49   ;;  %224 = dma.hbm_to_vmem [thread:$0]  %s220_s5, 65536, %s222_s19, [#allocation7] }
  0x37   :  { %v14086_v7 = vld [vmem:[%s18289_s17] sm:$0xff]  ;;  %581 = vmatpush.bf16.msra.mxu0 %v572_v6  ;;  %v14087_v8 = vld [vmem:[%s18289_s17 + $0x8] sm:$0xff]  ;;  %v14088_v9 = vld [vmem:[%s18289_s17 + $0x10] sm:$0xff]  ;;  %s15334_s26 = smov [#allocation6]  }
  0x38   :  { %v14089_v10 = vld [vmem:[%s18289_s17 + $0x18] sm:$0xff]  ;;  %v14090_v11 = vld [vmem:[%s18289_s17 + $0x20] sm:$0xff]  ;;  %v14091_v12 = vld [vmem:[%s18289_s17 + $0x28] sm:$0xff]  ;;  %s235_s7 = sshll.u32 %s15334_s26, 4  ;;  %s236_s7 = int_to_ptr.vmem [resolvable:$true] %s235_s7 }
  0x39   :  { %v14092_v13 = vld [vmem:[%s18289_s17 + $0x30] sm:$0xff]  ;;  %v14093_v14 = vld [vmem:[%s18289_s17 + $0x38] sm:$0xff]  ;;  %v14094_v15 = vld [vmem:[%s18289_s17 + $0x40] sm:$0xff]  ;;  %238 = dma.hbm_to_vmem [thread:$0]  %s234_s4, 16384, %s236_s7, [#allocation7 + $0x1] }
  0x3a   :  { %10892 = vmatmul.msk.bf16.vlgmr.msra.gmra.mxu0 %vm18250_vm2, %v14086_v7  ;;  %v14095_v22 = vld [vmem:[%s18289_s17 + $0x48] sm:$0xff]  ;;  %v14096_v34 = vld [vmem:[%s18289_s17 + $0x50] sm:$0xff]  ;;  %v14097_v53 = vld [vmem:[%s18289_s17 + $0x58] sm:$0xff] }
  0x3b   :  { %v14098_v7 = vld [vmem:[%s18289_s17 + $0x60] sm:$0xff] }
  0x3d   :  { %1289 = vperm.xlu0 %14919, %v1261_v40  }
  0x3e   :  { %1295 = vperm.xlu1 %14920, %v1263_v58  }
  0x45   :  { %1304 = vperm.xlu0 %14919, %v1266_v30   ;;  %v1282_v30 = vld [vmem:[#allocation13 + $0xb0] sm:$0xff] }
  0x4a   :  { %10893 = vmatmul.msk.bf16.gmra.mxu0 %vm18250_vm2, %v14087_v8 }
  0x5a   :  { %10894 = vmatmul.msk.bf16.gmra.mxu0 %vm18250_vm2, %v14088_v9 }
  0x6a   :  { %10895 = vmatmul.msk.bf16.gmra.mxu0 %vm18250_vm2, %v14089_v10 }
  0x7a   :  { %10896 = vmatmul.msk.bf16.gmra.mxu0 %vm18250_vm2, %v14090_v11 }
  0x8a   :  { %10897 = vmatmul.msk.bf16.gmra.mxu0 %vm18250_vm2, %v14091_v12 }
  0x9a   :  { %10898 = vmatmul.msk.bf16.gmra.mxu0 %vm18250_vm2, %v14092_v13 }
  0xaa   :  { %10899 = vmatmul.msk.bf16.gmra.mxu0 %vm18250_vm2, %v14093_v14 }
  0xb7   :  { %v583_v16 = vpop.f32.mrf.mxu0 }
  0xb8   :  { %v807_v18 = vrot.slane %v583_v16, 1 }
  0xba   :  { %10900 = vmatmul.msk.bf16.gmra.mxu0 %vm18250_vm2, %v14094_v15 }
  0xbf   :  { %v585_v17 = vpop.f32.mrf.mxu0 }
  0xc0   :  { %v808_v19 = vrot.slane %v585_v17, 1 }
  0xc2   :  { %v809_v20 = vsel %vm18251_vm3, %v807_v18, %v808_v19 }
  0xc3   :  { %v992_v21 = vmax.f32 %v583_v16, %v809_v20 }
  0xc7   :  { %v588_v23 = vpop.f32.mrf.mxu0 }
  0xc8   :  { %v810_v24 = vrot.slane %v588_v23, 1 }
  0xca   :  { %v811_v25 = vsel %vm18251_vm3, %v808_v19, %v810_v24  ;;  %10901 = vmatmul.msk.bf16.gmra.mxu0 %vm18250_vm2, %v14095_v22 }
  0xcb   :  { %v993_v26 = vmax.f32 %v585_v17, %v811_v25 }
  0xcf   :  { %v590_v27 = vpop.f32.mrf.mxu0 }
  0xd0   :  { %v812_v28 = vrot.slane %v590_v27, 1 }
  0xd2   :  { %v813_v29 = vsel %vm18251_vm3, %v810_v24, %v812_v28 }
  0xd3   :  { %v994_v32 = vmax.f32 %v588_v23, %v813_v29  ;;  %v14099_v23 = vld [vmem:[%s18289_s17 + $0x68] sm:$0xff]  ;;  %v1267_v29 = vld [vmem:[#allocation13 + $0x38] sm:$0xff] }
  0xd4   :  { %1307 = vperm.xlu1 %14920, %v1267_v29  }
  0xd5   :  { %v1066_v33 = vmax.f32 %v992_v21, %v994_v32 }
  0xd7   :  { %v593_v35 = vpop.f32.mrf.mxu0  ;;  %v1131_v42 = vadd.f32 %v15522_v37, %v1066_v33 }
  0xd8   :  { %v814_v36 = vrot.slane %v593_v35, 1 }
  0xd9   :  { %v1193_v46 = vmax.f32 %v1131_v42, 0.0 }
  0xda   :  { %v815_v38 = vsel %vm18251_vm3, %v812_v28, %v814_v36  ;;  %10902 = vmatmul.msk.bf16.gmra.mxu0 %vm18250_vm2, %v14096_v34  ;;  %v1264_v28 = vld [vmem:[#allocation13 + $0x20] sm:$0xff] }
  0xdb   :  { %v995_v39 = vmax.f32 %v590_v27, %v815_v38  ;;  %1298 = vperm.xlu2 %14921, %v1264_v28  }
  0xdd   :  { %v1067_v41 = vmax.f32 %v993_v26, %v995_v39 }
  0xdf   :  { %v595_v43 = vpop.f32.mrf.mxu0  ;;  %v1132_v44 = vadd.f32 %v15522_v37, %v1067_v41 }
  0xe0   :  { %v816_v45 = vrot.slane %v595_v43, 1 }
  0xe1   :  { %v1194_v47 = vmax.f32 %v1132_v44, 0.0  ;;  %v14100_v44 = vld [vmem:[%s18289_s17 + $0x70] sm:$0xff] }
  0xe2   :  { %v817_v48 = vsel %vm18251_vm3, %v814_v36, %v816_v45  ;;  %v1265_v36 = vld [vmem:[#allocation13 + $0x28] sm:$0xff] }
  0xe3   :  { %v996_v50 = vmax.f32 %v593_v35, %v817_v48  ;;  %v15529_v51 = vpack.c.bf16 %v1194_v47, %v1193_v46  ;;  %1301 = vperm.xlu2 %14921, %v1265_v36   ;;  %v1269_v48 = vld [vmem:[#allocation13 + $0x48] sm:$0xff] }
  0xe4   :  { %1313 = vperm.xlu0 %14919, %v1269_v48  }
  0xe5   :  { %v1068_v52 = vmax.f32 %v994_v32, %v996_v50 }
  0xe7   :  { %v598_v54 = vpop.f32.mrf.mxu0  ;;  %v1133_v60 = vadd.f32 %v15522_v37, %v1068_v52 }
  0xe8   :  { %v818_v55 = vrot.slane %v598_v54, 1 }
  0xe9   :  { %v1195_v1 = vmax.f32 %v1133_v60, 0.0  ;;  %v1270_v60 = vld [vmem:[#allocation13 + $0x50] sm:$0xff] }
  0xea   :  { %v819_v56 = vsel %vm18251_vm3, %v816_v45, %v818_v55  ;;  %10903 = vmatmul.msk.bf16.gmra.mxu0 %vm18250_vm2, %v14097_v53  ;;  %1316 = vperm.xlu1 %14920, %v1270_v60  }
  0xeb   :  { %v997_v57 = vmax.f32 %v595_v43, %v819_v56 }
  0xed   :  { %v1069_v59 = vmax.f32 %v995_v39, %v997_v57 }
  0xef   :  { %v600_v61 = vpop.f32.mrf.mxu0  ;;  %v1134_v62 = vadd.f32 %v15522_v37, %v1069_v59 }
  0xf0   :  { %v820_v63 = vrot.slane %v600_v61, 1 }
  0xf1   :  { %v1196_v2 = vmax.f32 %v1134_v62, 0.0  ;;  %v14101_v62 = vld [vmem:[%s18289_s17 + $0x78] sm:$0xff] }
  0xf2   :  { %v821_v3 = vsel %vm18251_vm3, %v818_v55, %v820_v63 }
  0xf3   :  { %v998_v4 = vmax.f32 %v598_v54, %v821_v3  ;;  %v15539_v5 = vpack.c.bf16 %v1196_v2, %v1195_v1 }
  0xf5   :  { %v1070_v6 = vmax.f32 %v996_v50, %v998_v4 }
  0xf7   :  { %v603_v8 = vpop.f32.mrf.mxu0  ;;  %v1135_v13 = vadd.f32 %v15522_v37, %v1070_v6  ;;  %v1273_v6 = vld [vmem:[#allocation13 + $0x68] sm:$0xff] }
  0xf8   :  { %v822_v9 = vrot.slane %v603_v8, 1  ;;  %1325 = vperm.xlu1 %14920, %v1273_v6  }
  0xf9   :  { %v1197_v17 = vmax.f32 %v1135_v13, 0.0 }
  0xfa   :  { %v823_v10 = vsel %vm18251_vm3, %v820_v63, %v822_v9  ;;  %10904 = vmatmul.msk.bf16.gmra.mxu0 %vm18250_vm2, %v14098_v7  ;;  %v1272_v7 = vld [vmem:[#allocation13 + $0x60] sm:$0xff] }
  0xfb   :  { %v999_v11 = vmax.f32 %v600_v61, %v823_v10  ;;  %1322 = vperm.xlu0 %14919, %v1272_v7  }
  0xfd   :  { %v1071_v12 = vmax.f32 %v997_v57, %v999_v11 }
  0xff   :  { %v605_v14 = vpop.f32.mrf.mxu0  ;;  %v1136_v15 = vadd.f32 %v15522_v37, %v1071_v12 }
 0x100   :  { %v824_v16 = vrot.slane %v605_v14, 1 }
 0x101   :  { %v1198_v18 = vmax.f32 %v1136_v15, 0.0  ;;  %v1276_v15 = vld [vmem:[#allocation13 + $0x80] sm:$0xff] }
 0x102   :  { %v825_v19 = vsel %vm18251_vm3, %v822_v9, %v824_v16  ;;  %1334 = vperm.xlu1 %14920, %v1276_v15  }
 0x103   :  { %v1000_v20 = vmax.f32 %v603_v8, %v825_v19  ;;  %v15549_v21 = vpack.c.bf16 %v1198_v18, %v1197_v17  ;;  %v1268_v17 = vld [vmem:[#allocation13 + $0x40] sm:$0xff] }
 0x104   :  { %v14102_v18 = vld [vmem:[%s18289_s17 + $0x80] sm:$0xff]  ;;  %1310 = vperm.xlu2 %14921, %v1268_v17  }
 0x105   :  { %v1072_v22 = vmax.f32 %v998_v4, %v1000_v20 }
 0x107   :  { %v608_v24 = vpop.f32.mrf.mxu0  ;;  %v1137_v32 = vadd.f32 %v15522_v37, %v1072_v22  ;;  %v1278_v22 = vld [vmem:[#allocation13 + $0x90] sm:$0xff] }
 0x108   :  { %v826_v25 = vrot.slane %v608_v24, 1 }
 0x109   :  { %v1199_v38 = vmax.f32 %v1137_v32, 0.0 }
 0x10a   :  { %v827_v26 = vsel %vm18251_vm3, %v824_v16, %v826_v25  ;;  %10905 = vmatmul.msk.bf16.gmra.mxu0 %vm18250_vm2, %v14099_v23  ;;  %v1275_v16 = vld [vmem:[#allocation13 + $0x78] sm:$0xff] }
 0x10b   :  { %v1001_v27 = vmax.f32 %v605_v14, %v827_v26  ;;  %1331 = vperm.xlu0 %14919, %v1275_v16  }
 0x10d   :  { %v1073_v31 = vmax.f32 %v999_v11, %v1001_v27 }
 0x10f   :  { %v610_v33 = vpop.f32.mrf.mxu0  ;;  %v1138_v34 = vadd.f32 %v15522_v37, %v1073_v31  ;;  %v1281_v31 = vld [vmem:[#allocation13 + $0xa8] sm:$0xff] }
 0x110   :  { %v828_v35 = vrot.slane %v610_v33, 1 }
 0x111   :  { %v1200_v39 = vmax.f32 %v1138_v34, 0.0  ;;  %v14103_v34 = vld [vmem:[%s18289_s17 + $0x88] sm:$0xff] }
 0x112   :  { %v829_v40 = vsel %vm18251_vm3, %v826_v25, %v828_v35 }
 0x113   :  { %v1002_v41 = vmax.f32 %v608_v24, %v829_v40  ;;  %v15559_v42 = vpack.c.bf16 %v1200_v39, %v1199_v38  ;;  %1340 = vperm.xlu0 %14919, %v1278_v22  }
 0x115   :  { %v1074_v43 = vmax.f32 %v1000_v20, %v1002_v41  ;;  %v1279_v20 = vld [vmem:[#allocation13 + $0x98] sm:$0xff] }
 0x116   :  { %1343 = vperm.xlu1 %14920, %v1279_v20   ;;  %v15610_v20 = vpop.permute.xlu0 %1286 }
 0x117   :  { %v613_v45 = vpop.f32.mrf.mxu0  ;;  %v1139_v52 = vadd.f32 %v15522_v37, %v1074_v43 }
 0x118   :  { %v830_v46 = vrot.slane %v613_v45, 1 }
 0x119   :  { %v1201_v56 = vmax.f32 %v1139_v52, 0.0 }
 0x11a   :  { %v831_v47 = vsel %vm18251_vm3, %v828_v35, %v830_v46  ;;  %10906 = vmatmul.msk.bf16.gmra.mxu0 %vm18250_vm2, %v14100_v44 }
 0x11b   :  { %v1003_v49 = vmax.f32 %v610_v33, %v831_v47  ;;  %v1271_v33 = vld [vmem:[#allocation13 + $0x58] sm:$0xff]  ;;  %1349 = vperm.xlu0 %14919, %v1281_v31  }
 0x11c   :  { %1319 = vperm.xlu2 %14921, %v1271_v33  }
 0x11d   :  { %v1075_v50 = vmax.f32 %v1001_v27, %v1003_v49 }
 0x11e   :  { %1352 = vperm.xlu1 %14920, %v1282_v30   ;;  %v1255_v30 = vlaneseq }
 0x11f   :  { %v615_v53 = vpop.f32.mrf.mxu0  ;;  %v1140_v54 = vadd.f32 %v15522_v37, %v1075_v50 }
 0x120   :  { %v832_v55 = vrot.slane %v615_v53, 1 }
 0x121   :  { %v1202_v57 = vmax.f32 %v1140_v54, 0.0 }
 0x122   :  { %v833_v58 = vsel %vm18251_vm3, %v830_v46, %v832_v55  ;;  %v1284_v46 = vld [vmem:[#allocation13 + $0xc0] sm:$0xff] }
 0x123   :  { %v15569_v59 = vpack.c.bf16 %v1202_v57, %v1201_v56  ;;  %v15571_v61 = vmax.f32 %v613_v45, %v833_v58  ;;  %v4230_v45 = vld [vmem:[#allocation17] sm:$0xff]  ;;  %1358 = vperm.xlu0 %14919, %v1284_v46  }
 0x125   :  { %v1076_v2 = vmax.f32 %v1002_v41, %v15571_v61 }
 0x126   :  { %4240 = vperm.xlu1 %14920, %v4230_v45  }
 0x127   :  { %v618_v63 = vpop.f32.mrf.mxu0  ;;  %v1141_v9 = vadd.f32 %v15522_v37, %v1076_v2 }
 0x128   :  { %v834_v1 = vrot.slane %v618_v63, 1 }
 0x129   :  { %v1203_v12 = vmax.f32 %v1141_v9, 0.0 }
 0x12a   :  { %v835_v3 = vsel %vm18251_vm3, %v832_v55, %v834_v1  ;;  %10907 = vmatmul.msk.bf16.gmra.mxu0 %vm18250_vm2, %v14101_v62 }
 0x12b   :  { %v1005_v4 = vmax.f32 %v615_v53, %v835_v3  ;;  %v14104_v3 = vld [vmem:[%s18289_s17 + $0x90] sm:$0xff] }
 0x12d   :  { %v1077_v8 = vmax.f32 %v1003_v49, %v1005_v4 }
 0x12f   :  { %v620_v10 = vpop.f32.mrf.mxu0  ;;  %v1142_v11 = vadd.f32 %v15522_v37, %v1077_v8 }
 0x130   :  { %v836_v24 = vrot.slane %v620_v10, 1 }
 0x131   :  { %v1204_v13 = vmax.f32 %v1142_v11, 0.0  ;;  %v1274_v11 = vld [vmem:[#allocation13 + $0x70] sm:$0xff] }
 0x132   :  { %v837_v29 = vsel %vm18251_vm3, %v834_v1, %v836_v24  ;;  %v4232_v1 = vld [vmem:[#allocation17 + $0x10] sm:$0xff]  ;;  %1328 = vperm.xlu2 %14921, %v1274_v11  }
 0x133   :  { %v15581_v14 = vpack.c.bf16 %v1204_v13, %v1203_v12  ;;  %v1006_v36 = vmax.f32 %v618_v63, %v837_v29  ;;  %v4233_v63 = vld [vmem:[#allocation17 + $0x18] sm:$0xff]  ;;  %4246 = vperm.xlu0 %14919, %v4232_v1   ;;  %v4236_v12 = vld [vmem:[#allocation17 + $0x30] sm:$0xff]  ;;  %v4235_v13 = vld [vmem:[#allocation17 + $0x28] sm:$0xff] }
 0x134   :  { %4249 = vperm.xlu1 %14920, %v4233_v63  }
 0x135   :  { %v1078_v49 = vmax.f32 %v15571_v61, %v1006_v36 }
 0x137   :  { %v623_v19 = vpop.f32.mrf.mxu0  ;;  %v1143_v57 = vadd.f32 %v15522_v37, %v1078_v49 }
 0x138   :  { %v838_v25 = vrot.slane %v623_v19, 1 }
 0x139   :  { %v1205_v61 = vmax.f32 %v1143_v57, 0.0 }
 0x13a   :  { %10908 = vmatmul.msk.bf16.gmra.mxu0 %vm18250_vm2, %v14102_v18  ;;  %v839_v28 = vsel %vm18251_vm3, %v836_v24, %v838_v25 }
 0x13b   :  { %v1007_v38 = vmax.f32 %v620_v10, %v839_v28  ;;  %4255 = vperm.xlu0 %14919, %v4235_v13   ;;  %v4238_v28 = vld [vmem:[#allocation17 + $0x40] sm:$0xff] }
 0x13c   :  { %4258 = vperm.xlu1 %14920, %v4236_v12   ;;  %v14107_v12 = vld [vmem:[%s18289_s17 + $0xa8] sm:$0xff] }
 0x13d   :  { %v1079_v44 = vmax.f32 %v1005_v4, %v1007_v38 }
 0x13f   :  { %v625_v23 = vpop.f32.mrf.mxu0  ;;  %v1144_v53 = vadd.f32 %v15522_v37, %v1079_v44 }
 0x140   :  { %v840_v26 = vrot.slane %v625_v23, 1 }
 0x141   :  { %v1206_v62 = vmax.f32 %v1144_v53, 0.0 }
 0x142   :  { %v841_v27 = vsel %vm18251_vm3, %v838_v25, %v840_v26 }
 0x143   :  { %v1008_v32 = vmax.f32 %v623_v19, %v841_v27  ;;  %v1618_v7 = vpack.c.bf16 %v1206_v62, %v1205_v61  ;;  %v5390_v27 = vld [vmem:[#allocation22] sm:$0xff]  ;;  %4264 = vperm.xlu0 %14919, %v4238_v28  }
 0x144   :  { %5395 = vperm.xlu1 %14920, %v5390_v27  }
 0x145   :  { %v1080_v40 = vmax.f32 %v1006_v36, %v1008_v32  ;;  %v1280_v36 = vld [vmem:[#allocation13 + $0xa0] sm:$0xff] }
 0x147   :  { %v628_v35 = vpop.f32.mrf.mxu0  ;;  %v1145_v48 = vadd.f32 %v15522_v37, %v1080_v40 }
 0x148   :  { %v842_v39 = vrot.slane %v628_v35, 1 }
 0x149   :  { %v1207_v55 = vmax.f32 %v1145_v48, 0.0 }
 0x14a   :  { %v843_v41 = vsel %vm18251_vm3, %v840_v26, %v842_v39  ;;  %10909 = vmatmul.msk.bf16.gmra.mxu0 %vm18250_vm2, %v14103_v34  ;;  %v1277_v26 = vld [vmem:[#allocation13 + $0x88] sm:$0xff]  ;;  %v15621_v34 = vand.u32 127, %v1255_v30 }
 0x14b   :  { %v1009_v43 = vmax.f32 %v625_v23, %v843_v41  ;;  %1337 = vperm.xlu2 %14921, %v1277_v26  }
 0x14c   :  { %18290 = vst [vmem:[#allocation42_spill] sm:$0xff] %v15621_v34  ;;  %vm1360_vm4 = vcmp.eq.s32.totalorder %v15621_v34, %v15610_v20 }
 0x14d   :  { %v1081_v47 = vmax.f32 %v1007_v38, %v1009_v43  ;;  %v5393_v38 = vld [vmem:[#allocation22 + $0x18] sm:$0xff] }
 0x14e   :  { %5404 = vperm.xlu1 %14920, %v5393_v38  }
 0x14f   :  { %v630_v50 = vpop.f32.mrf.mxu0  ;;  %v1146_v52 = vadd.f32 %v15522_v37, %v1081_v47 }
 0x150   :  { %v844_v54 = vrot.slane %v630_v50, 1 }
 0x151   :  { %v1208_v56 = vmax.f32 %v1146_v52, 0.0  ;;  %v1283_v52 = vld [vmem:[#allocation13 + $0xb8] sm:$0xff] }
 0x152   :  { %v845_v58 = vsel %vm18251_vm3, %v842_v39, %v844_v54  ;;  %v5392_v39 = vld [vmem:[#allocation22 + $0x10] sm:$0xff] }
 0x153   :  { %v1619_v60 = vpack.c.bf16 %v1208_v56, %v1207_v55  ;;  %v1010_v2 = vmax.f32 %v628_v35, %v845_v58  ;;  %v15624_v35 = vpop.permute.xlu0 %1289  ;;  %1346 = vperm.xlu2 %14921, %v1280_v36   ;;  %5401 = vperm.xlu0 %14919, %v5392_v39   ;;  %v14108_v36 = vld [vmem:[%s18289_s17 + $0xb0] sm:$0xff] }
 0x154   :  { %vm1364_vm5 = vcmp.eq.s32.totalorder %v15621_v34, %v15624_v35 }
 0x155   :  { %1689 = vmatpush.bf16.msra.mxu1 %v1619_v60  ;;  %v1082_v4 = vmax.f32 %v1008_v32, %v1010_v2  ;;  %vm10924_vm6 = vmpackc.low %vm1364_vm5, %vm1360_vm4  ;;  %v4231_v60 = vld [vmem:[#allocation17 + $0x8] sm:$0xff] }
 0x157   :  { %v633_v6 = vpop.f32.mrf.mxu0  ;;  %v1147_v16 = vadd.f32 %v15522_v37, %v1082_v4 }
 0x158   :  { %v846_v8 = vrot.slane %v633_v6, 1 }
 0x159   :  { %1690 = vmatpush.bf16.msra.mxu1 %v1618_v7  ;;  %v1209_v22 = vmax.f32 %v1147_v16, 0.0 }
 0x15a   :  { %v847_v9 = vsel %vm18251_vm3, %v844_v54, %v846_v8  ;;  %10910 = vmatmul.msk.bf16.gmra.mxu0 %vm18250_vm2, %v14104_v3  ;;  %v15653_v3 = vpop.permute.xlu2 %1298 }
 0x15b   :  { %v1011_v10 = vmax.f32 %v630_v50, %v847_v9  ;;  %v18233_v50 = vmov 1.0|1.0   ;;  %1355 = vperm.xlu2 %14921, %v1283_v52   ;;  %v4234_v9 = vld [vmem:[#allocation17 + $0x20] sm:$0xff]  ;;  %vm1376_vm10 = vcmp.eq.s32.totalorder %v15621_v34, %v15653_v3  ;;  %v15672_v27 = vpop.permute.xlu0 %1304 }
 0x15c   :  { %vm1384_vm13 = vcmp.eq.s32.totalorder %v15621_v34, %v15672_v27 }
 0x15d   :  { %1691 = vmatpush.bf16.msra.mxu1 %v15581_v14  ;;  %v1083_v15 = vmax.f32 %v1009_v43, %v1011_v10 }
 0x15f   :  { %v635_v17 = vpop.f32.mrf.mxu0  ;;  %v1148_v18 = vadd.f32 %v15522_v37, %v1083_v15 }
 0x160   :  { %v848_v19 = vrot.slane %v635_v17, 1 }
 0x161   :  { %1692 = vmatpush.bf16.msra.mxu1 %v15569_v59  ;;  %v1210_v23 = vmax.f32 %v1148_v18, 0.0  ;;  %v14105_v59 = vld [vmem:[%s18289_s17 + $0x98] sm:$0xff] }
 0x162   :  { %v849_v24 = vsel %vm18251_vm3, %v846_v8, %v848_v19  ;;  %v15664_v18 = vpop.permute.xlu2 %1301 }
 0x163   :  { %v1012_v25 = vmax.f32 %v633_v6, %v849_v24  ;;  %v15613_v14 = vpack.c.bf16 %v1210_v23, %v1209_v22  ;;  %4243 = vperm.xlu2 %14921, %v4231_v60   ;;  %vm1380_vm11 = vcmp.eq.s32.totalorder %v15621_v34, %v15664_v18  ;;  %v14109_v60 = vld [vmem:[%s18289_s17 + $0xb8] sm:$0xff] }
 0x164   :  { %vm10928_vm12 = vmpackc.low %vm1380_vm11, %vm1376_vm10 }
 0x165   :  { %1693 = vmatpush.bf16.msra.mxu1 %v15559_v42  ;;  %v1084_v29 = vmax.f32 %v1010_v2, %v1012_v25 }
 0x167   :  { %v638_v31 = vpop.f32.mrf.mxu0  ;;  %v1149_v41 = vadd.f32 %v15522_v37, %v1084_v29 }
 0x168   :  { %v850_v32 = vrot.slane %v638_v31, 1 }
 0x169   :  { %1694 = vmatpush.bf16.msra.mxu1 %v15549_v21  ;;  %v1211_v45 = vmax.f32 %v1149_v41, 0.0 }
 0x16a   :  { %v851_v33 = vsel %vm18251_vm3, %v848_v19, %v850_v32  ;;  %10911 = vmatmul.msk.bf16.gmra.mxu0 %vm18250_vm2, %v14105_v59  ;;  %v4237_v19 = vld [vmem:[#allocation17 + $0x38] sm:$0xff] }
 0x16b   :  { %v1013_v42 = vmax.f32 %v635_v17, %v851_v33  ;;  %4252 = vperm.xlu2 %14921, %v4234_v9  }
 0x16d   :  { %1695 = vmatpush.bf16.msra.mxu1 %v15539_v5  ;;  %v1085_v40 = vmax.f32 %v1011_v10, %v1013_v42  ;;  %v15634_v5 = vpop.permute.xlu1 %1292 }
 0x16e   :  { %vm1368_vm7 = vcmp.eq.s32.totalorder %v15621_v34, %v15634_v5 }
 0x16f   :  { %v640_v21 = vpop.f32.mrf.mxu0  ;;  %v1150_v43 = vadd.f32 %v15522_v37, %v1085_v40  ;;  %v15683_v40 = vpop.permute.xlu0 %1313 }
 0x170   :  { %v852_v44 = vrot.slane %v640_v21, 1  ;;  %vm1396_vm5 = vcmp.eq.s32.totalorder %v15621_v34, %v15683_v40 }
 0x171   :  { %1696 = vmatpush.bf16.msra.mxu1 %v15529_v51  ;;  %v1212_v46 = vmax.f32 %v1150_v43, 0.0  ;;  %v14106_v51 = vld [vmem:[%s18289_s17 + $0xa0] sm:$0xff] }
 0x172   :  { %v853_v47 = vsel %vm18251_vm3, %v850_v32, %v852_v44  ;;  %v5391_v32 = vld [vmem:[#allocation22 + $0x8] sm:$0xff] }
 0x173   :  { %v1014_v48 = vmax.f32 %v638_v31, %v853_v47  ;;  %v15637_v49 = vpack.c.bf16 %v1212_v46, %v1211_v45  ;;  %4261 = vperm.xlu2 %14921, %v4237_v19  }
 0x174   :  { %10925 = vmatmul.msk.bf16.vlgmr.msra.gmra.mxu1 %vm10924_vm6, %v18233_v50 }
 0x175   :  { %v1086_v53 = vmax.f32 %v1012_v25, %v1014_v48  ;;  %v15645_v58 = vpop.permute.xlu1 %1295 }
 0x176   :  { %vm1372_vm8 = vcmp.eq.s32.totalorder %v15621_v34, %v15645_v58 }
 0x177   :  { %v643_v54 = vpop.f32.mrf.mxu0  ;;  %v1151_v63 = vadd.f32 %v15522_v37, %v1086_v53  ;;  %vm10926_vm9 = vmpackc.low %vm1372_vm8, %vm1368_vm7  ;;  %v15695_v52 = vpop.permute.xlu0 %1322 }
 0x178   :  { %v854_v55 = vrot.slane %v643_v54, 1  ;;  %vm1408_vm10 = vcmp.eq.s32.totalorder %v15621_v34, %v15695_v52 }
 0x179   :  { %v1213_v7 = vmax.f32 %v1151_v63, 0.0 }
 0x17a   :  { %v855_v56 = vsel %vm18251_vm3, %v852_v44, %v854_v55  ;;  %10912 = vmatmul.msk.bf16.gmra.mxu0 %vm18250_vm2, %v14106_v51 }
 0x17b   :  { %v1015_v57 = vmax.f32 %v640_v21, %v855_v56  ;;  %5398 = vperm.xlu2 %14921, %v5391_v32  }
 0x17d   :  { %v1087_v62 = vmax.f32 %v1013_v42, %v1015_v57  ;;  %v15675_v59 = vpop.permute.xlu1 %1307 }
 0x17e   :  { %vm1388_vm14 = vcmp.eq.s32.totalorder %v15621_v34, %v15675_v59 }
 0x17f   :  { %v645_v1 = vpop.f32.mrf.mxu0  ;;  %v1152_v2 = vadd.f32 %v15522_v37, %v1087_v62  ;;  %vm10930_vm15 = vmpackc.low %vm1388_vm14, %vm1384_vm13 }
 0x180   :  { %v856_v61 = vrot.slane %v645_v1, 1 }
 0x181   :  { %v1214_v4 = vmax.f32 %v1152_v2, 0.0  ;;  %v15710_v2 = vpop.permute.xlu0 %1331 }
 0x182   :  { %v857_v6 = vsel %vm18251_vm3, %v854_v55, %v856_v61  ;;  %18291 = vst [vmem:[#allocation43_spill] sm:$0xff] %v15710_v2 }
 0x183   :  { %v1016_v8 = vmax.f32 %v643_v54, %v857_v6  ;;  %v15657_v10 = vpack.c.bf16 %v1214_v4, %v1213_v7 }
 0x184   :  { %10927 = vmatmul.msk.bf16.gmra.mxu1 %vm10926_vm9, %v18233_v50 }
 0x185   :  { %v1088_v11 = vmax.f32 %v1014_v48, %v1016_v8  ;;  %v15687_v43 = vpop.permute.xlu1 %1316 }
 0x186   :  { %vm1400_vm7 = vcmp.eq.s32.totalorder %v15621_v34, %v15687_v43 }
 0x187   :  { %v648_v13 = vpop.f32.mrf.mxu0  ;;  %v1153_v23 = vadd.f32 %v15522_v37, %v1088_v11 }
 0x188   :  { %v858_v15 = vrot.slane %v648_v13, 1 }
 0x189   :  { %v1215_v29 = vmax.f32 %v1153_v23, 0.0 }
 0x18a   :  { %v859_v16 = vsel %vm18251_vm3, %v856_v61, %v858_v15  ;;  %10913 = vmatmul.msk.bf16.gmra.mxu0 %vm18250_vm2, %v14107_v12 }
 0x18b   :  { %v1017_v17 = vmax.f32 %v645_v1, %v859_v16  ;;  %v15708_v1 = vpop.permute.xlu2 %1310 }
 0x18c   :  { %vm1392_vm4 = vcmp.eq.s32.totalorder %v15621_v34, %v15708_v1 }
 0x18d   :  { %v1089_v22 = vmax.f32 %v1015_v57, %v1017_v17  ;;  %v15701_v56 = vpop.permute.xlu1 %1325  ;;  %vm10932_vm6 = vmpackc.low %vm1396_vm5, %vm1392_vm4  ;;  %vm1420_vm5 = vcmp.eq.s32.totalorder %v15621_v34, %v15710_v2 }
 0x18e   :  { %vm1412_vm11 = vcmp.eq.s32.totalorder %v15621_v34, %v15701_v56 }
 0x18f   :  { %v650_v24 = vpop.f32.mrf.mxu0  ;;  %v1154_v25 = vadd.f32 %v15522_v37, %v1089_v22  ;;  %v14110_v22 = vld [vmem:[%s18289_s17 + $0xc0] sm:$0xff] }
 0x190   :  { %v860_v26 = vrot.slane %v650_v24, 1 }
 0x191   :  { %v1216_v30 = vmax.f32 %v1154_v25, 0.0 }
 0x192   :  { %v861_v28 = vsel %vm18251_vm3, %v858_v15, %v860_v26 }
 0x193   :  { %v1018_v31 = vmax.f32 %v648_v13, %v861_v28  ;;  %v15678_v33 = vpack.c.bf16 %v1216_v30, %v1215_v29  ;;  %v15723_v13 = vpop.permute.xlu2 %1319 }
 0x194   :  { %10929 = vmatmul.msk.bf16.gmra.mxu1 %vm10928_vm12, %v18233_v50  ;;  %vm1404_vm8 = vcmp.eq.s32.totalorder %v15621_v34, %v15723_v13  ;;  %vm10936_vm12 = vmpackc.low %vm1412_vm11, %vm1408_vm10 }
 0x195   :  { %v1090_v42 = vmax.f32 %v1016_v8, %v1018_v31  ;;  %v15720_v11 = vpop.permute.xlu1 %1334  ;;  %vm10934_vm9 = vmpackc.low %vm1404_vm8, %vm1400_vm7 }
 0x196   :  { %18292 = vst [vmem:[#allocation44_spill] sm:$0xff] %v15720_v11  ;;  %vm1424_vm11 = vcmp.eq.s32.totalorder %v15621_v34, %v15720_v11 }
 0x197   :  { %v653_v38 = vpop.f32.mrf.mxu0  ;;  %v1155_v45 = vadd.f32 %v15522_v37, %v1090_v42 }
 0x198   :  { %v862_v39 = vrot.slane %v653_v38, 1 }
 0x199   :  { %v1217_v53 = vmax.f32 %v1155_v45, 0.0 }
 0x19a   :  { %v863_v41 = vsel %vm18251_vm3, %v860_v26, %v862_v39  ;;  %10914 = vmatmul.msk.bf16.gmra.mxu0 %vm18250_vm2, %v14108_v36 }
 0x19b   :  { %v1019_v21 = vmax.f32 %v650_v24, %v863_v41  ;;  %v15733_v24 = vpop.permute.xlu2 %1328 }
 0x19c   :  { %18293 = vst [vmem:[#allocation45_spill] sm:$0xff] %v15733_v24  ;;  %vm1416_vm4 = vcmp.eq.s32.totalorder %v15621_v34, %v15733_v24 }
 0x19d   :  { %v1091_v44 = vmax.f32 %v1017_v17, %v1019_v21  ;;  %v15725_v17 = vpop.permute.xlu0 %1340  ;;  %v15735_v25 = vpop.permute.xlu1 %1343 }
 0x19f   :  { %v655_v46 = vpop.f32.mrf.mxu0  ;;  %v1156_v47 = vadd.f32 %v15522_v37, %v1091_v44  ;;  %v14111_v44 = vld [vmem:[%s18289_s17 + $0xc8] sm:$0xff] }
 0x1a0   :  { %v864_v48 = vrot.slane %v655_v46, 1 }
 0x1a1   :  { %v1218_v51 = vmax.f32 %v1156_v47, 0.0 }
 0x1a2   :  { %v865_v54 = vsel %vm18251_vm3, %v862_v39, %v864_v48 }
 0x1a3   :  { %v15698_v55 = vpack.c.bf16 %v1218_v51, %v1217_v53  ;;  %v15703_v57 = vmax.f32 %v653_v38, %v865_v54 }
 0x1a4   :  { %10931 = vmatmul.msk.bf16.gmra.mxu1 %vm10930_vm15, %v18233_v50 }
 0x1a5   :  { %v1092_v61 = vmax.f32 %v1018_v31, %v15703_v57  ;;  %v15738_v26 = vpop.permute.xlu0 %1349  ;;  %v15744_v32 = vpop.permute.xlu2 %1337 }
 0x1a6   :  { %18294 = vst [vmem:[#allocation46_spill] sm:$0xff] %v15744_v32  ;;  %v15747_v36 = vpop.permute.xlu1 %1352 }
 0x1a7   :  { %v658_v62 = vpop.f32.mrf.mxu0  ;;  %v1157_v8 = vadd.f32 %v15522_v37, %v1092_v61 }
 0x1a8   :  { %v866_v63 = vrot.slane %v658_v62, 1 }
 0x1a9   :  { %v1219_v15 = vmax.f32 %v1157_v8, 0.0 }
 0x1aa   :  { %v867_v4 = vsel %vm18251_vm3, %v864_v48, %v866_v63  ;;  %10915 = vmatmul.msk.bf16.gmra.mxu0 %vm18250_vm2, %v14109_v60 }
 0x1ab   :  { %v1021_v6 = vmax.f32 %v655_v46, %v867_v4 }
 0x1ad   :  { %v1093_v7 = vmax.f32 %v1019_v21, %v1021_v6  ;;  %v15754_v21 = vpop.permute.xlu0 %1358  ;;  %v15759_v53 = vpop.permute.xlu2 %1346 }
 0x1af   :  { %v660_v9 = vpop.f32.mrf.mxu0  ;;  %v1158_v12 = vadd.f32 %v15522_v37, %v1093_v7 }
 0x1b0   :  { %v868_v29 = vrot.slane %v660_v9, 1 }
 0x1b1   :  { %v1220_v16 = vmax.f32 %v1158_v12, 0.0 }
 0x1b2   :  { %v869_v39 = vsel %vm18251_vm3, %v866_v63, %v868_v29 }
 0x1b3   :  { %v15727_v19 = vpack.c.bf16 %v1220_v16, %v1219_v15  ;;  %v1022_v46 = vmax.f32 %v658_v62, %v869_v39  ;;  %v15769_v62 = vpop.permute.xlu1 %4240  ;;  %v14112_v39 = vld [vmem:[%s18289_s17 + $0xd0] sm:$0xff] }
 0x1b4   :  { %10933 = vmatmul.msk.bf16.gmra.mxu1 %vm10932_vm6, %v18233_v50  ;;  %18295 = vst [vmem:[#allocation47_spill] sm:$0xff] %v15769_v62  ;;  %vm10938_vm6 = vmpackc.low %vm1420_vm5, %vm1416_vm4 }
 0x1b5   :  { %v1094_v7 = vmax.f32 %v15703_v57, %v1022_v46  ;;  %v15779_v16 = vpop.permute.xlu2 %1355 }
 0x1b7   :  { %v663_v23 = vpop.f32.mrf.mxu0 }
 0x1b8   :  { %v870_v30 = vrot.slane %v663_v23, 1 }
 0x1ba   :  { %10916 = vmatmul.msk.bf16.gmra.mxu0 %vm18250_vm2, %v14110_v22  ;;  %v871_v38 = vsel %vm18251_vm3, %v868_v29, %v870_v30 }
 0x1bb   :  { %v1023_v47 = vmax.f32 %v660_v9, %v871_v38 }
 0x1bd   :  { %v1095_v63 = vmax.f32 %v1021_v6, %v1023_v47  ;;  %v15777_v6 = vpop.permute.xlu0 %4246 }
 0x1be   :  { %18296 = vst [vmem:[#allocation48_spill] sm:$0xff] %v15777_v6 }
 0x1bf   :  { %v665_v28 = vpop.f32.mrf.mxu0  ;;  %v1160_v12 = vadd.f32 %v15522_v37, %v1095_v63 }
 0x1c0   :  { %v872_v31 = vrot.slane %v665_v28, 1 }
 0x1c2   :  { %v873_v42 = vsel %vm18251_vm3, %v870_v30, %v872_v31 }
 0x1c3   :  { %v15752_v41 = vmax.f32 %v663_v23, %v873_v42  ;;  %v1159_v23 = vadd.f32 %v15522_v37, %v1094_v7 }
 0x1c4   :  { %10935 = vmatmul.msk.bf16.gmra.mxu1 %vm10934_vm9, %v18233_v50 }
 0x1c5   :  { %v1096_v51 = vmax.f32 %v1022_v46, %v15752_v41  ;;  %v1221_v42 = vmax.f32 %v1159_v23, 0.0  ;;  %v15800_v63 = vpop.permute.xlu0 %4255 }
 0x1c6   :  { %18300 = vst [vmem:[#allocation52_spill] sm:$0xff] %v15800_v63 }
 0x1c7   :  { %v668_v45 = vpop.f32.mrf.mxu0  ;;  %v1161_v4 = vadd.f32 %v15522_v37, %v1096_v51 }
 0x1c8   :  { %v874_v48 = vrot.slane %v668_v45, 1 }
 0x1c9   :  { %v1223_v57 = vmax.f32 %v1161_v4, 0.0  ;;  %v18236_v4 = vmov 0.0  }
 0x1ca   :  { %v875_v54 = vsel %vm18251_vm3, %v872_v31, %v874_v48  ;;  %10917 = vmatmul.msk.bf16.gmra.mxu0 %vm18250_vm2, %v14111_v44  ;;  %v1222_v31 = vmax.f32 %v1160_v12, 0.0 }
 0x1cb   :  { %v15764_v60 = vmax.f32 %v665_v28, %v875_v54  ;;  %v15783_v28 = vadd.s32 128, %v15621_v34  ;;  %v15798_v54 = vpop.permute.xlu2 %4243 }
 0x1cc   :  { %v1626_v46 = vpack.c.bf16 %v1222_v31, %v1221_v42  ;;  %18299 = vst [vmem:[#allocation51_spill] sm:$0xff] %v15798_v54 }
 0x1cd   :  { %v1097_v61 = vmax.f32 %v1023_v47, %v15764_v60  ;;  %18297 = vst [vmem:[#allocation49_spill] sm:$0xff] %v15783_v28  ;;  %vm4267_vm13 = vcmp.eq.s32.totalorder %v15783_v28, %v15769_v62  ;;  %v15794_v47 = vpop.permute.xlu1 %4249  ;;  %vm4271_vm15 = vcmp.eq.s32.totalorder %v15783_v28, %v15777_v6  ;;  %vm4277_vm7 = vcmp.eq.s32.totalorder %v15783_v28, %v15800_v63 }
 0x1ce   :  { %18298 = vst [vmem:[#allocation50_spill] sm:$0xff] %v15794_v47  ;;  %vm4273_vm14 = vcmp.eq.s32.totalorder %v15783_v28, %v15794_v47  ;;  %v15839_v23 = vsel %vm4277_vm7, 1.0, %v18236_v4  ;;  %vm1421_vm4 = vcmp.eq.s32.totalorder %v15783_v28, %v15710_v2  ;;  %vm1433_vm7 = vcmp.eq.s32.totalorder %v15783_v28, %v15725_v17 }
 0x1cf   :  { %v670_v8 = vpop.f32.mrf.mxu0  ;;  %v1162_v9 = vadd.f32 %v15522_v37, %v1097_v61  ;;  %v15809_v7 = vsel %vm4273_vm14, 1.0, %v18236_v4  ;;  %18306 = vst [vmem:[#allocation58_spill] sm:$0xff] %v15839_v23  ;;  %vm1417_vm14 = vcmp.eq.s32.totalorder %v15783_v28, %v15733_v24  ;;  %vm1445_vm9 = vcmp.eq.s32.totalorder %v15783_v28, %v15738_v26 }
 0x1d0   :  { %v876_v15 = vrot.slane %v670_v8, 1  ;;  %18301 = vst [vmem:[#allocation53_spill] sm:$0xff] %v15809_v7  ;;  %v18331_v7 = vmov 0  ;;  %vm1429_vm0 = vcmp.eq.s32.totalorder %v15783_v28, %v15744_v32  ;;  %v18343_v6 = vmov 0 }
 0x1d1   :  { %v1224_v22 = vmax.f32 %v1162_v9, 0.0 }
 0x1d2   :  { %v877_v29 = vsel %vm18251_vm3, %v874_v48, %v876_v15 }
 0x1d3   :  { %v1627_v30 = vpack.c.bf16 %v1224_v22, %v1223_v57  ;;  %v15789_v38 = vmax.f32 %v668_v45, %v877_v29  ;;  %v15833_v57 = vpop.permute.xlu2 %4252  ;;  %v15835_v22 = vpop.permute.xlu0 %4264 }
 0x1d4   :  { %10937 = vmatmul.msk.bf16.gmra.mxu1 %vm10936_vm12, %v18233_v50  ;;  %18304 = vst [vmem:[#allocation56_spill] sm:$0xff] %v15833_v57  ;;  %vm4275_vm10 = vcmp.eq.s32.totalorder %v15783_v28, %v15833_v57  ;;  %vm1428_vm12 = vcmp.eq.s32.totalorder %v15621_v34, %v15744_v32 }
 0x1d5   :  { %1762 = vmatpush.bf16.msra.mxu2 %v1627_v30  ;;  %v1098_v48 = vmax.f32 %v15752_v41, %v15789_v38  ;;  %v15815_v41 = vsel %vm4271_vm15, 1.0, %v18236_v4  ;;  %18305 = vst [vmem:[#allocation57_spill] sm:$0xff] %v15835_v22  ;;  %v15850_v29 = vsel %vm4275_vm10, 1.0, %v18236_v4  ;;  %vm4269_vm15 = vcmp.eq.s32.totalorder %v15783_v28, %v15798_v54  ;;  %vm15893_vm5 = vmpackc.low %vm1428_vm12, %vm1424_vm11 }
 0x1d6   :  { %18302 = vst [vmem:[#allocation54_spill] sm:$0xff] %v15815_v41  ;;  %vm15908_vm10 = vmpackc.low %vm1421_vm4, %vm1417_vm14  ;;  %vm1437_vm11 = vcmp.eq.s32.totalorder %v15783_v28, %v15735_v25  ;;  %vm1441_vm12 = vcmp.eq.s32.totalorder %v15783_v28, %v15759_v53  ;;  %v18324_v41 = vmov 0.0  }
 0x1d7   :  { %v673_v44 = vpop.f32.mrf.mxu0  ;;  %18307 = vst [vmem:[#allocation59_spill] sm:$0xff] %v15850_v29  ;;  %v18323_v29 = vmov 1.0|1.0  }
 0x1d8   :  { %v878_v51 = vrot.slane %v673_v44, 1 }
 0x1d9   :  { %1763 = vmatpush.bf16.msra.mxu2 %v1626_v46 }
 0x1da   :  { %v879_v45 = vsel %vm18251_vm3, %v876_v15, %v878_v51  ;;  %10918 = vmatmul.msk.bf16.gmra.mxu0 %vm18250_vm2, %v14112_v39  ;;  %v1163_v39 = vadd.f32 %v15522_v37, %v1098_v48 }
 0x1db   :  { %v15804_v61 = vmax.f32 %v670_v8, %v879_v45  ;;  %v15937_v31 = vpop.permute.xlu2 %4261 }
 0x1dc   :  { %18319 = vst [vmem:[#allocation63_spill] sm:$0xff] %v15937_v31 }
 0x1dd   :  { %1764 = vmatpush.bf16.msra.mxu2 %v15727_v19  ;;  %v1099_v9 = vmax.f32 %v15764_v60, %v15804_v61  ;;  %v15826_v19 = vpop.permute.xlu1 %4258 }
 0x1de   :  { %18303 = vst [vmem:[#allocation55_spill] sm:$0xff] %v15826_v19  ;;  %vm4279_vm8 = vcmp.eq.s32.totalorder %v15783_v28, %v15826_v19 }
 0x1df   :  { %v675_v12 = vpop.f32.mrf.mxu0  ;;  %v1164_v46 = vadd.f32 %v15522_v37, %v1099_v9  ;;  %v15885_v9 = vsel %vm4269_vm15, 1.0, %v18236_v4  ;;  %vm15918_vm15 = vmpackc.low %vm1437_vm11, %vm1433_vm7 }
 0x1e0   :  { %v880_v15 = vrot.slane %v675_v12, 1  ;;  %18309 = vst [vmem:[#allocation61_spill] sm:$0xff] %v15885_v9 }
 0x1e1   :  { %1765 = vmatpush.bf16.msra.mxu2 %v15698_v55  ;;  %v14113_v55 = vld [vmem:[%s18289_s17 + $0xd8] sm:$0xff] }
 0x1e2   :  { %v881_v60 = vsel %vm18251_vm3, %v878_v51, %v880_v15  ;;  %v15864_v51 = vsel %vm4267_vm13, 1.0, %v18236_v4  ;;  %vm1361_vm13 = vcmp.eq.s32.totalorder %v15783_v28, %v15610_v20 }
 0x1e3   :  { %18308 = vst [vmem:[#allocation60_spill] sm:$0xff] %v15864_v51 }
 0x1e4   :  { %10939 = vmatmul.msk.bf16.gmra.mxu1 %vm10938_vm6, %v18233_v50  ;;  %vm1365_vm6 = vcmp.eq.s32.totalorder %v15783_v28, %v15624_v35 }
 0x1e5   :  { %1766 = vmatpush.bf16.msra.mxu2 %v15678_v33  ;;  %v15857_v33 = vadd.s32 384, %v15621_v34  ;;  %vm15927_vm14 = vmpackc.low %vm1365_vm6, %vm1361_vm13  ;;  %vm4281_vm13 = vcmp.eq.s32.totalorder %v15783_v28, %v15937_v31 }
 0x1e6   :  { %vm15948_vm6 = vmpackc.low %vm1445_vm9, %vm1441_vm12 }
 0x1e7   :  { %v678_v30 = vpop.f32.mrf.mxu0  ;;  %vm1439_vm4 = vcmp.eq.s32.totalorder %v15857_v33, %v15735_v25  ;;  %vm1447_vm7 = vcmp.eq.s32.totalorder %v15857_v33, %v15738_v26  ;;  %vm1443_vm9 = vcmp.eq.s32.totalorder %v15857_v33, %v15759_v53 }
 0x1e8   :  { %v882_v42 = vrot.slane %v678_v30, 1 }
 0x1e9   :  { %1767 = vmatpush.bf16.msra.mxu2 %v15657_v10  ;;  %v15874_v10 = vmax.f32 %v673_v44, %v881_v60  ;;  %v1226_v44 = vmax.f32 %v1164_v46, 0.0 }
 0x1ea   :  { %v883_v45 = vsel %vm18251_vm3, %v880_v15, %v882_v42  ;;  %10919 = vmatmul.msk.bf16.gmra.mxu0 %vm18250_vm2, %v14113_v55  ;;  %v1225_v55 = vmax.f32 %v1163_v39, 0.0 }
 0x1eb   :  { %v15876_v48 = vmax.f32 %v675_v12, %v883_v45  ;;  %v1100_v15 = vmax.f32 %v15789_v38, %v15874_v10 }
 0x1ec   :  { %v15912_v39 = vpack.c.bf16 %v1226_v44, %v1225_v55  ;;  %v15935_v44 = vsel %vm4279_vm8, 1.0, %v18236_v4  ;;  %vm1435_vm8 = vcmp.eq.s32.totalorder %v15857_v33, %v15725_v17 }
 0x1ed   :  { %1768 = vmatpush.bf16.msra.mxu2 %v15637_v49  ;;  %v1101_v38 = vmax.f32 %v15804_v61, %v15876_v48  ;;  %18318 = vst [vmem:[#allocation62_spill] sm:$0xff] %v15935_v44  ;;  %v1165_v8 = vadd.f32 %v15522_v37, %v1100_v15  ;;  %v15982_v12 = vsel %vm1435_vm8, 1.0, %v18324_v41  ;;  %v16001_v44 = vsel %vm1443_vm9, 1.0, %v18324_v41 }
 0x1ee   :  { %18326 = vst [vmem:[#allocation66_spill] sm:$0xff] %v15982_v12  ;;  %vm1455_vm8 = vcmp.eq.s32.totalorder %v15857_v33, %v15779_v16 }
 0x1ef   :  { %v680_v46 = vpop.f32.mrf.mxu0  ;;  %v1166_v60 = vadd.f32 %v15522_v37, %v1101_v38  ;;  %v15956_v37 = vsel %vm4281_vm13, 1.0, %v18236_v4  ;;  %v15959_v38 = vadd.s32 256, %v15621_v34  ;;  %v1227_v4 = vmax.f32 %v1165_v8, 0.0  ;;  %v14114_v8 = vld [vmem:[%s18289_s17 + $0xe0] sm:$0xff]  ;;  %18328 = vst [vmem:[#allocation68_spill] sm:$0xff] %v16001_v44 }
 0x1f0   :  { %v884_v45 = vrot.slane %v680_v46, 1  ;;  %18322 = vst [vmem:[#allocation64_spill] sm:$0xff] %v15956_v37  ;;  %v16039_v31 = vsel %vm1455_vm8, 1.0, %v18324_v41  ;;  %vm1373_vm8 = vcmp.eq.s32.totalorder %v15783_v28, %v15645_v58 }
 0x1f1   :  { %v15943_v0 = vpop.f32.mrf.mxu1  ;;  %1769 = vmatpush.bf16.msra.mxu2 %v15613_v14  ;;  %v1228_v23 = vmax.f32 %v1166_v60, 0.0  ;;  %v15979_v14 = vsel %vm1439_vm4, 1.0, %v18324_v41  ;;  %vm1418_vm12 = vcmp.eq.s32.totalorder %v15959_v38, %v15733_v24  ;;  %vm1434_vm4 = vcmp.eq.s32.totalorder %v15959_v38, %v15725_v17  ;;  %18333 = vst [vmem:[#allocation71_spill] sm:$0xff] %v16039_v31 }
 0x1f2   :  { %v885_v15 = vsel %vm18251_vm3, %v882_v42, %v884_v45  ;;  %18325 = vst [vmem:[#allocation65_spill] sm:$0xff] %v15979_v14  ;;  %vm1438_vm13 = vcmp.eq.s32.totalorder %v15959_v38, %v15735_v25  ;;  %vm1454_vm9 = vcmp.eq.s32.totalorder %v15959_v38, %v15779_v16 }
 0x1f3   :  { %v15973_v42 = vmax.f32 %v678_v30, %v885_v15  ;;  %v15989_v30 = vsel %vm1447_vm7, 1.0, %v18324_v41  ;;  %v15996_v55 = vpack.c.bf16 %v1228_v23, %v1227_v4 }
 0x1f4   :  { %10941 = vmatmul.msk.bf16.gmra.mxu1 %vm15893_vm5, %v18323_v29  ;;  %10951 = vmatmul.msk.bf16.vlgmr.msra.gmra.mxu2 %vm15927_vm14, %v18323_v29  ;;  %vm1451_vm5 = vcmp.eq.s32.totalorder %v15857_v33, %v15747_v36  ;;  %18327 = vst [vmem:[#allocation67_spill] sm:$0xff] %v15989_v30  ;;  %vm1422_vm14 = vcmp.eq.s32.totalorder %v15959_v38, %v15710_v2 }
 0x1f5   :  { %v1102_v60 = vmax.f32 %v15874_v10, %v15973_v42  ;;  %v16023_v23 = vsel %vm1451_vm5, 1.0, %v18324_v41  ;;  %vm16030_vm1 = vmpackc.low %vm1422_vm14, %vm1418_vm12  ;;  %vm1425_vm5 = vcmp.eq.s32.totalorder %v15783_v28, %v15720_v11  ;;  %vm1369_vm14 = vcmp.eq.s32.totalorder %v15783_v28, %v15634_v5 }
 0x1f6   :  { %18330 = vst [vmem:[#allocation70_spill] sm:$0xff] %v16023_v23  ;;  %v18332_v7 = vsel %vm16030_vm1, 4294967295, %v18331_v7  ;;  %vm16051_vm12 = vmpackc.low %vm1438_vm13, %vm1434_vm4  ;;  %vm1426_vm4 = vcmp.eq.s32.totalorder %v15959_v38, %v15720_v11  ;;  %vm18351_vm1 = vcmask 1046528  }
 0x1f7   :  { %v683_v15 = vpop.f32.mrf.mxu0  ;;  %vm16059_vm11 = vmpackc.low %vm1429_vm0, %vm1425_vm5  ;;  %vm1430_vm0 = vcmp.eq.s32.totalorder %v15959_v38, %v15744_v32 }
 0x1f8   :  { %v886_v37 = vrot.slane %v683_v15, 1  ;;  %vm16083_vm7 = vmpackc.low %vm1373_vm8, %vm1369_vm14  ;;  %vm18346_vm14 = vcmp.eq.s32.totalorder %v15959_v38, %v15759_v53  ;;  %vm18347_vm8 = vcmp.eq.s32.totalorder %v15959_v38, %v15738_v26 }
 0x1f9   :  { %v16015_v4 = vpop.f32.mrf.mxu1  ;;  %vm16094_vm5 = vmpackc.low %vm1430_vm0, %vm1426_vm4  ;;  %vm18352_vm4 = vcmp.eq.s32.totalorder %v15959_v38, %v15747_v36 }
 0x1fa   :  { %18329 = vst [vmem:[#allocation69_spill] sm:$0xff] %v16015_v4  ;;  %v887_v10 = vsel %vm18251_vm3, %v884_v45, %v886_v37  ;;  %10920 = vmatmul.msk.bf16.gmra.mxu0 %vm18250_vm2, %v14114_v8  ;;  %v18334_v45 = vmov 0  ;;  %vm1449_vm2 = vcmp.eq.s32.totalorder %v15783_v28, %v15747_v36  ;;  %vm1453_vm3 = vcmp.eq.s32.totalorder %v15783_v28, %v15779_v16  ;;  %vm16114_vm0 = vmpackc.low %vm1454_vm9, %vm18352_vm4 }
 0x1fb   :  { %v1031_v22 = vmax.f32 %v680_v46, %v887_v10  ;;  %v18335_v45 = vsel %vm16051_vm12, 4294967295, %v18334_v45  ;;  %v16068_v10 = vld [vmem:[#allocation11] ss:$0 sm:$0xff]  ;;  %vm16073_vm13 = vmpackc.low %vm1453_vm3, %vm1449_vm2  ;;  %vm1432_vm2 = vcmp.eq.s32.totalorder %v15621_v34, %v15725_v17  ;;  %vm1436_vm3 = vcmp.eq.s32.totalorder %v15621_v34, %v15735_v25 }
 0x1fc   :  { %18336 = vst [vmem:[#allocation72_spill] sm:$0xff] %v18335_v45  ;;  %v1167_v9 = vadd.f32 %v16068_v10, %v1102_v60  ;;  %v18344_v6 = vsel %vm16094_vm5, 4294967295, %v18343_v6  ;;  %vm16106_vm12 = vmpackc.low %vm18347_vm8, %vm18346_vm14  ;;  %v18353_v25 = vmov 0  ;;  %vm18357_vm9 = vcmask 72704  }
 0x1fd   :  { %v1103_v8 = vmax.f32 %v15876_v48, %v1031_v22  ;;  %v18354_v25 = vsel %vm16114_vm0, 4294967295, %v18353_v25  ;;  %vm10942_vm5 = vmpackc.low %vm1436_vm3, %vm1432_vm2  ;;  %vm1440_vm2 = vcmp.eq.s32.totalorder %v15621_v34, %v15759_v53  ;;  %vm1444_vm3 = vcmp.eq.s32.totalorder %v15621_v34, %v15738_v26  ;;  %v14116_v26 = vld [vmem:[%s18289_s17 + $0xf0] sm:$0xff] }
 0x1fe   :  { %v1229_v54 = vmax.f32 %v1167_v9, 0.0  ;;  %18355 = vst [vmem:[#allocation75_spill] sm:$0xff] %v18354_v25  ;;  %vm18359_vm8 = vmmov %vm18351_vm1 }
 0x1ff   :  { %v685_v48 = vpop.f32.mrf.mxu0  ;;  %v1168_v60 = vadd.f32 %v16068_v10, %v1103_v8  ;;  %v18348_v8 = vmov 0  ;;  %vm10944_vm4 = vmpackc.low %vm1444_vm3, %vm1440_vm2  ;;  %vm1448_vm2 = vcmp.eq.s32.totalorder %v15621_v34, %v15747_v36  ;;  %vm1452_vm3 = vcmp.eq.s32.totalorder %v15621_v34, %v15779_v16 }
 0x200   :  { %v888_v63 = vrot.slane %v685_v48, 1  ;;  %v18349_v8 = vsel %vm16106_vm12, 4294967295, %v18348_v8 }
 0x201   :  { %v16098_v47 = vpop.f32.mrf.mxu1  ;;  %v1230_v62 = vmax.f32 %v1168_v60, 0.0  ;;  %18350 = vst [vmem:[#allocation74_spill] sm:$0xff] %v18349_v8 }
 0x202   :  { %18345 = vst [vmem:[#allocation73_spill] sm:$0xff] %v16098_v47  ;;  %v889_v17 = vsel %vm18351_vm1, %v886_v37, %v888_v63  ;;  %v14115_v37 = vld [vmem:[%s18289_s17 + $0xe8] sm:$0xff] }
 0x203   :  { %v1032_v9 = vmax.f32 %v683_v15, %v889_v17  ;;  %v16118_v60 = vpack.c.bf16 %v1230_v62, %v1229_v54 }
 0x204   :  { %10943 = vmatmul.msk.bf16.gmra.mxu1 %vm10942_vm5, %v18323_v29  ;;  %10953 = vmatmul.msk.bf16.gmra.mxu2 %vm16083_vm7, %v18323_v29  ;;  %vm1377_vm7 = vcmp.eq.s32.totalorder %v15783_v28, %v15653_v3  ;;  %vm1381_vm5 = vcmp.eq.s32.totalorder %v15783_v28, %v15664_v18 }
 0x205   :  { %v1104_v57 = vmax.f32 %v15973_v42, %v1032_v9  ;;  %vm10954_vm14 = vmpackc.low %vm1381_vm5, %vm1377_vm7  ;;  %vm1385_vm7 = vcmp.eq.s32.totalorder %v15783_v28, %v15672_v27  ;;  %vm1389_vm5 = vcmp.eq.s32.totalorder %v15783_v28, %v15675_v59 }
 0x207   :  { %v688_v23 = vpop.f32.mrf.mxu0  ;;  %v1169_v17 = vadd.f32 %v16068_v10, %v1104_v57 }
 0x208   :  { %v890_v31 = vrot.slane %v688_v23, 1 }
 0x209   :  { %v16128_v44 = vpop.f32.mrf.mxu1  ;;  %v1231_v57 = vmax.f32 %v1169_v17, 0.0 }
 0x20a   :  { %18356 = vst [vmem:[#allocation76_spill] sm:$0xff] %v16128_v44  ;;  %v891_v15 = vsel %vm18351_vm1, %v888_v63, %v890_v31  ;;  %10921 = vmatmul.msk.bf16.gmra.mxu0 %vm18357_vm9, %v14115_v37 }
 0x20b   :  { %v1033_v62 = vmax.f32 %v685_v48, %v891_v15 }
 0x20d   :  { %v1105_v54 = vmax.f32 %v1031_v22, %v1033_v62 }
 0x20f   :  { %v690_v19 = vpop.f32.mrf.mxu0  ;;  %v1170_v42 = vadd.f32 %v16068_v10, %v1105_v54 }
 0x210   :  { %v892_v30 = vrot.slane %v690_v19, 1 }
 0x211   :  { %v16142_v63 = vpop.f32.mrf.mxu1  ;;  %v1232_v22 = vmax.f32 %v1170_v42, 0.0 }
 0x212   :  { %18358 = vst [vmem:[#allocation77_spill] sm:$0xff] %v16142_v63  ;;  %v893_v48 = vsel %vm18359_vm8, %v890_v31, %v892_v30  ;;  %vm10946_vm8 = vmpackc.low %vm1452_vm3, %vm1448_vm2  ;;  %vm1401_vm3 = vcmp.eq.s32.totalorder %v15783_v28, %v15687_v43 }
 0x213   :  { %v16145_v37 = vmax.f32 %v688_v23, %v893_v48  ;;  %v16147_v15 = vpack.c.bf16 %v1232_v22, %v1231_v57 }
 0x214   :  { %10945 = vmatmul.msk.bf16.gmra.mxu1 %vm10944_vm4, %v18323_v29  ;;  %10955 = vmatmul.msk.bf16.gmra.mxu2 %vm10954_vm14, %v18323_v29  ;;  %vm10956_vm14 = vmpackc.low %vm1389_vm5, %vm1385_vm7  ;;  %vm1397_vm7 = vcmp.eq.s32.totalorder %v15783_v28, %v15683_v40 }
 0x215   :  { %v1106_v53 = vmax.f32 %v1032_v9, %v16145_v37  ;;  %vm18363_vm4 = vmmov %vm18357_vm9 }
 0x217   :  { %v16155_v54 = vpop.f32.mrf.mxu0  ;;  %v1171_v9 = vadd.f32 %v16068_v10, %v1106_v53 }
 0x218   :  { %v894_v17 = vrot.slane %v16155_v54, 1 }
 0x219   :  { %v16158_v31 = vpop.f32.mrf.mxu1 }
 0x21a   :  { %18360 = vst [vmem:[#allocation78_spill] sm:$0xff] %v16158_v31  ;;  %v895_v23 = vsel %vm18351_vm1, %v892_v30, %v894_v17  ;;  %10922 = vmatmul.msk.bf16.gmra.mxu0 %vm18357_vm9, %v14116_v26  ;;  %v14117_v26 = vld [vmem:[%s18289_s17 + $0xf8] sm:$0xff]  ;;  %vm1456_vm1 = vcmp.eq.s32.totalorder %v15621_v34, %v15754_v21  ;;  %vm1393_vm9 = vcmp.eq.s32.totalorder %v15783_v28, %v15708_v1 }
 0x21b   :  { %v16162_v42 = vmax.f32 %v690_v19, %v895_v23  ;;  %vm10948_vm5 = vmpackc.low %vm1456_vm1, %vm1456_vm1 }
 0x21c   :  { %vm10958_vm2 = vmpackc.low %vm1397_vm7, %vm1393_vm9 }
 0x21d   :  { %v1107_v57 = vmax.f32 %v1033_v62, %v16162_v42  ;;  %v1233_v62 = vmax.f32 %v1171_v9, 0.0 }
 0x21f   :  { %v695_v22 = vpop.f32.mrf.mxu0  ;;  %v1172_v48 = vadd.f32 %v16068_v10, %v1107_v57 }
 0x220   :  { %v896_v12 = vrot.slane %v695_v22, 1 }
 0x221   :  { %v16175_v30 = vpop.f32.mrf.mxu1  ;;  %v1234_v19 = vmax.f32 %v1172_v48, 0.0 }
 0x222   :  { %18361 = vst [vmem:[#allocation79_spill] sm:$0xff] %v16175_v30 }
 0x223   :  { %v16177_v53 = vpack.c.bf16 %v1234_v19, %v1233_v62 }
 0x224   :  { %10947 = vmatmul.msk.bf16.gmra.mxu1 %vm10946_vm8, %v18323_v29  ;;  %10957 = vmatmul.msk.bf16.gmra.mxu2 %vm10956_vm14, %v18323_v29  ;;  %vm1405_vm14 = vcmp.eq.s32.totalorder %v15783_v28, %v15723_v13  ;;  %vm18367_vm8 = vcmask 1046528  }
 0x225   :  { %vm18368_vm1 = vmmov %vm18367_vm8 }
 0x226   :  { %vm18369_vm9 = vmmov %vm18368_vm1 }
 0x227   :  { %v698_v36 = vpop.f32.mrf.mxu0  ;;  %vm18370_vm7 = vmmov %vm18368_vm1 }
 0x228   :  { %v898_v31 = vrot.slane %v698_v36, 1 }
 0x229   :  { %v16184_v23 = vpop.f32.mrf.mxu1 }
 0x22a   :  { %18362 = vst [vmem:[#allocation80_spill] sm:$0xff] %v16184_v23  ;;  %10923 = vmatmul.msk.bf16.gmra.mxu0 %vm18363_vm4, %v14117_v26  ;;  %vm10960_vm4 = vmpackc.low %vm1405_vm14, %vm1401_vm3  ;;  %v899_v11 = vsel %vm18370_vm7, %v896_v12, %v898_v31  ;;  %vm1409_vm3 = vcmp.eq.s32.totalorder %v15783_v28, %v15695_v52  ;;  %vm1413_vm14 = vcmp.eq.s32.totalorder %v15783_v28, %v15701_v56 }
 0x22b   :  { %v1037_v25 = vmax.f32 %v695_v22, %v899_v11  ;;  %vm18378_vm7 = vmmov %vm18368_vm1 }
 0x22d   :  { %v1109_v11 = vmax.f32 %v16162_v42, %v1037_v25 }
 0x22f   :  { %v700_v16 = vpop.f32.mrf.mxu0  ;;  %v1174_v42 = vadd.f32 %v16068_v10, %v1109_v11 }
 0x230   :  { %v900_v19 = vrot.slane %v700_v16, 1 }
 0x231   :  { %v16193_v57 = vpop.f32.mrf.mxu1 }
 0x232   :  { %18364 = vst [vmem:[#allocation81_spill] sm:$0xff] %v16193_v57 }
 0x234   :  { %10949 = vmatmul.msk.bf16.gmra.mxu1 %vm10948_vm5, %v18323_v29  ;;  %10959 = vmatmul.msk.bf16.gmra.mxu2 %vm10958_vm2, %v18323_v29  ;;  %vm18371_vm5 = vmmov %vm18368_vm1 }
 0x235   :  { %v897_v30 = vsel %vm18371_vm5, %v894_v17, %v896_v12  ;;  %vm18373_vm2 = vmmov %vm18368_vm1  ;;  %vm1366_vm5 = vcmp.eq.s32.totalorder %v15959_v38, %v15624_v35 }
 0x236   :  { %v1036_v45 = vmax.f32 %v16155_v54, %v897_v30 }
 0x237   :  { %v703_v9 = vpop.f32.mrf.mxu0 }
 0x238   :  { %v902_v26 = vrot.slane %v703_v9, 1 }
 0x239   :  { %v16197_v48 = vpop.f32.mrf.mxu1 }
 0x23a   :  { %18365 = vst [vmem:[#allocation82_spill] sm:$0xff] %v16197_v48  ;;  %v903_v14 = vsel %vm18368_vm1, %v900_v19, %v902_v26  ;;  %v901_v48 = vsel %vm18369_vm9, %v898_v31, %v900_v19  ;;  %vm18376_vm9 = vmmov %vm18368_vm1 }
 0x23b   :  { %v1038_v2 = vmax.f32 %v698_v36, %v901_v48  ;;  %v1039_v57 = vmax.f32 %v700_v16, %v903_v14 }
 0x23d   :  { %v1111_v4 = vmax.f32 %v1037_v25, %v1039_v57  ;;  %v1110_v31 = vmax.f32 %v1036_v45, %v1038_v2 }
 0x23f   :  { %v705_v62 = vpop.f32.mrf.mxu0  ;;  %v1176_v12 = vadd.f32 %v16068_v10, %v1111_v4 }
 0x240   :  { %v904_v34 = vrot.slane %v705_v62, 1 }
 0x241   :  { %v16203_v23 = vpop.f32.mrf.mxu1  ;;  %v1238_v25 = vmax.f32 %v1176_v12, 0.0 }
 0x242   :  { %18366 = vst [vmem:[#allocation83_spill] sm:$0xff] %v16203_v23  ;;  %v905_v44 = vsel %vm18367_vm8, %v902_v26, %v904_v34  ;;  %vm18374_vm8 = vmmov %vm18368_vm1 }
 0x243   :  { %v1040_v32 = vmax.f32 %v703_v9, %v905_v44 }
 0x244   :  { %10961 = vmatmul.msk.bf16.gmra.mxu2 %vm10960_vm4, %v18323_v29  ;;  %vm10962_vm4 = vmpackc.low %vm1413_vm14, %vm1409_vm3 }
 0x245   :  { %v1112_v8 = vmax.f32 %v1038_v2, %v1040_v32  ;;  %v1175_v2 = vadd.f32 %v16068_v10, %v1110_v31  ;;  %vm18381_vm14 = vmmov %vm18368_vm1 }
 0x247   :  { %v708_v24 = vpop.f32.mrf.mxu0  ;;  %v1177_v44 = vadd.f32 %v16068_v10, %v1112_v8  ;;  %v1108_v8 = vmax.f32 %v16145_v37, %v1036_v45  ;;  %v1237_v36 = vmax.f32 %v1175_v2, 0.0 }
 0x248   :  { %v906_v23 = vrot.slane %v708_v24, 1 }
 0x249   :  { %v16211_v63 = vpop.f32.mrf.mxu1  ;;  %v1173_v16 = vadd.f32 %v16068_v10, %v1108_v8 }
 0x24a   :  { %18372 = vst [vmem:[#allocation84_spill] sm:$0xff] %v16211_v63  ;;  %v907_v47 = vsel %vm18373_vm2, %v904_v34, %v906_v23  ;;  %vm18379_vm2 = vmmov %vm18368_vm1 }
 0x24b   :  { %v1041_v26 = vmax.f32 %v705_v62, %v907_v47  ;;  %v1239_v47 = vmax.f32 %v1177_v44, 0.0  ;;  %v1634_v62 = vpack.c.bf16 %v1238_v25, %v1237_v36  ;;  %v1235_v37 = vmax.f32 %v1173_v16, 0.0 }
 0x24d   :  { %v1113_v19 = vmax.f32 %v1039_v57, %v1041_v26 }
 0x24f   :  { %v710_v9 = vpop.f32.mrf.mxu0  ;;  %v1178_v14 = vadd.f32 %v16068_v10, %v1113_v19  ;;  %v1236_v19 = vmax.f32 %v1174_v42, 0.0 }
 0x250   :  { %v908_v17 = vrot.slane %v710_v9, 1 }
 0x251   :  { %v16223_v34 = vpop.f32.mrf.mxu1  ;;  %v1240_v54 = vmax.f32 %v1178_v14, 0.0  ;;  %v1633_v14 = vpack.c.bf16 %v1236_v19, %v1235_v37 }
 0x252   :  { %v909_v22 = vsel %vm18374_vm8, %v906_v23, %v908_v17  ;;  %vm1374_vm8 = vcmp.eq.s32.totalorder %v15959_v38, %v15645_v58 }
 0x253   :  { %v1635_v4 = vpack.c.bf16 %v1240_v54, %v1239_v47  ;;  %v1042_v30 = vmax.f32 %v708_v24, %v909_v22 }
 0x254   :  { %10963 = vmatmul.msk.bf16.gmra.mxu2 %vm10962_vm4, %v18323_v29  ;;  %vm18383_vm4 = vmmov %vm18368_vm1 }
 0x255   :  { %1835 = vmatpush.bf16.msra.mxu3 %v1635_v4  ;;  %v1114_v57 = vmax.f32 %v1040_v32, %v1042_v30 }
 0x257   :  { %v713_v48 = vpop.f32.mrf.mxu0  ;;  %v1179_v12 = vadd.f32 %v16068_v10, %v1114_v57 }
 0x258   :  { %v910_v44 = vrot.slane %v713_v48, 1 }
 0x259   :  { %v16231_v45 = vpop.f32.mrf.mxu1  ;;  %1836 = vmatpush.bf16.msra.mxu3 %v1634_v62  ;;  %v1241_v2 = vmax.f32 %v1179_v12, 0.0 }
 0x25a   :  { %18375 = vst [vmem:[#allocation85_spill] sm:$0xff] %v16231_v45  ;;  %v911_v23 = vsel %vm18368_vm1, %v908_v17, %v910_v44 }
 0x25b   :  { %v1043_v31 = vmax.f32 %v710_v9, %v911_v23 }
 0x25d   :  { %1837 = vmatpush.bf16.msra.mxu3 %v1633_v14  ;;  %v1115_v24 = vmax.f32 %v1041_v26, %v1043_v31 }
 0x25f   :  { %v715_v11 = vpop.f32.mrf.mxu0  ;;  %v1180_v47 = vadd.f32 %v16068_v10, %v1115_v24 }
 0x260   :  { %v912_v32 = vrot.slane %v715_v11, 1 }
 0x261   :  { %v16236_v54 = vpop.f32.mrf.mxu1  ;;  %1838 = vmatpush.bf16.msra.mxu3 %v16177_v53  ;;  %v1242_v8 = vmax.f32 %v1180_v47, 0.0 }
 0x262   :  { %v913_v22 = vsel %vm18376_vm9, %v910_v44, %v912_v32  ;;  %vm18385_vm9 = vmmov %vm18379_vm2 }
 0x263   :  { %v1044_v4 = vmax.f32 %v713_v48, %v913_v22  ;;  %v16240_v17 = vpack.c.bf16 %v1242_v8, %v1241_v2 }
 0x264   :  { %10965 = vmatmul.msk.bf16.gmra.mxu2 %vm15908_vm10, %v18323_v29  ;;  %vm1362_vm10 = vcmp.eq.s32.totalorder %v15959_v38, %v15610_v20 }
 0x265   :  { %1839 = vmatpush.bf16.msra.mxu3 %v16147_v15  ;;  %v1116_v26 = vmax.f32 %v1042_v30, %v1044_v4  ;;  %vm10976_vm3 = vmpackc.low %vm1366_vm5, %vm1362_vm10  ;;  %vm1386_vm5 = vcmp.eq.s32.totalorder %v15959_v38, %v15672_v27 }
 0x267   :  { %v718_v9 = vpop.f32.mrf.mxu0  ;;  %v1181_v57 = vadd.f32 %v16068_v10, %v1116_v26 }
 0x268   :  { %v914_v25 = vrot.slane %v718_v9, 1 }
 0x269   :  { %v16246_v42 = vpop.f32.mrf.mxu1  ;;  %1840 = vmatpush.bf16.msra.mxu3 %v16118_v60  ;;  %v1243_v60 = vmax.f32 %v1181_v57, 0.0 }
 0x26a   :  { %18377 = vst [vmem:[#allocation86_spill] sm:$0xff] %v16246_v42  ;;  %v915_v53 = vsel %vm18378_vm7, %v912_v32, %v914_v25  ;;  %vm1382_vm7 = vcmp.eq.s32.totalorder %v15959_v38, %v15664_v18 }
 0x26b   :  { %v1045_v36 = vmax.f32 %v715_v11, %v915_v53 }
 0x26d   :  { %1841 = vmatpush.bf16.msra.mxu3 %v15996_v55  ;;  %v1117_v16 = vmax.f32 %v1043_v31, %v1045_v36 }
 0x26f   :  { %v720_v48 = vpop.f32.mrf.mxu0  ;;  %v1182_v49 = vadd.f32 %v16068_v10, %v1117_v16 }
 0x270   :  { %v916_v62 = vrot.slane %v720_v48, 1 }
 0x271   :  { %v16257_v15 = vpop.f32.mrf.mxu1  ;;  %1842 = vmatpush.bf16.msra.mxu3 %v15912_v39  ;;  %v1244_v30 = vmax.f32 %v1182_v49, 0.0 }
 0x272   :  { %v917_v55 = vsel %vm18379_vm2, %v914_v25, %v916_v62  ;;  %vm1390_vm2 = vcmp.eq.s32.totalorder %v15959_v38, %v15675_v59 }
 0x273   :  { %v1046_v19 = vmax.f32 %v718_v9, %v917_v55  ;;  %v16261_v44 = vpack.c.bf16 %v1244_v30, %v1243_v60 }
 0x274   :  { %10967 = vmatmul.msk.bf16.gmra.mxu2 %vm16059_vm11, %v18323_v29  ;;  %10977 = vmatmul.msk.bf16.vlgmr.msra.gmra.mxu3 %vm10976_vm3, %v18323_v29  ;;  %vm1370_vm11 = vcmp.eq.s32.totalorder %v15959_v38, %v15634_v5  ;;  %vm10982_vm3 = vmpackc.low %vm1390_vm2, %vm1386_vm5  ;;  %vm1402_vm2 = vcmp.eq.s32.totalorder %v15959_v38, %v15687_v43 }
 0x275   :  { %v1118_v37 = vmax.f32 %v1044_v4, %v1046_v19  ;;  %vm10978_vm1 = vmpackc.low %vm1374_vm8, %vm1370_vm11  ;;  %vm1398_vm8 = vcmp.eq.s32.totalorder %v15959_v38, %v15683_v40 }
 0x276   :  { %vm18393_vm11 = vmmov %vm18383_vm4 }
 0x277   :  { %v723_v23 = vpop.f32.mrf.mxu0  ;;  %v16267_v31 = vpop.f32.mrf.mxu2  ;;  %v1183_v47 = vadd.f32 %v16068_v10, %v1118_v37 }
 0x278   :  { %v918_v14 = vrot.slane %v723_v23, 1 }
 0x279   :  { %v16269_v39 = vpop.f32.mrf.mxu1  ;;  %v1245_v4 = vmax.f32 %v1183_v47, 0.0 }
 0x27a   :  { %18380 = vst [vmem:[#allocation87_spill] sm:$0xff] %v16269_v39  ;;  %v919_v24 = vsel %vm18381_vm14, %v916_v62, %v918_v14  ;;  %vm1394_vm14 = vcmp.eq.s32.totalorder %v15959_v38, %v15708_v1 }
 0x27b   :  { %v1047_v12 = vmax.f32 %v720_v48, %v919_v24 }
 0x27d   :  { %v1119_v11 = vmax.f32 %v1045_v36, %v1047_v12 }
 0x27f   :  { %v725_v32 = vpop.f32.mrf.mxu0  ;;  %v16273_v2 = vpop.f32.mrf.mxu2  ;;  %v1184_v46 = vadd.f32 %v16068_v10, %v1119_v11 }
 0x280   :  { %v920_v8 = vrot.slane %v725_v32, 1 }
 0x281   :  { %v16280_v22 = vpop.f32.mrf.mxu1  ;;  %v1246_v26 = vmax.f32 %v1184_v46, 0.0 }
 0x282   :  { %18382 = vst [vmem:[#allocation88_spill] sm:$0xff] %v16280_v22  ;;  %v921_v9 = vsel %vm18383_vm4, %v918_v14, %v920_v8 }
 0x283   :  { %v16283_v25 = vmax.f32 %v723_v23, %v921_v9  ;;  %v16285_v53 = vpack.c.bf16 %v1246_v26, %v1245_v4 }
 0x284   :  { %10969 = vmatmul.msk.bf16.gmra.mxu2 %vm15918_vm15, %v18323_v29  ;;  %10979 = vmatmul.msk.bf16.gmra.mxu3 %vm10978_vm1, %v18323_v29  ;;  %vm1378_vm15 = vcmp.eq.s32.totalorder %v15959_v38, %v15653_v3  ;;  %vm18394_vm1 = vmmov %vm18383_vm4 }
 0x285   :  { %v1120_v36 = vmax.f32 %v1046_v19, %v16283_v25  ;;  %vm10980_vm10 = vmpackc.low %vm1382_vm7, %vm1378_vm15 }
 0x286   :  { %vm10984_vm7 = vmpackc.low %vm1398_vm8, %vm1394_vm14  ;;  %vm1410_vm14 = vcmp.eq.s32.totalorder %v15959_v38, %v15695_v52  ;;  %vm1367_vm8 = vcmp.eq.s32.totalorder %v15857_v33, %v15624_v35 }
 0x287   :  { %v728_v16 = vpop.f32.mrf.mxu0  ;;  %v16292_v57 = vpop.f32.mrf.mxu2  ;;  %v1185_v55 = vadd.f32 %v16068_v10, %v1120_v36  ;;  %vm18397_vm5 = vmmov %vm18394_vm1 }
 0x288   :  { %v922_v48 = vrot.slane %v728_v16, 1 }
 0x289   :  { %v16294_v49 = vpop.f32.mrf.mxu1  ;;  %v1247_v14 = vmax.f32 %v1185_v55, 0.0 }
 0x28a   :  { %18384 = vst [vmem:[#allocation89_spill] sm:$0xff] %v16294_v49  ;;  %v923_v62 = vsel %vm18385_vm9, %v920_v8, %v922_v48  ;;  %vm18395_vm9 = vcmp.eq.s32.totalorder %v15783_v28, %v15754_v21 }
 0x28b   :  { %v16297_v60 = vmax.f32 %v725_v32, %v923_v62  ;;  %vm10974_vm15 = vmpackc.low %vm18395_vm9, %vm18395_vm9  ;;  %vm1371_vm9 = vcmp.eq.s32.totalorder %v15857_v33, %v15634_v5 }
 0x28c   :  { %v1471_v35 = vsel %vm1371_vm9, 1.0, %v18324_v41  ;;  %vm18408_vm9 = vcmp.eq.s32.totalorder %v15959_v38, %v15754_v21 }
 0x28d   :  { %v1121_v30 = vmax.f32 %v1047_v12, %v16297_v60 }
 0x28f   :  { %v730_v61 = vpop.f32.mrf.mxu0  ;;  %v16301_v37 = vpop.f32.mrf.mxu2  ;;  %v1186_v23 = vadd.f32 %v16068_v10, %v1121_v30 }
 0x290   :  { %v924_v55 = vrot.slane %v730_v61, 1 }
 0x291   :  { %v16308_v19 = vpop.f32.mrf.mxu1  ;;  %v1248_v24 = vmax.f32 %v1186_v23, 0.0 }
 0x292   :  { %18386 = vst [vmem:[#allocation90_spill] sm:$0xff] %v16308_v19  ;;  %v925_v42 = vsel %vm18383_vm4, %v922_v48, %v924_v55 }
 0x293   :  { %v16310_v11 = vpack.c.bf16 %v1248_v24, %v1247_v14  ;;  %v1050_v48 = vmax.f32 %v728_v16, %v925_v42 }
 0x294   :  { %10971 = vmatmul.msk.bf16.gmra.mxu2 %vm15948_vm6, %v18323_v29  ;;  %10981 = vmatmul.msk.bf16.gmra.mxu3 %vm10980_vm10, %v18323_v29  ;;  %vm18390_vm6 = vmmov %vm18383_vm4  ;;  %vm1683_vm10 = vcmask 1047552  }
 0x297   :  { %v733_v12 = vpop.f32.mrf.mxu0  ;;  %v16316_v47 = vpop.f32.mrf.mxu2 }
 0x298   :  { %v926_v62 = vrot.slane %v733_v12, 1 }
 0x299   :  { %v16318_v32 = vpop.f32.mrf.mxu1 }
 0x29a   :  { %18387 = vst [vmem:[#allocation91_spill] sm:$0xff] %v16318_v32 }
 0x29f   :  { %v735_v46 = vpop.f32.mrf.mxu0  ;;  %v16320_v8 = vpop.f32.mrf.mxu2 }
 0x2a0   :  { %v928_v30 = vrot.slane %v735_v46, 1 }
 0x2a1   :  { %v16326_v4 = vpop.f32.mrf.mxu1 }
 0x2a2   :  { %18388 = vst [vmem:[#allocation92_spill] sm:$0xff] %v16326_v4  ;;  %v929_v32 = vsel %vm18393_vm11, %v926_v62, %v928_v30  ;;  %v1053_v45 = vmax.f32 %v735_v46, %v928_v30  ;;  %vm1363_vm11 = vcmp.eq.s32.totalorder %v15857_v33, %v15610_v20 }
 0x2a4   :  { %10973 = vmatmul.msk.bf16.gmra.mxu2 %vm16073_vm13, %v18323_v29  ;;  %10983 = vmatmul.msk.bf16.gmra.mxu3 %vm10982_vm3, %v18323_v29  ;;  %vm18392_vm13 = vmmov %vm18383_vm4  ;;  %vm1406_vm3 = vcmp.eq.s32.totalorder %v15959_v38, %v15723_v13 }
 0x2a5   :  { %v927_v51 = vsel %vm18392_vm13, %v924_v55, %v926_v62  ;;  %v18396_v55 = vmov 65535   ;;  %vm1414_vm13 = vcmp.eq.s32.totalorder %v15959_v38, %v15701_v56 }
 0x2a6   :  { %v1051_v19 = vmax.f32 %v730_v61, %v927_v51  ;;  %vm10988_vm4 = vmpackc.low %vm1414_vm13, %vm1410_vm14  ;;  %vm1395_vm13 = vcmp.eq.s32.totalorder %v15857_v33, %v15708_v1 }
 0x2a7   :  { %v738_v50 = vpop.f32.mrf.mxu0  ;;  %v16332_v26 = vpop.f32.mrf.mxu2 }
 0x2a8   :  { %v1056_v36 = vrot.slane %v738_v50, 1 }
 0x2a9   :  { %v16334_v9 = vpop.f32.mrf.mxu1 }
 0x2aa   :  { %18389 = vst [vmem:[#allocation93_spill] sm:$0xff] %v16334_v9  ;;  %v1057_v23 = vsel %vm18390_vm6, %v928_v30, %v1056_v36  ;;  %vm10986_vm6 = vmpackc.low %vm1406_vm3, %vm1402_vm2  ;;  %vm18399_vm2 = vnez %v18344_v6  ;;  %vm1391_vm3 = vcmp.eq.s32.totalorder %v15857_v33, %v15675_v59 }
 0x2ab   :  { %v1063_v9 = vmax.f32 %v735_v46, %v1057_v23 }
 0x2ad   :  { %v1125_v46 = vmax.f32 %v1051_v19, %v1063_v9  ;;  %v1122_v9 = vmax.f32 %v16283_v25, %v1050_v48 }
 0x2af   :  { %v740_v14 = vpop.f32.mrf.mxu0  ;;  %v16337_v24 = vpop.f32.mrf.mxu2 }
 0x2b0   :  { %18391 = vst [vmem:[#allocation94_spill] sm:$0xff] %v16337_v24  ;;  %v1058_v49 = vrot.slane %v740_v14, 1  ;;  %v1052_v24 = vmax.f32 %v733_v12, %v929_v32 }
 0x2b1   :  { %v16345_v39 = vpop.f32.mrf.mxu1 }
 0x2b2   :  { %v1059_v63 = vsel %vm18394_vm1, %v1056_v36, %v1058_v49  ;;  %v1065_v4 = vmax.f32 %v740_v14, %v1058_v49  ;;  %v1124_v61 = vmax.f32 %v1050_v48, %v1052_v24  ;;  %vm1643_vm1 = vcmask 908288  }
 0x2b3   :  { %v1064_v62 = vmax.f32 %v738_v50, %v1059_v63  ;;  %v1684_v63 = vsel %vm18397_vm5, 4294967295, %v18396_v55  ;;  %v1123_v50 = vmax.f32 %v16297_v60, %v1051_v19  ;;  %vm1383_vm5 = vcmp.eq.s32.totalorder %v15857_v33, %v15664_v18  ;;  %v18400_v18 = vld [vmem:[#allocation69_spill] sm:$0xff] }
 0x2b4   :  { %v1127_v22 = vmax.f32 %v1053_v45, %v1065_v4  ;;  %10975 = vmatmul.msk.bf16.gmra.mxu2 %vm10974_vm15, %v18323_v29  ;;  %10985 = vmatmul.msk.bf16.gmra.mxu3 %vm10984_vm7, %v18323_v29  ;;  %v1190_v4 = vadd.f32 %v16068_v10, %v1125_v46  ;;  %v1685_v42 = vsel %vm1683_vm10, %v1684_v63, 0  ;;  %vm1375_vm15 = vcmp.eq.s32.totalorder %v15857_v33, %v15645_v58 }
 0x2b5   :  { %v1126_v23 = vmax.f32 %v1052_v24, %v1064_v62  ;;  %v1188_v62 = vadd.f32 %v16068_v10, %v1123_v50  ;;  %vm18398_vm7 = vnez %v18332_v7  ;;  %vm1379_vm10 = vcmp.eq.s32.totalorder %v15857_v33, %v15653_v3 }
 0x2b6   :  { %v1192_v36 = vadd.f32 %v16068_v10, %v1127_v22  ;;  %v1189_v22 = vadd.f32 %v16068_v10, %v1124_v61  ;;  %v1252_v51 = vmax.f32 %v1190_v4, 0.0  ;;  %v1479_v5 = vsel %vm1379_vm10, 1.0, %v18324_v41 }
 0x2b7   :  { %v16356_v49 = vpop.f32.mrf.mxu2  ;;  %v1191_v30 = vadd.f32 %v16068_v10, %v1126_v23  ;;  %v1250_v19 = vmax.f32 %v1188_v62, 0.0  ;;  %v1483_v58 = vsel %vm1383_vm5, 1.0, %v18324_v41  ;;  %v1772_v7 = vadd.f32 %v16267_v31, %v15943_v0  ;;  %v18401_v0 = vld [vmem:[#allocation72_spill] sm:$0xff] }
 0x2b8   :  { %v1254_v12 = vmax.f32 %v1192_v36, 0.0  ;;  %v1251_v24 = vmax.f32 %v1189_v22, 0.0  ;;  %v1187_v36 = vadd.f32 %v16068_v10, %v1122_v9  ;;  %v1571_v3 = vpack.c.bf16 %v1483_v58, %v1479_v5 }
 0x2b9   :  { %v1760_v45 = vpop.f32.mrf.mxu1  ;;  %v1253_v32 = vmax.f32 %v1191_v30, 0.0  ;;  %v1774_v50 = vadd.f32 %v16273_v2, %v18400_v18  ;;  %vm18402_vm14 = vnez %v18401_v0  ;;  %v1491_v31 = vsel %vm1391_vm3, 1.0, %v18324_v41  ;;  %v18403_v2 = vld [vmem:[#allocation73_spill] sm:$0xff] }
 0x2ba   :  { %v1641_v60 = vpack.c.bf16 %v1252_v51, %v1251_v24  ;;  %v1249_v25 = vmax.f32 %v1187_v36, 0.0  ;;  %v1777_v9 = vadd.f32 %v16292_v57, %v18403_v2  ;;  %v1495_v36 = vsel %vm1395_vm13, 1.0, %v18324_v41  ;;  %v18410_v2 = vld [vmem:[#allocation43_spill] sm:$0xff] }
 0x2bb   :  { %v1642_v16 = vpack.c.bf16 %v1254_v12, %v1253_v32  ;;  %v18412_v57 = vld [vmem:[#allocation83_spill] sm:$0xff]  ;;  %vm2006_vm3 = vcmask 257024   ;;  %vm3124_vm13 = vcmask 1045504  }
 0x2bc   :  { %v1640_v48 = vpack.c.bf16 %v1250_v19, %v1249_v25  ;;  %v18405_v19 = vld [vmem:[#allocation77_spill] sm:$0xff] }
 0x2bd   :  { %v1687_v14 = vand.u32 %v1685_v42, %v1642_v16  ;;  %v1782_v25 = vadd.f32 %v16316_v47, %v18405_v19 }
 0x2bf   :  { %v16366_v23 = vpop.f32.mrf.mxu2  ;;  %1909 = vmatpush.bf16.msrb.mxu1 %v1687_v14 }
 0x2c3   :  { %1910 = vmatpush.bf16.msrb.mxu1 %v1641_v60 }
 0x2c4   :  { %10987 = vmatmul.msk.bf16.gmra.mxu3 %vm10986_vm6, %v18323_v29  ;;  %vm1387_vm6 = vcmp.eq.s32.totalorder %v15857_v33, %v15672_v27 }
 0x2c5   :  { %v1487_v22 = vsel %vm1387_vm6, 1.0, %v18324_v41  ;;  %vm2230_vm6 = vcmask 261120  }
 0x2c6   :  { %v1575_v59 = vpack.c.bf16 %v1491_v31, %v1487_v22 }
 0x2c7   :  { %v16374_v46 = vpop.f32.mrf.mxu2  ;;  %1911 = vmatpush.bf16.msrb.mxu1 %v1640_v48 }
 0x2cb   :  { %1912 = vmatpush.bf16.msrb.mxu1 %v16310_v11  ;;  %v1463_v11 = vsel %vm1363_vm11, 1.0, %v18324_v41  ;;  %vm1399_vm11 = vcmp.eq.s32.totalorder %v15857_v33, %v15683_v40 }
 0x2cc   :  { %v1499_v60 = vsel %vm1399_vm11, 1.0, %v18324_v41  ;;  %vm18424_vm11 = vcmask 1046528  }
 0x2cd   :  { %v1579_v1 = vpack.c.bf16 %v1499_v60, %v1495_v36  ;;  %v1797_v36 = vadd.f32 %v16374_v46, %v18412_v57 }
 0x2cf   :  { %v16377_v10 = vpop.f32.mrf.mxu2  ;;  %1913 = vmatpush.bf16.msrb.mxu1 %v16285_v53  ;;  %v1467_v53 = vsel %vm1367_vm8, 1.0, %v18324_v41  ;;  %vm1403_vm8 = vcmp.eq.s32.totalorder %v15857_v33, %v15687_v43 }
 0x2d0   :  { %v1563_v63 = vpack.c.bf16 %v1467_v53, %v1463_v11 }
 0x2d3   :  { %1914 = vmatpush.bf16.msrb.mxu1 %v16261_v44 }
 0x2d4   :  { %10989 = vmatmul.msk.bf16.gmra.mxu3 %vm10988_vm4, %v18323_v29  ;;  %vm1411_vm4 = vcmp.eq.s32.totalorder %v15857_v33, %v15695_v52 }
 0x2d5   :  { %v1511_v18 = vsel %vm1411_vm4, 1.0, %v18324_v41  ;;  %vm18433_vm4 = vmmov %vm18424_vm11 }
 0x2d7   :  { %v16392_v30 = vpop.f32.mrf.mxu2  ;;  %1915 = vmatpush.bf16.msrb.mxu1 %v16240_v17  ;;  %v1475_v17 = vsel %vm1375_vm15, 1.0, %v18324_v41  ;;  %vm11000_vm15 = vmpackc.low %vm18408_vm9, %vm18408_vm9  ;;  %vm2869_vm9 = vsmask.f32 6400 }
 0x2d8   :  { %v1567_v61 = vpack.c.bf16 %v1475_v17, %v1471_v35  ;;  %v1503_v17 = vsel %vm1403_vm8, 1.0, %v18324_v41  ;;  %vm3542_vm8 = vsmask.f32 5376 }
 0x2da   :  { %11002 = vmatmul.msk.bf16.vlgmr.msrb.gmra.mxu1 %vm1643_vm1, %v1563_v63 }
 0x2df   :  { %v16396_v20 = vpop.f32.mrf.mxu2 }
 0x2e4   :  { %10991 = vmatmul.msk.bf16.gmra.mxu3 %vm18398_vm7, %v18323_v29  ;;  %vm1423_vm7 = vcmp.eq.s32.totalorder %v15857_v33, %v18410_v2 }
 0x2e7   :  { %v16407_v44 = vpop.f32.mrf.mxu2 }
 0x2ea   :  { %11003 = vmatmul.msk.bf16.gmra.mxu1 %vm1643_vm1, %v1567_v61  ;;  %v18407_v61 = vld [vmem:[#allocation79_spill] sm:$0xff] }
 0x2eb   :  { %v1787_v5 = vadd.f32 %v16332_v26, %v18407_v61 }
 0x2ef   :  { %v16410_v12 = vpop.f32.mrf.mxu2 }
 0x2f4   :  { %10993 = vmatmul.msk.bf16.gmra.mxu3 %vm18399_vm2, %v18323_v29 }
 0x2f7   :  { %v16423_v45 = vpop.f32.mrf.mxu2  ;;  %v1844_v32 = vpop.f32.mrf.mxu3 }
 0x2f8   :  { %v16425_v4 = vadd.f32 %v1844_v32, %v1772_v7 }
 0x2fa   :  { %11004 = vmatmul.msk.bf16.gmra.mxu1 %vm1643_vm1, %v1571_v3 }
 0x2ff   :  { %v16430_v6 = vpop.f32.mrf.mxu2  ;;  %v1846_v42 = vpop.f32.mrf.mxu3 }
 0x300   :  { %v16432_v16 = vadd.f32 %v1846_v42, %v1774_v50  ;;  %v18409_v50 = vld [vmem:[#allocation81_spill] sm:$0xff] }
 0x301   :  { %v1792_v42 = vadd.f32 %v16356_v49, %v18409_v50  ;;  %v1523_v49 = vsel %vm1423_vm7, 1.0, %v18324_v41 }
 0x304   :  { %10995 = vmatmul.msk.bf16.gmra.mxu3 %vm18402_vm14, %v18323_v29  ;;  %vm2122_vm14 = vsmask.f32 7424 }
 0x307   :  { %v16445_v14 = vpop.f32.mrf.mxu2  ;;  %v1849_v51 = vpop.f32.mrf.mxu3 }
 0x308   :  { %v16447_v62 = vadd.f32 %v1849_v51, %v1777_v9  ;;  %v18411_v9 = vld [vmem:[#allocation45_spill] sm:$0xff] }
 0x309   :  { %vm1419_vm10 = vcmp.eq.s32.totalorder %v15857_v33, %v18411_v9  ;;  %v14130_v51 = vld [vmem:[#allocation14 + $0x8] sm:$0xff]  ;;  %v14149_v9 = vld [vmem:[#allocation14 + $0x50] sm:$0xff] }
 0x30a   :  { %11005 = vmatmul.msk.bf16.gmra.mxu1 %vm1643_vm1, %v1575_v59  ;;  %v1519_v59 = vsel %vm1419_vm10, 1.0, %v18324_v41  ;;  %2381 = vmatpush.bf16.msrb.mxu3 %v14130_v51 }
 0x30f   :  { %v16450_v27 = vpop.f32.mrf.mxu2  ;;  %v16452_v24 = vpop.f32.mrf.mxu3 }
 0x314   :  { %10997 = vmatmul.msk.bf16.gmra.mxu3 %vm16106_vm12, %v18323_v29  ;;  %vm1407_vm12 = vcmp.eq.s32.totalorder %v15857_v33, %v15723_v13 }
 0x315   :  { %v1507_v35 = vsel %vm1407_vm12, 1.0, %v18324_v41  ;;  %vm18430_vm12 = vmmov %vm18424_vm11 }
 0x316   :  { %v1583_v13 = vpack.c.bf16 %v1507_v35, %v1503_v17  ;;  %v18413_v35 = vld [vmem:[#allocation44_spill] sm:$0xff]  ;;  %v18414_v17 = vld [vmem:[#allocation46_spill] sm:$0xff] }
 0x317   :  { %v16465_v48 = vpop.f32.mrf.mxu2  ;;  %v1854_v11 = vpop.f32.mrf.mxu3  ;;  %vm1427_vm5 = vcmp.eq.s32.totalorder %v15857_v33, %v18413_v35  ;;  %vm1431_vm2 = vcmp.eq.s32.totalorder %v15857_v33, %v18414_v17 }
 0x318   :  { %v16467_v53 = vadd.f32 %v1854_v11, %v1782_v25  ;;  %v1591_v25 = vpack.c.bf16 %v1523_v49, %v1519_v59  ;;  %v14132_v11 = vld [vmem:[#allocation14 + $0x18] sm:$0xff]  ;;  %v1527_v46 = vsel %vm1427_vm5, 1.0, %v18324_v41  ;;  %v1531_v61 = vsel %vm1431_vm2, 1.0, %v18324_v41 }
 0x319   :  { %2273 = vmatpush.bf16.msrb.mxu2 %v14132_v11  ;;  %v1595_v50 = vpack.c.bf16 %v1531_v61, %v1527_v46  ;;  %v1812_v61 = vadd.f32 %v16423_v45, %v16257_v15 }
 0x31a   :  { %11006 = vmatmul.msk.bf16.gmra.mxu1 %vm1643_vm1, %v1579_v1  ;;  %v14129_v1 = vld [vmem:[#allocation14] sm:$0xff] }
 0x31b   :  { %2382 = vmatpush.bf16.msrb.mxu3 %v14129_v1  ;;  %v18418_v1 = vld [vmem:[#allocation76_spill] sm:$0xff] }
 0x31f   :  { %v16470_v40 = vpop.f32.mrf.mxu2  ;;  %v16472_v63 = vpop.f32.mrf.mxu3 }
 0x324   :  { %10999 = vmatmul.msk.bf16.gmra.mxu3 %vm16114_vm0, %v18323_v29  ;;  %vm1415_vm0 = vcmp.eq.s32.totalorder %v15857_v33, %v15701_v56 }
 0x325   :  { %v1515_v26 = vsel %vm1415_vm0, 1.0, %v18324_v41  ;;  %vm1459_vm0 = vcmp.eq.s32.totalorder %v15857_v33, %v15754_v21 }
 0x326   :  { %v1587_v52 = vpack.c.bf16 %v1515_v26, %v1511_v18 }
 0x327   :  { %v16485_v58 = vpop.f32.mrf.mxu2  ;;  %v1859_v7 = vpop.f32.mrf.mxu3 }
 0x328   :  { %v16487_v32 = vadd.f32 %v1859_v7, %v1787_v5  ;;  %v1802_v5 = vadd.f32 %v16392_v30, %v16223_v34  ;;  %v14131_v34 = vld [vmem:[#allocation14 + $0x10] sm:$0xff]  ;;  %v14150_v30 = vld [vmem:[#allocation14 + $0x58] sm:$0xff] }
 0x329   :  { %2274 = vmatpush.bf16.msrb.mxu2 %v14131_v34  ;;  %3202 = vmatpush.bf16.msrb.mxu0 %v14150_v30 }
 0x32a   :  { %11007 = vmatmul.msk.bf16.gmra.mxu1 %vm1643_vm1, %v1583_v13 }
 0x32d   :  { %3203 = vmatpush.bf16.msrb.mxu0 %v14149_v9 }
 0x32f   :  { %v16490_v43 = vpop.f32.mrf.mxu2  ;;  %v16492_v3 = vpop.f32.mrf.mxu3 }
 0x334   :  { %11001 = vmatmul.msk.bf16.gmra.mxu3 %vm11000_vm15, %v18323_v29 }
 0x337   :  { %v16507_v0 = vpop.f32.mrf.mxu2  ;;  %v1864_v56 = vpop.f32.mrf.mxu3 }
 0x338   :  { %v16509_v31 = vadd.f32 %v1864_v56, %v1792_v42 }
 0x33a   :  { %11008 = vmatmul.msk.bf16.gmra.mxu1 %vm1643_vm1, %v1587_v52 }
 0x33f   :  { %v1833_v38 = vpop.f32.mrf.mxu2  ;;  %v16512_v22 = vpop.f32.mrf.mxu3 }
 0x347   :  { %v1869_v60 = vpop.f32.mrf.mxu3 }
 0x348   :  { %v16522_v19 = vadd.f32 %v1869_v60, %v1797_v36  ;;  %v18416_v60 = vld [vmem:[#allocation66_spill] sm:$0xff] }
 0x34a   :  { %11009 = vmatmul.msk.bf16.gmra.mxu1 %vm1643_vm1, %v1591_v25 }
 0x34f   :  { %v16525_v47 = vpop.f32.mrf.mxu3 }
 0x357   :  { %v1874_v7 = vpop.f32.mrf.mxu3  ;;  %v1917_v13 = vpop.f32.mrf.mxu1 }
 0x358   :  { %v16535_v26 = vadd.f32 %v1874_v7, %v1802_v5  ;;  %v1918_v18 = vadd.f32 %v1917_v13, %v16425_v4  ;;  %v1807_v4 = vadd.f32 %v16407_v44, %v16236_v54  ;;  %v1779_v54 = vadd.f32 %v16301_v37, %v18418_v1 }
 0x35a   :  { %v1981_v42 = vpack.c.bf16 %v1918_v18, %v1918_v18  ;;  %11010 = vmatmul.msk.bf16.gmra.mxu1 %vm1643_vm1, %v1595_v50  ;;  %v1852_v44 = vadd.f32 %v16452_v24, %v1779_v54  ;;  %v18419_v24 = vld [vmem:[#allocation67_spill] sm:$0xff] }
 0x35c   :  { %2007 = vst.msk [vmem:[#allocation2] sm:$0xf] %vm2006_vm3, %v1981_v42 }
 0x35f   :  { %v16540_v56 = vpop.f32.mrf.mxu3  ;;  %v1919_v52 = vpop.f32.mrf.mxu1 }
 0x360   :  { %v1920_v38 = vadd.f32 %v1919_v52, %v16432_v16  ;;  %v18415_v16 = vld [vmem:[#allocation65_spill] sm:$0xff]  ;;  %v18420_v52 = vld [vmem:[#allocation68_spill] sm:$0xff] }
 0x361   :  { %v18417_v25 = vpack.c.bf16 %v18415_v16, %v18416_v60 }
 0x362   :  { %v1982_v2 = vpack.c.bf16 %v1920_v38, %v1920_v38  ;;  %v18421_v38 = vpack.c.bf16 %v18419_v24, %v18420_v52  ;;  %v18423_v52 = vld [vmem:[#allocation88_spill] sm:$0xff] }
 0x364   :  { %2008 = vst.msk [vmem:[#allocation2 + $0x4] sm:$0xf] %vm2006_vm3, %v1982_v2 }
 0x367   :  { %v1879_v51 = vpop.f32.mrf.mxu3  ;;  %v1922_v49 = vpop.f32.mrf.mxu1 }
 0x368   :  { %v16546_v59 = vadd.f32 %v1879_v51, %v1807_v4  ;;  %v1923_v57 = vadd.f32 %v1922_v49, %v16447_v62  ;;  %v18422_v4 = vld [vmem:[#allocation78_spill] sm:$0xff] }
 0x369   :  { %v1784_v15 = vadd.f32 %v16320_v8, %v18422_v4 }
 0x36a   :  { %v1983_v36 = vpack.c.bf16 %v1923_v57, %v1923_v57  ;;  %11011 = vmatmul.msk.bf16.gmra.mxu1 %vm1643_vm1, %v18417_v25 }
 0x36b   :  { %v14846_v11 = vld [vmem:[#allocation2] sm:$0xff]   ;;  %v1857_v49 = vadd.f32 %v16472_v63, %v1784_v15 }
 0x36c   :  { %2009 = vst.msk [vmem:[#allocation2 + $0x8] sm:$0xf] %vm2006_vm3, %v1983_v36  ;;  %11083 = vmatmul.msk.bf16.vlgmr.msrb.gmra.mxu3 %vm2230_vm6, %v14846_v11  ;;  %v2126_v5 = vshll.u32 %v14846_v11, 16  ;;  %v3116_v30 = vld [vmem:[#allocation2 + $0x4] sm:$0xc]  ;;  %v2124_v51 = vshrl.u32 %v14846_v11, 16 }
 0x36d   :  { %v2614_v45 = vld [vmem:[#allocation2 + $0x4] sm:$0xe]  ;;  %v3122_v57 = vunpack.c.l.b16 %v3116_v30 }
 0x36e   :  { %v2128_v2 = vrot.slane %v2126_v5, 1  ;;  %v2664_v1 = vunpack.c.l.b16 %v2614_v45 }
 0x36f   :  { %v16558_v35 = vpop.f32.mrf.mxu3  ;;  %v1924_v62 = vpop.f32.mrf.mxu1 }
 0x370   :  { %v1925_v17 = vadd.f32 %v1924_v62, %v1852_v44  ;;  %v2129_v16 = vor.u32 %v2128_v2, %v2124_v51 }
 0x372   :  { %v1984_v46 = vpack.c.bf16 %v1925_v17, %v1925_v17 }
 0x373   :  { %v2615_v50 = vld [vmem:[#allocation2 + $0x8] sm:$0xf] }
 0x374   :  { %2010 = vst.msk [vmem:[#allocation2 + $0xc] sm:$0xf] %vm2006_vm3, %v1984_v46  ;;  %v2665_v9 = vunpack.c.l.b16 %v2615_v50  ;;  %v3287_v11 = vld [vmem:[#allocation2 + $0x8] sm:$0xc] }
 0x375   :  { %v3337_v5 = vunpack.c.l.b16 %v3287_v11 }
 0x376   :  { %v3123_v44 = vpack.c.b16 %v2665_v9, %v3122_v57  ;;  %v16584_v17 = vpack.c.b16 %v2665_v9, %v2664_v1 }
 0x377   :  { %v1884_v7 = vpop.f32.mrf.mxu3  ;;  %v1927_v13 = vpop.f32.mrf.mxu1 }
 0x378   :  { %v16563_v37 = vadd.f32 %v1884_v7, %v1812_v61  ;;  %v1928_v18 = vadd.f32 %v1927_v13, %v16467_v53  ;;  %v3125_v7 = vrot.slane %v3123_v44, 2  ;;  %v14148_v13 = vld [vmem:[#allocation14 + $0x48] sm:$0xff]  ;;  %v2699_v50 = vrot.slane %v16584_v17, 1 }
 0x379   :  { %3031 = vmatpush.bf16.msra.mxu1 %v14148_v13 }
 0x37a   :  { %v1985_v42 = vpack.c.bf16 %v1928_v18, %v1928_v18  ;;  %11012 = vmatmul.msk.bf16.gmra.mxu1 %vm1643_vm1, %v18421_v38  ;;  %v1817_v38 = vadd.f32 %v16445_v14, %v18423_v52  ;;  %v18427_v14 = vld [vmem:[#allocation71_spill] sm:$0xff] }
 0x37b   :  { %v16570_v34 = vld [vmem:[#allocation2 + $0x8] sm:$0xff] }
 0x37c   :  { %2011 = vst.msk [vmem:[#allocation2 + $0x10] sm:$0xf] %vm2006_vm3, %v1985_v42  ;;  %11084 = vmatmul.msk.bf16.gmra.mxu3 %vm2230_vm6, %v16570_v34  ;;  %v2131_v53 = vshll.u32 %v16570_v34, 16  ;;  %v16579_v36 = vld [vmem:[#allocation2 + $0xc] sm:$0xf] }
 0x37d   :  { %v18274_v46 = vunpack.c.l.b16 %v16579_v36 }
 0x37e   :  { %v2133_v25 = vrot.slane %v2131_v53, 1  ;;  %v18425_v53 = vld [vmem:[#allocation80_spill] sm:$0xff] }
 0x37f   :  { %v16581_v60 = vpop.f32.mrf.mxu3  ;;  %v1929_v8 = vpop.f32.mrf.mxu1  ;;  %v3360_v24 = vpack.c.b16 %v18274_v46, %v3337_v5 }
 0x380   :  { %v1930_v54 = vadd.f32 %v1929_v8, %v1857_v49  ;;  %v2134_v62 = vsel %vm2122_vm14, %v2129_v16, %v2133_v25  ;;  %v18426_v49 = vld [vmem:[#allocation94_spill] sm:$0xff] }
 0x381   :  { %11063 = vmatmul.msk.bf16.vlgmr.msrb.gmra.mxu2 %vm2230_vm6, %v2134_v62  ;;  %v3544_v51 = vshrl.u32 %v3360_v24, 16  ;;  %v1789_v57 = vadd.f32 %v18426_v49, %v18425_v53  ;;  %v18428_v8 = vld [vmem:[#allocation70_spill] sm:$0xff] }
 0x382   :  { %v1986_v63 = vpack.c.bf16 %v1930_v54, %v1930_v54  ;;  %v18429_v1 = vpack.c.bf16 %v18427_v14, %v18428_v8  ;;  %v3547_v54 = vshll.u32 %v3360_v24, 16 }
 0x383   :  { %v16588_v61 = vld [vmem:[#allocation2 + $0xc] sm:$0xff]  ;;  %v1862_v62 = vadd.f32 %v16492_v3, %v1789_v57  ;;  %v3372_v57 = vrot.slane %v3360_v24, 2 }
 0x384   :  { %2012 = vst.msk [vmem:[#allocation2 + $0x14] sm:$0xf] %vm2006_vm3, %v1986_v63  ;;  %v3126_v18 = vrot.slane %v16588_v61, 2  ;;  %v2700_v42 = vrot.slane %v16588_v61, 1  ;;  %v14147_v63 = vld [vmem:[#allocation14 + $0x40] sm:$0xff]  ;;  %v3549_v52 = vrot.slane %v3547_v54, 3 }
 0x385   :  { %3032 = vmatpush.bf16.msra.mxu1 %v14147_v63  ;;  %v1559_v63 = vsel %vm1459_vm0, 1.0, %v18324_v41 }
 0x386   :  { %v3127_v4 = vsel %vm3124_vm13, %v3125_v7, %v3126_v18  ;;  %v16600_v15 = vsel %vm18424_vm11, %v2699_v50, %v2700_v42  ;;  %v18275_v7 = vrot.slane %v16570_v34, 1  ;;  %v3546_v50 = vrot.slane %v3544_v51, 2 }
 0x387   :  { %v1889_v2 = vpop.f32.mrf.mxu3  ;;  %v1932_v30 = vpop.f32.mrf.mxu1  ;;  %11203 = vmatmul.msk.bf16.vlgmr.msrb.gmra.mxu0 %vm2230_vm6, %v3127_v4 }
 0x388   :  { %v16602_v45 = vadd.f32 %v1889_v2, %v1817_v38  ;;  %v1933_v9 = vadd.f32 %v1932_v30, %v16487_v32  ;;  %v2135_v32 = vshrl.u32 %v16570_v34, 16  ;;  %v3550_v54 = vor.u32 %v3549_v52, %v3546_v50 }
 0x38a   :  { %v1987_v16 = vpack.c.bf16 %v1933_v9, %v1933_v9  ;;  %11013 = vmatmul.msk.bf16.gmra.mxu1 %vm1643_vm1, %v18429_v1  ;;  %v2137_v9 = vor.u32 %v2135_v32, %v2133_v25 }
 0x38b   :  { %v16612_v44 = vld [vmem:[#allocation2 + $0x10] sm:$0xff] }
 0x38c   :  { %v16614_v11 = vld [vmem:[#allocation2 + $0x10] sm:$0xff]  ;;  %2013 = vst.msk [vmem:[#allocation2 + $0x18] sm:$0xf] %vm2006_vm3, %v1987_v16  ;;  %11085 = vmatmul.msk.bf16.gmra.mxu3 %vm2230_vm6, %v16612_v44  ;;  %v2139_v5 = vshll.u32 %v16612_v44, 16  ;;  %v2455_v13 = vrot.slane %v16612_v44, 1 }
 0x38d   :  { %v3552_v38 = vshrl.u32 %v16614_v11, 16  ;;  %v3555_v3 = vshll.u32 %v16614_v11, 16  ;;  %v18276_v2 = vrot.slane %v16614_v11, 2  ;;  %v18436_v28 = vrot.slane %v16614_v11, 2 }
 0x38e   :  { %v2141_v53 = vrot.slane %v2139_v5, 1  ;;  %v16632_v49 = vsel %vm18430_vm12, %v18275_v7, %v2455_v13 }
 0x38f   :  { %v16627_v30 = vpop.f32.mrf.mxu3  ;;  %v1934_v4 = vpop.f32.mrf.mxu1  ;;  %v3554_v16 = vrot.slane %v3552_v38, 2  ;;  %v3557_v14 = vrot.slane %v3555_v3, 3  ;;  %v16638_v1 = vsel %vm3124_vm13, %v3372_v57, %v18276_v2  ;;  %v18432_v3 = vld [vmem:[#allocation90_spill] sm:$0xff] }
 0x390   :  { %v1935_v51 = vadd.f32 %v1934_v4, %v1862_v62  ;;  %v2142_v8 = vsel %vm2122_vm14, %v2137_v9, %v2141_v53  ;;  %18431 = vst [vmem:[#allocation69_spill] sm:$0xff] %v16638_v1  ;;  %v1822_v21 = vadd.f32 %v16465_v48, %v18432_v3  ;;  %v1611_v9 = vpack.c.bf16 %v1559_v63, %v1559_v63 }
 0x391   :  { %11064 = vmatmul.msk.bf16.gmra.mxu2 %vm2230_vm6, %v2142_v8  ;;  %v3558_v32 = vor.u32 %v3557_v14, %v3554_v16  ;;  %v18434_v16 = vld [vmem:[#allocation82_spill] sm:$0xff]  ;;  %v2871_v3 = vshrl.u32 %v16584_v17, 16 }
 0x392   :  { %v1988_v25 = vpack.c.bf16 %v1935_v51, %v1935_v51  ;;  %v1794_v14 = vadd.f32 %v16366_v23, %v18434_v16 }
 0x393   :  { %v16643_v24 = vld [vmem:[#allocation2 + $0x14] sm:$0xff]  ;;  %v16647_v62 = vsel %vm3542_vm8, %v3550_v54, %v3558_v32  ;;  %v2882_v54 = vshll.u32 %v16588_v61, 16 }
 0x394   :  { %2014 = vst.msk [vmem:[#allocation2 + $0x1c] sm:$0xf] %vm2006_vm3, %v1988_v25  ;;  %v3128_v5 = vrot.slane %v16643_v24, 2  ;;  %v2702_v38 = vrot.slane %v16643_v24, 1 }
 0x395   :  { %v2884_v2 = vrot.slane %v2882_v54, 2 }
 0x396   :  { %v3129_v50 = vsel %vm3124_vm13, %v3126_v18, %v3128_v5  ;;  %v16656_v52 = vsel %vm18433_vm4, %v2700_v42, %v2702_v38  ;;  %v1867_v18 = vadd.f32 %v16512_v22, %v1794_v14  ;;  %v2879_v42 = vshrl.u32 %v16588_v61, 16 }
 0x397   :  { %v1894_v33 = vpop.f32.mrf.mxu3  ;;  %v1937_v4 = vpop.f32.mrf.mxu1  ;;  %11204 = vmatmul.msk.bf16.gmra.mxu0 %vm2230_vm6, %v3129_v50 }
 0x398   :  { %v16658_v57 = vadd.f32 %v1894_v33, %v1822_v21  ;;  %v1938_v51 = vadd.f32 %v1937_v4, %v16509_v31  ;;  %v2143_v31 = vshrl.u32 %v16612_v44, 16  ;;  %v2874_v44 = vshll.u32 %v16584_v17, 16 }
 0x399   :  { %v2881_v7 = vrot.slane %v2879_v42, 1 }
 0x39a   :  { %v1989_v8 = vpack.c.bf16 %v1938_v51, %v1938_v51  ;;  %11014 = vmatmul.msk.bf16.gmra.mxu1 %vm1643_vm1, %v1611_v9  ;;  %v2145_v9 = vor.u32 %v2143_v31, %v2141_v53  ;;  %vm18435_vm1 = vmmov %vm18433_vm4  ;;  %v2876_v31 = vrot.slane %v2874_v44, 2 }
 0x39b   :  { %v16665_v48 = vld [vmem:[#allocation2 + $0x18] sm:$0xff]  ;;  %v2885_v54 = vor.u32 %v2884_v2, %v2881_v7  ;;  %vm18440_vm15 = vmmov %vm18435_vm1 }
 0x39c   :  { %v16667_v25 = vld [vmem:[#allocation2 + $0x18] sm:$0xff]  ;;  %2015 = vst.msk [vmem:[#allocation2 + $0x20] sm:$0xf] %vm2006_vm3, %v1989_v8  ;;  %11086 = vmatmul.msk.bf16.gmra.mxu3 %vm2230_vm6, %v16665_v48  ;;  %v2147_v23 = vshll.u32 %v16665_v48, 16  ;;  %v2457_v63 = vrot.slane %v16665_v48, 1  ;;  %vm18442_vm7 = vmmov %vm18435_vm1 }
 0x39d   :  { %v3561_v21 = vshrl.u32 %v16667_v25, 16  ;;  %v3564_v22 = vshll.u32 %v16667_v25, 16  ;;  %v3375_v33 = vrot.slane %v16667_v25, 2  ;;  %v1832_v25 = vadd.f32 %v16507_v0, %v16345_v39  ;;  %vm18445_vm10 = vmmov %vm18435_vm1  ;;  %v18446_v0 = vld [vmem:[#allocation85_spill] sm:$0xff] }
 0x39e   :  { %v2149_v51 = vrot.slane %v2147_v23, 1  ;;  %v16686_v16 = vsel %vm18435_vm1, %v2455_v13, %v2457_v63  ;;  %vm18447_vm5 = vmmov %vm18435_vm1 }
 0x39f   :  { %v16682_v4 = vpop.f32.mrf.mxu3  ;;  %v1939_v50 = vpop.f32.mrf.mxu1  ;;  %v3563_v14 = vrot.slane %v3561_v21, 2  ;;  %v3566_v8 = vrot.slane %v3564_v22, 3  ;;  %v16694_v41 = vsel %vm3124_vm13, %v18436_v28, %v3375_v33  ;;  %v18439_v28 = vld [vmem:[#allocation92_spill] sm:$0xff]  ;;  %vm18450_vm2 = vmmov %vm18435_vm1 }
 0x3a0   :  { %v1940_v61 = vadd.f32 %v1939_v50, %v1867_v18  ;;  %v2150_v46 = vsel %vm2122_vm14, %v2145_v9, %v2149_v51  ;;  %18437 = vst [vmem:[#allocation72_spill] sm:$0xff] %v16694_v41  ;;  %v2873_v18 = vrot.slane %v2871_v3, 1  ;;  %v1827_v21 = vadd.f32 %v16485_v58, %v18439_v28  ;;  %vm18452_vm11 = vmmov %vm18435_vm1 }
 0x3a1   :  { %11065 = vmatmul.msk.bf16.gmra.mxu2 %vm2230_vm6, %v2150_v46  ;;  %v3567_v17 = vor.u32 %v3566_v8, %v3563_v14  ;;  %vm18455_vm12 = vmmov %vm18435_vm1 }
 0x3a2   :  { %v1990_v53 = vpack.c.bf16 %v1940_v61, %v1940_v61  ;;  %v2877_v3 = vor.u32 %v2876_v31, %v2873_v18  ;;  %vm18457_vm0 = vmmov %vm18435_vm1 }
 0x3a3   :  { %v16697_v13 = vld [vmem:[#allocation2 + $0x1c] sm:$0xff]  ;;  %v16701_v42 = vsel %vm3542_vm8, %v3558_v32, %v3567_v17  ;;  %vm18460_vm4 = vmmov %vm18457_vm0 }
 0x3a4   :  { %2016 = vst.msk [vmem:[#allocation2 + $0x24] sm:$0xf] %vm2006_vm3, %v1990_v53  ;;  %v3130_v23 = vrot.slane %v16697_v13, 2  ;;  %v2704_v11 = vrot.slane %v16697_v13, 1  ;;  %v2886_v7 = vsel %vm2869_vm9, %v2877_v3, %v2885_v54  ;;  %v2891_v53 = vshll.u32 %v16643_v24, 16  ;;  %vm18462_vm1 = vmmov %vm18457_vm0 }
 0x3a5   :  { %18438 = vst [vmem:[#allocation73_spill] sm:$0xff] %v16701_v42 }
 0x3a6   :  { %v3131_v50 = vsel %vm3124_vm13, %v3128_v5, %v3130_v23  ;;  %v16709_v9 = vsel %vm18440_vm15, %v2702_v38, %v2704_v11  ;;  %v18441_v5 = vld [vmem:[#allocation84_spill] sm:$0xff]  ;;  %v2888_v38 = vshrl.u32 %v16643_v24, 16  ;;  %vm18465_vm15 = vmmov %vm18457_vm0 }
 0x3a7   :  { %v1899_v46 = vpop.f32.mrf.mxu3  ;;  %v1942_v22 = vpop.f32.mrf.mxu1  ;;  %11205 = vmatmul.msk.bf16.gmra.mxu0 %vm2230_vm6, %v3131_v50  ;;  %v1799_v14 = vadd.f32 %v16377_v10, %v18441_v5  ;;  %v2893_v5 = vrot.slane %v2891_v53, 2 }
 0x3a8   :  { %v16711_v44 = vadd.f32 %v1899_v46, %v1827_v21  ;;  %v1943_v32 = vadd.f32 %v1942_v22, %v16522_v19  ;;  %v2151_v19 = vshrl.u32 %v16665_v48, 16 }
 0x3a9   :  { %v1872_v31 = vadd.f32 %v16525_v47, %v1799_v14  ;;  %v2890_v47 = vrot.slane %v2888_v38, 1 }
 0x3aa   :  { %v1991_v2 = vpack.c.bf16 %v1943_v32, %v1943_v32  ;;  %11183 = vmatmul.msk.bf16.vlgmr.msra.gmra.mxu1 %vm2230_vm6, %v2886_v7  ;;  %v2153_v50 = vor.u32 %v2151_v19, %v2149_v51 }
 0x3ab   :  { %v16717_v58 = vld [vmem:[#allocation2 + $0x20] sm:$0xff]  ;;  %v2894_v38 = vor.u32 %v2893_v5, %v2890_v47 }
 0x3ac   :  { %v16719_v61 = vld [vmem:[#allocation2 + $0x20] sm:$0xff]  ;;  %2017 = vst.msk [vmem:[#allocation2 + $0x28] sm:$0xf] %vm2006_vm3, %v1991_v2  ;;  %11087 = vmatmul.msk.bf16.gmra.mxu3 %vm2230_vm6, %v16717_v58  ;;  %v2155_v8 = vshll.u32 %v16717_v58, 16  ;;  %v2459_v18 = vrot.slane %v16717_v58, 1 }
 0x3ad   :  { %v3570_v28 = vshrl.u32 %v16719_v61, 16  ;;  %v3573_v10 = vshll.u32 %v16719_v61, 16  ;;  %v3377_v21 = vrot.slane %v16719_v61, 2 }
 0x3ae   :  { %v2157_v3 = vrot.slane %v2155_v8, 1  ;;  %v16738_v48 = vsel %vm18442_vm7, %v2457_v63, %v2459_v18  ;;  %vm18467_vm7 = vmmov %vm18457_vm0 }
 0x3af   :  { %v16735_v46 = vpop.f32.mrf.mxu3  ;;  %v1944_v22 = vpop.f32.mrf.mxu1  ;;  %v3572_v24 = vrot.slane %v3570_v28, 2  ;;  %v3575_v7 = vrot.slane %v3573_v10, 3  ;;  %v16744_v14 = vsel %vm3124_vm13, %v3375_v33, %v3377_v21 }
 0x3b0   :  { %v1945_v32 = vadd.f32 %v1944_v22, %v1872_v31  ;;  %v2158_v2 = vsel %vm2122_vm14, %v2153_v50, %v2157_v3  ;;  %18443 = vst [vmem:[#allocation74_spill] sm:$0xff] %v16744_v14 }
 0x3b1   :  { %11066 = vmatmul.msk.bf16.gmra.mxu2 %vm2230_vm6, %v2158_v2  ;;  %v3576_v51 = vor.u32 %v3575_v7, %v3572_v24 }
 0x3b2   :  { %v1992_v29 = vpack.c.bf16 %v1945_v32, %v1945_v32 }
 0x3b3   :  { %v16747_v19 = vld [vmem:[#allocation2 + $0x24] sm:$0xff]  ;;  %v16751_v63 = vsel %vm3542_vm8, %v3567_v17, %v3576_v51  ;;  %v2895_v17 = vsel %vm2869_vm9, %v2885_v54, %v2894_v38  ;;  %v2900_v54 = vshll.u32 %v16697_v13, 16 }
 0x3b4   :  { %2018 = vst.msk [vmem:[#allocation2 + $0x2c] sm:$0xf] %vm2006_vm3, %v1992_v29  ;;  %v3132_v8 = vrot.slane %v16747_v19, 2  ;;  %v2706_v53 = vrot.slane %v16747_v19, 1 }
 0x3b5   :  { %18444 = vst [vmem:[#allocation77_spill] sm:$0xff] %v16751_v63 }
 0x3b6   :  { %v3133_v28 = vsel %vm3124_vm13, %v3130_v23, %v3132_v8  ;;  %v16759_v10 = vsel %vm18445_vm10, %v2704_v11, %v2706_v53  ;;  %v1804_v23 = vadd.f32 %v16396_v20, %v18446_v0  ;;  %v2897_v11 = vshrl.u32 %v16697_v13, 16  ;;  %vm18471_vm10 = vmmov %vm18457_vm0 }
 0x3b7   :  { %v1904_v33 = vpop.f32.mrf.mxu3  ;;  %v1947_v31 = vpop.f32.mrf.mxu1  ;;  %11206 = vmatmul.msk.bf16.gmra.mxu0 %vm2230_vm6, %v3133_v28 }
 0x3b8   :  { %v16761_v22 = vadd.f32 %v1904_v33, %v1832_v25  ;;  %v1948_v29 = vadd.f32 %v1947_v31, %v16535_v26  ;;  %v2159_v26 = vshrl.u32 %v16717_v58, 16  ;;  %v1877_v2 = vadd.f32 %v16540_v56, %v1804_v23 }
 0x3b9   :  { %v2899_v0 = vrot.slane %v2897_v11, 1  ;;  %v2902_v23 = vrot.slane %v2900_v54, 2 }
 0x3ba   :  { %v1993_v50 = vpack.c.bf16 %v1948_v29, %v1948_v29  ;;  %11184 = vmatmul.msk.bf16.gmra.mxu1 %vm2230_vm6, %v2895_v17  ;;  %v2161_v31 = vor.u32 %v2159_v26, %v2157_v3 }
 0x3bb   :  { %v14123_v32 = vld [vmem:[#allocation2 + $0x28] sm:$0xff]  ;;  %v2903_v26 = vor.u32 %v2902_v23, %v2899_v0 }
 0x3bc   :  { %v16767_v39 = vld [vmem:[#allocation2 + $0x28] sm:$0xff]  ;;  %2019 = vst.msk [vmem:[#allocation2 + $0x30] sm:$0xf] %vm2006_vm3, %v1993_v50  ;;  %11088 = vmatmul.msk.bf16.gmra.mxu3 %vm2230_vm6, %v14123_v32  ;;  %v2163_v24 = vshll.u32 %v14123_v32, 16  ;;  %v2461_v7 = vrot.slane %v14123_v32, 1 }
 0x3bd   :  { %v3579_v47 = vshrl.u32 %v16767_v39, 16  ;;  %v3582_v5 = vshll.u32 %v16767_v39, 16  ;;  %v3379_v20 = vrot.slane %v16767_v39, 2 }
 0x3be   :  { %v2165_v28 = vrot.slane %v2163_v24, 1  ;;  %v16781_v29 = vsel %vm18447_vm5, %v2459_v18, %v2461_v7  ;;  %vm18474_vm5 = vmmov %vm18457_vm0 }
 0x3bf   :  { %v1906_v25 = vpop.f32.mrf.mxu3  ;;  %v1949_v33 = vpop.f32.mrf.mxu1  ;;  %v3581_v17 = vrot.slane %v3579_v47, 2  ;;  %v3584_v50 = vrot.slane %v3582_v5, 3  ;;  %v16784_v13 = vsel %vm3124_vm13, %v3377_v21, %v3379_v20 }
 0x3c0   :  { %v1950_v58 = vadd.f32 %v1949_v33, %v1877_v2  ;;  %18448 = vst [vmem:[#allocation75_spill] sm:$0xff] %v16784_v13  ;;  %v2166_v56 = vsel %vm2122_vm14, %v2161_v31, %v2165_v28  ;;  %v18451_v33 = vld [vmem:[#allocation86_spill] sm:$0xff] }
 0x3c1   :  { %11067 = vmatmul.msk.bf16.gmra.mxu2 %vm2230_vm6, %v2166_v56  ;;  %v3585_v25 = vor.u32 %v3584_v50, %v3581_v17  ;;  %v1809_v31 = vadd.f32 %v16410_v12, %v18451_v33 }
 0x3c2   :  { %v1994_v55 = vpack.c.bf16 %v1950_v58, %v1950_v58  ;;  %v2909_v58 = vshll.u32 %v16747_v19, 16 }
 0x3c3   :  { %v16788_v14 = vld [vmem:[#allocation2 + $0x2c] sm:$0xff]  ;;  %v16792_v18 = vsel %vm3542_vm8, %v3576_v51, %v3585_v25  ;;  %v1882_v17 = vadd.f32 %v16558_v35, %v1809_v31 }
 0x3c4   :  { %2020 = vst.msk [vmem:[#allocation2 + $0x34] sm:$0xf] %vm2006_vm3, %v1994_v55  ;;  %v3134_v3 = vrot.slane %v16788_v14, 2  ;;  %v2708_v21 = vrot.slane %v16788_v14, 1  ;;  %v2904_v55 = vsel %vm2869_vm9, %v2894_v38, %v2903_v26  ;;  %v2911_v33 = vrot.slane %v2909_v58, 2 }
 0x3c5   :  { %18449 = vst [vmem:[#allocation79_spill] sm:$0xff] %v16792_v18 }
 0x3c6   :  { %v3135_v11 = vsel %vm3124_vm13, %v3132_v8, %v3134_v3  ;;  %v16798_v54 = vsel %vm18450_vm2, %v2706_v53, %v2708_v21  ;;  %v2906_v8 = vshrl.u32 %v16747_v19, 16  ;;  %vm18481_vm2 = vmmov %vm18457_vm0 }
 0x3c7   :  { %v1952_v24 = vpop.f32.mrf.mxu1  ;;  %11207 = vmatmul.msk.bf16.gmra.mxu0 %vm2230_vm6, %v3135_v11 }
 0x3c8   :  { %v1953_v2 = vadd.f32 %v1952_v24, %v16546_v59  ;;  %v2167_v59 = vshrl.u32 %v14123_v32, 16 }
 0x3ca   :  { %v1995_v47 = vpack.c.bf16 %v1953_v2, %v1953_v2  ;;  %11185 = vmatmul.msk.bf16.gmra.mxu1 %vm2230_vm6, %v2904_v55  ;;  %v2169_v23 = vor.u32 %v2167_v59, %v2165_v28 }
 0x3cb   :  { %v14124_v51 = vld [vmem:[#allocation2 + $0x30] sm:$0xff] }
 0x3cc   :  { %v16804_v5 = vld [vmem:[#allocation2 + $0x30] sm:$0xff]  ;;  %2021 = vst.msk [vmem:[#allocation2 + $0x38] sm:$0xf] %vm2006_vm3, %v1995_v47  ;;  %11089 = vmatmul.msk.bf16.gmra.mxu3 %vm2230_vm6, %v14124_v51  ;;  %v2171_v53 = vshll.u32 %v14124_v51, 16  ;;  %v2463_v38 = vrot.slane %v14124_v51, 1  ;;  %v2908_v47 = vrot.slane %v2906_v8, 1 }
 0x3cd   :  { %v3588_v50 = vshrl.u32 %v16804_v5, 16  ;;  %v3591_v56 = vshll.u32 %v16804_v5, 16  ;;  %v3381_v0 = vrot.slane %v16804_v5, 2 }
 0x3ce   :  { %v2173_v24 = vrot.slane %v2171_v53, 1  ;;  %v16817_v11 = vsel %vm18452_vm11, %v2461_v7, %v2463_v38  ;;  %v2912_v59 = vor.u32 %v2911_v33, %v2908_v47  ;;  %vm18482_vm11 = vmmov %vm18457_vm0 }
 0x3cf   :  { %v1954_v12 = vpop.f32.mrf.mxu1  ;;  %v3590_v32 = vrot.slane %v3588_v50, 2  ;;  %v3593_v55 = vrot.slane %v3591_v56, 3  ;;  %v16820_v19 = vsel %vm3124_vm13, %v3379_v20, %v3381_v0 }
 0x3d0   :  { %v1955_v2 = vadd.f32 %v1954_v12, %v1882_v17  ;;  %18453 = vst [vmem:[#allocation81_spill] sm:$0xff] %v16820_v19  ;;  %v2174_v35 = vsel %vm2122_vm14, %v2169_v23, %v2173_v24  ;;  %v2913_v50 = vsel %vm2869_vm9, %v2903_v26, %v2912_v59  ;;  %v18456_v23 = vld [vmem:[#allocation87_spill] sm:$0xff] }
 0x3d1   :  { %11068 = vmatmul.msk.bf16.gmra.mxu2 %vm2230_vm6, %v2174_v35  ;;  %v3594_v13 = vor.u32 %v3593_v55, %v3590_v32  ;;  %v2918_v32 = vshll.u32 %v16788_v14, 16 }
 0x3d2   :  { %v1996_v31 = vpack.c.bf16 %v1955_v2, %v1955_v2  ;;  %v1814_v2 = vadd.f32 %v16430_v6, %v18456_v23 }
 0x3d3   :  { %v16824_v18 = vld [vmem:[#allocation2 + $0x34] sm:$0xff]  ;;  %v16828_v7 = vsel %vm3542_vm8, %v3585_v25, %v3594_v13  ;;  %v2920_v23 = vrot.slane %v2918_v32, 2 }
 0x3d4   :  { %2022 = vst.msk [vmem:[#allocation2 + $0x3c] sm:$0xf] %vm2006_vm3, %v1996_v31  ;;  %v3136_v28 = vrot.slane %v16824_v18, 2  ;;  %v2710_v20 = vrot.slane %v16824_v18, 1  ;;  %v1887_v55 = vadd.f32 %v16581_v60, %v1814_v2 }
 0x3d5   :  { %18454 = vst [vmem:[#allocation43_spill] sm:$0xff] %v16828_v7 }
 0x3d6   :  { %v3137_v8 = vsel %vm3124_vm13, %v3134_v3, %v3136_v28  ;;  %v16834_v58 = vsel %vm18455_vm12, %v2708_v21, %v2710_v20  ;;  %v2915_v3 = vshrl.u32 %v16788_v14, 16 }
 0x3d7   :  { %v1957_v53 = vpop.f32.mrf.mxu1  ;;  %11208 = vmatmul.msk.bf16.gmra.mxu0 %vm2230_vm6, %v3137_v8 }
 0x3d8   :  { %v1958_v17 = vadd.f32 %v1957_v53, %v16563_v37  ;;  %v2175_v37 = vshrl.u32 %v14124_v51, 16 }
 0x3da   :  { %v1997_v56 = vpack.c.bf16 %v1958_v17, %v1958_v17  ;;  %11186 = vmatmul.msk.bf16.gmra.mxu1 %vm2230_vm6, %v2913_v50  ;;  %v2177_v31 = vor.u32 %v2175_v37, %v2173_v24 }
 0x3db   :  { %v14125_v25 = vld [vmem:[#allocation2 + $0x38] sm:$0xff] }
 0x3dc   :  { %v16840_v12 = vld [vmem:[#allocation2 + $0x38] sm:$0xff]  ;;  %2023 = vst.msk [vmem:[#allocation2 + $0x40] sm:$0xf] %vm2006_vm3, %v1997_v56  ;;  %11090 = vmatmul.msk.bf16.gmra.mxu3 %vm2230_vm6, %v14125_v25  ;;  %v2179_v21 = vshll.u32 %v14125_v25, 16  ;;  %v2465_v26 = vrot.slane %v14125_v25, 1  ;;  %v2917_v56 = vrot.slane %v2915_v3, 1 }
 0x3dd   :  { %v3597_v35 = vshrl.u32 %v16840_v12, 16  ;;  %v3600_v47 = vshll.u32 %v16840_v12, 16  ;;  %v3383_v33 = vrot.slane %v16840_v12, 2 }
 0x3de   :  { %v2181_v53 = vrot.slane %v2179_v21, 1  ;;  %v16853_v8 = vsel %vm18457_vm0, %v2463_v38, %v2465_v26  ;;  %v2921_v37 = vor.u32 %v2920_v23, %v2917_v56 }
 0x3df   :  { %v1959_v6 = vpop.f32.mrf.mxu1  ;;  %v3599_v51 = vrot.slane %v3597_v35, 2  ;;  %v3602_v50 = vrot.slane %v3600_v47, 3  ;;  %v16856_v14 = vsel %vm3124_vm13, %v3381_v0, %v3383_v33 }
 0x3e0   :  { %v1960_v17 = vadd.f32 %v1959_v6, %v1887_v55  ;;  %18458 = vst [vmem:[#allocation45_spill] sm:$0xff] %v16856_v14  ;;  %v2182_v60 = vsel %vm2122_vm14, %v2177_v31, %v2181_v53  ;;  %v2922_v35 = vsel %vm2869_vm9, %v2912_v59, %v2921_v37  ;;  %v18461_v31 = vld [vmem:[#allocation89_spill] sm:$0xff] }
 0x3e1   :  { %11069 = vmatmul.msk.bf16.gmra.mxu2 %vm2230_vm6, %v2182_v60  ;;  %v3603_v19 = vor.u32 %v3602_v50, %v3599_v51 }
 0x3e2   :  { %v1998_v2 = vpack.c.bf16 %v1960_v17, %v1960_v17  ;;  %v1819_v17 = vadd.f32 %v16450_v27, %v18461_v31 }
 0x3e3   :  { %v16860_v7 = vld [vmem:[#allocation2 + $0x3c] sm:$0xff]  ;;  %v16864_v38 = vsel %vm3542_vm8, %v3594_v13, %v3603_v19 }
 0x3e4   :  { %2024 = vst.msk [vmem:[#allocation2 + $0x44] sm:$0xf] %vm2006_vm3, %v1998_v2  ;;  %v3138_v24 = vrot.slane %v16860_v7, 2  ;;  %v2712_v0 = vrot.slane %v16860_v7, 1  ;;  %v1892_v50 = vadd.f32 %v16627_v30, %v1819_v17 }
 0x3e5   :  { %18459 = vst [vmem:[#allocation83_spill] sm:$0xff] %v16864_v38 }
 0x3e6   :  { %v3139_v3 = vsel %vm3124_vm13, %v3136_v28, %v3138_v24  ;;  %v16870_v32 = vsel %vm18460_vm4, %v2710_v20, %v2712_v0  ;;  %v2924_v28 = vshrl.u32 %v16824_v18, 16  ;;  %v2927_v20 = vshll.u32 %v16824_v18, 16 }
 0x3e7   :  { %v1962_v21 = vpop.f32.mrf.mxu1  ;;  %11209 = vmatmul.msk.bf16.gmra.mxu0 %vm2230_vm6, %v3139_v3 }
 0x3e8   :  { %v1963_v55 = vadd.f32 %v1962_v21, %v16602_v45  ;;  %v2183_v45 = vshrl.u32 %v14125_v25, 16  ;;  %v2926_v31 = vrot.slane %v2924_v28, 1  ;;  %v2929_v17 = vrot.slane %v2927_v20, 2 }
 0x3ea   :  { %v1999_v47 = vpack.c.bf16 %v1963_v55, %v1963_v55  ;;  %11187 = vmatmul.msk.bf16.gmra.mxu1 %vm2230_vm6, %v2922_v35  ;;  %v2185_v21 = vor.u32 %v2183_v45, %v2181_v53  ;;  %v2930_v45 = vor.u32 %v2929_v17, %v2926_v31 }
 0x3eb   :  { %v16876_v13 = vld [vmem:[#allocation2 + $0x40] sm:$0xff] }
 0x3ec   :  { %v16878_v6 = vld [vmem:[#allocation2 + $0x40] sm:$0xff]  ;;  %2025 = vst.msk [vmem:[#allocation2 + $0x48] sm:$0xf] %vm2006_vm3, %v1999_v47  ;;  %11091 = vmatmul.msk.bf16.gmra.mxu3 %vm2230_vm6, %v16876_v13  ;;  %v2187_v59 = vshll.u32 %v16876_v13, 16  ;;  %v2467_v51 = vrot.slane %v16876_v13, 1 }
 0x3ed   :  { %v3606_v60 = vshrl.u32 %v16878_v6, 16  ;;  %v3609_v27 = vshll.u32 %v16878_v6, 16  ;;  %v3385_v56 = vrot.slane %v16878_v6, 2 }
 0x3ee   :  { %v2189_v3 = vrot.slane %v2187_v59, 1  ;;  %v16896_v25 = vsel %vm18462_vm1, %v2465_v26, %v2467_v51 }
 0x3ef   :  { %v1964_v23 = vpop.f32.mrf.mxu1  ;;  %v16893_v2 = vpop.f32.mrf.mxu3  ;;  %v3608_v18 = vrot.slane %v3606_v60, 2  ;;  %v3611_v35 = vrot.slane %v3609_v27, 3  ;;  %v16899_v47 = vsel %vm3124_vm13, %v3383_v33, %v3385_v56 }
 0x3f0   :  { %v1965_v55 = vadd.f32 %v1964_v23, %v1892_v50  ;;  %18463 = vst [vmem:[#allocation44_spill] sm:$0xff] %v16899_v47  ;;  %v2190_v30 = vsel %vm2122_vm14, %v2185_v21, %v2189_v3  ;;  %v18466_v21 = vld [vmem:[#allocation91_spill] sm:$0xff] }
 0x3f1   :  { %11070 = vmatmul.msk.bf16.gmra.mxu2 %vm2230_vm6, %v2190_v30  ;;  %v3612_v38 = vor.u32 %v3611_v35, %v3608_v18 }
 0x3f2   :  { %v2000_v14 = vpack.c.bf16 %v1965_v55, %v1965_v55  ;;  %v1824_v55 = vadd.f32 %v16470_v40, %v18466_v21 }
 0x3f3   :  { %v16903_v41 = vld [vmem:[#allocation2 + $0x44] sm:$0xff]  ;;  %v16907_v26 = vsel %vm3542_vm8, %v3603_v19, %v3612_v38  ;;  %v2931_v19 = vsel %vm2869_vm9, %v2921_v37, %v2930_v45 }
 0x3f4   :  { %2026 = vst.msk [vmem:[#allocation2 + $0x4c] sm:$0xf] %vm2006_vm3, %v2000_v14  ;;  %v3140_v53 = vrot.slane %v16903_v41, 2  ;;  %v2714_v33 = vrot.slane %v16903_v41, 1  ;;  %v1897_v35 = vadd.f32 %v16682_v4, %v1824_v55 }
 0x3f5   :  { %18464 = vst [vmem:[#allocation46_spill] sm:$0xff] %v16907_v26 }
 0x3f6   :  { %v3141_v28 = vsel %vm3124_vm13, %v3138_v24, %v3140_v53  ;;  %v16915_v20 = vsel %vm18465_vm15, %v2712_v0, %v2714_v33  ;;  %v2933_v24 = vshrl.u32 %v16860_v7, 16  ;;  %v2936_v0 = vshll.u32 %v16860_v7, 16 }
 0x3f7   :  { %v1967_v59 = vpop.f32.mrf.mxu1  ;;  %v16911_v50 = vpop.f32.mrf.mxu3  ;;  %11210 = vmatmul.msk.bf16.gmra.mxu0 %vm2230_vm6, %v3141_v28 }
 0x3f8   :  { %v1968_v60 = vadd.f32 %v1967_v59, %v16658_v57  ;;  %v2191_v57 = vshrl.u32 %v16876_v13, 16  ;;  %v2935_v55 = vrot.slane %v2933_v24, 1 }
 0x3fa   :  { %v2001_v14 = vpack.c.bf16 %v1968_v60, %v1968_v60  ;;  %11188 = vmatmul.msk.bf16.gmra.mxu1 %vm2230_vm6, %v2931_v19  ;;  %v2193_v59 = vor.u32 %v2191_v57, %v2189_v3  ;;  %v2938_v3 = vrot.slane %v2936_v0, 2 }
 0x3fb   :  { %v16921_v27 = vld [vmem:[#allocation2 + $0x48] sm:$0xff] }
 0x3fc   :  { %v16923_v23 = vld [vmem:[#allocation2 + $0x48] sm:$0xff]  ;;  %2027 = vst.msk [vmem:[#allocation2 + $0x50] sm:$0xf] %vm2006_vm3, %v2001_v14  ;;  %11092 = vmatmul.msk.bf16.gmra.mxu3 %vm2230_vm6, %v16921_v27  ;;  %v2195_v37 = vshll.u32 %v16921_v27, 16  ;;  %v2469_v18 = vrot.slane %v16921_v27, 1 }
 0x3fd   :  { %v3615_v30 = vshrl.u32 %v16923_v23, 16  ;;  %v3618_v40 = vshll.u32 %v16923_v23, 16  ;;  %v18282_v31 = vrot.slane %v16923_v23, 2 }
 0x3fe   :  { %v2197_v28 = vrot.slane %v2195_v37, 1  ;;  %v16942_v13 = vsel %vm18467_vm7, %v2467_v51, %v2469_v18 }
 0x3ff   :  { %v1969_v17 = vpop.f32.mrf.mxu1  ;;  %v16944_v7 = vpop.f32.mrf.mxu3  ;;  %v3617_v19 = vrot.slane %v3615_v30, 2  ;;  %v3620_v14 = vrot.slane %v3618_v40, 3  ;;  %v16949_v4 = vsel %vm3124_vm13, %v3385_v56, %v18282_v31 }
 0x400   :  { %v1970_v60 = vadd.f32 %v1969_v17, %v1897_v35  ;;  %18468 = vst [vmem:[#allocation65_spill] sm:$0xff] %v16949_v4  ;;  %v2198_v21 = vsel %vm2122_vm14, %v2193_v59, %v2197_v28  ;;  %v16962_v17 = vor.u32 %v2938_v3, %v2935_v55  ;;  %v14146_v59 = vld [vmem:[#allocation14 + $0x38] sm:$0xff]  ;;  %v18472_v55 = vld [vmem:[#allocation93_spill] sm:$0xff] }
 0x401   :  { %11071 = vmatmul.msk.bf16.gmra.mxu2 %vm2230_vm6, %v2198_v21  ;;  %v3621_v37 = vor.u32 %v3620_v14, %v3617_v19  ;;  %2776 = vmatpush.bf16.msra.mxu3 %v14146_v59  ;;  %v1829_v3 = vadd.f32 %v16490_v43, %v18472_v55  ;;  %v2942_v59 = vshrl.u32 %v16903_v41, 16 }
 0x402   :  { %v2002_v57 = vpack.c.bf16 %v1970_v60, %v1970_v60 }
 0x403   :  { %v16953_v51 = vld [vmem:[#allocation2 + $0x4c] sm:$0xff]  ;;  %v16957_v35 = vsel %vm3542_vm8, %v3612_v38, %v3621_v37 }
 0x404   :  { %2028 = vst.msk [vmem:[#allocation2 + $0x54] sm:$0xf] %vm2006_vm3, %v2002_v57  ;;  %v2276_v30 = vpop.f32.mrf.mxu2  ;;  %v16959_v40 = vpop.f32.mrf.mxu0  ;;  %v18281_v56 = vrot.slane %v16953_v51, 2  ;;  %v18280_v24 = vrot.slane %v16953_v51, 1 }
 0x405   :  { %18469 = vst [vmem:[#allocation66_spill] sm:$0xff] %v16957_v35  ;;  %v16966_v0 = vadd.f32 %v16893_v2, %v2276_v30  ;;  %v2940_v2 = vsel %vm2869_vm9, %v2930_v45, %v16962_v17  ;;  %v2199_v45 = vshrl.u32 %v16921_v27, 16 }
 0x406   :  { %18470 = vst [vmem:[#allocation76_spill] sm:$0xff] %v16959_v40  ;;  %v3143_v19 = vsel %vm3124_vm13, %v3140_v53, %v18281_v56  ;;  %v16974_v38 = vsel %vm18471_vm10, %v2714_v33, %v18280_v24  ;;  %v14145_v53 = vld [vmem:[#allocation14 + $0x30] sm:$0xff]  ;;  %vm18527_vm10 = vmmov %vm18481_vm2 }
 0x407   :  { %v1972_v60 = vpop.f32.mrf.mxu1  ;;  %v16977_v21 = vpop.f32.mrf.mxu3  ;;  %11211 = vmatmul.msk.bf16.gmra.mxu0 %vm2230_vm6, %v3143_v19  ;;  %2777 = vmatpush.bf16.msra.mxu3 %v14145_v53  ;;  %v2201_v24 = vor.u32 %v2199_v45, %v2197_v28  ;;  %v2944_v45 = vrot.slane %v2942_v59, 1 }
 0x408   :  { %v1973_v14 = vadd.f32 %v1972_v60, %v16711_v44  ;;  %v1902_v44 = vadd.f32 %v16735_v46, %v1829_v3 }
 0x40a   :  { %v2003_v57 = vpack.c.bf16 %v1973_v14, %v1973_v14  ;;  %11189 = vmatmul.msk.bf16.gmra.mxu1 %vm2230_vm6, %v2940_v2  ;;  %v2945_v14 = vshll.u32 %v16903_v41, 16 }
 0x40b   :  { %v16985_v30 = vld [vmem:[#allocation2 + $0x50] sm:$0xff] }
 0x40c   :  { %v16987_v33 = vld [vmem:[#allocation2 + $0x50] sm:$0xff]  ;;  %2029 = vst.msk [vmem:[#allocation2 + $0x58] sm:$0xf] %vm2006_vm3, %v2003_v57  ;;  %v2278_v60 = vpop.f32.mrf.mxu2  ;;  %11093 = vmatmul.msk.bf16.gmra.mxu3 %vm2230_vm6, %v16985_v30  ;;  %v16994_v43 = vpop.f32.mrf.mxu0  ;;  %v2203_v19 = vshll.u32 %v16985_v30, 16  ;;  %v2471_v2 = vrot.slane %v16985_v30, 1 }
 0x40d   :  { %18473 = vst [vmem:[#allocation67_spill] sm:$0xff] %v16994_v43  ;;  %v17001_v46 = vadd.f32 %v16911_v50, %v2278_v60  ;;  %v3624_v55 = vshrl.u32 %v16987_v33, 16  ;;  %v3627_v3 = vshll.u32 %v16987_v33, 16  ;;  %v18283_v57 = vrot.slane %v16987_v33, 2 }
 0x40e   :  { %v2205_v56 = vrot.slane %v2203_v19, 1  ;;  %v17009_v31 = vsel %vm18474_vm5, %v2469_v18, %v2471_v2  ;;  %v18475_v60 = vrot.slane %v16923_v23, 2  ;;  %v2947_v19 = vrot.slane %v2945_v14, 2 }
 0x40f   :  { %v1974_v53 = vpop.f32.mrf.mxu1  ;;  %v17011_v43 = vpop.f32.mrf.mxu3  ;;  %v3626_v40 = vrot.slane %v3624_v55, 2  ;;  %v3629_v50 = vrot.slane %v3627_v3, 3 }
 0x410   :  { %v1975_v41 = vadd.f32 %v1974_v53, %v1902_v44  ;;  %v17018_v4 = vsel %vm3124_vm13, %v18475_v60, %v18283_v57  ;;  %v2206_v28 = vsel %vm2122_vm14, %v2201_v24, %v2205_v56  ;;  %v17031_v59 = vor.u32 %v2947_v19, %v2944_v45 }
 0x411   :  { %18476 = vst [vmem:[#allocation68_spill] sm:$0xff] %v17018_v4  ;;  %11072 = vmatmul.msk.bf16.gmra.mxu2 %vm2230_vm6, %v2206_v28  ;;  %v3630_v18 = vor.u32 %v3629_v50, %v3626_v40  ;;  %v18479_v28 = vrot.slane %v16953_v51, 2  ;;  %v2951_v4 = vshrl.u32 %v16953_v51, 16 }
 0x412   :  { %v2004_v27 = vpack.c.bf16 %v1975_v41, %v1975_v41 }
 0x413   :  { %v17022_v44 = vld [vmem:[#allocation2 + $0x54] sm:$0xff]  ;;  %v17026_v47 = vsel %vm3542_vm8, %v3621_v37, %v3630_v18  ;;  %v2953_v42 = vrot.slane %v2951_v4, 1 }
 0x414   :  { %v2059_v53 = vld [vmem:[#allocation2 + $0x58] sm:$0x3]  ;;  %2030 = vst.msk [vmem:[#allocation2 + $0x5c] sm:$0xf] %vm2006_vm3, %v2004_v27  ;;  %v2281_v60 = vpop.f32.mrf.mxu2  ;;  %v17028_v57 = vpop.f32.mrf.mxu0  ;;  %v3144_v24 = vrot.slane %v17022_v44, 2  ;;  %v18284_v14 = vrot.slane %v17022_v44, 1 }
 0x415   :  { %v2054_v55 = vld [vmem:[#allocation2 + $0x58] sm:$0x1]  ;;  %v2109_v3 = vunpack.c.l.b16 %v2059_v53  ;;  %18477 = vst [vmem:[#allocation78_spill] sm:$0xff] %v17026_v47  ;;  %v17035_v40 = vadd.f32 %v16944_v7, %v2281_v60 }
 0x416   :  { %18478 = vst [vmem:[#allocation88_spill] sm:$0xff] %v17028_v57  ;;  %v3145_v37 = vsel %vm3124_vm13, %v18479_v28, %v3144_v24  ;;  %v2336_v27 = vunpack.c.l.b16 %v2054_v55  ;;  %v14134_v53 = vld [vmem:[#allocation14 + $0x28] sm:$0xff]  ;;  %v18480_v57 = vrot.slane %v16953_v51, 1  ;;  %v2949_v55 = vsel %vm2869_vm9, %v16962_v17, %v17031_v59 }
 0x417   :  { %v17037_v41 = vpack.c.b16 %v2109_v3, %v2109_v3  ;;  %v1977_v50 = vpop.f32.mrf.mxu1  ;;  %v17050_v7 = vpop.f32.mrf.mxu3  ;;  %11212 = vmatmul.msk.bf16.gmra.mxu0 %vm2230_vm6, %v3145_v37  ;;  %2529 = vmatpush.bf16.msra.mxu2 %v14134_v53  ;;  %v2954_v53 = vshll.u32 %v16953_v51, 16  ;;  %v14133_v51 = vld [vmem:[#allocation14 + $0x20] sm:$0xff] }
 0x418   :  { %v17047_v45 = vsel %vm18481_vm2, %v18480_v57, %v18284_v14  ;;  %v1978_v19 = vadd.f32 %v1977_v50, %v16761_v22  ;;  %v2337_v57 = vpack.c.b16 %v2336_v27, %v2336_v27  ;;  %v2207_v14 = vshrl.u32 %v16985_v30, 16 }
 0x419   :  { %v18285_v3 = vrot.slane %v17037_v41, 1  ;;  %v2211_v60 = vshll.u32 %v17037_v41, 16 }
 0x41a   :  { %v2005_v28 = vpack.c.bf16 %v1978_v19, %v1978_v19  ;;  %11190 = vmatmul.msk.bf16.gmra.mxu1 %vm2230_vm6, %v2949_v55  ;;  %v2209_v30 = vor.u32 %v2207_v14, %v2205_v56 }
 0x41b   :  { %v17062_v22 = vsel %vm18482_vm11, %v2471_v2, %v18285_v3  ;;  %v2861_v50 = vld [vmem:[#allocation2 + $0x5c] sm:$0x7]  ;;  %v2213_v2 = vrot.slane %v2211_v60, 1  ;;  %v18484_v60 = vrot.slane %v16987_v33, 2  ;;  %2530 = vmatpush.bf16.msra.mxu2 %v14133_v51 }
 0x41c   :  { %v17064_v37 = vld [vmem:[#allocation2 + $0x58] sm:$0xff]  ;;  %2031 = vst.msk [vmem:[#allocation2 + $0x60] sm:$0xf] %vm2006_vm3, %v2005_v28  ;;  %v2867_v17 = vunpack.c.l.b16 %v2861_v50  ;;  %v2283_v19 = vpop.f32.mrf.mxu2  ;;  %11094 = vmatmul.msk.bf16.gmra.mxu3 %vm2230_vm6, %v2337_v57  ;;  %v17071_v55 = vpop.f32.mrf.mxu0  ;;  %vm18493_vm3 = vmmov %vm18457_vm0 }
 0x41d   :  { %18483 = vst [vmem:[#allocation80_spill] sm:$0xff] %v17071_v55  ;;  %v3633_v27 = vshrl.u32 %v17064_v37, 16  ;;  %v3636_v3 = vshll.u32 %v17064_v37, 16  ;;  %v18286_v47 = vrot.slane %v17064_v37, 2  ;;  %v17077_v28 = vadd.f32 %v16977_v21, %v2283_v19 }
 0x41e   :  { %v17079_v35 = vpack.c.b16 %v2867_v17, %v2867_v17  ;;  %v2214_v1 = vsel %vm2122_vm14, %v2209_v30, %v2213_v2  ;;  %v2956_v21 = vrot.slane %v2954_v53, 2 }
 0x41f   :  { %v1979_v50 = vpop.f32.mrf.mxu1  ;;  %v3635_v26 = vrot.slane %v3633_v27, 2  ;;  %v3638_v63 = vrot.slane %v3636_v3, 3  ;;  %v17086_v57 = vsel %vm3124_vm13, %v18484_v60, %v18286_v47  ;;  %v2399_v55 = vpop.f32.mrf.mxu3 }
 0x420   :  { %18485 = vst [vmem:[#allocation94_spill] sm:$0xff] %v17086_v57  ;;  %v3146_v14 = vrot.slane %v17079_v35, 2  ;;  %v2957_v60 = vor.u32 %v2956_v21, %v2953_v42 }
 0x421   :  { %v3639_v56 = vor.u32 %v3638_v63, %v3635_v26  ;;  %11073 = vmatmul.msk.bf16.gmra.mxu2 %vm2230_vm6, %v2214_v1 }
 0x422   :  { %v3147_v1 = vsel %vm3124_vm13, %v3144_v24, %v3146_v14  ;;  %v2958_v30 = vsel %vm2869_vm9, %v17031_v59, %v2957_v60  ;;  %v2215_v59 = vshrl.u32 %v17037_v41, 16 }
 0x423   :  { %v3534_v17 = vld [vmem:[#allocation2 + $0x60] sm:$0xf]  ;;  %v17092_v3 = vsel %vm3542_vm8, %v3630_v18, %v3639_v56 }
 0x424   :  { %v3540_v19 = vunpack.c.l.b16 %v3534_v17  ;;  %v2286_v27 = vpop.f32.mrf.mxu2  ;;  %v17094_v50 = vpop.f32.mrf.mxu0  ;;  %v2960_v17 = vshrl.u32 %v17022_v44, 16 }
 0x425   :  { %18486 = vst [vmem:[#allocation71_spill] sm:$0xff] %v17094_v50  ;;  %v17097_v47 = vadd.f32 %v17011_v43, %v2286_v27 }
 0x426   :  { %v17099_v4 = vpack.c.b16 %v3540_v19, %v3540_v19  ;;  %v2963_v19 = vshll.u32 %v17022_v44, 16 }
 0x427   :  { %v17101_v53 = vpop.f32.mrf.mxu1  ;;  %v2401_v63 = vpop.f32.mrf.mxu3  ;;  %11213 = vmatmul.msk.bf16.gmra.mxu0 %vm2230_vm6, %v3147_v1 }
 0x428   :  { %v3642_v26 = vshrl.u32 %v17099_v4, 16  ;;  %v3645_v18 = vshll.u32 %v17099_v4, 16 }
 0x42a   :  { %11191 = vmatmul.msk.bf16.gmra.mxu1 %vm2230_vm6, %v2958_v30  ;;  %v3644_v42 = vrot.slane %v3642_v26, 2  ;;  %v3647_v43 = vrot.slane %v3645_v18, 3  ;;  %v2217_v30 = vor.u32 %v2215_v59, %v2213_v2  ;;  %v14876_v2 = vld [vmem:[#allocation2] sm:$0xe] }
 0x42c   :  { %v17110_v51 = vor.u32 %v3647_v43, %v3644_v42  ;;  %v2288_v21 = vpop.f32.mrf.mxu2  ;;  %11163 = vmatmul.msk.bf16.vlgmr.msra.gmra.mxu3 %vm2230_vm6, %v16600_v15  ;;  %v17114_v24 = vpop.f32.mrf.mxu0  ;;  %v2962_v15 = vrot.slane %v2960_v17, 1  ;;  %v2965_v42 = vrot.slane %v2963_v19, 2 }
 0x42d   :  { %18488 = vst [vmem:[#allocation90_spill] sm:$0xff] %v17114_v24  ;;  %v17119_v27 = vadd.f32 %v17050_v7, %v2288_v21 }
 0x42e   :  { %18487 = vst [vmem:[#allocation70_spill] sm:$0xff] %v17110_v51  ;;  %v17124_v1 = vsel %vm3542_vm8, %v3639_v56, %v17110_v51  ;;  %v2966_v50 = vor.u32 %v2965_v42, %v2962_v15  ;;  %v14875_v56 = vld [vmem:[#allocation2] sm:$0xf0] }
 0x42f   :  { %v17126_v26 = vpop.f32.mrf.mxu1  ;;  %v2404_v18 = vpop.f32.mrf.mxu3  ;;  %v14877_v17 = vor.u32 %v14876_v2, %v14875_v56 }
 0x430   :  { %v2967_v51 = vsel %vm2869_vm9, %v2957_v60, %v2966_v50 }
 0x431   :  { %11074 = vmatmul.msk.bf16.gmra.mxu2 %vm2230_vm6, %v2217_v30  ;;  %v2972_v30 = vshll.u32 %v17079_v35, 16  ;;  %v2452_v42 = vrot.slane %v14877_v17, 1  ;;  %v14165_v17 = vld [vmem:[#allocation14 + $0x80] sm:$0xff] }
 0x433   :  { %v2974_v2 = vrot.slane %v2972_v30, 2 }
 0x434   :  { %v2291_v43 = vpop.f32.mrf.mxu2  ;;  %v17129_v24 = vpop.f32.mrf.mxu0 }
 0x435   :  { %18489 = vst [vmem:[#allocation82_spill] sm:$0xff] %v17129_v24  ;;  %v17131_v7 = vadd.f32 %v2399_v55, %v2291_v43  ;;  %v2969_v55 = vshrl.u32 %v17079_v35, 16 }
 0x437   :  { %v17133_v21 = vpop.f32.mrf.mxu1  ;;  %v2406_v57 = vpop.f32.mrf.mxu3  ;;  %11214 = vmatmul.msk.bf16.gmra.mxu0 %vm2230_vm6, %v3146_v14  ;;  %v2971_v56 = vrot.slane %v2969_v55, 1 }
 0x439   :  { %v2975_v35 = vor.u32 %v2974_v2, %v2971_v56 }
 0x43a   :  { %11192 = vmatmul.msk.bf16.gmra.mxu1 %vm2230_vm6, %v2967_v51  ;;  %v18492_v51 = vrot.slane %v16570_v34, 1 }
 0x43b   :  { %v2976_v34 = vsel %vm2869_vm9, %v2966_v50, %v2975_v35  ;;  %vm18501_vm9 = vcmask 1044480  }
 0x43c   :  { %v2293_v19 = vpop.f32.mrf.mxu2  ;;  %11164 = vmatmul.msk.bf16.gmra.mxu3 %vm2230_vm6, %v16656_v52  ;;  %v17140_v59 = vpop.f32.mrf.mxu0  ;;  %v2454_v43 = vsel %vm18493_vm3, %v2452_v42, %v18492_v51  ;;  %v14166_v52 = vld [vmem:[#allocation14 + $0x88] sm:$0xff]  ;;  %vm18504_vm12 = vmmov %vm18501_vm9 }
 0x43d   :  { %18490 = vst [vmem:[#allocation92_spill] sm:$0xff] %v17140_v59  ;;  %v17144_v15 = vadd.f32 %v2401_v63, %v2293_v19  ;;  %3875 = vmatpush.bf16.msrb.mxu1 %v14166_v52  ;;  %vm18508_vm0 = vmmov %vm18501_vm9 }
 0x43e   :  { %vm18512_vm4 = vmmov %vm18508_vm0 }
 0x43f   :  { %v17146_v14 = vpop.f32.mrf.mxu1  ;;  %v2409_v60 = vpop.f32.mrf.mxu3  ;;  %vm18517_vm1 = vmmov %vm18508_vm0 }
 0x440   :  { %18491 = vst [vmem:[#allocation84_spill] sm:$0xff] %v17146_v14  ;;  %vm18522_vm15 = vmmov %vm18508_vm0 }
 0x441   :  { %11103 = vmatmul.msk.bf16.vlgmr.msra.gmra.mxu2 %vm2230_vm6, %v2454_v43  ;;  %3876 = vmatpush.bf16.msrb.mxu1 %v14165_v17  ;;  %v3789_v17 = vld [vmem:[#allocation2 + $0x8] sm:$0x8]  ;;  %vm18525_vm7 = vmmov %vm18508_vm0 }
 0x442   :  { %vm18530_vm5 = vmmov %vm18508_vm0 }
 0x443   :  { %vm18531_vm2 = vmmov %vm18508_vm0 }
 0x444   :  { %v2296_v59 = vpop.f32.mrf.mxu2  ;;  %v17152_v24 = vpop.f32.mrf.mxu0  ;;  %vm18533_vm11 = vmmov %vm18508_vm0 }
 0x445   :  { %18494 = vst [vmem:[#allocation85_spill] sm:$0xff] %v17152_v24  ;;  %v17154_v63 = vadd.f32 %v2404_v18, %v2296_v59  ;;  %vm18536_vm3 = vmmov %vm18508_vm0 }
 0x447   :  { %v17156_v19 = vpop.f32.mrf.mxu1  ;;  %v2411_v14 = vpop.f32.mrf.mxu3 }
 0x44a   :  { %11193 = vmatmul.msk.bf16.gmra.mxu1 %vm2230_vm6, %v2976_v34 }
 0x44c   :  { %v2298_v55 = vpop.f32.mrf.mxu2  ;;  %11165 = vmatmul.msk.bf16.gmra.mxu3 %vm2230_vm6, %v16709_v9  ;;  %v17162_v30 = vpop.f32.mrf.mxu0 }
 0x44d   :  { %18495 = vst [vmem:[#allocation86_spill] sm:$0xff] %v17162_v30  ;;  %v17164_v42 = vadd.f32 %v2406_v57, %v2298_v55  ;;  %v3795_v55 = vunpack.c.l.b16 %v3789_v17  ;;  %v14926_v30 = vld [vmem:[#allocation2 + $0x10] sm:$0xff] }
 0x44f   :  { %v17166_v51 = vpop.f32.mrf.mxu1  ;;  %v2414_v18 = vpop.f32.mrf.mxu3 }
 0x451   :  { %11104 = vmatmul.msk.bf16.gmra.mxu2 %vm2230_vm6, %v16632_v49 }
 0x454   :  { %v2301_v59 = vpop.f32.mrf.mxu2  ;;  %v17170_v43 = vpop.f32.mrf.mxu0 }
 0x455   :  { %18496 = vst [vmem:[#allocation87_spill] sm:$0xff] %v17170_v43  ;;  %v17172_v50 = vadd.f32 %v2409_v60, %v2301_v59  ;;  %v18499_v60 = vunpack.c.l.b16 %v16579_v36 }
 0x457   :  { %v17174_v56 = vpop.f32.mrf.mxu1  ;;  %v2416_v2 = vpop.f32.mrf.mxu3  ;;  %v3796_v59 = vpack.c.b16 %v18499_v60, %v3795_v55 }
 0x45a   :  { %11194 = vmatmul.msk.bf16.gmra.mxu1 %vm2230_vm6, %v2975_v35 }
 0x45c   :  { %v2303_v9 = vpop.f32.mrf.mxu2  ;;  %11166 = vmatmul.msk.bf16.gmra.mxu3 %vm2230_vm6, %v16759_v10  ;;  %v17179_v57 = vpop.f32.mrf.mxu0  ;;  %v3799_v10 = vrot.slane %v14926_v30, 3 }
 0x45d   :  { %18497 = vst [vmem:[#allocation89_spill] sm:$0xff] %v17179_v57  ;;  %v17181_v52 = vadd.f32 %v2411_v14, %v2303_v9  ;;  %v3798_v9 = vrot.slane %v3796_v59, 3  ;;  %v14927_v59 = vld [vmem:[#allocation2 + $0x18] sm:$0xff] }
 0x45f   :  { %v17183_v49 = vpop.f32.mrf.mxu1  ;;  %v2419_v34 = vpop.f32.mrf.mxu3 }
 0x460   :  { %18498 = vst [vmem:[#allocation91_spill] sm:$0xff] %v17183_v49  ;;  %v3800_v49 = vsel %vm18501_vm9, %v3798_v9, %v3799_v10  ;;  %vm18567_vm9 = vmmov %vm18527_vm10 }
 0x461   :  { %11105 = vmatmul.msk.bf16.gmra.mxu2 %vm2230_vm6, %v16686_v16 }
 0x464   :  { %v2306_v35 = vpop.f32.mrf.mxu2  ;;  %v17189_v43 = vpop.f32.mrf.mxu0 }
 0x465   :  { %18500 = vst [vmem:[#allocation93_spill] sm:$0xff] %v17189_v43  ;;  %v17191_v24 = vadd.f32 %v2414_v18, %v2306_v35  ;;  %v3801_v35 = vrot.slane %v14927_v59, 3 }
 0x467   :  { %v17193_v14 = vpop.f32.mrf.mxu1  ;;  %v2421_v57 = vpop.f32.mrf.mxu3 }
 0x46a   :  { %11303 = vmatmul.msk.bf16.vlgmr.msrb.gmra.mxu1 %vm2230_vm6, %v3800_v49 }
 0x46c   :  { %v2308_v17 = vpop.f32.mrf.mxu2  ;;  %11167 = vmatmul.msk.bf16.gmra.mxu3 %vm2230_vm6, %v16798_v54  ;;  %v17199_v36 = vpop.f32.mrf.mxu0 }
 0x46d   :  { %18502 = vst [vmem:[#allocation95_spill] sm:$0xff] %v17199_v36  ;;  %v17201_v16 = vadd.f32 %v2416_v2, %v2308_v17  ;;  %v3802_v36 = vsel %vm18504_vm12, %v3799_v10, %v3801_v35  ;;  %v3803_v10 = vrot.slane %v16719_v61, 3  ;;  %vm18571_vm12 = vmmov %vm18567_vm9 }
 0x46f   :  { %v17203_v55 = vpop.f32.mrf.mxu1  ;;  %v2424_v30 = vpop.f32.mrf.mxu3 }
 0x471   :  { %11106 = vmatmul.msk.bf16.gmra.mxu2 %vm2230_vm6, %v16738_v48 }
 0x474   :  { %v2311_v18 = vpop.f32.mrf.mxu2  ;;  %v17207_v60 = vpop.f32.mrf.mxu0 }
 0x475   :  { %18503 = vst [vmem:[#allocation96_spill] sm:$0xff] %v17207_v60  ;;  %v17209_v49 = vadd.f32 %v2419_v34, %v2311_v18 }
 0x477   :  { %v17211_v9 = vpop.f32.mrf.mxu1  ;;  %v2426_v54 = vpop.f32.mrf.mxu3 }
 0x47a   :  { %11304 = vmatmul.msk.bf16.gmra.mxu1 %vm2230_vm6, %v3802_v36 }
 0x47c   :  { %v2313_v2 = vpop.f32.mrf.mxu2  ;;  %11168 = vmatmul.msk.bf16.gmra.mxu3 %vm2230_vm6, %v16834_v58  ;;  %v17217_v17 = vpop.f32.mrf.mxu0 }
 0x47d   :  { %18505 = vst [vmem:[#allocation97_spill] sm:$0xff] %v17217_v17  ;;  %v17219_v48 = vadd.f32 %v2421_v57, %v2313_v2  ;;  %v3804_v17 = vsel %vm18508_vm0, %v3801_v35, %v3803_v10  ;;  %v3805_v35 = vrot.slane %v16767_v39, 3  ;;  %vm18574_vm0 = vmmov %vm18567_vm9 }
 0x47f   :  { %v17221_v60 = vpop.f32.mrf.mxu1  ;;  %v2429_v59 = vpop.f32.mrf.mxu3 }
 0x481   :  { %11107 = vmatmul.msk.bf16.gmra.mxu2 %vm2230_vm6, %v16781_v29 }
 0x484   :  { %v2316_v34 = vpop.f32.mrf.mxu2  ;;  %v17225_v18 = vpop.f32.mrf.mxu0 }
 0x485   :  { %18506 = vst [vmem:[#allocation98_spill] sm:$0xff] %v17225_v18  ;;  %v17228_v36 = vadd.f32 %v2424_v30, %v2316_v34 }
 0x487   :  { %v17230_v43 = vpop.f32.mrf.mxu1  ;;  %v2431_v58 = vpop.f32.mrf.mxu3 }
 0x488   :  { %18507 = vst [vmem:[#allocation99_spill] sm:$0xff] %v17230_v43 }
 0x48a   :  { %11305 = vmatmul.msk.bf16.gmra.mxu1 %vm2230_vm6, %v3804_v17 }
 0x48c   :  { %v2318_v57 = vpop.f32.mrf.mxu2  ;;  %11169 = vmatmul.msk.bf16.gmra.mxu3 %vm2230_vm6, %v16870_v32  ;;  %v17236_v2 = vpop.f32.mrf.mxu0 }
 0x48d   :  { %18509 = vst [vmem:[#allocation100_spill] sm:$0xff] %v17236_v2  ;;  %v17238_v29 = vadd.f32 %v2426_v54, %v2318_v57  ;;  %v3806_v2 = vsel %vm18512_vm4, %v3803_v10, %v3805_v35  ;;  %v3807_v10 = vrot.slane %v16804_v5, 3  ;;  %vm18576_vm4 = vmmov %vm18574_vm0 }
 0x48f   :  { %v17240_v18 = vpop.f32.mrf.mxu1  ;;  %v2434_v61 = vpop.f32.mrf.mxu3 }
 0x491   :  { %11108 = vmatmul.msk.bf16.gmra.mxu2 %vm2230_vm6, %v16817_v11 }
 0x494   :  { %v2321_v30 = vpop.f32.mrf.mxu2  ;;  %v17244_v34 = vpop.f32.mrf.mxu0 }
 0x495   :  { %18510 = vst [vmem:[#allocation101_spill] sm:$0xff] %v17244_v34  ;;  %v17247_v17 = vadd.f32 %v2429_v59, %v2321_v30 }
 0x497   :  { %v17249_v43 = vpop.f32.mrf.mxu1  ;;  %v2436_v32 = vpop.f32.mrf.mxu3 }
 0x498   :  { %18511 = vst [vmem:[#allocation102_spill] sm:$0xff] %v17249_v43 }
 0x49a   :  { %11306 = vmatmul.msk.bf16.gmra.mxu1 %vm2230_vm6, %v3806_v2 }
 0x49c   :  { %v2323_v54 = vpop.f32.mrf.mxu2  ;;  %11170 = vmatmul.msk.bf16.gmra.mxu3 %vm2230_vm6, %v16915_v20  ;;  %v17255_v57 = vpop.f32.mrf.mxu0 }
 0x49d   :  { %18513 = vst [vmem:[#allocation103_spill] sm:$0xff] %v17255_v57  ;;  %v17257_v11 = vadd.f32 %v2431_v58, %v2323_v54  ;;  %v3808_v57 = vsel %vm18517_vm1, %v3805_v35, %v3807_v10  ;;  %v3809_v35 = vrot.slane %v16840_v12, 3  ;;  %vm18578_vm1 = vmmov %vm18574_vm0 }
 0x49f   :  { %v17259_v34 = vpop.f32.mrf.mxu1  ;;  %v2439_v39 = vpop.f32.mrf.mxu3 }
 0x4a0   :  { %18514 = vst [vmem:[#allocation104_spill] sm:$0xff] %v17259_v34 }
 0x4a1   :  { %11109 = vmatmul.msk.bf16.gmra.mxu2 %vm2230_vm6, %v16853_v8 }
 0x4a4   :  { %v2326_v59 = vpop.f32.mrf.mxu2  ;;  %v17263_v30 = vpop.f32.mrf.mxu0 }
 0x4a5   :  { %18515 = vst [vmem:[#allocation105_spill] sm:$0xff] %v17263_v30  ;;  %v17266_v2 = vadd.f32 %v2434_v61, %v2326_v59 }
 0x4a7   :  { %v17268_v43 = vpop.f32.mrf.mxu1  ;;  %v2441_v20 = vpop.f32.mrf.mxu3 }
 0x4a8   :  { %18516 = vst [vmem:[#allocation106_spill] sm:$0xff] %v17268_v43 }
 0x4aa   :  { %11307 = vmatmul.msk.bf16.gmra.mxu1 %vm2230_vm6, %v3808_v57 }
 0x4ac   :  { %v2328_v58 = vpop.f32.mrf.mxu2  ;;  %11171 = vmatmul.msk.bf16.gmra.mxu3 %vm2230_vm6, %v16974_v38  ;;  %v17274_v54 = vpop.f32.mrf.mxu0 }
 0x4ad   :  { %18518 = vst [vmem:[#allocation107_spill] sm:$0xff] %v17274_v54  ;;  %v17276_v8 = vadd.f32 %v2436_v32, %v2328_v58  ;;  %v3810_v54 = vsel %vm18522_vm15, %v3807_v10, %v3809_v35  ;;  %vm18583_vm15 = vmmov %vm18574_vm0 }
 0x4af   :  { %v17278_v30 = vpop.f32.mrf.mxu1  ;;  %v2779_v5 = vpop.f32.mrf.mxu3 }
 0x4b0   :  { %18519 = vst [vmem:[#allocation108_spill] sm:$0xff] %v17278_v30 }
 0x4b1   :  { %11110 = vmatmul.msk.bf16.gmra.mxu2 %vm2230_vm6, %v16896_v25  ;;  %v2636_v25 = vld [vmem:[#allocation2 + $0x5c] sm:$0x3] }
 0x4b2   :  { %v2686_v43 = vunpack.c.l.b16 %v2636_v25  ;;  %v14163_v25 = vld [vmem:[#allocation14 + $0x70] sm:$0xff] }
 0x4b4   :  { %v2331_v61 = vpop.f32.mrf.mxu2  ;;  %v17282_v59 = vpop.f32.mrf.mxu0  ;;  %v2698_v12 = vpack.c.b16 %v2686_v43, %v2686_v43 }
 0x4b5   :  { %18520 = vst [vmem:[#allocation109_spill] sm:$0xff] %v17282_v59  ;;  %v17285_v57 = vadd.f32 %v2439_v39, %v2331_v61  ;;  %v3811_v61 = vrot.slane %v16878_v6, 3 }
 0x4b7   :  { %v17287_v20 = vpop.f32.mrf.mxu1  ;;  %v2781_v38 = vpop.f32.mrf.mxu3 }
 0x4b8   :  { %18521 = vst [vmem:[#allocation110_spill] sm:$0xff] %v17287_v20  ;;  %v14164_v20 = vld [vmem:[#allocation14 + $0x78] sm:$0xff] }
 0x4b9   :  { %3704 = vmatpush.bf16.msrb.mxu3 %v14164_v20 }
 0x4ba   :  { %11308 = vmatmul.msk.bf16.gmra.mxu1 %vm2230_vm6, %v3810_v54 }
 0x4bc   :  { %v2333_v32 = vpop.f32.mrf.mxu2  ;;  %11172 = vmatmul.msk.bf16.gmra.mxu3 %vm2230_vm6, %v17047_v45  ;;  %v3262_v58 = vpop.f32.mrf.mxu0 }
 0x4bd   :  { %v2720_v58 = vrot.slane %v2698_v12, 1  ;;  %3705 = vmatpush.bf16.msrb.mxu3 %v14163_v25 }
 0x4bf   :  { %v17293_v30 = vpop.f32.mrf.mxu1  ;;  %v2784_v59 = vpop.f32.mrf.mxu3 }
 0x4c0   :  { %18523 = vst [vmem:[#allocation111_spill] sm:$0xff] %v17293_v30  ;;  %v3812_v30 = vsel %vm18525_vm7, %v3809_v35, %v3811_v61  ;;  %v3813_v35 = vrot.slane %v16923_v23, 3  ;;  %vm18585_vm7 = vmmov %vm18574_vm0 }
 0x4c1   :  { %11111 = vmatmul.msk.bf16.gmra.mxu2 %vm2230_vm6, %v16942_v13  ;;  %v18526_v13 = vrot.slane %v17022_v44, 1 }
 0x4c2   :  { %v3814_v25 = vsel %vm18530_vm5, %v3811_v61, %v3813_v35  ;;  %v3815_v61 = vrot.slane %v16987_v33, 3  ;;  %vm18589_vm5 = vmmov %vm18574_vm0 }
 0x4c3   :  { %v2721_v43 = vsel %vm18527_vm10, %v18526_v13, %v2720_v58  ;;  %vm18587_vm10 = vmmov %vm18574_vm0 }
 0x4c4   :  { %v2532_v39 = vpop.f32.mrf.mxu2 }
 0x4c5   :  { %v2591_v10 = vadd.f32 %v2532_v39, %v16966_v0 }
 0x4c7   :  { %v17299_v54 = vpop.f32.mrf.mxu1  ;;  %v17301_v32 = vadd.f32 %v2779_v5, %v2591_v10  ;;  %v2786_v45 = vpop.f32.mrf.mxu3 }
 0x4c8   :  { %18524 = vst [vmem:[#allocation112_spill] sm:$0xff] %v17299_v54 }
 0x4ca   :  { %11309 = vmatmul.msk.bf16.gmra.mxu1 %vm2230_vm6, %v3812_v30 }
 0x4cc   :  { %v2534_v6 = vpop.f32.mrf.mxu2  ;;  %11173 = vmatmul.msk.bf16.gmra.mxu3 %vm2230_vm6, %v2721_v43 }
 0x4cd   :  { %v2592_v0 = vadd.f32 %v2534_v6, %v17001_v46  ;;  %v14162_v46 = vld [vmem:[#allocation14 + $0x68] sm:$0xff]  ;;  %v14161_v6 = vld [vmem:[#allocation14 + $0x60] sm:$0xff] }
 0x4ce   :  { %3449 = vmatpush.bf16.msrb.mxu2 %v14162_v46 }
 0x4cf   :  { %v17310_v5 = vpop.f32.mrf.mxu1  ;;  %v17312_v12 = vadd.f32 %v2781_v38, %v2592_v0  ;;  %v2789_v39 = vpop.f32.mrf.mxu3 }
 0x4d0   :  { %18528 = vst [vmem:[#allocation113_spill] sm:$0xff] %v17310_v5 }
 0x4d1   :  { %11112 = vmatmul.msk.bf16.gmra.mxu2 %vm2230_vm6, %v17009_v31 }
 0x4d2   :  { %3450 = vmatpush.bf16.msrb.mxu2 %v14161_v6  ;;  %v18534_v6 = vld [vmem:[#allocation73_spill] sm:$0xff] }
 0x4d4   :  { %v2537_v30 = vpop.f32.mrf.mxu2 }
 0x4d5   :  { %v2593_v44 = vadd.f32 %v2537_v30, %v17035_v40 }
 0x4d7   :  { %v17318_v20 = vpop.f32.mrf.mxu1  ;;  %v17320_v10 = vadd.f32 %v2784_v59, %v2593_v44  ;;  %v2791_v13 = vpop.f32.mrf.mxu3 }
 0x4d8   :  { %18529 = vst [vmem:[#allocation114_spill] sm:$0xff] %v17318_v20 }
 0x4da   :  { %11310 = vmatmul.msk.bf16.gmra.mxu1 %vm2230_vm6, %v3814_v25  ;;  %v18532_v25 = vrot.slane %v17037_v41, 1 }
 0x4dc   :  { %v2539_v38 = vpop.f32.mrf.mxu2  ;;  %11174 = vmatmul.msk.bf16.gmra.mxu3 %vm2230_vm6, %v2720_v58 }
 0x4dd   :  { %v2594_v31 = vadd.f32 %v2539_v38, %v17077_v28  ;;  %v3816_v28 = vsel %vm18531_vm2, %v3813_v35, %v3815_v61  ;;  %v3817_v35 = vrot.slane %v17064_v37, 3  ;;  %vm18592_vm2 = vmmov %vm18574_vm0 }
 0x4df   :  { %v3091_v43 = vpop.f32.mrf.mxu1  ;;  %v17326_v23 = vadd.f32 %v2786_v45, %v2594_v31  ;;  %v2794_v40 = vpop.f32.mrf.mxu3 }
 0x4e1   :  { %11113 = vmatmul.msk.bf16.gmra.mxu2 %vm2230_vm6, %v17062_v22 }
 0x4e4   :  { %v2542_v59 = vpop.f32.mrf.mxu2 }
 0x4e5   :  { %v2595_v0 = vadd.f32 %v2542_v59, %v17097_v47 }
 0x4e7   :  { %v17332_v30 = vpop.f32.mrf.mxu1  ;;  %v17334_v44 = vadd.f32 %v2789_v39, %v2595_v0  ;;  %v2796_v58 = vpop.f32.mrf.mxu3 }
 0x4ea   :  { %11311 = vmatmul.msk.bf16.gmra.mxu1 %vm2230_vm6, %v3816_v28  ;;  %v18535_v28 = vld [vmem:[#allocation69_spill] sm:$0xff] }
 0x4ec   :  { %v2544_v45 = vpop.f32.mrf.mxu2  ;;  %11283 = vmatmul.msk.bf16.vlgmr.msrb.gmra.mxu3 %vm2230_vm6, %v16647_v62 }
 0x4ed   :  { %v2596_v22 = vadd.f32 %v2544_v45, %v17119_v27  ;;  %v3818_v27 = vsel %vm18533_vm11, %v3815_v61, %v3817_v35  ;;  %v3819_v45 = vrot.slane %v17099_v4, 3  ;;  %vm18594_vm11 = vmmov %vm18574_vm0 }
 0x4ef   :  { %v17341_v46 = vpop.f32.mrf.mxu1  ;;  %v17343_v33 = vadd.f32 %v2791_v13, %v2596_v22  ;;  %v2799_v47 = vpop.f32.mrf.mxu3 }
 0x4f1   :  { %11114 = vmatmul.msk.bf16.gmra.mxu2 %vm2230_vm6, %v18532_v25 }
 0x4f4   :  { %v2547_v39 = vpop.f32.mrf.mxu2 }
 0x4f5   :  { %v2597_v38 = vadd.f32 %v2547_v39, %v17131_v7 }
 0x4f7   :  { %v17350_v31 = vpop.f32.mrf.mxu1  ;;  %v17352_v43 = vadd.f32 %v2794_v40, %v2597_v38  ;;  %v2801_v62 = vpop.f32.mrf.mxu3  ;;  %v18537_v38 = vld [vmem:[#allocation77_spill] sm:$0xff] }
 0x4fa   :  { %11312 = vmatmul.msk.bf16.gmra.mxu1 %vm2230_vm6, %v3818_v27 }
 0x4fc   :  { %v2549_v13 = vpop.f32.mrf.mxu2  ;;  %11284 = vmatmul.msk.bf16.gmra.mxu3 %vm2230_vm6, %v18534_v6  ;;  %v18538_v6 = vld [vmem:[#allocation72_spill] sm:$0xff] }
 0x4fd   :  { %v2598_v41 = vadd.f32 %v2549_v13, %v17144_v15  ;;  %v3820_v15 = vsel %vm18536_vm3, %v3817_v35, %v3819_v45  ;;  %vm18597_vm3 = vmmov %vm18574_vm0 }
 0x4ff   :  { %v17359_v59 = vpop.f32.mrf.mxu1  ;;  %v17361_v0 = vadd.f32 %v2796_v58, %v2598_v41  ;;  %v2804_v7 = vpop.f32.mrf.mxu3 }
 0x501   :  { %11263 = vmatmul.msk.bf16.vlgmr.msrb.gmra.mxu2 %vm2230_vm6, %v18535_v28 }
 0x504   :  { %v2552_v40 = vpop.f32.mrf.mxu2 }
 0x505   :  { %v2599_v61 = vadd.f32 %v2552_v40, %v17154_v63 }
 0x507   :  { %v17367_v22 = vpop.f32.mrf.mxu1  ;;  %v17369_v25 = vadd.f32 %v2799_v47, %v2599_v61  ;;  %v2806_v39 = vpop.f32.mrf.mxu3 }
 0x50a   :  { %11313 = vmatmul.msk.bf16.gmra.mxu1 %vm2230_vm6, %v3820_v15 }
 0x50c   :  { %v2554_v58 = vpop.f32.mrf.mxu2  ;;  %11285 = vmatmul.msk.bf16.gmra.mxu3 %vm2230_vm6, %v18537_v38 }
 0x50d   :  { %v2600_v27 = vadd.f32 %v2554_v58, %v17164_v42  ;;  %v18539_v42 = vld [vmem:[#allocation79_spill] sm:$0xff] }
 0x50f   :  { %v17376_v13 = vpop.f32.mrf.mxu1  ;;  %v17378_v4 = vadd.f32 %v2801_v62, %v2600_v27  ;;  %v2809_v63 = vpop.f32.mrf.mxu3  ;;  %v18540_v27 = vld [vmem:[#allocation74_spill] sm:$0xff] }
 0x511   :  { %11264 = vmatmul.msk.bf16.gmra.mxu2 %vm2230_vm6, %v18538_v6 }
 0x514   :  { %v2557_v47 = vpop.f32.mrf.mxu2 }
 0x515   :  { %v2601_v41 = vadd.f32 %v2557_v47, %v17172_v50 }
 0x517   :  { %v17383_v35 = vpop.f32.mrf.mxu1  ;;  %v17385_v28 = vadd.f32 %v2804_v7, %v2601_v41  ;;  %v2811_v40 = vpop.f32.mrf.mxu3 }
 0x51a   :  { %11314 = vmatmul.msk.bf16.gmra.mxu1 %vm2230_vm6, %v3819_v45 }
 0x51c   :  { %v2559_v61 = vpop.f32.mrf.mxu2  ;;  %11286 = vmatmul.msk.bf16.gmra.mxu3 %vm2230_vm6, %v18539_v42  ;;  %v18541_v42 = vld [vmem:[#allocation43_spill] sm:$0xff] }
 0x51d   :  { %v2602_v62 = vadd.f32 %v2559_v61, %v17181_v52 }
 0x51f   :  { %v17391_v15 = vpop.f32.mrf.mxu1  ;;  %v17393_v58 = vadd.f32 %v2806_v39, %v2602_v62  ;;  %v2814_v38 = vpop.f32.mrf.mxu3 }
 0x521   :  { %11265 = vmatmul.msk.bf16.gmra.mxu2 %vm2230_vm6, %v18540_v27  ;;  %v18542_v27 = vld [vmem:[#allocation75_spill] sm:$0xff] }
 0x524   :  { %v2562_v50 = vpop.f32.mrf.mxu2 }
 0x525   :  { %v2603_v7 = vadd.f32 %v2562_v50, %v17191_v24 }
 0x527   :  { %v17398_v6 = vpop.f32.mrf.mxu1  ;;  %v17400_v45 = vadd.f32 %v2809_v63, %v2603_v7  ;;  %v2816_v47 = vpop.f32.mrf.mxu3 }
 0x52c   :  { %v2564_v41 = vpop.f32.mrf.mxu2  ;;  %11287 = vmatmul.msk.bf16.gmra.mxu3 %vm2230_vm6, %v18541_v42  ;;  %v18543_v42 = vld [vmem:[#allocation83_spill] sm:$0xff] }
 0x52d   :  { %v2604_v52 = vadd.f32 %v2564_v41, %v17201_v16 }
 0x52f   :  { %v17405_v39 = vpop.f32.mrf.mxu1  ;;  %v17407_v61 = vadd.f32 %v2811_v40, %v2604_v52  ;;  %v2819_v62 = vpop.f32.mrf.mxu3 }
 0x531   :  { %11266 = vmatmul.msk.bf16.gmra.mxu2 %vm2230_vm6, %v18542_v27  ;;  %v18545_v27 = vld [vmem:[#allocation81_spill] sm:$0xff] }
 0x534   :  { %v2567_v24 = vpop.f32.mrf.mxu2 }
 0x535   :  { %v2605_v50 = vadd.f32 %v2567_v24, %v17209_v49 }
 0x537   :  { %v17412_v63 = vpop.f32.mrf.mxu1  ;;  %v17414_v7 = vadd.f32 %v2814_v38, %v2605_v50  ;;  %v2821_v20 = vpop.f32.mrf.mxu3 }
 0x53c   :  { %v2569_v5 = vpop.f32.mrf.mxu2  ;;  %11288 = vmatmul.msk.bf16.gmra.mxu3 %vm2230_vm6, %v18543_v42  ;;  %v18547_v42 = vld [vmem:[#allocation46_spill] sm:$0xff] }
 0x53d   :  { %v2606_v16 = vadd.f32 %v2569_v5, %v17219_v48 }
 0x53f   :  { %v17419_v40 = vpop.f32.mrf.mxu1  ;;  %v17421_v41 = vadd.f32 %v2816_v47, %v2606_v16  ;;  %v2824_v52 = vpop.f32.mrf.mxu3 }
 0x541   :  { %18544 = vst [vmem:[#allocation73_spill] sm:$0xff] %v17421_v41  ;;  %11267 = vmatmul.msk.bf16.gmra.mxu2 %vm2230_vm6, %v18545_v27  ;;  %v18549_v27 = vld [vmem:[#allocation45_spill] sm:$0xff] }
 0x544   :  { %v2572_v49 = vpop.f32.mrf.mxu2 }
 0x545   :  { %v2607_v24 = vadd.f32 %v2572_v49, %v17228_v36 }
 0x547   :  { %v17426_v38 = vpop.f32.mrf.mxu1  ;;  %v17428_v50 = vadd.f32 %v2819_v62, %v2607_v24  ;;  %v2826_v54 = vpop.f32.mrf.mxu3 }
 0x549   :  { %18546 = vst [vmem:[#allocation69_spill] sm:$0xff] %v17428_v50 }
 0x54c   :  { %v2574_v34 = vpop.f32.mrf.mxu2  ;;  %11289 = vmatmul.msk.bf16.gmra.mxu3 %vm2230_vm6, %v18547_v42  ;;  %v18551_v42 = vld [vmem:[#allocation66_spill] sm:$0xff] }
 0x54d   :  { %v2608_v48 = vadd.f32 %v2574_v34, %v17238_v29 }
 0x54f   :  { %v17433_v5 = vpop.f32.mrf.mxu1  ;;  %v17435_v47 = vadd.f32 %v2821_v20, %v2608_v48  ;;  %v2829_v16 = vpop.f32.mrf.mxu3 }
 0x551   :  { %18548 = vst [vmem:[#allocation77_spill] sm:$0xff] %v17435_v47  ;;  %11268 = vmatmul.msk.bf16.gmra.mxu2 %vm2230_vm6, %v18549_v27  ;;  %v18552_v27 = vld [vmem:[#allocation44_spill] sm:$0xff] }
 0x554   :  { %v2577_v36 = vpop.f32.mrf.mxu2 }
 0x555   :  { %v2609_v49 = vadd.f32 %v2577_v36, %v17247_v17 }
 0x557   :  { %v17440_v62 = vpop.f32.mrf.mxu1  ;;  %v17442_v24 = vadd.f32 %v2824_v52, %v2609_v49  ;;  %v2831_v50 = vpop.f32.mrf.mxu3 }
 0x559   :  { %18550 = vst [vmem:[#allocation72_spill] sm:$0xff] %v17442_v24 }
 0x55c   :  { %v2579_v41 = vpop.f32.mrf.mxu2  ;;  %11290 = vmatmul.msk.bf16.gmra.mxu3 %vm2230_vm6, %v18551_v42  ;;  %v18554_v42 = vld [vmem:[#allocation78_spill] sm:$0xff] }
 0x55d   :  { %v2610_v29 = vadd.f32 %v2579_v41, %v17257_v11 }
 0x55f   :  { %v17447_v34 = vpop.f32.mrf.mxu1  ;;  %v17449_v20 = vadd.f32 %v2826_v54, %v2610_v29  ;;  %v2834_v48 = vpop.f32.mrf.mxu3 }
 0x561   :  { %11269 = vmatmul.msk.bf16.gmra.mxu2 %vm2230_vm6, %v18552_v27  ;;  %v18556_v27 = vld [vmem:[#allocation65_spill] sm:$0xff] }
 0x564   :  { %v2582_v17 = vpop.f32.mrf.mxu2 }
 0x565   :  { %v2611_v36 = vadd.f32 %v2582_v17, %v17266_v2 }
 0x567   :  { %v17454_v52 = vpop.f32.mrf.mxu1  ;;  %v17456_v49 = vadd.f32 %v2829_v16, %v2611_v36  ;;  %v2836_v24 = vpop.f32.mrf.mxu3 }
 0x569   :  { %18553 = vst [vmem:[#allocation79_spill] sm:$0xff] %v17456_v49 }
 0x56c   :  { %v2584_v47 = vpop.f32.mrf.mxu2  ;;  %11291 = vmatmul.msk.bf16.gmra.mxu3 %vm2230_vm6, %v18554_v42  ;;  %v18560_v42 = vld [vmem:[#allocation68_spill] sm:$0xff] }
 0x56d   :  { %v2612_v11 = vadd.f32 %v2584_v47, %v17276_v8  ;;  %v3093_v47 = vadd.f32 %v17101_v53, %v17301_v32 }
 0x56f   :  { %v17461_v54 = vpop.f32.mrf.mxu1  ;;  %v17463_v41 = vadd.f32 %v2831_v50, %v2612_v11  ;;  %v3707_v29 = vpop.f32.mrf.mxu3  ;;  %v18561_v11 = vld [vmem:[#allocation76_spill] sm:$0xff] }
 0x571   :  { %18555 = vst [vmem:[#allocation74_spill] sm:$0xff] %v17463_v41  ;;  %11270 = vmatmul.msk.bf16.gmra.mxu2 %vm2230_vm6, %v18556_v27 }
 0x574   :  { %v2587_v2 = vpop.f32.mrf.mxu2 }
 0x575   :  { %v2613_v17 = vadd.f32 %v2587_v2, %v17285_v57  ;;  %v3264_v57 = vadd.f32 %v18561_v11, %v3093_v47 }
 0x577   :  { %v17468_v16 = vpop.f32.mrf.mxu1  ;;  %v17470_v24 = vadd.f32 %v2834_v48, %v2613_v17  ;;  %v3709_v36 = vpop.f32.mrf.mxu3 }
 0x578   :  { %18557 = vst [vmem:[#allocation43_spill] sm:$0xff] %v17468_v16 }
 0x579   :  { %18558 = vst [vmem:[#allocation75_spill] sm:$0xff] %v17470_v24  ;;  %v18563_v24 = vld [vmem:[#allocation67_spill] sm:$0xff] }
 0x57c   :  { %v2589_v49 = vpop.f32.mrf.mxu2  ;;  %11292 = vmatmul.msk.bf16.gmra.mxu3 %vm2230_vm6, %v17092_v3  ;;  %v3094_v3 = vadd.f32 %v17126_v26, %v17312_v12  ;;  %v3309_v26 = vld [vmem:[#allocation2 + $0x60] sm:$0x7] }
 0x57e   :  { %v3265_v41 = vadd.f32 %v18563_v24, %v3094_v3 }
 0x57f   :  { %v17474_v8 = vpop.f32.mrf.mxu1  ;;  %v3712_v50 = vpop.f32.mrf.mxu3 }
 0x580   :  { %18559 = vst [vmem:[#allocation83_spill] sm:$0xff] %v17474_v8 }
 0x581   :  { %11271 = vmatmul.msk.bf16.gmra.mxu2 %vm2230_vm6, %v18560_v42 }
 0x584   :  { %v3452_v27 = vpop.f32.mrf.mxu2 }
 0x585   :  { %v3511_v2 = vadd.f32 %v3452_v27, %v3264_v57  ;;  %v18565_v27 = vld [vmem:[#allocation94_spill] sm:$0xff] }
 0x587   :  { %v17481_v48 = vpop.f32.mrf.mxu1  ;;  %v3766_v17 = vadd.f32 %v3707_v29, %v3511_v2  ;;  %v3714_v49 = vpop.f32.mrf.mxu3  ;;  %v3095_v29 = vadd.f32 %v17133_v21, %v17320_v10  ;;  %v18566_v2 = vld [vmem:[#allocation88_spill] sm:$0xff] }
 0x588   :  { %18562 = vst [vmem:[#allocation81_spill] sm:$0xff] %v17481_v48  ;;  %v18568_v10 = vld [vmem:[#allocation84_spill] sm:$0xff] }
 0x589   :  { %v3937_v47 = vadd.f32 %v17332_v30, %v3766_v17  ;;  %v18569_v48 = vld [vmem:[#allocation80_spill] sm:$0xff] }
 0x58b   :  { %v3982_v12 = vrot.slane %v3937_v47, 1 }
 0x58c   :  { %v3454_v8 = vpop.f32.mrf.mxu2  ;;  %11293 = vmatmul.msk.bf16.gmra.mxu3 %vm2230_vm6, %v17124_v1  ;;  %v3266_v1 = vadd.f32 %v18566_v2, %v3095_v29  ;;  %v18570_v2 = vld [vmem:[#allocation70_spill] sm:$0xff] }
 0x58d   :  { %v3512_v53 = vadd.f32 %v3454_v8, %v3265_v41  ;;  %v3359_v8 = vunpack.c.l.b16 %v3309_v26 }
 0x58f   :  { %v17488_v32 = vpop.f32.mrf.mxu1  ;;  %v3767_v42 = vadd.f32 %v3709_v36, %v3512_v53  ;;  %v3717_v11 = vpop.f32.mrf.mxu3 }
 0x590   :  { %18564 = vst [vmem:[#allocation46_spill] sm:$0xff] %v17488_v32 }
 0x591   :  { %v3938_v57 = vadd.f32 %v17341_v46, %v3767_v42  ;;  %11272 = vmatmul.msk.bf16.gmra.mxu2 %vm2230_vm6, %v18565_v27  ;;  %v3096_v46 = vadd.f32 %v18568_v10, %v17326_v23  ;;  %v3371_v42 = vpack.c.b16 %v3359_v8, %v3359_v8  ;;  %v3097_v23 = vadd.f32 %v17156_v19, %v17334_v44 }
 0x592   :  { %v3098_v19 = vadd.f32 %v17166_v51, %v17343_v33  ;;  %v3099_v51 = vadd.f32 %v17174_v56, %v17352_v43  ;;  %v17524_v33 = vld [vmem:[#allocation16] ss:$0 sm:$0xff] }
 0x593   :  { %v3983_v24 = vrot.slane %v3938_v57, 1  ;;  %v3267_v16 = vadd.f32 %v18569_v48, %v3096_v46  ;;  %v3393_v26 = vrot.slane %v3371_v42, 2 }
 0x594   :  { %v3457_v41 = vpop.f32.mrf.mxu2 }
 0x595   :  { %v3513_v3 = vadd.f32 %v3457_v41, %v3266_v1  ;;  %v3984_v30 = vsel %vm18567_vm9, %v3982_v12, %v3983_v24  ;;  %vm18601_vm9 = vmmov %vm18574_vm0 }
 0x596   :  { %v4044_v17 = vmax.f32 %v3937_v47, %v3984_v30 }
 0x597   :  { %v17498_v36 = vpop.f32.mrf.mxu1  ;;  %v3768_v53 = vadd.f32 %v3712_v50, %v3513_v3  ;;  %v3719_v21 = vpop.f32.mrf.mxu3 }
 0x599   :  { %v3939_v27 = vadd.f32 %v17350_v31, %v3768_v53  ;;  %v18572_v31 = vrot.slane %v17064_v37, 2  ;;  %v18573_v53 = vld [vmem:[#allocation71_spill] sm:$0xff] }
 0x59a   :  { %v3268_v10 = vadd.f32 %v18573_v53, %v3097_v23 }
 0x59b   :  { %v3985_v32 = vrot.slane %v3939_v27, 1  ;;  %v3394_v8 = vsel %vm3124_vm13, %v18572_v31, %v3393_v26 }
 0x59c   :  { %v3459_v29 = vpop.f32.mrf.mxu2  ;;  %11294 = vmatmul.msk.bf16.gmra.mxu3 %vm2230_vm6, %v18570_v2 }
 0x59d   :  { %v3986_v12 = vsel %vm18571_vm12, %v3983_v24, %v3985_v32  ;;  %v3514_v1 = vadd.f32 %v3459_v29, %v3267_v16  ;;  %vm18605_vm12 = vmmov %vm18574_vm0 }
 0x59e   :  { %v4045_v50 = vmax.f32 %v3938_v57, %v3986_v12  ;;  %v18575_v12 = vld [vmem:[#allocation90_spill] sm:$0xff] }
 0x59f   :  { %v3935_v47 = vpop.f32.mrf.mxu1  ;;  %v3769_v41 = vadd.f32 %v3714_v49, %v3514_v1  ;;  %v3722_v3 = vpop.f32.mrf.mxu3  ;;  %v3269_v1 = vadd.f32 %v18575_v12, %v3098_v19 }
 0x5a0   :  { %v4100_v44 = vrot.slane %v4045_v50, 2 }
 0x5a1   :  { %v3940_v48 = vadd.f32 %v17359_v59, %v3769_v41  ;;  %11273 = vmatmul.msk.bf16.gmra.mxu2 %vm2230_vm6, %v3394_v8 }
 0x5a3   :  { %v3987_v30 = vrot.slane %v3940_v48, 1 }
 0x5a4   :  { %v3462_v24 = vpop.f32.mrf.mxu2 }
 0x5a5   :  { %v3515_v16 = vadd.f32 %v3462_v24, %v3268_v10  ;;  %v3988_v57 = vsel %vm18574_vm0, %v3985_v32, %v3987_v30  ;;  %v18577_v10 = vld [vmem:[#allocation82_spill] sm:$0xff] }
 0x5a6   :  { %v4046_v49 = vmax.f32 %v3939_v27, %v3988_v57  ;;  %v3270_v24 = vadd.f32 %v18577_v10, %v3099_v51 }
 0x5a7   :  { %v3770_v46 = vadd.f32 %v3717_v11, %v3515_v16  ;;  %v3724_v42 = vpop.f32.mrf.mxu3 }
 0x5a8   :  { %v4101_v37 = vrot.slane %v4046_v49, 2 }
 0x5a9   :  { %v3941_v29 = vadd.f32 %v17367_v22, %v3770_v46 }
 0x5aa   :  { %v4102_v59 = vsel %vm3124_vm13, %v4100_v44, %v4101_v37 }
 0x5ab   :  { %v3989_v2 = vrot.slane %v3941_v29, 1  ;;  %v4164_v47 = vmax.f32 %v4044_v17, %v4102_v59 }
 0x5ac   :  { %v3464_v41 = vpop.f32.mrf.mxu2 }
 0x5ad   :  { %v3990_v23 = vsel %vm18576_vm4, %v3987_v30, %v3989_v2  ;;  %v3516_v32 = vadd.f32 %v3464_v41, %v3269_v1  ;;  %v18580_v41 = vld [vmem:[#allocation92_spill] sm:$0xff]  ;;  %vm18612_vm4 = vmmov %vm18574_vm0 }
 0x5ae   :  { %v4047_v27 = vmax.f32 %v3940_v48, %v3990_v23  ;;  %v4188_v48 = vadd.f32 %v17524_v33, %v4164_v47 }
 0x5af   :  { %v3771_v11 = vadd.f32 %v3719_v21, %v3516_v32  ;;  %v3727_v31 = vpop.f32.mrf.mxu3 }
 0x5b0   :  { %v4103_v8 = vrot.slane %v4047_v27, 2  ;;  %v4209_v44 = vmax.f32 %v4188_v48, 0.0 }
 0x5b1   :  { %v3942_v22 = vadd.f32 %v17376_v13, %v3771_v11  ;;  %11274 = vmatmul.msk.bf16.gmra.mxu2 %vm2230_vm6, %v3393_v26  ;;  %v18579_v13 = vld [vmem:[#allocation91_spill] sm:$0xff]  ;;  %vm18581_vm6 = vmmov %vm18574_vm0 }
 0x5b2   :  { %v4104_v53 = vsel %vm3124_vm13, %v4101_v37, %v4103_v8  ;;  %v3100_v26 = vadd.f32 %v18579_v13, %v17361_v0 }
 0x5b3   :  { %v3991_v17 = vrot.slane %v3942_v22, 1  ;;  %v4165_v30 = vmax.f32 %v4045_v50, %v4104_v53  ;;  %v3101_v53 = vadd.f32 %v17193_v14, %v17369_v25  ;;  %v3102_v25 = vadd.f32 %v17203_v55, %v17378_v4 }
 0x5b4   :  { %v3467_v21 = vpop.f32.mrf.mxu2  ;;  %v3103_v4 = vadd.f32 %v17211_v9, %v17385_v28  ;;  %v3104_v28 = vadd.f32 %v17221_v60, %v17393_v58  ;;  %v18590_v58 = vld [vmem:[#allocation99_spill] sm:$0xff] }
 0x5b5   :  { %v3517_v16 = vadd.f32 %v3467_v21, %v3270_v24  ;;  %v3992_v57 = vsel %vm18578_vm1, %v3989_v2, %v3991_v17  ;;  %v4189_v56 = vadd.f32 %v17524_v33, %v4165_v30  ;;  %v3271_v2 = vadd.f32 %v18580_v41, %v3100_v26  ;;  %v18582_v30 = vld [vmem:[#allocation85_spill] sm:$0xff]  ;;  %vm18616_vm1 = vmmov %vm18574_vm0 }
 0x5b6   :  { %v4048_v43 = vmax.f32 %v3941_v29, %v3992_v57  ;;  %v3272_v48 = vadd.f32 %v18582_v30, %v3101_v53 }
 0x5b7   :  { %v3772_v46 = vadd.f32 %v3722_v3, %v3517_v16  ;;  %v3729_v19 = vpop.f32.mrf.mxu3  ;;  %v4210_v37 = vmax.f32 %v4189_v56, 0.0 }
 0x5b8   :  { %v4105_v59 = vrot.slane %v4048_v43, 2 }
 0x5b9   :  { %v3943_v12 = vadd.f32 %v17383_v35, %v3772_v46  ;;  %v17536_v50 = vpack.c.bf16 %v4210_v37, %v4209_v44 }
 0x5ba   :  { %v4106_v1 = vsel %vm3124_vm13, %v4103_v8, %v4105_v59 }
 0x5bb   :  { %v3993_v47 = vrot.slane %v3943_v12, 1  ;;  %v4166_v23 = vmax.f32 %v4046_v49, %v4106_v1 }
 0x5bc   :  { %v3469_v32 = vpop.f32.mrf.mxu2 }
 0x5bd   :  { %v3994_v3 = vsel %vm18581_vm6, %v3991_v17, %v3993_v47  ;;  %v3518_v29 = vadd.f32 %v3469_v32, %v3271_v2  ;;  %v4190_v49 = vadd.f32 %v17524_v33, %v4166_v23  ;;  %vm18621_vm6 = vmmov %vm18574_vm0 }
 0x5be   :  { %v4049_v11 = vmax.f32 %v3942_v22, %v3994_v3 }
 0x5bf   :  { %v3773_v51 = vadd.f32 %v3724_v42, %v3518_v29  ;;  %v3732_v0 = vpop.f32.mrf.mxu3 }
 0x5c0   :  { %v4107_v10 = vrot.slane %v4049_v11, 2 }
 0x5c1   :  { %v3944_v35 = vadd.f32 %v17391_v15, %v3773_v51  ;;  %v4211_v15 = vmax.f32 %v4190_v49, 0.0  ;;  %v18586_v51 = vld [vmem:[#allocation87_spill] sm:$0xff] }
 0x5c2   :  { %v4108_v24 = vsel %vm3124_vm13, %v4105_v59, %v4107_v10  ;;  %v18584_v59 = vld [vmem:[#allocation86_spill] sm:$0xff]  ;;  %v3274_v53 = vadd.f32 %v18586_v51, %v3103_v4 }
 0x5c3   :  { %v3995_v8 = vrot.slane %v3944_v35, 1  ;;  %v4167_v21 = vmax.f32 %v4047_v27, %v4108_v24  ;;  %v3273_v1 = vadd.f32 %v18584_v59, %v3102_v25 }
 0x5c4   :  { %v3472_v16 = vpop.f32.mrf.mxu2 }
 0x5c5   :  { %v3519_v17 = vadd.f32 %v3472_v16, %v3272_v48  ;;  %v3996_v22 = vsel %vm18583_vm15, %v3993_v47, %v3995_v8  ;;  %v4191_v42 = vadd.f32 %v17524_v33, %v4167_v21  ;;  %vm18626_vm15 = vmmov %vm18574_vm0 }
 0x5c6   :  { %v4050_v57 = vmax.f32 %v3943_v12, %v3996_v22 }
 0x5c7   :  { %v3774_v56 = vadd.f32 %v3727_v31, %v3519_v17  ;;  %v3734_v14 = vpop.f32.mrf.mxu3  ;;  %v4212_v46 = vmax.f32 %v4191_v42, 0.0  ;;  %v18588_v42 = vld [vmem:[#allocation89_spill] sm:$0xff] }
 0x5c8   :  { %v4109_v13 = vrot.slane %v4050_v57, 2 }
 0x5c9   :  { %v3945_v26 = vadd.f32 %v17398_v6, %v3774_v56  ;;  %v17552_v27 = vpack.c.bf16 %v4212_v46, %v4211_v15  ;;  %v3275_v56 = vadd.f32 %v18588_v42, %v3104_v28 }
 0x5ca   :  { %v4110_v44 = vsel %vm3124_vm13, %v4107_v10, %v4109_v13 }
 0x5cb   :  { %v3997_v37 = vrot.slane %v3945_v26, 1  ;;  %v4168_v47 = vmax.f32 %v4048_v43, %v4110_v44  ;;  %v3105_v44 = vadd.f32 %v18590_v58, %v17400_v45  ;;  %v18598_v58 = vld [vmem:[#allocation73_spill] sm:$0xff] }
 0x5cc   :  { %v3474_v41 = vpop.f32.mrf.mxu2 }
 0x5cd   :  { %v3998_v31 = vsel %vm18585_vm7, %v3995_v8, %v3997_v37  ;;  %v3520_v12 = vadd.f32 %v3474_v41, %v3273_v1  ;;  %v4192_v43 = vadd.f32 %v17524_v33, %v4168_v47  ;;  %v18591_v47 = vld [vmem:[#allocation93_spill] sm:$0xff]  ;;  %vm18631_vm7 = vmmov %vm18574_vm0 }
 0x5ce   :  { %v4051_v2 = vmax.f32 %v3944_v35, %v3998_v31  ;;  %v3276_v41 = vadd.f32 %v18591_v47, %v3105_v44  ;;  %v18599_v44 = vld [vmem:[#allocation104_spill] sm:$0xff] }
 0x5cf   :  { %v3775_v23 = vadd.f32 %v3729_v19, %v3520_v12  ;;  %v3737_v55 = vpop.f32.mrf.mxu3 }
 0x5d0   :  { %v4111_v32 = vrot.slane %v4051_v2, 2 }
 0x5d1   :  { %v3946_v6 = vadd.f32 %v17405_v39, %v3775_v23  ;;  %v4213_v39 = vmax.f32 %v4192_v43, 0.0 }
 0x5d2   :  { %v4112_v3 = vsel %vm3124_vm13, %v4109_v13, %v4111_v32 }
 0x5d3   :  { %v3999_v29 = vrot.slane %v3946_v6, 1  ;;  %v4169_v10 = vmax.f32 %v4049_v11, %v4112_v3 }
 0x5d4   :  { %v3477_v24 = vpop.f32.mrf.mxu2 }
 0x5d5   :  { %v3521_v8 = vadd.f32 %v3477_v24, %v3274_v53  ;;  %v4000_v35 = vsel %vm18587_vm10, %v3997_v37, %v3999_v29  ;;  %v4193_v19 = vadd.f32 %v17524_v33, %v4169_v10  ;;  %v18593_v24 = vld [vmem:[#allocation95_spill] sm:$0xff]  ;;  %vm18632_vm10 = vmmov %vm18574_vm0 }
 0x5d6   :  { %v4052_v30 = vmax.f32 %v3945_v26, %v4000_v35 }
 0x5d7   :  { %v3776_v48 = vadd.f32 %v3732_v0, %v3521_v8  ;;  %v3739_v9 = vpop.f32.mrf.mxu3  ;;  %v4214_v21 = vmax.f32 %v4193_v19, 0.0 }
 0x5d8   :  { %v4113_v49 = vrot.slane %v4052_v30, 2 }
 0x5d9   :  { %v3947_v16 = vadd.f32 %v17412_v63, %v3776_v48  ;;  %v17568_v11 = vpack.c.bf16 %v4214_v21, %v4213_v39 }
 0x5da   :  { %v4114_v17 = vsel %vm3124_vm13, %v4111_v32, %v4113_v49 }
 0x5db   :  { %v4001_v22 = vrot.slane %v3947_v16, 1  ;;  %v4170_v25 = vmax.f32 %v4050_v57, %v4114_v17 }
 0x5dc   :  { %v3479_v15 = vpop.f32.mrf.mxu2 }
 0x5dd   :  { %v4002_v0 = vsel %vm18589_vm5, %v3999_v29, %v4001_v22  ;;  %v3522_v46 = vadd.f32 %v3479_v15, %v3275_v56  ;;  %v4194_v57 = vadd.f32 %v17524_v33, %v4170_v25  ;;  %vm4339_vm5 = vcmask 1042432  }
 0x5de   :  { %v4053_v13 = vmax.f32 %v3946_v6, %v4002_v0 }
 0x5df   :  { %v3777_v26 = vadd.f32 %v3734_v14, %v3522_v46  ;;  %v3742_v60 = vpop.f32.mrf.mxu3  ;;  %v4215_v3 = vmax.f32 %v4194_v57, 0.0 }
 0x5e0   :  { %v4115_v37 = vrot.slane %v4053_v13, 2 }
 0x5e1   :  { %v3948_v63 = vadd.f32 %v17419_v40, %v3777_v26  ;;  %v3106_v40 = vadd.f32 %v17240_v18, %v17407_v61  ;;  %v18595_v61 = vld [vmem:[#allocation102_spill] sm:$0xff] }
 0x5e2   :  { %v4116_v59 = vsel %vm3124_vm13, %v4113_v49, %v4115_v37  ;;  %v3107_v21 = vadd.f32 %v18595_v61, %v17414_v7 }
 0x5e3   :  { %v4003_v1 = vrot.slane %v3948_v63, 1  ;;  %v4171_v31 = vmax.f32 %v4051_v2, %v4116_v59  ;;  %v3277_v8 = vadd.f32 %v18593_v24, %v3106_v40  ;;  %v18604_v24 = vld [vmem:[#allocation98_spill] sm:$0xff] }
 0x5e4   :  { %v3482_v12 = vpop.f32.mrf.mxu2 }
 0x5e5   :  { %v3523_v23 = vadd.f32 %v3482_v12, %v3276_v41  ;;  %v4004_v4 = vsel %vm18592_vm2, %v4001_v22, %v4003_v1  ;;  %v4195_v14 = vadd.f32 %v17524_v33, %v4171_v31  ;;  %v18596_v22 = vld [vmem:[#allocation96_spill] sm:$0xff]  ;;  %v18600_v31 = vld [vmem:[#allocation97_spill] sm:$0xff] }
 0x5e6   :  { %v4054_v32 = vmax.f32 %v3947_v16, %v4004_v4  ;;  %v3278_v42 = vadd.f32 %v18596_v22, %v3107_v21 }
 0x5e7   :  { %v3778_v6 = vadd.f32 %v3737_v55, %v3523_v23  ;;  %v3744_v45 = vpop.f32.mrf.mxu3  ;;  %v4216_v29 = vmax.f32 %v4195_v14, 0.0 }
 0x5e8   :  { %v4117_v51 = vrot.slane %v4054_v32, 2 }
 0x5e9   :  { %v3949_v53 = vadd.f32 %v17426_v38, %v3778_v6  ;;  %v17584_v2 = vpack.c.bf16 %v4216_v29, %v4215_v3  ;;  %v18602_v3 = vld [vmem:[#allocation69_spill] sm:$0xff]  ;;  %v18603_v29 = vld [vmem:[#allocation106_spill] sm:$0xff] }
 0x5ea   :  { %v4118_v10 = vsel %vm3124_vm13, %v4115_v37, %v4117_v51 }
 0x5eb   :  { %v4005_v43 = vrot.slane %v3949_v53, 1  ;;  %v4172_v35 = vmax.f32 %v4052_v30, %v4118_v10 }
 0x5ec   :  { %v3484_v19 = vpop.f32.mrf.mxu2 }
 0x5ed   :  { %v4006_v55 = vsel %vm18594_vm11, %v4003_v1, %v4005_v43  ;;  %v3524_v48 = vadd.f32 %v3484_v19, %v3277_v8  ;;  %v4196_v30 = vadd.f32 %v17524_v33, %v4172_v35 }
 0x5ee   :  { %v4055_v28 = vmax.f32 %v3948_v63, %v4006_v55 }
 0x5ef   :  { %v3779_v39 = vadd.f32 %v3739_v9, %v3524_v48  ;;  %v3747_v18 = vpop.f32.mrf.mxu3  ;;  %v4217_v37 = vmax.f32 %v4196_v30, 0.0 }
 0x5f0   :  { %v4119_v49 = vrot.slane %v4055_v28, 2 }
 0x5f1   :  { %v3950_v38 = vadd.f32 %v17433_v5, %v3779_v39  ;;  %v3108_v5 = vadd.f32 %v18599_v44, %v18598_v58 }
 0x5f2   :  { %v4120_v16 = vsel %vm3124_vm13, %v4117_v51, %v4119_v49  ;;  %v3109_v51 = vadd.f32 %v18603_v29, %v18602_v3 }
 0x5f3   :  { %v4007_v17 = vrot.slane %v3950_v38, 1  ;;  %v4173_v56 = vmax.f32 %v4053_v13, %v4120_v16  ;;  %v3279_v57 = vadd.f32 %v18600_v31, %v3108_v5  ;;  %v18611_v31 = vld [vmem:[#allocation101_spill] sm:$0xff] }
 0x5f4   :  { %v3487_v25 = vpop.f32.mrf.mxu2  ;;  %v3280_v8 = vadd.f32 %v18604_v24, %v3109_v51  ;;  %v18613_v51 = vld [vmem:[#allocation111_spill] sm:$0xff] }
 0x5f5   :  { %v3525_v15 = vadd.f32 %v3487_v25, %v3278_v42  ;;  %v4008_v0 = vsel %vm18597_vm3, %v4005_v43, %v4007_v17  ;;  %v4197_v9 = vadd.f32 %v17524_v33, %v4173_v56  ;;  %v18608_v25 = vld [vmem:[#allocation100_spill] sm:$0xff]  ;;  %vm18637_vm3 = vcmask 1043456  }
 0x5f6   :  { %v4056_v46 = vmax.f32 %v3949_v53, %v4008_v0 }
 0x5f7   :  { %v3780_v26 = vadd.f32 %v3742_v60, %v3525_v15  ;;  %v3749_v7 = vpop.f32.mrf.mxu3  ;;  %v4218_v63 = vmax.f32 %v4197_v9, 0.0 }
 0x5f8   :  { %v4121_v59 = vrot.slane %v4056_v46, 2 }
 0x5f9   :  { %v3951_v1 = vadd.f32 %v17440_v62, %v3780_v26  ;;  %v17600_v13 = vpack.c.bf16 %v4218_v63, %v4217_v37  ;;  %v18609_v37 = vld [vmem:[#allocation72_spill] sm:$0xff]  ;;  %v18610_v63 = vld [vmem:[#allocation110_spill] sm:$0xff] }
 0x5fa   :  { %v4122_v47 = vsel %vm3124_vm13, %v4119_v49, %v4121_v59  ;;  %v18606_v49 = vld [vmem:[#allocation77_spill] sm:$0xff] }
 0x5fb   :  { %v4009_v41 = vrot.slane %v3951_v1, 1  ;;  %v4174_v12 = vmax.f32 %v4054_v32, %v4122_v47 }
 0x5fc   :  { %v3489_v23 = vpop.f32.mrf.mxu2 }
 0x5fd   :  { %v4010_v60 = vsel %vm18601_vm9, %v4007_v17, %v4009_v41  ;;  %v3526_v4 = vadd.f32 %v3489_v23, %v3279_v57  ;;  %v4198_v32 = vadd.f32 %v17524_v33, %v4174_v12 }
 0x5fe   :  { %v4057_v14 = vmax.f32 %v3950_v38, %v4010_v60  ;;  %v18607_v38 = vld [vmem:[#allocation108_spill] sm:$0xff] }
 0x5ff   :  { %v3781_v6 = vadd.f32 %v3744_v45, %v3526_v4  ;;  %v3752_v40 = vpop.f32.mrf.mxu3  ;;  %v4219_v16 = vmax.f32 %v4198_v32, 0.0  ;;  %v18615_v32 = vld [vmem:[#allocation103_spill] sm:$0xff] }
 0x600   :  { %v4123_v53 = vrot.slane %v4057_v14, 2 }
 0x601   :  { %v3952_v62 = vadd.f32 %v17447_v34, %v3781_v6  ;;  %v3110_v34 = vadd.f32 %v18607_v38, %v18606_v49 }
 0x602   :  { %v4124_v10 = vsel %vm3124_vm13, %v4121_v59, %v4123_v53  ;;  %v3111_v59 = vadd.f32 %v18610_v63, %v18609_v37 }
 0x603   :  { %v4011_v43 = vrot.slane %v3952_v62, 1  ;;  %v4175_v35 = vmax.f32 %v4055_v28, %v4124_v10  ;;  %v3281_v15 = vadd.f32 %v18608_v25, %v3110_v34  ;;  %v18618_v34 = vld [vmem:[#allocation112_spill] sm:$0xff]  ;;  %v18620_v25 = vld [vmem:[#allocation105_spill] sm:$0xff] }
 0x604   :  { %v3492_v19 = vpop.f32.mrf.mxu2  ;;  %v3282_v57 = vadd.f32 %v18611_v31, %v3111_v59 }
 0x605   :  { %v4012_v55 = vsel %vm18605_vm12, %v4009_v41, %v4011_v43  ;;  %v3527_v48 = vadd.f32 %v3492_v19, %v3280_v8  ;;  %v4199_v45 = vadd.f32 %v17524_v33, %v4175_v35 }
 0x606   :  { %v4058_v39 = vmax.f32 %v3951_v1, %v4012_v55 }
 0x607   :  { %v3782_v61 = vadd.f32 %v3747_v18, %v3527_v48  ;;  %v3754_v21 = vpop.f32.mrf.mxu3  ;;  %v4220_v17 = vmax.f32 %v4199_v45, 0.0 }
 0x608   :  { %v4125_v22 = vrot.slane %v4058_v39, 2 }
 0x609   :  { %v3953_v42 = vadd.f32 %v17454_v52, %v3782_v61  ;;  %v17616_v28 = vpack.c.bf16 %v4220_v17, %v4219_v16 }
 0x60a   :  { %v4126_v56 = vsel %vm3124_vm13, %v4123_v53, %v4125_v22 }
 0x60b   :  { %v4013_v30 = vrot.slane %v3953_v42, 1  ;;  %v4176_v0 = vmax.f32 %v4056_v46, %v4126_v56 }
 0x60c   :  { %v3494_v9 = vpop.f32.mrf.mxu2 }
 0x60d   :  { %v4014_v18 = vsel %vm18574_vm0, %v4011_v43, %v4013_v30  ;;  %v3528_v26 = vadd.f32 %v3494_v9, %v3281_v15  ;;  %v4200_v46 = vadd.f32 %v17524_v33, %v4176_v0  ;;  %v18614_v43 = vld [vmem:[#allocation43_spill] sm:$0xff] }
 0x60e   :  { %v4059_v58 = vmax.f32 %v3952_v62, %v4014_v18 }
 0x60f   :  { %v3783_v44 = vadd.f32 %v3749_v7, %v3528_v26  ;;  %v3757_v5 = vpop.f32.mrf.mxu3  ;;  %v4221_v53 = vmax.f32 %v4200_v46, 0.0 }
 0x610   :  { %v4127_v1 = vrot.slane %v4059_v58, 2 }
 0x611   :  { %v3954_v52 = vadd.f32 %v17461_v54, %v3783_v44  ;;  %v3112_v54 = vadd.f32 %v18613_v51, %v17449_v20  ;;  %v18617_v20 = vld [vmem:[#allocation79_spill] sm:$0xff] }
 0x612   :  { %v4128_v47 = vsel %vm3124_vm13, %v4125_v22, %v4127_v1  ;;  %v3113_v16 = vadd.f32 %v18618_v34, %v18617_v20  ;;  %v18619_v22 = vld [vmem:[#allocation83_spill] sm:$0xff] }
 0x613   :  { %v4015_v41 = vrot.slane %v3954_v52, 1  ;;  %v4177_v12 = vmax.f32 %v4057_v14, %v4128_v47  ;;  %v3283_v19 = vadd.f32 %v18615_v32, %v3112_v54  ;;  %v18623_v47 = vld [vmem:[#allocation113_spill] sm:$0xff] }
 0x614   :  { %v3497_v23 = vpop.f32.mrf.mxu2  ;;  %v3284_v15 = vadd.f32 %v18620_v25, %v3113_v16 }
 0x615   :  { %v4016_v60 = vsel %vm18612_vm4, %v4013_v30, %v4015_v41  ;;  %v3529_v4 = vadd.f32 %v3497_v23, %v3282_v57  ;;  %v4201_v7 = vadd.f32 %v17524_v33, %v4177_v12  ;;  %v18624_v57 = vld [vmem:[#allocation81_spill] sm:$0xff] }
 0x616   :  { %v4060_v6 = vmax.f32 %v3953_v42, %v4016_v60  ;;  %v18625_v60 = vld [vmem:[#allocation107_spill] sm:$0xff] }
 0x617   :  { %v3784_v3 = vadd.f32 %v3752_v40, %v3529_v4  ;;  %v3759_v29 = vpop.f32.mrf.mxu3  ;;  %v4222_v62 = vmax.f32 %v4201_v7, 0.0 }
 0x618   :  { %v4129_v10 = vrot.slane %v4060_v6, 2 }
 0x619   :  { %v3955_v24 = vadd.f32 %v18614_v43, %v3784_v3  ;;  %v4318_v14 = vpack.c.bf16 %v4222_v62, %v4221_v53  ;;  %v18627_v62 = vld [vmem:[#allocation75_spill] sm:$0xff] }
 0x61a   :  { %v4130_v8 = vsel %vm3124_vm13, %v4127_v1, %v4129_v10 }
 0x61b   :  { %v4017_v35 = vrot.slane %v3955_v24, 1  ;;  %v4178_v55 = vmax.f32 %v4058_v39, %v4130_v8  ;;  %v18629_v8 = vld [vmem:[#allocation46_spill] sm:$0xff] }
 0x61c   :  { %v3499_v48 = vpop.f32.mrf.mxu2 }
 0x61d   :  { %v4018_v45 = vsel %vm18616_vm1, %v4015_v41, %v4017_v35  ;;  %v3530_v40 = vadd.f32 %v3499_v48, %v3283_v19  ;;  %v4202_v39 = vadd.f32 %v17524_v33, %v4178_v55  ;;  %v18630_v55 = vld [vmem:[#allocation109_spill] sm:$0xff] }
 0x61e   :  { %v4061_v61 = vmax.f32 %v3954_v52, %v4018_v45  ;;  %v18622_v52 = vld [vmem:[#allocation74_spill] sm:$0xff] }
 0x61f   :  { %v3785_v49 = vadd.f32 %v3754_v21, %v3530_v40  ;;  %v3762_v38 = vpop.f32.mrf.mxu3  ;;  %v4223_v59 = vmax.f32 %v4202_v39, 0.0  ;;  %v3114_v41 = vadd.f32 %v18623_v47, %v18622_v52  ;;  %v18636_v52 = vld [vmem:[#allocation51_spill] sm:$0xff] }
 0x620   :  { %v4131_v17 = vrot.slane %v4061_v61, 2 }
 0x621   :  { %v3956_v42 = vadd.f32 %v18619_v22, %v3785_v49  ;;  %v3285_v4 = vadd.f32 %v18625_v60, %v3114_v41  ;;  %v18642_v60 = vld [vmem:[#allocation56_spill] sm:$0xff] }
 0x622   :  { %v4132_v56 = vsel %vm3124_vm13, %v4129_v10, %v4131_v17  ;;  %v18628_v10 = vld [vmem:[#allocation114_spill] sm:$0xff] }
 0x623   :  { %v4019_v30 = vrot.slane %v3956_v42, 1  ;;  %v4179_v0 = vmax.f32 %v4059_v58, %v4132_v56  ;;  %v3115_v43 = vadd.f32 %v18628_v10, %v18627_v62  ;;  %v18650_v62 = vld [vmem:[#allocation54_spill] sm:$0xff] }
 0x624   :  { %v3502_v9 = vpop.f32.mrf.mxu2 }
 0x625   :  { %v3531_v18 = vadd.f32 %v3502_v9, %v3284_v15  ;;  %v4203_v26 = vadd.f32 %v17524_v33, %v4179_v0  ;;  %v4020_v21 = vsel %vm18621_vm6, %v4017_v35, %v4019_v30 }
 0x626   :  { %v4062_v44 = vmax.f32 %v3955_v24, %v4020_v21 }
 0x627   :  { %v3786_v37 = vadd.f32 %v3757_v5, %v3531_v18  ;;  %v3764_v63 = vpop.f32.mrf.mxu3  ;;  %v4224_v1 = vmax.f32 %v4203_v26, 0.0 }
 0x628   :  { %v4133_v31 = vrot.slane %v4062_v44, 2 }
 0x629   :  { %v3957_v12 = vadd.f32 %v18624_v57, %v3786_v37  ;;  %v4319_v58 = vpack.c.bf16 %v4224_v1, %v4223_v59  ;;  %v18635_v1 = vld [vmem:[#allocation42_spill] sm:$0xff] }
 0x62a   :  { %v4134_v46 = vsel %vm3124_vm13, %v4131_v17, %v4133_v31  ;;  %vm4268_vm11 = vcmp.eq.s32.totalorder %v18635_v1, %v18636_v52  ;;  %vm4274_vm6 = vcmp.eq.s32.totalorder %v18635_v1, %v18642_v60  ;;  %v14173_v52 = vld [vmem:[#allocation19 + $0x20] sm:$0xff] }
 0x62b   :  { %v4021_v23 = vrot.slane %v3957_v12, 1  ;;  %4345 = vmatpush.bf16.msra.mxu0 %v4319_v58  ;;  %v4180_v7 = vmax.f32 %v4060_v6, %v4134_v46  ;;  %v3286_v6 = vadd.f32 %v18630_v55, %v3115_v43  ;;  %v18638_v58 = vmov 1.0|1.0   ;;  %v18652_v43 = vld [vmem:[#allocation58_spill] sm:$0xff] }
 0x62c   :  { %v3504_v3 = vpop.f32.mrf.mxu2 }
 0x62d   :  { %v3532_v51 = vadd.f32 %v3504_v3, %v3285_v4  ;;  %v4022_v5 = vsel %vm18626_vm15, %v4019_v30, %v4021_v23  ;;  %v4204_v45 = vadd.f32 %v17524_v33, %v4180_v7  ;;  %v4064_v9 = vmax.f32 %v3957_v12, %v4021_v23  ;;  %v18643_v4 = vld [vmem:[#allocation55_spill] sm:$0xff]  ;;  %v18645_v3 = vld [vmem:[#allocation57_spill] sm:$0xff] }
 0x62e   :  { %v4063_v54 = vmax.f32 %v3956_v42, %v4022_v5  ;;  %v18644_v7 = vld [vmem:[#allocation63_spill] sm:$0xff]  ;;  %v18647_v5 = vld [vmem:[#allocation60_spill] sm:$0xff] }
 0x62f   :  { %v3787_v53 = vadd.f32 %v3759_v29, %v3532_v51  ;;  %4346 = vmatpush.bf16.msra.mxu0 %v4318_v14  ;;  %v4225_v16 = vmax.f32 %v4204_v45, 0.0  ;;  %v18646_v51 = vld [vmem:[#allocation61_spill] sm:$0xff] }
 0x630   :  { %v4135_v24 = vrot.slane %v4063_v54, 2  ;;  %v18659_v45 = vld [vmem:[#allocation49_spill] sm:$0xff] }
 0x631   :  { %v3958_v35 = vadd.f32 %v18629_v8, %v3787_v53  ;;  %v18649_v53 = vld [vmem:[#allocation53_spill] sm:$0xff] }
 0x632   :  { %v4136_v32 = vsel %vm3124_vm13, %v4133_v31, %v4135_v24  ;;  %v18651_v10 = vpack.c.bf16 %v18649_v53, %v18650_v62 }
 0x633   :  { %v4067_v19 = vrot.slane %v3958_v35, 1  ;;  %4347 = vmatpush.bf16.msra.mxu0 %v17616_v28  ;;  %v4181_v48 = vmax.f32 %v4061_v61, %v4136_v32  ;;  %v18655_v32 = vld [vmem:[#allocation64_spill] sm:$0xff] }
 0x634   :  { %v3507_v40 = vpop.f32.mrf.mxu2 }
 0x635   :  { %v4068_v29 = vsel %vm18631_vm7, %v4021_v23, %v4067_v19  ;;  %v3533_v14 = vadd.f32 %v3507_v40, %v3286_v6  ;;  %v4205_v49 = vadd.f32 %v17524_v33, %v4181_v48  ;;  %v18640_v23 = vld [vmem:[#allocation48_spill] sm:$0xff]  ;;  %vm4278_vm7 = vcmp.eq.s32.totalorder %v18635_v1, %v18643_v4 }
 0x636   :  { %v4074_v20 = vmax.f32 %v3957_v12, %v4068_v29  ;;  %vm4270_vm0 = vcmp.eq.s32.totalorder %v18635_v1, %v18640_v23  ;;  %v18658_v48 = vmov 0.0  }
 0x637   :  { %v3788_v34 = vadd.f32 %v3762_v38, %v3533_v14  ;;  %4348 = vmatpush.bf16.msra.mxu0 %v17600_v13  ;;  %v4226_v17 = vmax.f32 %v4205_v49, 0.0 }
 0x638   :  { %v4137_v22 = vrot.slane %v4074_v20, 2 }
 0x639   :  { %v3959_v28 = vadd.f32 %v17498_v36, %v3788_v34  ;;  %v4320_v42 = vpack.c.bf16 %v4226_v17, %v4225_v16  ;;  %v14172_v17 = vld [vmem:[#allocation19 + $0x18] sm:$0xff] }
 0x63a   :  { %v4138_v61 = vsel %vm3124_vm13, %v4135_v24, %v4137_v22  ;;  %v18653_v24 = vld [vmem:[#allocation59_spill] sm:$0xff]  ;;  %4612 = vmatpush.bf16.msra.mxu3 %v14172_v17 }
 0x63b   :  { %v4069_v56 = vrot.slane %v3959_v28, 1  ;;  %4349 = vmatpush.bf16.msra.mxu0 %v17584_v2  ;;  %v4182_v30 = vmax.f32 %v4062_v44, %v4138_v61  ;;  %v18633_v44 = vmov 65535   ;;  %v18654_v8 = vpack.c.bf16 %v18652_v43, %v18653_v24  ;;  %v14192_v17 = vld [vmem:[#allocation19 + $0xb8] sm:$0xff] }
 0x63c   :  { %v3509_v25 = vpop.f32.mrf.mxu2  ;;  %v4340_v37 = vsel %vm4339_vm5, 4294967295, %v18633_v44  ;;  %v14177_v44 = vld [vmem:[#allocation19 + $0x40] sm:$0xff] }
 0x63d   :  { %v4070_v15 = vsel %vm18632_vm10, %v4067_v19, %v4069_v56  ;;  %v4076_v0 = vmax.f32 %v3959_v28, %v4069_v56  ;;  %v4206_v21 = vadd.f32 %v17524_v33, %v4182_v30  ;;  %v4341_v31 = vsel %vm18637_vm3, %v4340_v37, 0  ;;  %v18656_v19 = vld [vmem:[#allocation62_spill] sm:$0xff]  ;;  %v14169_v56 = vld [vmem:[#allocation19] sm:$0xff] }
 0x63e   :  { %v4075_v39 = vmax.f32 %v3958_v35, %v4070_v15  ;;  %vm4280_vm10 = vcmp.eq.s32.totalorder %v18635_v1, %v18644_v7  ;;  %vm4323_vm3 = vcmask 318464   ;;  %v18657_v55 = vpack.c.bf16 %v18655_v32, %v18656_v19  ;;  %v14171_v28 = vld [vmem:[#allocation19 + $0x10] sm:$0xff]  ;;  %v14180_v25 = vld [vmem:[#allocation19 + $0x58] sm:$0xff] }
 0x63f   :  { %v4141_v38 = vrot.slane %v4076_v0, 2  ;;  %4350 = vmatpush.bf16.msra.mxu0 %v17568_v11  ;;  %v18634_v11 = vld [vmem:[#allocation47_spill] sm:$0xff]  ;;  %vm11321_vm5 = vmpackc.low %vm4280_vm10, %vm4278_vm7  ;;  %4613 = vmatpush.bf16.msra.mxu3 %v14171_v28 }
 0x640   :  { %v4139_v13 = vrot.slane %v4075_v39, 2  ;;  %vm4266_vm2 = vcmp.eq.s32.totalorder %v18635_v1, %v18634_v11  ;;  %v14184_v15 = vld [vmem:[#allocation19 + $0x78] sm:$0xff]  ;;  %4696 = vmatpush.bf16.msra.mxu1 %v14180_v25  ;;  %v14179_v39 = vld [vmem:[#allocation19 + $0x50] sm:$0xff] }
 0x641   :  { %vm11315_vm9 = vmpackc.low %vm4268_vm11, %vm4266_vm2  ;;  %vm4282_vm2 = vcmp.eq.s32.totalorder %v18635_v1, %v18645_v3  ;;  %v14176_v0 = vld [vmem:[#allocation19 + $0x38] sm:$0xff] }
 0x642   :  { %v4142_v36 = vsel %vm3124_vm13, %v4139_v13, %v4141_v38  ;;  %v4140_v18 = vsel %vm3124_vm13, %v4137_v22, %v4139_v13  ;;  %vm11323_vm11 = vmpackc.low %vm4282_vm2, %vm4282_vm2  ;;  %v14183_v38 = vld [vmem:[#allocation19 + $0x70] sm:$0xff]  ;;  %4547 = vmatpush.bf16.msra.mxu2 %v14176_v0 }
 0x643   :  { %4351 = vmatpush.bf16.msra.mxu0 %v17552_v27  ;;  %v4184_v26 = vmax.f32 %v4064_v9, %v4142_v36  ;;  %v4183_v2 = vmax.f32 %v4063_v54, %v4140_v18  ;;  %v4227_v27 = vmax.f32 %v4206_v21, 0.0  ;;  %v18648_v54 = vpack.c.bf16 %v18646_v51, %v18647_v5  ;;  %v14175_v18 = vld [vmem:[#allocation19 + $0x30] sm:$0xff]  ;;  %v14174_v21 = vld [vmem:[#allocation19 + $0x28] sm:$0xff] }
 0x644   :  { %4697 = vmatpush.bf16.msra.mxu1 %v14179_v39 }
 0x645   :  { %v4208_v63 = vadd.f32 %v17524_v33, %v4184_v26  ;;  %v4207_v59 = vadd.f32 %v17524_v33, %v4183_v2  ;;  %v18639_v33 = vld [vmem:[#allocation50_spill] sm:$0xff]  ;;  %v14178_v26 = vld [vmem:[#allocation19 + $0x48] sm:$0xff] }
 0x646   :  { %vm4272_vm12 = vcmp.eq.s32.totalorder %v18635_v1, %v18639_v33  ;;  %v14182_v2 = vld [vmem:[#allocation19 + $0x68] sm:$0xff]  ;;  %4548 = vmatpush.bf16.msra.mxu2 %v14175_v18 }
 0x647   :  { %4352 = vmatpush.bf16.msra.mxu0 %v17536_v50  ;;  %v4229_v47 = vmax.f32 %v4208_v63, 0.0  ;;  %v4228_v41 = vmax.f32 %v4207_v59, 0.0  ;;  %vm11317_vm4 = vmpackc.low %vm4272_vm12, %vm4270_vm0  ;;  %v18641_v50 = vld [vmem:[#allocation52_spill] sm:$0xff]  ;;  %vm4420_vm12 = vcmask 519168   ;;  %vm4530_vm0 = vcmask 523264  }
 0x648   :  { %vm4276_vm1 = vcmp.eq.s32.totalorder %v18635_v1, %v18641_v50  ;;  %4698 = vmatpush.bf16.msra.mxu1 %v14178_v26  ;;  %v14181_v63 = vld [vmem:[#allocation19 + $0x60] sm:$0xff] }
 0x649   :  { %v4322_v57 = vpack.c.bf16 %v4229_v47, %v4229_v47  ;;  %v4321_v12 = vpack.c.bf16 %v4228_v41, %v4227_v27  ;;  %vm11319_vm15 = vmpackc.low %vm4276_vm1, %vm4274_vm6  ;;  %vm18662_vm1 = vcmask 1044480   ;;  %v14189_v26 = vld [vmem:[#allocation19 + $0xa0] sm:$0xff] }
 0x64a   :  { %11316 = vmatmul.msk.bf16.vlgmr.msra.gmra.mxu0 %vm11315_vm9, %v18638_v58  ;;  %vm18660_vm9 = vcmp.eq.s32.totalorder %v18659_v45, %v18645_v3  ;;  %4549 = vmatpush.bf16.msra.mxu2 %v14174_v21  ;;  %vm18663_vm6 = vmmov %vm18662_vm1 }
 0x64b   :  { %v4343_v46 = vand.u32 %v4341_v31, %v4322_v57  ;;  %v4301_v40 = vsel %vm18660_vm9, 1.0, %v18658_v48  ;;  %vm18665_vm7 = vmmov %vm18662_vm1  ;;  %vm5420_vm9 = vcmask 474112  }
 0x64c   :  { %v4311_v14 = vpack.c.bf16 %v4301_v40, %v4301_v40  ;;  %4699 = vmatpush.bf16.msra.mxu1 %v14177_v44  ;;  %vm18666_vm10 = vmmov %vm18662_vm1 }
 0x64d   :  { %4383 = vmatpush.bf16.msrb.mxu0 %v4343_v46  ;;  %vm18668_vm2 = vmmov %vm18662_vm1 }
 0x64e   :  { %4550 = vmatpush.bf16.msra.mxu2 %v14173_v52 }
 0x651   :  { %4384 = vmatpush.bf16.msrb.mxu0 %v4321_v12 }
 0x655   :  { %4385 = vmatpush.bf16.msrb.mxu0 %v4320_v42  ;;  %v14170_v42 = vld [vmem:[#allocation19 + $0x8] sm:$0xff] }
 0x656   :  { %4614 = vmatpush.bf16.msra.mxu3 %v14170_v42 }
 0x659   :  { %4792 = vmatpush.bf16.msra.mxu0 %v14184_v15  ;;  %v14191_v15 = vld [vmem:[#allocation19 + $0xb0] sm:$0xff] }
 0x65a   :  { %11318 = vmatmul.msk.bf16.gmra.mxu0 %vm11317_vm4, %v18638_v58  ;;  %4615 = vmatpush.bf16.msra.mxu3 %v14169_v56  ;;  %vm18661_vm4 = vcmask 1046528  }
 0x65d   :  { %4793 = vmatpush.bf16.msra.mxu0 %v14183_v38  ;;  %v14190_v38 = vld [vmem:[#allocation19 + $0xa8] sm:$0xff] }
 0x65e   :  { %5031 = vmatpush.bf16.msrb.mxu3 %v14192_v17 }
 0x661   :  { %4794 = vmatpush.bf16.msra.mxu0 %v14182_v2 }
 0x662   :  { %5032 = vmatpush.bf16.msrb.mxu3 %v14191_v15 }
 0x665   :  { %4795 = vmatpush.bf16.msra.mxu0 %v14181_v63 }
 0x666   :  { %5033 = vmatpush.bf16.msrb.mxu3 %v14190_v38 }
 0x66a   :  { %11320 = vmatmul.msk.bf16.gmra.mxu0 %vm11319_vm15, %v18638_v58  ;;  %vm18664_vm15 = vmmov %vm18661_vm4  ;;  %5034 = vmatpush.bf16.msrb.mxu3 %v14189_v26 }
 0x67a   :  { %11322 = vmatmul.msk.bf16.gmra.mxu0 %vm11321_vm5, %v18638_v58  ;;  %vm18667_vm5 = vmmov %vm18661_vm4 }
 0x68a   :  { %11324 = vmatmul.msk.bf16.gmra.mxu0 %vm11323_vm11, %v18638_v58  ;;  %vm18669_vm11 = vmmov %vm18662_vm1 }
 0x69a   :  { %11325 = vmatmul.msk.bf16.vlgmr.msrb.gmra.mxu0 %vm4323_vm3, %v18648_v54 }
 0x6aa   :  { %11326 = vmatmul.msk.bf16.gmra.mxu0 %vm4323_vm3, %v18651_v10 }
 0x6ba   :  { %11327 = vmatmul.msk.bf16.gmra.mxu0 %vm4323_vm3, %v18654_v8 }
 0x6c7   :  { %v4354_v35 = vpop.f32.mrf.mxu0 }
 0x6ca   :  { %11328 = vmatmul.msk.bf16.gmra.mxu0 %vm4323_vm3, %v18657_v55 }
 0x6cf   :  { %v4356_v6 = vpop.f32.mrf.mxu0 }
 0x6d7   :  { %v4359_v29 = vpop.f32.mrf.mxu0 }
 0x6da   :  { %11329 = vmatmul.msk.bf16.gmra.mxu0 %vm4323_vm3, %v4311_v14 }
 0x6df   :  { %v4361_v49 = vpop.f32.mrf.mxu0 }
 0x6e7   :  { %v17712_v20 = vpop.f32.mrf.mxu0 }
 0x6ef   :  { %v17714_v34 = vpop.f32.mrf.mxu0 }
 0x6f7   :  { %v17716_v16 = vpop.f32.mrf.mxu0 }
 0x6ff   :  { %v17718_v22 = vpop.f32.mrf.mxu0 }
 0x707   :  { %v17720_v61 = vpop.f32.mrf.mxu0 }
 0x70f   :  { %v4376_v30 = vpop.f32.mrf.mxu0 }
 0x717   :  { %v4387_v13 = vpop.f32.mrf.mxu0 }
 0x718   :  { %v4388_v9 = vadd.f32 %v4387_v13, %v4354_v35 }
 0x71a   :  { %v4411_v36 = vpack.c.bf16 %v4388_v9, %v4388_v9 }
 0x71c   :  { %4421 = vst.msk [vmem:[#allocation3] sm:$0xf] %vm4420_vm12, %v4411_v36 }
 0x71f   :  { %v4389_v37 = vpop.f32.mrf.mxu0 }
 0x720   :  { %v4390_v59 = vadd.f32 %v4389_v37, %v4356_v6 }
 0x722   :  { %v4412_v11 = vpack.c.bf16 %v4390_v59, %v4390_v59 }
 0x723   :  { %v4637_v46 = vld [vmem:[#allocation3] sm:$0xe] }
 0x724   :  { %4422 = vst.msk [vmem:[#allocation3 + $0x4] sm:$0xf] %vm4420_vm12, %v4412_v11  ;;  %v4729_v23 = vld [vmem:[#allocation3] sm:$0x8]  ;;  %v4647_v50 = vunpack.c.l.b16 %v4637_v46  ;;  %v14195_v46 = vld [vmem:[#allocation19 + $0xd0] sm:$0xff] }
 0x725   :  { %v4741_v7 = vunpack.c.l.b16 %v4729_v23 }
 0x727   :  { %v4392_v47 = vpop.f32.mrf.mxu0 }
 0x728   :  { %v4393_v27 = vadd.f32 %v4392_v47, %v4359_v29 }
 0x72a   :  { %v4413_v41 = vpack.c.bf16 %v4393_v27, %v4393_v27 }
 0x72b   :  { %v14850_v31 = vld [vmem:[#allocation3] sm:$0xff]  }
 0x72c   :  { %4423 = vst.msk [vmem:[#allocation3 + $0x8] sm:$0xf] %vm4420_vm12, %v4413_v41  ;;  %11374 = vmatmul.msk.bf16.vlgmr.msra.gmra.mxu3 %vm4530_vm0, %v14850_v31  ;;  %v14852_v33 = vunpack.c.h.b16 %v14850_v31  ;;  %v4478_v60 = vshll.u32 %v14850_v31, 16  ;;  %v4476_v43 = vshrl.u32 %v14850_v31, 16  ;;  %v5278_v55 = vld [vmem:[#allocation3 + $0x4] sm:$0x8] }
 0x72d   :  { %v5288_v28 = vunpack.c.l.b16 %v5278_v55  ;;  %v14196_v31 = vld [vmem:[#allocation19 + $0xd8] sm:$0xff]  ;;  %v4826_v38 = vld [vmem:[#allocation3 + $0x4] sm:$0xf] }
 0x72e   :  { %v4648_v51 = vpack.c.b16 %v14852_v33, %v4647_v50  ;;  %v4743_v5 = vpack.c.b16 %v14852_v33, %v4741_v7  ;;  %v4480_v53 = vrot.slane %v4478_v60, 1  ;;  %5127 = vmatpush.bf16.msrb.mxu1 %v14196_v31  ;;  %v14187_v50 = vld [vmem:[#allocation19 + $0x90] sm:$0xff]  ;;  %v14194_v7 = vld [vmem:[#allocation19 + $0xc8] sm:$0xff] }
 0x72f   :  { %v4394_v57 = vpop.f32.mrf.mxu0 }
 0x730   :  { %v4395_v12 = vadd.f32 %v4394_v57, %v4361_v49  ;;  %v4649_v24 = vrot.slane %v4648_v51, 1  ;;  %v4745_v35 = vrot.slane %v4743_v5, 3  ;;  %v4481_v14 = vor.u32 %v4480_v53, %v4476_v43  ;;  %v14200_v57 = vld [vmem:[#allocation19 + $0xf8] sm:$0xff]  ;;  %v14186_v5 = vld [vmem:[#allocation19 + $0x88] sm:$0xff] }
 0x731   :  { %5245 = vmatpush.bf16.msrb.mxu0 %v14200_v57 }
 0x732   :  { %v4414_v58 = vpack.c.bf16 %v4395_v12, %v4395_v12  ;;  %5128 = vmatpush.bf16.msrb.mxu1 %v14195_v46 }
 0x734   :  { %4424 = vst.msk [vmem:[#allocation3 + $0xc] sm:$0xf] %vm4420_vm12, %v4414_v58  ;;  %v14188_v58 = vld [vmem:[#allocation19 + $0x98] sm:$0xff] }
 0x735   :  { %4946 = vmatpush.bf16.msrb.mxu2 %v14188_v58 }
 0x736   :  { %5129 = vmatpush.bf16.msrb.mxu1 %v14194_v7 }
 0x737   :  { %v4397_v4 = vpop.f32.mrf.mxu0 }
 0x738   :  { %v4398_v3 = vadd.f32 %v4397_v4, %v17712_v20 }
 0x739   :  { %4947 = vmatpush.bf16.msrb.mxu2 %v14187_v50 }
 0x73a   :  { %v4415_v54 = vpack.c.bf16 %v4398_v3, %v4398_v3  ;;  %v14198_v3 = vld [vmem:[#allocation19 + $0xe8] sm:$0xff] }
 0x73b   :  { %v14167_v62 = vld [vmem:[#allocation3 + $0x8] sm:$0xff] }
 0x73c   :  { %v17728_v10 = vld [vmem:[#allocation3 + $0x8] sm:$0xff]   ;;  %4425 = vst.msk [vmem:[#allocation3 + $0x10] sm:$0xf] %vm4420_vm12, %v4415_v54  ;;  %11375 = vmatmul.msk.bf16.gmra.mxu3 %vm4530_vm0, %v14167_v62  ;;  %v4650_v8 = vrot.slane %v14167_v62, 1  ;;  %v4746_v32 = vrot.slane %v14167_v62, 3  ;;  %v4483_v19 = vshll.u32 %v14167_v62, 16 }
 0x73d   :  { %v17733_v6 = vunpack.c.l.b16 %v17728_v10  ;;  %v4487_v44 = vshrl.u32 %v14167_v62, 16  ;;  %4948 = vmatpush.bf16.msrb.mxu2 %v14186_v5  ;;  %v4875_v31 = vshrl.u32 %v17728_v10, 16  ;;  %v4878_v57 = vshll.u32 %v17728_v10, 16 }
 0x73e   :  { %v4651_v40 = vsel %vm18661_vm4, %v4649_v24, %v4650_v8  ;;  %v4747_v29 = vsel %vm18662_vm1, %v4745_v35, %v4746_v32  ;;  %v4485_v49 = vrot.slane %v4483_v19, 1 }
 0x73f   :  { %v4399_v45 = vpop.f32.mrf.mxu0  ;;  %11394 = vmatmul.msk.bf16.vlgmr.msra.gmra.mxu1 %vm4530_vm0, %v4651_v40  ;;  %11414 = vmatmul.msk.bf16.vlgmr.msra.gmra.mxu0 %vm4530_vm0, %v4747_v29  ;;  %v5289_v30 = vpack.c.b16 %v17733_v6, %v5288_v28  ;;  %v14193_v29 = vld [vmem:[#allocation19 + $0xc0] sm:$0xff]  ;;  %v4877_v50 = vrot.slane %v4875_v31, 3 }
 0x740   :  { %v4400_v20 = vadd.f32 %v4399_v45, %v17714_v34  ;;  %v4486_v42 = vsel %vm2122_vm14, %v4481_v14, %v4485_v49  ;;  %v4489_v11 = vor.u32 %v4487_v44, %v4485_v49  ;;  %v14197_v14 = vld [vmem:[#allocation19 + $0xe0] sm:$0xff]  ;;  %5130 = vmatpush.bf16.msrb.mxu1 %v14193_v29 }
 0x741   :  { %11354 = vmatmul.msk.bf16.vlgmr.msra.gmra.mxu2 %vm4530_vm0, %v4486_v42  ;;  %v5290_v34 = vrot.slane %v5289_v30, 3  ;;  %v14185_v49 = vld [vmem:[#allocation19 + $0x80] sm:$0xff] }
 0x742   :  { %v4416_v56 = vpack.c.bf16 %v4400_v20, %v4400_v20  ;;  %4949 = vmatpush.bf16.msrb.mxu2 %v14185_v49  ;;  %v4825_v44 = vld [vmem:[#allocation3] sm:$0x8] }
 0x743   :  { %v17743_v25 = vld [vmem:[#allocation3 + $0xc] sm:$0xff]  }
 0x744   :  { %4426 = vst.msk [vmem:[#allocation3 + $0x14] sm:$0xf] %vm4420_vm12, %v4416_v56  ;;  %v5291_v0 = vrot.slane %v17743_v25, 3  ;;  %v5081_v7 = vrot.slane %v17743_v25, 2 }
 0x746   :  { %v17749_v9 = vsel %vm18663_vm6, %v5290_v34, %v5291_v0 }
 0x747   :  { %v4402_v39 = vpop.f32.mrf.mxu0 }
 0x748   :  { %v4403_v13 = vadd.f32 %v4402_v39, %v17716_v16 }
 0x74a   :  { %v4417_v36 = vpack.c.bf16 %v4403_v13, %v4403_v13 }
 0x74b   :  { %v17751_v18 = vld [vmem:[#allocation3 + $0x10] sm:$0xff] }
 0x74c   :  { %4427 = vst.msk [vmem:[#allocation3 + $0x18] sm:$0xf] %vm4420_vm12, %v4417_v36  ;;  %11376 = vmatmul.msk.bf16.gmra.mxu3 %vm4530_vm0, %v17751_v18  ;;  %v4652_v2 = vrot.slane %v17751_v18, 1  ;;  %v4748_v21 = vrot.slane %v17751_v18, 3  ;;  %v4491_v16 = vshll.u32 %v17751_v18, 16  ;;  %v4495_v45 = vshrl.u32 %v17751_v18, 16 }
 0x74d   :  { %v4852_v18 = vunpack.c.l.b16 %v4826_v38 }
 0x74e   :  { %v4653_v63 = vsel %vm18664_vm15, %v4650_v8, %v4652_v2  ;;  %v4749_v59 = vsel %vm18665_vm7, %v4746_v32, %v4748_v21  ;;  %v4493_v52 = vrot.slane %v4491_v16, 1 }
 0x74f   :  { %v4404_v37 = vpop.f32.mrf.mxu0  ;;  %11395 = vmatmul.msk.bf16.gmra.mxu1 %vm4530_vm0, %v4653_v63  ;;  %11415 = vmatmul.msk.bf16.gmra.mxu0 %vm4530_vm0, %v4749_v59  ;;  %v4987_v26 = vpack.c.b16 %v17733_v6, %v4852_v18  ;;  %v4851_v59 = vunpack.c.l.b16 %v4825_v44 }
 0x750   :  { %v4405_v47 = vadd.f32 %v4404_v37, %v17718_v22  ;;  %v4494_v27 = vsel %vm2122_vm14, %v4489_v11, %v4493_v52  ;;  %v14199_v22 = vld [vmem:[#allocation19 + $0xf0] sm:$0xff]  ;;  %v4497_v28 = vor.u32 %v4495_v45, %v4493_v52  ;;  %v5180_v11 = vshrl.u32 %v17743_v25, 16 }
 0x751   :  { %11355 = vmatmul.msk.bf16.gmra.mxu2 %vm4530_vm0, %v4494_v27  ;;  %5246 = vmatpush.bf16.msrb.mxu0 %v14199_v22  ;;  %v5183_v52 = vshll.u32 %v17743_v25, 16 }
 0x752   :  { %v4418_v41 = vpack.c.bf16 %v4405_v47, %v4405_v47  ;;  %v4860_v47 = vpack.c.b16 %v4852_v18, %v4851_v59  ;;  %v5182_v58 = vrot.slane %v5180_v11, 2 }
 0x753   :  { %v17766_v12 = vld [vmem:[#allocation3 + $0x14] sm:$0xff]   ;;  %v5185_v46 = vrot.slane %v5183_v52, 3  ;;  %v14202_v52 = vld [vmem:[#allocation19 + $0x108] sm:$0xff] }
 0x754   :  { %4428 = vst.msk [vmem:[#allocation3 + $0x1c] sm:$0xf] %vm4420_vm12, %v4418_v41  ;;  %v5293_v33 = vrot.slane %v17766_v12, 3  ;;  %v4867_v22 = vshrl.u32 %v4860_v47, 16 }
 0x755   :  { %5247 = vmatpush.bf16.msrb.mxu0 %v14198_v3  ;;  %v5186_v3 = vor.u32 %v5185_v46, %v5182_v58 }
 0x756   :  { %v17772_v4 = vsel %vm18666_vm10, %v5291_v0, %v5293_v33 }
 0x757   :  { %v4407_v23 = vpop.f32.mrf.mxu0 }
 0x758   :  { %v4408_v60 = vadd.f32 %v4407_v23, %v17720_v61 }
 0x759   :  { %5248 = vmatpush.bf16.msrb.mxu0 %v14197_v14  ;;  %v5083_v14 = vrot.slane %v17766_v12, 2 }
 0x75a   :  { %v4419_v51 = vpack.c.bf16 %v4408_v60, %v4408_v60  ;;  %v4880_v60 = vrot.slane %v4878_v57, 4  ;;  %v14201_v57 = vld [vmem:[#allocation19 + $0x100] sm:$0xff] }
 0x75b   :  { %v4436_v54 = vld [vmem:[#allocation3 + $0x18] sm:$0xff]  }
 0x75c   :  { %v4437_v53 = vld [vmem:[#allocation3 + $0x1c] sm:$0x1]  ;;  %4429 = vst.msk [vmem:[#allocation3 + $0x20] sm:$0xf] %vm4420_vm12, %v4419_v51  ;;  %v4469_v43 = vunpack.c.l.b16 %v4436_v54  ;;  %v4750_v55 = vrot.slane %v4436_v54, 3  ;;  %v4869_v51 = vrot.slane %v4867_v22, 3 }
 0x75d   :  { %v4446_v62 = vld [vmem:[#allocation3 + $0x1c] sm:$0x3]  ;;  %v4573_v24 = vunpack.c.l.b16 %v4437_v53 }
 0x75e   :  { %v4470_v8 = vunpack.c.l.b16 %v4446_v62  ;;  %v4751_v17 = vsel %vm18668_vm2, %v4748_v21, %v4750_v55  ;;  %v17779_v56 = vld [vmem:[#allocation3 + $0x18] sm:$0xff]   ;;  %v4881_v62 = vor.u32 %v4880_v60, %v4877_v50 }
 0x75f   :  { %v4574_v61 = vpack.c.b16 %v4573_v24, %v4469_v43  ;;  %v4409_v32 = vpop.f32.mrf.mxu0  ;;  %11416 = vmatmul.msk.bf16.gmra.mxu0 %vm4530_vm0, %v4751_v17  ;;  %v17786_v34 = vunpack.c.h.b16 %v17779_v56  ;;  %v5084_v17 = vsel %vm3124_vm13, %v5081_v7, %v5083_v14 }
 0x760   :  { %v4474_v35 = vpack.c.b16 %v4470_v8, %v4469_v43 }
 0x761   :  { %11377 = vmatmul.msk.bf16.gmra.mxu3 %vm4530_vm0, %v4574_v61  ;;  %v14879_v61 = vld [vmem:[#allocation3 + $0x10] sm:$0xff]  }
 0x762   :  { %v4654_v19 = vrot.slane %v4474_v35, 1  ;;  %v4499_v40 = vshll.u32 %v4474_v35, 16  ;;  %v4503_v21 = vshrl.u32 %v4474_v35, 16  ;;  %v5191_v35 = vshll.u32 %v17766_v12, 16 }
 0x763   :  { %v5160_v30 = vld [vmem:[#allocation3 + $0x20] sm:$0xf]  ;;  %v4884_v32 = vshrl.u32 %v14879_v61, 16 }
 0x764   :  { %v4655_v20 = vsel %vm18667_vm5, %v4652_v2, %v4654_v19  ;;  %v4501_v42 = vrot.slane %v4499_v40, 1  ;;  %v5170_v0 = vunpack.c.l.b16 %v5160_v30  ;;  %v5064_v2 = vld [vmem:[#allocation3 + $0x4] sm:$0xc]  ;;  %v5193_v45 = vrot.slane %v5191_v35, 3  ;;  %v4833_v18 = vld [vmem:[#allocation3 + $0x20] sm:$0x1] }
 0x765   :  { %11396 = vmatmul.msk.bf16.gmra.mxu1 %vm4530_vm0, %v4655_v20  ;;  %v5076_v16 = vunpack.c.l.b16 %v5064_v2  ;;  %v4886_v40 = vrot.slane %v4884_v32, 3  ;;  %v4893_v2 = vshrl.u32 %v17779_v56, 16  ;;  %v4859_v44 = vunpack.c.l.b16 %v4833_v18 }
 0x766   :  { %v4502_v15 = vsel %vm2122_vm14, %v4497_v28, %v4501_v42  ;;  %v17789_v39 = vpack.c.b16 %v5170_v0, %v17786_v34  ;;  %v4505_v37 = vor.u32 %v4503_v21, %v4501_v42  ;;  %vm4865_vm14 = vsmask.f32 4352  ;;  %v5065_v42 = vld [vmem:[#allocation3 + $0x20] sm:$0x7] }
 0x767   :  { %11356 = vmatmul.msk.bf16.gmra.mxu2 %vm4530_vm0, %v4502_v15  ;;  %v5078_v63 = vpack.c.b16 %v17733_v6, %v5076_v16  ;;  %v14204_v15 = vld [vmem:[#allocation19 + $0x118] sm:$0xff]  ;;  %v5077_v0 = vunpack.c.l.b16 %v5065_v42  ;;  %v4896_v21 = vshll.u32 %v17779_v56, 16  ;;  %v4895_v59 = vrot.slane %v4893_v2, 3 }
 0x768   :  { %v5295_v13 = vrot.slane %v17789_v39, 3  ;;  %v5197_v38 = vshrl.u32 %v17789_v39, 16  ;;  %5337 = vmatpush.bf16.msra.mxu2 %v14204_v15 }
 0x769   :  { %v5173_v27 = vshrl.u32 %v5078_v63, 16  ;;  %v5176_v41 = vshll.u32 %v5078_v63, 16  ;;  %v5080_v54 = vrot.slane %v5078_v63, 2  ;;  %v5079_v16 = vpack.c.b16 %v5077_v0, %v17786_v34 }
 0x76a   :  { %v17795_v36 = vsel %vm18669_vm11, %v5293_v33, %v5295_v13  ;;  %v4870_v33 = vshll.u32 %v4860_v47, 16  ;;  %v4898_v11 = vrot.slane %v4896_v21, 4  ;;  %v4990_v47 = vpack.c.b16 %v4859_v44, %v17786_v34 }
 0x76b   :  { %v5175_v23 = vrot.slane %v5173_v27, 2  ;;  %v5178_v6 = vrot.slane %v5176_v41, 3  ;;  %v5082_v10 = vsel %vm3124_vm13, %v5080_v54, %v5081_v7  ;;  %v5085_v27 = vrot.slane %v5079_v16, 2 }
 0x76c   :  { %v4872_v5 = vrot.slane %v4870_v33, 4  ;;  %v4899_v31 = vor.u32 %v4898_v11, %v4895_v59  ;;  %v4864_v34 = vpack.c.b16 %v4859_v44, %v4859_v44 }
 0x76d   :  { %v5179_v53 = vor.u32 %v5178_v6, %v5175_v23  ;;  %v5086_v56 = vsel %vm3124_vm13, %v5083_v14, %v5085_v27  ;;  %vm18670_vm13 = vmmov %vm18662_vm1 }
 0x76e   :  { %v4873_v24 = vor.u32 %v4872_v5, %v4869_v51  ;;  %v4902_v22 = vshll.u32 %v4864_v34, 16 }
 0x76f   :  { %11417 = vmatmul.msk.bf16.gmra.mxu0 %vm4530_vm0, %v4750_v55  ;;  %v5187_v43 = vsel %vm3542_vm8, %v5179_v53, %v5186_v3 }
 0x770   :  { %v4882_v8 = vsel %vm4865_vm14, %v4873_v24, %v4881_v62  ;;  %v4904_v33 = vrot.slane %v4902_v22, 4 }
 0x771   :  { %11454 = vmatmul.msk.bf16.vlgmr.msrb.gmra.mxu3 %vm4530_vm0, %v4987_v26  ;;  %v14203_v26 = vld [vmem:[#allocation19 + $0x110] sm:$0xff] }
 0x772   :  { %5338 = vmatpush.bf16.msra.mxu2 %v14203_v26  ;;  %v4905_v23 = vsel %vm4865_vm14, %v4899_v31, %v4904_v33 }
 0x775   :  { %11397 = vmatmul.msk.bf16.gmra.mxu1 %vm4530_vm0, %v4654_v19  ;;  %v4887_v19 = vshll.u32 %v14879_v61, 16 }
 0x776   :  { %5339 = vmatpush.bf16.msra.mxu2 %v14202_v52 }
 0x777   :  { %11357 = vmatmul.msk.bf16.gmra.mxu2 %vm4530_vm0, %v4505_v37  ;;  %v4889_v29 = vrot.slane %v4887_v19, 4  ;;  %v5199_v37 = vrot.slane %v5197_v38, 2 }
 0x779   :  { %v4890_v20 = vor.u32 %v4889_v29, %v4886_v40 }
 0x77a   :  { %5340 = vmatpush.bf16.msra.mxu2 %v14201_v57 }
 0x77b   :  { %v4891_v30 = vsel %vm4865_vm14, %v4881_v62, %v4890_v20  ;;  %v4900_v46 = vsel %vm4865_vm14, %v4890_v20, %v4899_v31 }
 0x77f   :  { %11494 = vmatmul.msk.bf16.vlgmr.msrb.gmra.mxu0 %vm4530_vm0, %v5187_v43 }
 0x781   :  { %11455 = vmatmul.msk.bf16.gmra.mxu3 %vm4530_vm0, %v17743_v25  ;;  %v5188_v25 = vshrl.u32 %v17766_v12, 16 }
 0x783   :  { %v5190_v55 = vrot.slane %v5188_v25, 2 }
 0x785   :  { %11474 = vmatmul.msk.bf16.vlgmr.msrb.gmra.mxu1 %vm4530_vm0, %v5082_v10  ;;  %v5194_v49 = vor.u32 %v5193_v45, %v5190_v55 }
 0x787   :  { %11434 = vmatmul.msk.bf16.vlgmr.msrb.gmra.mxu2 %vm4530_vm0, %v4882_v8  ;;  %v5195_v28 = vsel %vm3542_vm8, %v5186_v3, %v5194_v49 }
 0x78f   :  { %11495 = vmatmul.msk.bf16.gmra.mxu0 %vm4530_vm0, %v5195_v28 }
 0x791   :  { %11456 = vmatmul.msk.bf16.gmra.mxu3 %vm4530_vm0, %v17766_v12  ;;  %v5200_v12 = vshll.u32 %v17789_v39, 16 }
 0x793   :  { %v5202_v63 = vrot.slane %v5200_v12, 3 }
 0x795   :  { %11475 = vmatmul.msk.bf16.gmra.mxu1 %vm4530_vm0, %v5084_v17  ;;  %v5203_v41 = vor.u32 %v5202_v63, %v5199_v37 }
 0x797   :  { %11435 = vmatmul.msk.bf16.gmra.mxu2 %vm4530_vm0, %v4891_v30  ;;  %v5204_v58 = vsel %vm3542_vm8, %v5194_v49, %v5203_v41 }
 0x79f   :  { %11496 = vmatmul.msk.bf16.gmra.mxu0 %vm4530_vm0, %v5204_v58 }
 0x7a1   :  { %11457 = vmatmul.msk.bf16.gmra.mxu3 %vm4530_vm0, %v4990_v47 }
 0x7a5   :  { %11476 = vmatmul.msk.bf16.gmra.mxu1 %vm4530_vm0, %v5086_v56 }
 0x7a7   :  { %11436 = vmatmul.msk.bf16.gmra.mxu2 %vm4530_vm0, %v4900_v46 }
 0x7af   :  { %11497 = vmatmul.msk.bf16.gmra.mxu0 %vm4530_vm0, %v5203_v41  ;;  %v4617_v6 = vpop.f32.mrf.mxu3 }
 0x7b5   :  { %11477 = vmatmul.msk.bf16.gmra.mxu1 %vm4530_vm0, %v5085_v27 }
 0x7b7   :  { %11437 = vmatmul.msk.bf16.gmra.mxu2 %vm4530_vm0, %v4905_v23  ;;  %v4619_v3 = vpop.f32.mrf.mxu3 }
 0x7bc   :  { %v4701_v50 = vpop.f32.mrf.mxu1  ;;  %v4797_v60 = vpop.f32.mrf.mxu0 }
 0x7bf   :  { %v4622_v24 = vpop.f32.mrf.mxu3 }
 0x7c4   :  { %v4552_v7 = vpop.f32.mrf.mxu2  ;;  %v4703_v54 = vpop.f32.mrf.mxu1 }
 0x7c5   :  { %v4618_v51 = vadd.f32 %v4617_v6, %v4552_v7  ;;  %v4799_v53 = vpop.f32.mrf.mxu0 }
 0x7c7   :  { %11514 = vmatmul.msk.bf16.vlgmr.msra.gmra.mxu2 %vm4530_vm0, %v17749_v9  ;;  %v4721_v5 = vadd.f32 %v4701_v50, %v4618_v51  ;;  %v4624_v55 = vpop.f32.mrf.mxu3 }
 0x7c9   :  { %v4817_v62 = vadd.f32 %v4797_v60, %v4721_v5 }
 0x7cc   :  { %v4554_v10 = vpop.f32.mrf.mxu2  ;;  %v4706_v61 = vpop.f32.mrf.mxu1 }
 0x7cd   :  { %v4620_v43 = vadd.f32 %v4619_v3, %v4554_v10  ;;  %v4802_v35 = vpop.f32.mrf.mxu0 }
 0x7cf   :  { %v4722_v8 = vadd.f32 %v4703_v54, %v4620_v43  ;;  %v4627_v28 = vpop.f32.mrf.mxu3 }
 0x7d1   :  { %v4818_v25 = vadd.f32 %v4799_v53, %v4722_v8 }
 0x7d4   :  { %v4557_v32 = vpop.f32.mrf.mxu2  ;;  %v4708_v40 = vpop.f32.mrf.mxu1 }
 0x7d5   :  { %v4623_v19 = vadd.f32 %v4622_v24, %v4557_v32  ;;  %v4804_v14 = vpop.f32.mrf.mxu0 }
 0x7d7   :  { %11515 = vmatmul.msk.bf16.gmra.mxu2 %vm4530_vm0, %v17772_v4  ;;  %v4723_v9 = vadd.f32 %v4706_v61, %v4623_v19  ;;  %v4629_v12 = vpop.f32.mrf.mxu3 }
 0x7d9   :  { %v4819_v45 = vadd.f32 %v4802_v35, %v4723_v9 }
 0x7dc   :  { %v4559_v29 = vpop.f32.mrf.mxu2 }
 0x7dd   :  { %v4625_v49 = vadd.f32 %v4624_v55, %v4559_v29  ;;  %v4807_v30 = vpop.f32.mrf.mxu0 }
 0x7df   :  { %v4724_v20 = vadd.f32 %v4708_v40, %v4625_v49 }
 0x7e1   :  { %v4820_v17 = vadd.f32 %v4804_v14, %v4724_v20 }
 0x7e2   :  { %v4711_v42 = vpop.f32.mrf.mxu1 }
 0x7e4   :  { %v4632_v37 = vpop.f32.mrf.mxu3 }
 0x7e5   :  { %v4809_v26 = vpop.f32.mrf.mxu0 }
 0x7e7   :  { %11516 = vmatmul.msk.bf16.gmra.mxu2 %vm4530_vm0, %v17795_v36 }
 0x7ea   :  { %v4562_v15 = vpop.f32.mrf.mxu2  ;;  %v4713_v18 = vpop.f32.mrf.mxu1 }
 0x7eb   :  { %v4628_v0 = vadd.f32 %v4627_v28, %v4562_v15 }
 0x7ec   :  { %v17853_v27 = vpop.f32.mrf.mxu3 }
 0x7ed   :  { %v4725_v4 = vadd.f32 %v4711_v42, %v4628_v0  ;;  %v4812_v11 = vpop.f32.mrf.mxu0 }
 0x7ef   :  { %v4821_v38 = vadd.f32 %v4807_v30, %v4725_v4 }
 0x7f2   :  { %v4564_v2 = vpop.f32.mrf.mxu2  ;;  %v4716_v63 = vpop.f32.mrf.mxu1 }
 0x7f3   :  { %v4630_v21 = vadd.f32 %v4629_v12, %v4564_v2 }
 0x7f4   :  { %v5036_v58 = vpop.f32.mrf.mxu3 }
 0x7f5   :  { %v4726_v44 = vadd.f32 %v4713_v18, %v4630_v21  ;;  %v17859_v57 = vpop.f32.mrf.mxu0 }
 0x7f7   :  { %11517 = vmatmul.msk.bf16.gmra.mxu2 %vm4530_vm0, %v5295_v13  ;;  %v4822_v16 = vadd.f32 %v4809_v26, %v4726_v44 }
 0x7fa   :  { %v4567_v59 = vpop.f32.mrf.mxu2  ;;  %v17857_v31 = vpop.f32.mrf.mxu1 }
 0x7fb   :  { %v4633_v36 = vadd.f32 %v4632_v37, %v4567_v59 }
 0x7fc   :  { %v5038_v24 = vpop.f32.mrf.mxu3 }
 0x7fd   :  { %v4727_v52 = vadd.f32 %v4716_v63, %v4633_v36  ;;  %v5250_v22 = vpop.f32.mrf.mxu0 }
 0x7ff   :  { %v4823_v47 = vadd.f32 %v4812_v11, %v4727_v52 }
 0x802   :  { %v17855_v41 = vpop.f32.mrf.mxu2  ;;  %v5132_v46 = vpop.f32.mrf.mxu1 }
 0x804   :  { %v5041_v35 = vpop.f32.mrf.mxu3 }
 0x805   :  { %v5252_v61 = vpop.f32.mrf.mxu0 }
 0x80a   :  { %v4951_v56 = vpop.f32.mrf.mxu2 }
 0x80b   :  { %v4971_v39 = vadd.f32 %v4951_v56, %v4817_v62  ;;  %v5134_v62 = vpop.f32.mrf.mxu1 }
 0x80c   :  { %v5043_v29 = vpop.f32.mrf.mxu3 }
 0x80d   :  { %v5056_v13 = vadd.f32 %v5036_v58, %v4971_v39  ;;  %v5255_v40 = vpop.f32.mrf.mxu0 }
 0x80f   :  { %v5152_v34 = vadd.f32 %v5132_v46, %v5056_v13 }
 0x811   :  { %v5270_v33 = vadd.f32 %v5250_v22, %v5152_v34 }
 0x812   :  { %v4953_v23 = vpop.f32.mrf.mxu2 }
 0x813   :  { %v4972_v6 = vadd.f32 %v4953_v23, %v4818_v25  ;;  %v5137_v19 = vpop.f32.mrf.mxu1 }
 0x814   :  { %v5046_v26 = vpop.f32.mrf.mxu3 }
 0x815   :  { %v5057_v32 = vadd.f32 %v5038_v24, %v4972_v6  ;;  %v5257_v4 = vpop.f32.mrf.mxu0  ;;  %v4635_v6 = vadd.f32 %v17853_v27, %v17855_v41 }
 0x817   :  { %v5153_v25 = vadd.f32 %v5134_v62, %v5057_v32 }
 0x819   :  { %v5271_v14 = vadd.f32 %v5252_v61, %v5153_v25 }
 0x81a   :  { %v4956_v50 = vpop.f32.mrf.mxu2 }
 0x81b   :  { %v4973_v60 = vadd.f32 %v4956_v50, %v4819_v45  ;;  %v17861_v45 = vld [vmem:[#allocation20] ss:$0 sm:$0xff]  ;;  %v5139_v28 = vpop.f32.mrf.mxu1 }
 0x81d   :  { %v5058_v42 = vadd.f32 %v5041_v35, %v4973_v60  ;;  %v5260_v59 = vpop.f32.mrf.mxu0 }
 0x81f   :  { %v5154_v12 = vadd.f32 %v5137_v19, %v5058_v42 }
 0x821   :  { %v5272_v21 = vadd.f32 %v5255_v40, %v5154_v12  ;;  %v5399_v12 = vpop.permute.xlu2 %5398 }
 0x822   :  { %v4958_v7 = vpop.f32.mrf.mxu2  ;;  %vm5407_vm3 = vcmp.eq.s32.totalorder %v18635_v1, %v5399_v12 }
 0x823   :  { %v4974_v3 = vadd.f32 %v4958_v7, %v4820_v17 }
 0x825   :  { %v5262_v50 = vpop.f32.mrf.mxu0 }
 0x82a   :  { %v4961_v51 = vpop.f32.mrf.mxu2 }
 0x82b   :  { %v4975_v5 = vadd.f32 %v4961_v51, %v4821_v38  ;;  %v5059_v38 = vadd.f32 %v5043_v29, %v4974_v3  ;;  %v4728_v51 = vadd.f32 %v17857_v31, %v4635_v6 }
 0x82d   :  { %v5155_v44 = vadd.f32 %v5139_v28, %v5059_v38  ;;  %v5060_v56 = vadd.f32 %v5046_v26, %v4975_v5  ;;  %v4824_v62 = vadd.f32 %v17859_v57, %v4728_v51  ;;  %v5265_v27 = vpop.f32.mrf.mxu0  ;;  %v5396_v26 = vpop.permute.xlu1 %5395 }
 0x82e   :  { %vm5406_vm8 = vcmp.eq.s32.totalorder %v18635_v1, %v5396_v26 }
 0x82f   :  { %v5273_v63 = vadd.f32 %v5257_v4, %v5155_v44 }
 0x832   :  { %v4963_v54 = vpop.f32.mrf.mxu2 }
 0x833   :  { %v4976_v53 = vadd.f32 %v4963_v54, %v4822_v16  ;;  %v5142_v16 = vpop.f32.mrf.mxu1 }
 0x834   :  { %v5156_v22 = vadd.f32 %v5142_v16, %v5060_v56  ;;  %v5402_v16 = vpop.permute.xlu0 %5401 }
 0x835   :  { %v5267_v57 = vpop.f32.mrf.mxu0  ;;  %v5405_v44 = vpop.permute.xlu1 %5404  ;;  %vm5408_vm0 = vcmp.eq.s32.totalorder %v18635_v1, %v5402_v16 }
 0x836   :  { %v5274_v60 = vadd.f32 %v5260_v59, %v5156_v22  ;;  %vm5409_vm12 = vcmp.eq.s32.totalorder %v18635_v1, %v5405_v44 }
 0x83a   :  { %v4966_v10 = vpop.f32.mrf.mxu2 }
 0x83b   :  { %v4977_v43 = vadd.f32 %v4966_v10, %v4823_v47  ;;  %v5048_v47 = vpop.f32.mrf.mxu3  ;;  %v5144_v46 = vpop.f32.mrf.mxu1 }
 0x83c   :  { %v5061_v34 = vadd.f32 %v5048_v47, %v4976_v53 }
 0x83e   :  { %v5157_v7 = vadd.f32 %v5144_v46, %v5061_v34 }
 0x840   :  { %v5275_v5 = vadd.f32 %v5262_v50, %v5157_v7 }
 0x842   :  { %v4968_v8 = vpop.f32.mrf.mxu2 }
 0x843   :  { %v5051_v3 = vpop.f32.mrf.mxu3  ;;  %v5147_v10 = vpop.f32.mrf.mxu1  ;;  %v4978_v32 = vadd.f32 %v4968_v8, %v4824_v62 }
 0x844   :  { %v5062_v35 = vadd.f32 %v5051_v3, %v4977_v43 }
 0x846   :  { %v5158_v40 = vadd.f32 %v5147_v10, %v5062_v35 }
 0x84a   :  { %v5342_v9 = vpop.f32.mrf.mxu2 }
 0x84b   :  { %v5362_v55 = vadd.f32 %v5342_v9, %v5270_v33 }
 0x84d   :  { %v5374_v20 = vadd.f32 %v17861_v45, %v5362_v55  ;;  %v5053_v55 = vpop.f32.mrf.mxu3 }
 0x84e   :  { %v5063_v25 = vadd.f32 %v5053_v55, %v4978_v32 }
 0x84f   :  { %v5382_v15 = vmax.f32 %v5374_v20, 0.0 }
 0x852   :  { %v5344_v49 = vpop.f32.mrf.mxu2 }
 0x853   :  { %v5363_v17 = vadd.f32 %v5344_v49, %v5271_v14  ;;  %v5149_v14 = vpop.f32.mrf.mxu1  ;;  %v5276_v49 = vadd.f32 %v5265_v27, %v5158_v40 }
 0x854   :  { %v5159_v20 = vadd.f32 %v5149_v14, %v5063_v25 }
 0x855   :  { %v5375_v30 = vadd.f32 %v17861_v45, %v5363_v17 }
 0x856   :  { %v5277_v28 = vadd.f32 %v5267_v57, %v5159_v20 }
 0x857   :  { %v5383_v0 = vmax.f32 %v5375_v30, 0.0 }
 0x859   :  { %v17865_v18 = vpack.c.bf16 %v5383_v0, %v5382_v15 }
 0x85a   :  { %v5347_v2 = vpop.f32.mrf.mxu2 }
 0x85b   :  { %v5364_v37 = vadd.f32 %v5347_v2, %v5272_v21  ;;  %v5410_v2 = vsel %vm5406_vm8, 1.0, %v18658_v48  ;;  %v5411_v21 = vsel %vm5407_vm3, 1.0, %v18658_v48 }
 0x85d   :  { %v5376_v11 = vadd.f32 %v17861_v45, %v5364_v37  ;;  %v5413_v37 = vsel %vm5409_vm12, 1.0, %v18658_v48 }
 0x85f   :  { %v5384_v58 = vmax.f32 %v5376_v11, 0.0 }
 0x862   :  { %v5349_v36 = vpop.f32.mrf.mxu2 }
 0x863   :  { %v5365_v52 = vadd.f32 %v5349_v36, %v5273_v63  ;;  %v5412_v63 = vsel %vm5408_vm0, 1.0, %v18658_v48 }
 0x864   :  { %v5415_v59 = vpack.c.bf16 %v5413_v37, %v5412_v63 }
 0x865   :  { %v5377_v39 = vadd.f32 %v17861_v45, %v5365_v52 }
 0x867   :  { %v5385_v13 = vmax.f32 %v5377_v39, 0.0 }
 0x869   :  { %v5417_v33 = vpack.c.bf16 %v5385_v13, %v5384_v58 }
 0x86a   :  { %v5352_v23 = vpop.f32.mrf.mxu2 }
 0x86b   :  { %v5366_v54 = vadd.f32 %v5352_v23, %v5274_v60 }
 0x86d   :  { %v5378_v53 = vadd.f32 %v17861_v45, %v5366_v54 }
 0x86f   :  { %v5386_v41 = vmax.f32 %v5378_v53, 0.0 }
 0x872   :  { %v5354_v24 = vpop.f32.mrf.mxu2 }
 0x873   :  { %v5367_v61 = vadd.f32 %v5354_v24, %v5275_v5 }
 0x875   :  { %v5379_v19 = vadd.f32 %v17861_v45, %v5367_v61 }
 0x877   :  { %v5387_v9 = vmax.f32 %v5379_v19, 0.0 }
 0x879   :  { %v5418_v31 = vpack.c.bf16 %v5387_v9, %v5386_v41 }
 0x87a   :  { %v5357_v29 = vpop.f32.mrf.mxu2 }
 0x87b   :  { %v5368_v17 = vadd.f32 %v5357_v29, %v5276_v49 }
 0x87d   :  { %v5380_v43 = vadd.f32 %v17861_v45, %v5368_v17 }
 0x87f   :  { %v5388_v15 = vmax.f32 %v5380_v43, 0.0 }
 0x882   :  { %v5359_v42 = vpop.f32.mrf.mxu2 }
 0x883   :  { %v5369_v8 = vadd.f32 %v5359_v42, %v5277_v28 }
 0x885   :  { %v5381_v30 = vadd.f32 %v17861_v45, %v5369_v8  ;;  %v5414_v45 = vpack.c.bf16 %v5411_v21, %v5410_v2 }
 0x887   :  { %v5389_v0 = vmax.f32 %v5381_v30, 0.0 }
 0x889   :  { %v5419_v4 = vpack.c.bf16 %v5389_v0, %v5388_v15 }
 0x88b   :  { %v5428_v38 = vsel %vm18670_vm13, %v5419_v4, 0 }
 0x88c   :  { %5434 = vmatpush.bf16.msra.mxu3 %v5428_v38 }
 0x890   :  { %5435 = vmatpush.bf16.msra.mxu3 %v5418_v31 }
 0x894   :  { %5436 = vmatpush.bf16.msra.mxu3 %v5417_v33 }
 0x898   :  { %5437 = vmatpush.bf16.msra.mxu3 %v17865_v18 }
 0x89b   :  { %11518 = vmatmul.msk.bf16.vlgmr.msra.gmra.mxu3 %vm5420_vm9, %v5414_v45 }
 0x8ab   :  { %11519 = vmatmul.msk.bf16.gmra.mxu3 %vm5420_vm9, %v5415_v59 }
 0x91e   :  { %v5439_v1 = vpop.f32.mrf.mxu3 }
 0x926   :  { %v5441_v48 = vpop.f32.mrf.mxu3 }
 0x927   :  { %v14868_v18 = vpack.c.bf16 %v5441_v48, %v5439_v1 }
 0x929   :  { %14869 = vst [vmem:[#allocation4] sm:$0xff] %v14868_v18  }
 0x92e   :  { %v5444_v36 = vpop.f32.mrf.mxu3 }
 0x936   :  { %v5446_v11 = vpop.f32.mrf.mxu3 }
 0x937   :  { %v14873_v52 = vpack.c.bf16 %v5446_v11, %v5444_v36 }
 0x939   :  { %14891 = vst [vmem:[#allocation4 + $0x8] sm:$0xff] %v14873_v52  }
 0x93a   :  { %15308 = dma.done.wait [#allocation7], 65536 }
 0x93b   :  { %15309 = vsyncadd [#allocation7], 4294901760  ;;  %v11634_v47 = vld [vmem:[#allocation5 + $0x1e0] sm:$0xf]  ;;  %v14267_v56 = vld [vmem:[#allocation5 + $0x1ec] sm:$0xf0] }
 0x93c   :  { %v14265_v39 = vld [vmem:[#allocation5 + $0x1e4] sm:$0xf]  ;;  %v11635_v58 = vor.u32 %v14267_v56, %v11634_v47  ;;  %v11636_v13 = vld [vmem:[#allocation5 + $0x1f0] sm:$0xf0]  ;;  %v14266_v46 = vld [vmem:[#allocation5 + $0x1ec] sm:$0xf] }
 0x93d   :  { %v11644_v34 = vld [vmem:[#allocation5 + $0x1f8] sm:$0xf0]  ;;  %v11639_v22 = vor.u32 %v14265_v39, %v11636_v13  ;;  %v11762_v23 = vld [vmem:[#allocation5 + $0xe0] sm:$0xf]  ;;  %v14235_v6 = vld [vmem:[#allocation5 + $0xec] sm:$0xf0] }
 0x93e   :  { %v11647_v33 = vor.u32 %v14266_v46, %v11644_v34  ;;  %v11618_v50 = vld [vmem:[#allocation5 + $0x1c0] sm:$0xf]  ;;  %5692 = vmatpush.bf16.msra.mxu1 %v11635_v58  ;;  %v11763_v60 = vor.u32 %v14235_v6, %v11762_v23  ;;  %v14263_v7 = vld [vmem:[#allocation5 + $0x1cc] sm:$0xf0]  ;;  %v14261_v3 = vld [vmem:[#allocation5 + $0x1c4] sm:$0xf] }
 0x93f   :  { %v11620_v51 = vld [vmem:[#allocation5 + $0x1d0] sm:$0xf0]  ;;  %5705 = vmatpush.bf16.msrb.mxu3 %v11639_v22  ;;  %v11619_v54 = vor.u32 %v14263_v7, %v11618_v50  ;;  %v14262_v10 = vld [vmem:[#allocation5 + $0x1cc] sm:$0xf]  ;;  %v11628_v24 = vld [vmem:[#allocation5 + $0x1d8] sm:$0xf0] }
 0x940   :  { %5731 = vmatpush.bf16.msra.mxu0 %v11647_v33  ;;  %v11623_v5 = vor.u32 %v14261_v3, %v11620_v51  ;;  %v11746_v62 = vld [vmem:[#allocation5 + $0xc0] sm:$0xf]  ;;  %5904 = vmatpush.bf16.msrb.mxu2 %v11763_v60  ;;  %v11631_v53 = vor.u32 %v14262_v10, %v11628_v24  ;;  %v14231_v61 = vld [vmem:[#allocation5 + $0xcc] sm:$0xf0]  ;;  %v14257_v27 = vld [vmem:[#allocation5 + $0x1a4] sm:$0xf] }
 0x941   :  { %v11602_v35 = vld [vmem:[#allocation5 + $0x1a0] sm:$0xf]  ;;  %v14259_v32 = vld [vmem:[#allocation5 + $0x1ac] sm:$0xf0]  ;;  %v11747_v19 = vor.u32 %v14231_v61, %v11746_v62  ;;  %v11604_v41 = vld [vmem:[#allocation5 + $0x1b0] sm:$0xf0] }
 0x942   :  { %v14258_v9 = vld [vmem:[#allocation5 + $0x1ac] sm:$0xf]  ;;  %5693 = vmatpush.bf16.msra.mxu1 %v11619_v54  ;;  %v11603_v55 = vor.u32 %v14259_v32, %v11602_v35  ;;  %v11612_v25 = vld [vmem:[#allocation5 + $0x1b8] sm:$0xf0]  ;;  %v11730_v40 = vld [vmem:[#allocation5 + $0xa0] sm:$0xf]  ;;  %v11607_v29 = vor.u32 %v14257_v27, %v11604_v41 }
 0x943   :  { %v14227_v31 = vld [vmem:[#allocation5 + $0xac] sm:$0xf0]  ;;  %5706 = vmatpush.bf16.msrb.mxu3 %v11623_v5  ;;  %v11615_v14 = vor.u32 %v14258_v9, %v11612_v25  ;;  %v11586_v49 = vld [vmem:[#allocation5 + $0x180] sm:$0xf]  ;;  %v14253_v17 = vld [vmem:[#allocation5 + $0x184] sm:$0xf] }
 0x944   :  { %5732 = vmatpush.bf16.msra.mxu0 %v11631_v53  ;;  %v14255_v20 = vld [vmem:[#allocation5 + $0x18c] sm:$0xf0]  ;;  %5905 = vmatpush.bf16.msrb.mxu2 %v11747_v19  ;;  %v11731_v57 = vor.u32 %v14227_v31, %v11730_v40  ;;  %v11588_v28 = vld [vmem:[#allocation5 + $0x190] sm:$0xf0]  ;;  %v14254_v42 = vld [vmem:[#allocation5 + $0x18c] sm:$0xf] }
 0x945   :  { %v11596_v43 = vld [vmem:[#allocation5 + $0x198] sm:$0xf0]  ;;  %v11714_v8 = vld [vmem:[#allocation5 + $0x80] sm:$0xf]  ;;  %v14223_v30 = vld [vmem:[#allocation5 + $0x8c] sm:$0xf0]  ;;  %v11587_v15 = vor.u32 %v14255_v20, %v11586_v49  ;;  %v11591_v0 = vor.u32 %v14253_v17, %v11588_v28 }
 0x946   :  { %5694 = vmatpush.bf16.msra.mxu1 %v11603_v55  ;;  %v11599_v4 = vor.u32 %v14254_v42, %v11596_v43  ;;  %v11570_v38 = vld [vmem:[#allocation5 + $0x160] sm:$0xf]  ;;  %v14251_v12 = vld [vmem:[#allocation5 + $0x16c] sm:$0xf0]  ;;  %v14249_v26 = vld [vmem:[#allocation5 + $0x164] sm:$0xf]  ;;  %v11715_v2 = vor.u32 %v14223_v30, %v11714_v8 }
 0x947   :  { %5707 = vmatpush.bf16.msrb.mxu3 %v11607_v29  ;;  %v11572_v21 = vld [vmem:[#allocation5 + $0x170] sm:$0xf0]  ;;  %v14250_v45 = vld [vmem:[#allocation5 + $0x16c] sm:$0xf]  ;;  %v11580_v44 = vld [vmem:[#allocation5 + $0x178] sm:$0xf0]  ;;  %v11571_v63 = vor.u32 %v14251_v12, %v11570_v38 }
 0x948   :  { %5733 = vmatpush.bf16.msra.mxu0 %v11615_v14  ;;  %5906 = vmatpush.bf16.msrb.mxu2 %v11731_v57  ;;  %v11698_v16 = vld [vmem:[#allocation5 + $0x60] sm:$0xf]  ;;  %v14219_v37 = vld [vmem:[#allocation5 + $0x6c] sm:$0xf0]  ;;  %v11575_v59 = vor.u32 %v14249_v26, %v11572_v21  ;;  %v11583_v1 = vor.u32 %v14250_v45, %v11580_v44  ;;  %v14245_v36 = vld [vmem:[#allocation5 + $0x144] sm:$0xf] }
 0x949   :  { %v11554_v48 = vld [vmem:[#allocation5 + $0x140] sm:$0xf]  ;;  %v14247_v18 = vld [vmem:[#allocation5 + $0x14c] sm:$0xf0]  ;;  %v11699_v11 = vor.u32 %v14219_v37, %v11698_v16  ;;  %v11556_v52 = vld [vmem:[#allocation5 + $0x150] sm:$0xf0] }
 0x94a   :  { %5695 = vmatpush.bf16.msra.mxu1 %v11587_v15  ;;  %v14246_v47 = vld [vmem:[#allocation5 + $0x14c] sm:$0xf]  ;;  %v11564_v56 = vld [vmem:[#allocation5 + $0x158] sm:$0xf0]  ;;  %v11682_v39 = vld [vmem:[#allocation5 + $0x40] sm:$0xf]  ;;  %v11555_v13 = vor.u32 %v14247_v18, %v11554_v48  ;;  %v11559_v46 = vor.u32 %v14245_v36, %v11556_v52 }
 0x94b   :  { %5708 = vmatpush.bf16.msrb.mxu3 %v11591_v0  ;;  %v14215_v58 = vld [vmem:[#allocation5 + $0x4c] sm:$0xf0]  ;;  %v11567_v34 = vor.u32 %v14246_v47, %v11564_v56  ;;  %v11538_v22 = vld [vmem:[#allocation5 + $0x120] sm:$0xf]  ;;  %v14241_v23 = vld [vmem:[#allocation5 + $0x124] sm:$0xf] }
 0x94c   :  { %5734 = vmatpush.bf16.msra.mxu0 %v11599_v4  ;;  %5907 = vmatpush.bf16.msrb.mxu2 %v11715_v2  ;;  %v14243_v33 = vld [vmem:[#allocation5 + $0x12c] sm:$0xf0]  ;;  %v11683_v6 = vor.u32 %v14215_v58, %v11682_v39  ;;  %v11540_v50 = vld [vmem:[#allocation5 + $0x130] sm:$0xf0]  ;;  %v14242_v60 = vld [vmem:[#allocation5 + $0x12c] sm:$0xf] }
 0x94d   :  { %v11548_v7 = vld [vmem:[#allocation5 + $0x138] sm:$0xf0]  ;;  %v11666_v3 = vld [vmem:[#allocation5 + $0x20] sm:$0xf]  ;;  %v14211_v51 = vld [vmem:[#allocation5 + $0x2c] sm:$0xf0]  ;;  %v11539_v54 = vor.u32 %v14243_v33, %v11538_v22  ;;  %v11543_v24 = vor.u32 %v14241_v23, %v11540_v50 }
 0x94e   :  { %5696 = vmatpush.bf16.msra.mxu1 %v11571_v63  ;;  %v11522_v5 = vld [vmem:[#allocation5 + $0x100] sm:$0xf]  ;;  %v14239_v10 = vld [vmem:[#allocation5 + $0x10c] sm:$0xf0]  ;;  %v11551_v62 = vor.u32 %v14242_v60, %v11548_v7  ;;  %v14237_v53 = vld [vmem:[#allocation5 + $0x104] sm:$0xf]  ;;  %v11667_v32 = vor.u32 %v14211_v51, %v11666_v3 }
 0x94f   :  { %5709 = vmatpush.bf16.msrb.mxu3 %v11575_v59  ;;  %v11524_v61 = vld [vmem:[#allocation5 + $0x110] sm:$0xf0]  ;;  %v14238_v35 = vld [vmem:[#allocation5 + $0x10c] sm:$0xf]  ;;  %v11532_v19 = vld [vmem:[#allocation5 + $0x118] sm:$0xf0]  ;;  %v11523_v40 = vor.u32 %v14239_v10, %v11522_v5 }
 0x950   :  { %5735 = vmatpush.bf16.msra.mxu0 %v11583_v1  ;;  %5908 = vmatpush.bf16.msrb.mxu2 %v11699_v11  ;;  %v11650_v27 = vld [vmem:[#allocation5] sm:$0xf]  ;;  %v14207_v41 = vld [vmem:[#allocation5 + $0xc] sm:$0xf0]  ;;  %v11642_v9 = vld [vmem:[#allocation5 + $0x1e8] sm:$0xf]  ;;  %v11527_v49 = vor.u32 %v14237_v53, %v11524_v61  ;;  %v11535_v20 = vor.u32 %v14238_v35, %v11532_v19 }
 0x951   :  { %v14268_v55 = vld [vmem:[#allocation5 + $0x1f4] sm:$0xf0]  ;;  %v14233_v25 = vld [vmem:[#allocation5 + $0xe4] sm:$0xf]  ;;  %v11764_v31 = vld [vmem:[#allocation5 + $0xf0] sm:$0xf0]  ;;  %v11651_v28 = vor.u32 %v14207_v41, %v11650_v27 }
 0x952   :  { %5697 = vmatpush.bf16.msra.mxu1 %v11555_v13  ;;  %v14234_v29 = vld [vmem:[#allocation5 + $0xec] sm:$0xf]  ;;  %v11772_v14 = vld [vmem:[#allocation5 + $0xf8] sm:$0xf0]  ;;  %v11890_v17 = vld [vmem:[#allocation5 + $0x2e0] sm:$0xf]  ;;  %v11643_v42 = vor.u32 %v14268_v55, %v11642_v9  ;;  %v11767_v43 = vor.u32 %v14233_v25, %v11764_v31 }
 0x953   :  { %5710 = vmatpush.bf16.msrb.mxu3 %v11559_v46  ;;  %v14299_v57 = vld [vmem:[#allocation5 + $0x2ec] sm:$0xf0]  ;;  %v11775_v8 = vor.u32 %v14234_v29, %v11772_v14  ;;  %v11626_v30 = vld [vmem:[#allocation5 + $0x1c8] sm:$0xf]  ;;  %v14264_v15 = vld [vmem:[#allocation5 + $0x1d4] sm:$0xf0] }
 0x954   :  { %5736 = vmatpush.bf16.msra.mxu0 %v11567_v34  ;;  %5909 = vmatpush.bf16.msrb.mxu2 %v11683_v6  ;;  %v14229_v0 = vld [vmem:[#allocation5 + $0xc4] sm:$0xf]  ;;  %v11891_v4 = vor.u32 %v14299_v57, %v11890_v17  ;;  %v11748_v38 = vld [vmem:[#allocation5 + $0xd0] sm:$0xf0]  ;;  %v14230_v12 = vld [vmem:[#allocation5 + $0xcc] sm:$0xf]  ;;  %v11627_v45 = vor.u32 %v14264_v15, %v11626_v30 }
 0x955   :  { %v11756_v26 = vld [vmem:[#allocation5 + $0xd8] sm:$0xf0]  ;;  %v11874_v2 = vld [vmem:[#allocation5 + $0x2c0] sm:$0xf]  ;;  %v14295_v21 = vld [vmem:[#allocation5 + $0x2cc] sm:$0xf0]  ;;  %v11751_v16 = vor.u32 %v14229_v0, %v11748_v38 }
 0x956   :  { %5698 = vmatpush.bf16.msra.mxu1 %v11539_v54  ;;  %v17893_v44 = vld [vmem:[#allocation4] sm:$0x1]  ;;  %v11759_v37 = vor.u32 %v14230_v12, %v11756_v26  ;;  %v11610_v63 = vld [vmem:[#allocation5 + $0x1a8] sm:$0xf]  ;;  %v14260_v59 = vld [vmem:[#allocation5 + $0x1b4] sm:$0xf0]  ;;  %v11875_v48 = vor.u32 %v14295_v21, %v11874_v2 }
 0x957   :  { %5711 = vmatpush.bf16.msrb.mxu3 %v11543_v24  ;;  %v14225_v1 = vld [vmem:[#allocation5 + $0xa4] sm:$0xf]  ;;  %v11732_v18 = vld [vmem:[#allocation5 + $0xb0] sm:$0xf0]  ;;  %v14226_v36 = vld [vmem:[#allocation5 + $0xac] sm:$0xf]  ;;  %v11611_v56 = vor.u32 %v14260_v59, %v11610_v63 }
 0x958   :  { %5737 = vmatpush.bf16.msra.mxu0 %v11551_v62  ;;  %5910 = vmatpush.bf16.msrb.mxu2 %v11667_v32  ;;  %v11740_v11 = vld [vmem:[#allocation5 + $0xb8] sm:$0xf0]  ;;  %v11858_v52 = vld [vmem:[#allocation5 + $0x2a0] sm:$0xf]  ;;  %v14291_v47 = vld [vmem:[#allocation5 + $0x2ac] sm:$0xf0]  ;;  %v11735_v58 = vor.u32 %v14225_v1, %v11732_v18 }
 0x959   :  { %v5494_v39 = vld [vmem:[#allocation4] sm:$0x2]  ;;  %v11743_v13 = vor.u32 %v14226_v36, %v11740_v11  ;;  %v11594_v46 = vld [vmem:[#allocation5 + $0x188] sm:$0xf]  ;;  %v14256_v34 = vld [vmem:[#allocation5 + $0x194] sm:$0xf0]  ;;  %v11859_v23 = vor.u32 %v14291_v47, %v11858_v52 }
 0x95a   :  { %5699 = vmatpush.bf16.msra.mxu1 %v11523_v40  ;;  %v14221_v22 = vld [vmem:[#allocation5 + $0x84] sm:$0xf]  ;;  %v5528_v33 = vunpack.c.l.b16 %v5494_v39  ;;  %v11716_v6 = vld [vmem:[#allocation5 + $0x90] sm:$0xf0]  ;;  %v14222_v50 = vld [vmem:[#allocation5 + $0x8c] sm:$0xf]  ;;  %v11595_v54 = vor.u32 %v14256_v34, %v11594_v46 }
 0x95b   :  { %5712 = vmatpush.bf16.msrb.mxu3 %v11527_v49  ;;  %v11724_v60 = vld [vmem:[#allocation5 + $0x98] sm:$0xf0]  ;;  %v11842_v7 = vld [vmem:[#allocation5 + $0x280] sm:$0xf]  ;;  %v14287_v3 = vld [vmem:[#allocation5 + $0x28c] sm:$0xf0]  ;;  %v11719_v10 = vor.u32 %v14221_v22, %v11716_v6 }
 0x95c   :  { %5738 = vmatpush.bf16.msra.mxu0 %v11535_v20  ;;  %5911 = vmatpush.bf16.msrb.mxu2 %v11651_v28  ;;  %v5529_v51 = vpack.c.b16 %v5528_v33, %v5528_v33  ;;  %v11578_v5 = vld [vmem:[#allocation5 + $0x168] sm:$0xf]  ;;  %v11727_v24 = vor.u32 %v14222_v50, %v11724_v60  ;;  %v14252_v62 = vld [vmem:[#allocation5 + $0x174] sm:$0xf0]  ;;  %v14217_v53 = vld [vmem:[#allocation5 + $0x64] sm:$0xf]  ;;  %v11843_v35 = vor.u32 %v14287_v3, %v11842_v7 }
 0x95d   :  { %v11700_v32 = vld [vmem:[#allocation5 + $0x70] sm:$0xf0]  ;;  %v14218_v19 = vld [vmem:[#allocation5 + $0x6c] sm:$0xf]  ;;  %v11708_v27 = vld [vmem:[#allocation5 + $0x78] sm:$0xf0]  ;;  %v11579_v55 = vor.u32 %v14252_v62, %v11578_v5 }
 0x95e   :  { %5718 = vmatpush.bf16.msrb.mxu1 %v11643_v42  ;;  %v17896_v61 = vrot.slane %v5529_v51, 1  ;;  %v11826_v41 = vld [vmem:[#allocation5 + $0x260] sm:$0xf]  ;;  %v14283_v9 = vld [vmem:[#allocation5 + $0x26c] sm:$0xf0]  ;;  %v11703_v25 = vor.u32 %v14217_v53, %v11700_v32  ;;  %v11711_v40 = vor.u32 %v14218_v19, %v11708_v27  ;;  %vm9511_vm4 = vcmask 1041408  }
 0x95f   :  { %5917 = vmatpush.bf16.msra.mxu3 %v11767_v43  ;;  %5912 = vmatmul.bf16.vlgmr.msrb.gmra.mxu2 %v17893_v44  ;;  %v11562_v31 = vld [vmem:[#allocation5 + $0x148] sm:$0xf]  ;;  %v14248_v29 = vld [vmem:[#allocation5 + $0x154] sm:$0xf0]  ;;  %v14213_v14 = vld [vmem:[#allocation5 + $0x44] sm:$0xf]  ;;  %v11827_v49 = vor.u32 %v14283_v9, %v11826_v41 }
 0x960   :  { %5943 = vmatpush.bf16.msrb.mxu0 %v11775_v8  ;;  %6154 = vmatpush.bf16.msra.mxu2 %v11891_v4  ;;  %v11684_v20 = vld [vmem:[#allocation5 + $0x50] sm:$0xf0]  ;;  %v14214_v17 = vld [vmem:[#allocation5 + $0x4c] sm:$0xf]  ;;  %v11692_v57 = vld [vmem:[#allocation5 + $0x58] sm:$0xf0]  ;;  %v11563_v43 = vor.u32 %v14248_v29, %v11562_v31 }
 0x961   :  { %5700 = vmatmul.bf16.vlgmr.msra.gmra.mxu1 %v17896_v61  ;;  %5713 = vmatmul.bf16.vlgmr.msrb.gmra.mxu3 %v17896_v61  ;;  %v11810_v28 = vld [vmem:[#allocation5 + $0x240] sm:$0xf]  ;;  %v14279_v42 = vld [vmem:[#allocation5 + $0x24c] sm:$0xf0]  ;;  %v11546_v8 = vld [vmem:[#allocation5 + $0x128] sm:$0xf]  ;;  %v11687_v30 = vor.u32 %v14213_v14, %v11684_v20  ;;  %v11695_v15 = vor.u32 %v14214_v17, %v11692_v57 }
 0x962   :  { %5719 = vmatpush.bf16.msrb.mxu1 %v11627_v45  ;;  %5739 = vmatmul.bf16.vlgmr.msra.gmra.mxu0 %v17896_v61  ;;  %v14244_v0 = vld [vmem:[#allocation5 + $0x134] sm:$0xf0]  ;;  %v14209_v4 = vld [vmem:[#allocation5 + $0x24] sm:$0xf]  ;;  %v11668_v38 = vld [vmem:[#allocation5 + $0x30] sm:$0xf0]  ;;  %v11811_v12 = vor.u32 %v14279_v42, %v11810_v28 }
 0x963   :  { %5918 = vmatpush.bf16.msra.mxu3 %v11751_v16  ;;  %v14210_v26 = vld [vmem:[#allocation5 + $0x2c] sm:$0xf]  ;;  %v11676_v2 = vld [vmem:[#allocation5 + $0x38] sm:$0xf0]  ;;  %v5956_v21 = vld [vmem:[#allocation4] sm:$0x4]  ;;  %v11671_v1 = vor.u32 %v14209_v4, %v11668_v38 }
 0x964   :  { %5944 = vmatpush.bf16.msrb.mxu0 %v11759_v37  ;;  %6155 = vmatpush.bf16.msra.mxu2 %v11875_v48  ;;  %v11794_v45 = vld [vmem:[#allocation5 + $0x220] sm:$0xf]  ;;  %v14275_v16 = vld [vmem:[#allocation5 + $0x22c] sm:$0xf0]  ;;  %v11547_v37 = vor.u32 %v14244_v0, %v11546_v8  ;;  %v11530_v63 = vld [vmem:[#allocation5 + $0x108] sm:$0xf]  ;;  %v11679_v48 = vor.u32 %v14210_v26, %v11676_v2  ;;  %v5990_v52 = vunpack.c.l.b16 %v5956_v21 }
 0x965   :  { %v14240_v59 = vld [vmem:[#allocation5 + $0x114] sm:$0xf0]  ;;  %v14205_v18 = vld [vmem:[#allocation5 + $0x4] sm:$0xf]  ;;  %v11652_v36 = vld [vmem:[#allocation5 + $0x10] sm:$0xf0]  ;;  %v11795_v47 = vor.u32 %v14275_v16, %v11794_v45 }
 0x966   :  { %5720 = vmatpush.bf16.msrb.mxu1 %v11611_v56  ;;  %v14206_v11 = vld [vmem:[#allocation5 + $0xc] sm:$0xf]  ;;  %v11660_v56 = vld [vmem:[#allocation5 + $0x18] sm:$0xf0]  ;;  %v11778_v39 = vld [vmem:[#allocation5 + $0x200] sm:$0xf]  ;;  %v11531_v22 = vor.u32 %v14240_v59, %v11530_v63  ;;  %v11655_v50 = vor.u32 %v14205_v18, %v11652_v36  ;;  %v5991_v51 = vpack.c.b16 %v5990_v52, %v5990_v52 }
 0x967   :  { %5919 = vmatpush.bf16.msra.mxu3 %v11735_v58  ;;  %v14271_v58 = vld [vmem:[#allocation5 + $0x20c] sm:$0xf0]  ;;  %v14236_v46 = vld [vmem:[#allocation5 + $0xf4] sm:$0xf0]  ;;  %v14297_v34 = vld [vmem:[#allocation5 + $0x2e4] sm:$0xf]  ;;  %v11663_v60 = vor.u32 %v14206_v11, %v11660_v56 }
 0x968   :  { %5945 = vmatpush.bf16.msrb.mxu0 %v11743_v13  ;;  %6156 = vmatpush.bf16.msra.mxu2 %v11859_v23  ;;  %v11770_v13 = vld [vmem:[#allocation5 + $0xe8] sm:$0xf]  ;;  %v11892_v33 = vld [vmem:[#allocation5 + $0x2f0] sm:$0xf0]  ;;  %v14298_v23 = vld [vmem:[#allocation5 + $0x2ec] sm:$0xf] }
 0x969   :  { %v11900_v6 = vld [vmem:[#allocation5 + $0x2f8] sm:$0xf0]  ;;  %v12018_v7 = vld [vmem:[#allocation5 + $0x3e0] sm:$0xf]  ;;  %v14331_v3 = vld [vmem:[#allocation5 + $0x3ec] sm:$0xf0]  ;;  %v11771_v5 = vor.u32 %v14236_v46, %v11770_v13 }
 0x96a   :  { %5721 = vmatpush.bf16.msrb.mxu1 %v11595_v54  ;;  %v11779_v54 = vor.u32 %v14271_v58, %v11778_v39  ;;  %v11754_v62 = vld [vmem:[#allocation5 + $0xc8] sm:$0xf]  ;;  %v14232_v53 = vld [vmem:[#allocation5 + $0xd4] sm:$0xf0]  ;;  %v12019_v32 = vor.u32 %v14331_v3, %v12018_v7  ;;  %v11876_v19 = vld [vmem:[#allocation5 + $0x2d0] sm:$0xf0] }
 0x96b   :  { %5920 = vmatpush.bf16.msra.mxu3 %v11719_v10  ;;  %v11895_v10 = vor.u32 %v14297_v34, %v11892_v33  ;;  %v14294_v27 = vld [vmem:[#allocation5 + $0x2cc] sm:$0xf]  ;;  %v11884_v41 = vld [vmem:[#allocation5 + $0x2d8] sm:$0xf0]  ;;  %v17901_v9 = vrot.slane %v5991_v51, 2 }
 0x96c   :  { %5946 = vmatpush.bf16.msrb.mxu0 %v11727_v24  ;;  %6157 = vmatpush.bf16.msra.mxu2 %v11843_v35  ;;  %v11903_v24 = vor.u32 %v14298_v23, %v11900_v6  ;;  %v14293_v35 = vld [vmem:[#allocation5 + $0x2c4] sm:$0xf]  ;;  %v11887_v29 = vor.u32 %v14294_v27, %v11884_v41  ;;  %v11738_v14 = vld [vmem:[#allocation5 + $0xa8] sm:$0xf]  ;;  %v11860_v57 = vld [vmem:[#allocation5 + $0x2b0] sm:$0xf0] }
 0x96d   :  { %v11879_v31 = vor.u32 %v14293_v35, %v11876_v19  ;;  %v14289_v20 = vld [vmem:[#allocation5 + $0x2a4] sm:$0xf]  ;;  %v14290_v28 = vld [vmem:[#allocation5 + $0x2ac] sm:$0xf]  ;;  %v11868_v42 = vld [vmem:[#allocation5 + $0x2b8] sm:$0xf0] }
 0x96e   :  { %5722 = vmatpush.bf16.msrb.mxu1 %v11579_v55  ;;  %v12002_v55 = vld [vmem:[#allocation5 + $0x3c0] sm:$0xf]  ;;  %v14323_v8 = vld [vmem:[#allocation5 + $0x3ac] sm:$0xf0]  ;;  %v11871_v0 = vor.u32 %v14290_v28, %v11868_v42  ;;  %v11722_v4 = vld [vmem:[#allocation5 + $0x88] sm:$0xf] }
 0x96f   :  { %5921 = vmatpush.bf16.msra.mxu3 %v11703_v25  ;;  %v14327_v25 = vld [vmem:[#allocation5 + $0x3cc] sm:$0xf0]  ;;  %v14224_v38 = vld [vmem:[#allocation5 + $0x94] sm:$0xf0]  ;;  %v14286_v2 = vld [vmem:[#allocation5 + $0x28c] sm:$0xf] }
 0x970   :  { %5947 = vmatpush.bf16.msrb.mxu0 %v11711_v40  ;;  %6158 = vmatpush.bf16.msra.mxu2 %v11827_v49  ;;  %v11755_v40 = vor.u32 %v14232_v53, %v11754_v62  ;;  %v14228_v49 = vld [vmem:[#allocation5 + $0xb4] sm:$0xf0]  ;;  %v12003_v17 = vor.u32 %v14327_v25, %v12002_v55  ;;  %v11852_v21 = vld [vmem:[#allocation5 + $0x298] sm:$0xf0]  ;;  %v11970_v45 = vld [vmem:[#allocation5 + $0x380] sm:$0xf] }
 0x971   :  { %v14319_v16 = vld [vmem:[#allocation5 + $0x38c] sm:$0xf0]  ;;  %v11855_v59 = vor.u32 %v14286_v2, %v11852_v21  ;;  %v14281_v18 = vld [vmem:[#allocation5 + $0x264] sm:$0xf]  ;;  %v11828_v11 = vld [vmem:[#allocation5 + $0x270] sm:$0xf0] }
 0x972   :  { %5723 = vmatpush.bf16.msrb.mxu1 %v11563_v43  ;;  %v11986_v43 = vld [vmem:[#allocation5 + $0x3a0] sm:$0xf]  ;;  %v11971_v36 = vor.u32 %v14319_v16, %v11970_v45  ;;  %v14282_v52 = vld [vmem:[#allocation5 + $0x26c] sm:$0xf]  ;;  %v14315_v39 = vld [vmem:[#allocation5 + $0x36c] sm:$0xf0]  ;;  %v11831_v13 = vor.u32 %v14281_v18, %v11828_v11 }
 0x973   :  { %5922 = vmatpush.bf16.msra.mxu3 %v11687_v30  ;;  %v11739_v30 = vor.u32 %v14228_v49, %v11738_v14  ;;  %v11987_v26 = vor.u32 %v14323_v8, %v11986_v43  ;;  %v11954_v56 = vld [vmem:[#allocation5 + $0x360] sm:$0xf]  ;;  %v11690_v34 = vld [vmem:[#allocation5 + $0x48] sm:$0xf]  ;;  %v14277_v33 = vld [vmem:[#allocation5 + $0x244] sm:$0xf] }
 0x974   :  { %5948 = vmatpush.bf16.msrb.mxu0 %v11695_v15  ;;  %6159 = vmatpush.bf16.msra.mxu2 %v11811_v12  ;;  %v11863_v15 = vor.u32 %v14289_v20, %v11860_v57  ;;  %v14285_v12 = vld [vmem:[#allocation5 + $0x284] sm:$0xf]  ;;  %v11955_v23 = vor.u32 %v14315_v39, %v11954_v56  ;;  %v11812_v6 = vld [vmem:[#allocation5 + $0x250] sm:$0xf0]  ;;  %v11938_v7 = vld [vmem:[#allocation5 + $0x340] sm:$0xf] }
 0x975   :  { %v14311_v3 = vld [vmem:[#allocation5 + $0x34c] sm:$0xf0]  ;;  %v14273_v62 = vld [vmem:[#allocation5 + $0x224] sm:$0xf]  ;;  %v11796_v53 = vld [vmem:[#allocation5 + $0x230] sm:$0xf0] }
 0x976   :  { %5724 = vmatpush.bf16.msrb.mxu1 %v11547_v37  ;;  %v11723_v37 = vor.u32 %v14224_v38, %v11722_v4  ;;  %v11939_v35 = vor.u32 %v14311_v3, %v11938_v7  ;;  %v11804_v19 = vld [vmem:[#allocation5 + $0x238] sm:$0xf0]  ;;  %v6210_v27 = vld [vmem:[#allocation4] sm:$0x8]  ;;  %v11922_v41 = vld [vmem:[#allocation5 + $0x320] sm:$0xf] }
 0x977   :  { %5923 = vmatpush.bf16.msra.mxu3 %v11671_v1  ;;  %v11706_v1 = vld [vmem:[#allocation5 + $0x68] sm:$0xf]  ;;  %v14307_v55 = vld [vmem:[#allocation5 + $0x32c] sm:$0xf0]  ;;  %v14269_v49 = vld [vmem:[#allocation5 + $0x204] sm:$0xf]  ;;  %v6244_v57 = vunpack.c.l.b16 %v6210_v27 }
 0x978   :  { %5949 = vmatpush.bf16.msrb.mxu0 %v11679_v48  ;;  %6160 = vmatpush.bf16.msra.mxu2 %v11795_v47  ;;  %v14220_v48 = vld [vmem:[#allocation5 + $0x74] sm:$0xf0]  ;;  %v11836_v47 = vld [vmem:[#allocation5 + $0x278] sm:$0xf0]  ;;  %v11780_v20 = vld [vmem:[#allocation5 + $0x210] sm:$0xf0]  ;;  %v11923_v28 = vor.u32 %v14307_v55, %v11922_v41 }
 0x979   :  { %v11707_v58 = vor.u32 %v14220_v48, %v11706_v1  ;;  %v11839_v46 = vor.u32 %v14282_v52, %v11836_v47  ;;  %v11788_v42 = vld [vmem:[#allocation5 + $0x218] sm:$0xf0]  ;;  %v11906_v43 = vld [vmem:[#allocation5 + $0x300] sm:$0xf]  ;;  %v14303_v8 = vld [vmem:[#allocation5 + $0x30c] sm:$0xf0]  ;;  %v6245_v16 = vpack.c.b16 %v6244_v57, %v6244_v57 }
 0x97a   :  { %5725 = vmatpush.bf16.msrb.mxu1 %v11531_v22  ;;  %v14216_v22 = vld [vmem:[#allocation5 + $0x54] sm:$0xf0]  ;;  %v12020_v38 = vld [vmem:[#allocation5 + $0x3f0] sm:$0xf0]  ;;  %v12146_v21 = vld [vmem:[#allocation5 + $0x4e0] sm:$0xf] }
 0x97b   :  { %5924 = vmatpush.bf16.msra.mxu3 %v11655_v50  ;;  %v14278_v50 = vld [vmem:[#allocation5 + $0x24c] sm:$0xf]  ;;  %v11691_v51 = vor.u32 %v14216_v22, %v11690_v34  ;;  %v14363_v45 = vld [vmem:[#allocation5 + $0x4ec] sm:$0xf0]  ;;  %v11882_v48 = vld [vmem:[#allocation5 + $0x2c8] sm:$0xf] }
 0x97c   :  { %5950 = vmatpush.bf16.msrb.mxu0 %v11663_v60  ;;  %6161 = vmatpush.bf16.msra.mxu2 %v11779_v54  ;;  %v11820_v60 = vld [vmem:[#allocation5 + $0x258] sm:$0xf0]  ;;  %v11674_v54 = vld [vmem:[#allocation5 + $0x28] sm:$0xf]  ;;  %v14296_v18 = vld [vmem:[#allocation5 + $0x2d4] sm:$0xf0]  ;;  %v12147_v11 = vor.u32 %v14363_v45, %v12146_v21 }
 0x97d   :  { %5726 = vmatmul.bf16.vlgmr.msrb.gmra.mxu1 %v17896_v61  ;;  %v11844_v61 = vld [vmem:[#allocation5 + $0x290] sm:$0xf0]  ;;  %v14326_v47 = vld [vmem:[#allocation5 + $0x3cc] sm:$0xf]  ;;  %v12012_v56 = vld [vmem:[#allocation5 + $0x3d8] sm:$0xf0] }
 0x97e   :  { %5930 = vmatpush.bf16.msra.mxu1 %v11771_v5  ;;  %5925 = vmatmul.bf16.vlgmr.msra.gmra.mxu3 %v17893_v44  ;;  %v11847_v63 = vor.u32 %v14285_v12, %v11844_v61  ;;  %v11815_v5 = vor.u32 %v14277_v33, %v11812_v6  ;;  %v14330_v12 = vld [vmem:[#allocation5 + $0x3ec] sm:$0xf]  ;;  %v11783_v61 = vor.u32 %v14269_v49, %v11780_v20  ;;  %v12004_v52 = vld [vmem:[#allocation5 + $0x3d0] sm:$0xf0]  ;;  %v17907_v39 = vrot.slane %v6245_v16, 3 }
 0x97f   :  { %6167 = vmatpush.bf16.msrb.mxu3 %v11895_v10  ;;  %6162 = vmatmul.bf16.vlgmr.msra.gmra.mxu2 %v17901_v9  ;;  %v11823_v10 = vor.u32 %v14278_v50, %v11820_v60  ;;  %v12015_v22 = vor.u32 %v14326_v47, %v12012_v56  ;;  %v11866_v33 = vld [vmem:[#allocation5 + $0x2a8] sm:$0xf]  ;;  %v14321_v6 = vld [vmem:[#allocation5 + $0x3a4] sm:$0xf]  ;;  %v11988_v60 = vld [vmem:[#allocation5 + $0x3b0] sm:$0xf0] }
 0x980   :  { %6193 = vmatpush.bf16.msra.mxu0 %v11903_v24  ;;  %6408 = vmatpush.bf16.msrb.mxu2 %v12019_v32  ;;  %v14212_v24 = vld [vmem:[#allocation5 + $0x34] sm:$0xf0]  ;;  %v14274_v32 = vld [vmem:[#allocation5 + $0x22c] sm:$0xf]  ;;  %v11996_v3 = vld [vmem:[#allocation5 + $0x3b8] sm:$0xf0] }
 0x981   :  { %5951 = vmatmul.bf16.vlgmr.msrb.gmra.mxu0 %v17893_v44  ;;  %v11675_v25 = vor.u32 %v14212_v24, %v11674_v54  ;;  %v11807_v14 = vor.u32 %v14274_v32, %v11804_v19  ;;  %v14322_v7 = vld [vmem:[#allocation5 + $0x3ac] sm:$0xf]  ;;  %v14355_v54 = vld [vmem:[#allocation5 + $0x4ac] sm:$0xf0]  ;;  %v11972_v32 = vld [vmem:[#allocation5 + $0x390] sm:$0xf0] }
 0x982   :  { %5931 = vmatpush.bf16.msra.mxu1 %v11755_v40  ;;  %v11658_v40 = vld [vmem:[#allocation5 + $0x8] sm:$0xf]  ;;  %v11999_v24 = vor.u32 %v14322_v7, %v11996_v3  ;;  %v14318_v19 = vld [vmem:[#allocation5 + $0x38c] sm:$0xf]  ;;  %v11980_v27 = vld [vmem:[#allocation5 + $0x398] sm:$0xf0] }
 0x983   :  { %6168 = vmatpush.bf16.msrb.mxu3 %v11879_v31  ;;  %v14208_v31 = vld [vmem:[#allocation5 + $0x14] sm:$0xf0]  ;;  %v12098_v41 = vld [vmem:[#allocation5 + $0x480] sm:$0xf]  ;;  %v14351_v55 = vld [vmem:[#allocation5 + $0x48c] sm:$0xf0] }
 0x984   :  { %6194 = vmatpush.bf16.msra.mxu0 %v11887_v29  ;;  %6409 = vmatpush.bf16.msrb.mxu2 %v12003_v17  ;;  %v11799_v29 = vor.u32 %v14273_v62, %v11796_v53  ;;  %v14270_v17 = vld [vmem:[#allocation5 + $0x20c] sm:$0xf]  ;;  %v11659_v4 = vor.u32 %v14208_v31, %v11658_v40  ;;  %v11850_v62 = vld [vmem:[#allocation5 + $0x288] sm:$0xf]  ;;  %v14317_v53 = vld [vmem:[#allocation5 + $0x384] sm:$0xf]  ;;  %v11983_v31 = vor.u32 %v14318_v19, %v11980_v27 }
 0x985   :  { %v11791_v2 = vor.u32 %v14270_v17, %v11788_v42  ;;  %v11975_v40 = vor.u32 %v14317_v53, %v11972_v32  ;;  %v14313_v49 = vld [vmem:[#allocation5 + $0x364] sm:$0xf]  ;;  %v12099_v20 = vor.u32 %v14351_v55, %v12098_v41  ;;  %v11956_v17 = vld [vmem:[#allocation5 + $0x370] sm:$0xf0]  ;;  %v14314_v57 = vld [vmem:[#allocation5 + $0x36c] sm:$0xf] }
 0x986   :  { %5932 = vmatpush.bf16.msra.mxu1 %v11739_v30  ;;  %v11898_v30 = vld [vmem:[#allocation5 + $0x2e8] sm:$0xf]  ;;  %v12082_v42 = vld [vmem:[#allocation5 + $0x460] sm:$0xf]  ;;  %v14343_v45 = vld [vmem:[#allocation5 + $0x44c] sm:$0xf0] }
 0x987   :  { %6169 = vmatpush.bf16.msrb.mxu3 %v11863_v15  ;;  %v14300_v15 = vld [vmem:[#allocation5 + $0x2f4] sm:$0xf0]  ;;  %v12066_v21 = vld [vmem:[#allocation5 + $0x440] sm:$0xf]  ;;  %v14339_v56 = vld [vmem:[#allocation5 + $0x42c] sm:$0xf0] }
 0x988   :  { %6195 = vmatpush.bf16.msra.mxu0 %v11871_v0  ;;  %6410 = vmatpush.bf16.msrb.mxu2 %v11987_v26  ;;  %v14329_v0 = vld [vmem:[#allocation5 + $0x3e4] sm:$0xf]  ;;  %v12028_v26 = vld [vmem:[#allocation5 + $0x3f8] sm:$0xf0]  ;;  %v12050_v47 = vld [vmem:[#allocation5 + $0x420] sm:$0xf] }
 0x989   :  { %v12031_v1 = vor.u32 %v14330_v12, %v12028_v26  ;;  %v11940_v26 = vld [vmem:[#allocation5 + $0x350] sm:$0xf0]  ;;  %v12034_v7 = vld [vmem:[#allocation5 + $0x400] sm:$0xf]  ;;  %v14335_v3 = vld [vmem:[#allocation5 + $0x40c] sm:$0xf0] }
 0x98a   :  { %5933 = vmatpush.bf16.msra.mxu1 %v11723_v37  ;;  %v11907_v37 = vor.u32 %v14303_v8, %v11906_v43  ;;  %v14347_v43 = vld [vmem:[#allocation5 + $0x46c] sm:$0xf0]  ;;  %v12274_v32 = vld [vmem:[#allocation5 + $0x5e0] sm:$0xf]  ;;  %v12035_v27 = vor.u32 %v14335_v3, %v12034_v7 }
 0x98b   :  { %6170 = vmatpush.bf16.msrb.mxu3 %v11847_v63  ;;  %v11899_v63 = vor.u32 %v14300_v15, %v11898_v30  ;;  %v11959_v30 = vor.u32 %v14313_v49, %v11956_v17  ;;  %v12083_v12 = vor.u32 %v14347_v43, %v12082_v42  ;;  %v14395_v19 = vld [vmem:[#allocation5 + $0x5ec] sm:$0xf0]  ;;  %v12132_v49 = vld [vmem:[#allocation5 + $0x4d0] sm:$0xf0]  ;;  %v12140_v17 = vld [vmem:[#allocation5 + $0x4d8] sm:$0xf0] }
 0x98c   :  { %6196 = vmatpush.bf16.msra.mxu0 %v11855_v59  ;;  %6411 = vmatpush.bf16.msrb.mxu2 %v11971_v36  ;;  %v12023_v59 = vor.u32 %v14329_v0, %v12020_v38  ;;  %v14325_v36 = vld [vmem:[#allocation5 + $0x3c4] sm:$0xf]  ;;  %v11818_v0 = vld [vmem:[#allocation5 + $0x248] sm:$0xf]  ;;  %v17913_v42 = vld [vmem:[#allocation4 + $0x4] sm:$0x1] }
 0x98d   :  { %v12007_v34 = vor.u32 %v14325_v36, %v12004_v52  ;;  %v14309_v38 = vld [vmem:[#allocation5 + $0x344] sm:$0xf]  ;;  %v11924_v36 = vld [vmem:[#allocation5 + $0x330] sm:$0xf0]  ;;  %v11932_v52 = vld [vmem:[#allocation5 + $0x338] sm:$0xf0] }
 0x98e   :  { %5934 = vmatpush.bf16.msra.mxu1 %v11707_v58  ;;  %v12130_v58 = vld [vmem:[#allocation5 + $0x4c0] sm:$0xf] }
 0x98f   :  { %6171 = vmatpush.bf16.msrb.mxu3 %v11831_v13  ;;  %v14359_v13 = vld [vmem:[#allocation5 + $0x4cc] sm:$0xf0] }
 0x990   :  { %6197 = vmatpush.bf16.msra.mxu0 %v11839_v46  ;;  %6412 = vmatpush.bf16.msrb.mxu2 %v11955_v23  ;;  %v11883_v46 = vor.u32 %v14296_v18, %v11882_v48  ;;  %v14292_v23 = vld [vmem:[#allocation5 + $0x2b4] sm:$0xf0]  ;;  %v12131_v50 = vor.u32 %v14359_v13, %v12130_v58  ;;  %v14305_v48 = vld [vmem:[#allocation5 + $0x324] sm:$0xf]  ;;  %v12067_v18 = vor.u32 %v14343_v45, %v12066_v21  ;;  %v11786_v13 = vld [vmem:[#allocation5 + $0x208] sm:$0xf] }
 0x991   :  { %v14387_v21 = vld [vmem:[#allocation5 + $0x5ac] sm:$0xf0] }
 0x992   :  { %5935 = vmatpush.bf16.msra.mxu1 %v11691_v51  ;;  %v12114_v51 = vld [vmem:[#allocation5 + $0x4a0] sm:$0xf] }
 0x993   :  { %6172 = vmatpush.bf16.msrb.mxu3 %v11815_v5  ;;  %v11867_v5 = vor.u32 %v14292_v23, %v11866_v33  ;;  %v14301_v33 = vld [vmem:[#allocation5 + $0x304] sm:$0xf]  ;;  %v11908_v23 = vld [vmem:[#allocation5 + $0x310] sm:$0xf0] }
 0x994   :  { %6198 = vmatpush.bf16.msra.mxu0 %v11823_v10  ;;  %6413 = vmatpush.bf16.msrb.mxu2 %v11939_v35  ;;  %v11991_v10 = vor.u32 %v14321_v6, %v11988_v60  ;;  %v12115_v35 = vor.u32 %v14355_v54, %v12114_v51  ;;  %v14302_v6 = vld [vmem:[#allocation5 + $0x30c] sm:$0xf]  ;;  %v11916_v60 = vld [vmem:[#allocation5 + $0x318] sm:$0xf0]  ;;  %v12026_v51 = vld [vmem:[#allocation5 + $0x3e8] sm:$0xf]  ;;  %v11911_v53 = vor.u32 %v14301_v33, %v11908_v23 }
 0x995   :  { %v14332_v54 = vld [vmem:[#allocation5 + $0x3f4] sm:$0xf0]  ;;  %v12084_v33 = vld [vmem:[#allocation5 + $0x470] sm:$0xf0]  ;;  %v14346_v23 = vld [vmem:[#allocation5 + $0x46c] sm:$0xf] }
 0x996   :  { %5936 = vmatpush.bf16.msra.mxu1 %v11675_v25  ;;  %v12027_v41 = vor.u32 %v14332_v54, %v12026_v51  ;;  %v11946_v54 = vld [vmem:[#allocation5 + $0x348] sm:$0xf] }
 0x997   :  { %6173 = vmatpush.bf16.msrb.mxu3 %v11799_v29  ;;  %v11834_v29 = vld [vmem:[#allocation5 + $0x268] sm:$0xf] }
 0x998   :  { %6199 = vmatpush.bf16.msra.mxu0 %v11807_v14  ;;  %6414 = vmatpush.bf16.msrb.mxu2 %v11923_v28  ;;  %v14284_v14 = vld [vmem:[#allocation5 + $0x274] sm:$0xf0]  ;;  %v11964_v28 = vld [vmem:[#allocation5 + $0x378] sm:$0xf0] }
 0x999   :  { %v11835_v8 = vor.u32 %v14284_v14, %v11834_v29  ;;  %v11967_v15 = vor.u32 %v14314_v57, %v11964_v28  ;;  %v14357_v29 = vld [vmem:[#allocation5 + $0x4c4] sm:$0xf]  ;;  %v12275_v14 = vor.u32 %v14395_v19, %v12274_v32  ;;  %v12258_v57 = vld [vmem:[#allocation5 + $0x5c0] sm:$0xf]  ;;  %v14391_v28 = vld [vmem:[#allocation5 + $0x5cc] sm:$0xf0] }
 0x99a   :  { %5937 = vmatpush.bf16.msra.mxu1 %v11659_v4  ;;  %v14280_v4 = vld [vmem:[#allocation5 + $0x254] sm:$0xf0]  ;;  %v14375_v32 = vld [vmem:[#allocation5 + $0x54c] sm:$0xf0] }
 0x99b   :  { %6174 = vmatpush.bf16.msrb.mxu3 %v11783_v61  ;;  %v14310_v61 = vld [vmem:[#allocation5 + $0x34c] sm:$0xf]  ;;  %v11819_v16 = vor.u32 %v14280_v4, %v11818_v0  ;;  %v14324_v0 = vld [vmem:[#allocation5 + $0x3b4] sm:$0xf0]  ;;  %v14353_v4 = vld [vmem:[#allocation5 + $0x4a4] sm:$0xf] }
 0x99c   :  { %6200 = vmatpush.bf16.msra.mxu0 %v11791_v2  ;;  %6415 = vmatpush.bf16.msrb.mxu2 %v11907_v37  ;;  %v11948_v2 = vld [vmem:[#allocation5 + $0x358] sm:$0xf0]  ;;  %v11943_v37 = vor.u32 %v14309_v38, %v11940_v26  ;;  %v12259_v38 = vor.u32 %v14391_v28, %v12258_v57  ;;  %v14354_v26 = vld [vmem:[#allocation5 + $0x4ac] sm:$0xf]  ;;  %v6713_v57 = vld [vmem:[#allocation4 + $0x4] sm:$0x2] }
 0x99d   :  { %5938 = vmatmul.bf16.vlgmr.msra.gmra.mxu1 %v17893_v44  ;;  %v14288_v44 = vld [vmem:[#allocation5 + $0x294] sm:$0xf0] }
 0x99e   :  { %6180 = vmatpush.bf16.msrb.mxu1 %v11899_v63  ;;  %6175 = vmatmul.bf16.vlgmr.msrb.gmra.mxu3 %v17901_v9  ;;  %v11851_v25 = vor.u32 %v14288_v44, %v11850_v62  ;;  %v11951_v63 = vor.u32 %v14310_v61, %v11948_v2  ;;  %v14362_v62 = vld [vmem:[#allocation5 + $0x4ec] sm:$0xf]  ;;  %v12156_v44 = vld [vmem:[#allocation5 + $0x4f8] sm:$0xf0]  ;;  %v12242_v2 = vld [vmem:[#allocation5 + $0x5a0] sm:$0xf] }
 0x99f   :  { %6421 = vmatpush.bf16.msra.mxu3 %v12023_v59  ;;  %6416 = vmatmul.bf16.vlgmr.msrb.gmra.mxu2 %v17907_v39  ;;  %v11802_v59 = vld [vmem:[#allocation5 + $0x228] sm:$0xf]  ;;  %v12124_v61 = vld [vmem:[#allocation5 + $0x4b8] sm:$0xf0] }
 0x9a0   :  { %6447 = vmatpush.bf16.msrb.mxu0 %v12031_v1  ;;  %6657 = vmatpush.bf16.msra.mxu2 %v12147_v11  ;;  %v14276_v1 = vld [vmem:[#allocation5 + $0x234] sm:$0xf0]  ;;  %v14306_v11 = vld [vmem:[#allocation5 + $0x32c] sm:$0xf] }
 0x9a1   :  { %6201 = vmatmul.bf16.vlgmr.msra.gmra.mxu0 %v17901_v9  ;;  %v11803_v58 = vor.u32 %v14276_v1, %v11802_v59  ;;  %v14349_v59 = vld [vmem:[#allocation5 + $0x484] sm:$0xf]  ;;  %v12243_v1 = vor.u32 %v14387_v21, %v12242_v2  ;;  %v14367_v2 = vld [vmem:[#allocation5 + $0x50c] sm:$0xf0]  ;;  %v6747_v21 = vunpack.c.l.b16 %v6713_v57 }
 0x9a2   :  { %6181 = vmatpush.bf16.msrb.mxu1 %v11883_v46  ;;  %v14272_v46 = vld [vmem:[#allocation5 + $0x214] sm:$0xf0]  ;;  %v14415_v57 = vld [vmem:[#allocation5 + $0x68c] sm:$0xf0] }
 0x9a3   :  { %6422 = vmatpush.bf16.msra.mxu3 %v12007_v34  ;;  %v11927_v34 = vor.u32 %v14305_v48, %v11924_v36  ;;  %v12100_v48 = vld [vmem:[#allocation5 + $0x490] sm:$0xf0]  ;;  %v12108_v36 = vld [vmem:[#allocation5 + $0x498] sm:$0xf0] }
 0x9a4   :  { %6448 = vmatpush.bf16.msrb.mxu0 %v12015_v22  ;;  %6658 = vmatpush.bf16.msra.mxu2 %v12131_v50  ;;  %v11935_v22 = vor.u32 %v14306_v11, %v11932_v52  ;;  %v12051_v50 = vor.u32 %v14339_v56, %v12050_v47  ;;  %v12226_v11 = vld [vmem:[#allocation5 + $0x580] sm:$0xf]  ;;  %v14383_v52 = vld [vmem:[#allocation5 + $0x58c] sm:$0xf0]  ;;  %v12103_v56 = vor.u32 %v14349_v59, %v12100_v48  ;;  %v14394_v59 = vld [vmem:[#allocation5 + $0x5ec] sm:$0xf] }
 0x9a6   :  { %6182 = vmatpush.bf16.msrb.mxu1 %v11867_v5  ;;  %v14361_v5 = vld [vmem:[#allocation5 + $0x4e4] sm:$0xf] }
 0x9a7   :  { %6423 = vmatpush.bf16.msra.mxu3 %v11991_v10  ;;  %v11787_v10 = vor.u32 %v14272_v46, %v11786_v13  ;;  %v11962_v13 = vld [vmem:[#allocation5 + $0x368] sm:$0xf]  ;;  %v14316_v46 = vld [vmem:[#allocation5 + $0x374] sm:$0xf0] }
 0x9a8   :  { %6449 = vmatpush.bf16.msrb.mxu0 %v11999_v24  ;;  %6659 = vmatpush.bf16.msra.mxu2 %v12115_v35  ;;  %v12148_v24 = vld [vmem:[#allocation5 + $0x4f0] sm:$0xf0]  ;;  %v11919_v35 = vor.u32 %v14302_v6, %v11916_v60  ;;  %v12092_v6 = vld [vmem:[#allocation5 + $0x478] sm:$0xf0]  ;;  %v14379_v60 = vld [vmem:[#allocation5 + $0x56c] sm:$0xf0]  ;;  %v11963_v7 = vor.u32 %v14316_v46, %v11962_v13 }
 0x9a9   :  { %v12151_v55 = vor.u32 %v14361_v5, %v12148_v24  ;;  %v12095_v51 = vor.u32 %v14346_v23, %v12092_v6  ;;  %v14312_v5 = vld [vmem:[#allocation5 + $0x354] sm:$0xf0]  ;;  %v12138_v46 = vld [vmem:[#allocation5 + $0x4c8] sm:$0xf]  ;;  %v12260_v23 = vld [vmem:[#allocation5 + $0x5d0] sm:$0xf0] }
 0x9aa   :  { %6183 = vmatpush.bf16.msrb.mxu1 %v11851_v25  ;;  %v12159_v25 = vor.u32 %v14362_v62, %v12156_v44  ;;  %v12068_v62 = vld [vmem:[#allocation5 + $0x450] sm:$0xf0]  ;;  %v14342_v44 = vld [vmem:[#allocation5 + $0x44c] sm:$0xf]  ;;  %v11947_v19 = vor.u32 %v14312_v5, %v11946_v54 }
 0x9ab   :  { %6424 = vmatpush.bf16.msra.mxu3 %v11975_v40  ;;  %v12010_v40 = vld [vmem:[#allocation5 + $0x3c8] sm:$0xf]  ;;  %v14390_v6 = vld [vmem:[#allocation5 + $0x5cc] sm:$0xf] }
 0x9ac   :  { %6450 = vmatpush.bf16.msrb.mxu0 %v11983_v31  ;;  %6660 = vmatpush.bf16.msra.mxu2 %v12099_v20  ;;  %v14328_v31 = vld [vmem:[#allocation5 + $0x3d4] sm:$0xf0]  ;;  %v14358_v20 = vld [vmem:[#allocation5 + $0x4cc] sm:$0xf] }
 0x9ad   :  { %v12011_v43 = vor.u32 %v14328_v31, %v12010_v40  ;;  %v14337_v40 = vld [vmem:[#allocation5 + $0x424] sm:$0xf] }
 0x9ae   :  { %6184 = vmatpush.bf16.msrb.mxu1 %v11835_v8  ;;  %v12135_v8 = vor.u32 %v14357_v29, %v12132_v49  ;;  %v12052_v29 = vld [vmem:[#allocation5 + $0x430] sm:$0xf0]  ;;  %v12060_v49 = vld [vmem:[#allocation5 + $0x438] sm:$0xf0] }
 0x9af   :  { %6425 = vmatpush.bf16.msra.mxu3 %v11959_v30  ;;  %v12143_v30 = vor.u32 %v14358_v20, %v12140_v17  ;;  %v12178_v20 = vld [vmem:[#allocation5 + $0x520] sm:$0xf]  ;;  %v14371_v17 = vld [vmem:[#allocation5 + $0x52c] sm:$0xf0] }
 0x9b0   :  { %6451 = vmatpush.bf16.msrb.mxu0 %v11967_v15  ;;  %6661 = vmatpush.bf16.msra.mxu2 %v12083_v12  ;;  %v11994_v15 = vld [vmem:[#allocation5 + $0x3a8] sm:$0xf]  ;;  %v12116_v12 = vld [vmem:[#allocation5 + $0x4b0] sm:$0xf0] }
 0x9b1   :  { %v11995_v45 = vor.u32 %v14324_v0, %v11994_v15  ;;  %v14333_v0 = vld [vmem:[#allocation5 + $0x404] sm:$0xf] }
 0x9b2   :  { %6185 = vmatpush.bf16.msrb.mxu1 %v11819_v16  ;;  %v12119_v16 = vor.u32 %v14353_v4, %v12116_v12  ;;  %v12036_v4 = vld [vmem:[#allocation5 + $0x410] sm:$0xf0]  ;;  %v12179_v12 = vor.u32 %v14371_v17, %v12178_v20  ;;  %v12236_v20 = vld [vmem:[#allocation5 + $0x598] sm:$0xf0]  ;;  %v12354_v17 = vld [vmem:[#allocation5 + $0x680] sm:$0xf] }
 0x9b3   :  { %6426 = vmatpush.bf16.msra.mxu3 %v11943_v37  ;;  %v12127_v37 = vor.u32 %v14354_v26, %v12124_v61  ;;  %v12044_v26 = vld [vmem:[#allocation5 + $0x418] sm:$0xf0]  ;;  %v12162_v61 = vld [vmem:[#allocation5 + $0x500] sm:$0xf]  ;;  %v12039_v48 = vor.u32 %v14333_v0, %v12036_v4  ;;  %v14377_v0 = vld [vmem:[#allocation5 + $0x564] sm:$0xf]  ;;  %v12355_v4 = vor.u32 %v14415_v57, %v12354_v17 }
 0x9b4   :  { %6452 = vmatpush.bf16.msrb.mxu0 %v11951_v63  ;;  %6662 = vmatpush.bf16.msra.mxu2 %v12067_v18  ;;  %v11978_v63 = vld [vmem:[#allocation5 + $0x388] sm:$0xf]  ;;  %v14350_v18 = vld [vmem:[#allocation5 + $0x48c] sm:$0xf]  ;;  %v12404_v17 = vld [vmem:[#allocation5 + $0x6f0] sm:$0xf0] }
 0x9b5   :  { %v14426_v57 = vld [vmem:[#allocation5 + $0x6ec] sm:$0xf] }
 0x9b6   :  { %6186 = vmatpush.bf16.msrb.mxu1 %v11803_v58  ;;  %v12111_v58 = vor.u32 %v14350_v18, %v12108_v36  ;;  %v12402_v36 = vld [vmem:[#allocation5 + $0x6e0] sm:$0xf] }
 0x9b7   :  { %6427 = vmatpush.bf16.msra.mxu3 %v11927_v34  ;;  %v14345_v34 = vld [vmem:[#allocation5 + $0x464] sm:$0xf] }
 0x9b8   :  { %6453 = vmatpush.bf16.msrb.mxu0 %v11935_v22  ;;  %6663 = vmatpush.bf16.msra.mxu2 %v12051_v50  ;;  %v12227_v22 = vor.u32 %v14383_v52, %v12226_v11  ;;  %v12210_v50 = vld [vmem:[#allocation5 + $0x560] sm:$0xf]  ;;  %v12087_v3 = vor.u32 %v14345_v34, %v12084_v33  ;;  %v14427_v11 = vld [vmem:[#allocation5 + $0x6ec] sm:$0xf0]  ;;  %v12163_v52 = vor.u32 %v14367_v2, %v12162_v61  ;;  %v14360_v34 = vld [vmem:[#allocation5 + $0x4d4] sm:$0xf0] }
 0x9b9   :  { %v12211_v24 = vor.u32 %v14379_v60, %v12210_v50  ;;  %v12403_v33 = vor.u32 %v14427_v11, %v12402_v36  ;;  %v12268_v50 = vld [vmem:[#allocation5 + $0x5d8] sm:$0xf0]  ;;  %v12386_v60 = vld [vmem:[#allocation5 + $0x6c0] sm:$0xf]  ;;  %v14411_v2 = vld [vmem:[#allocation5 + $0x66c] sm:$0xf0] }
 0x9ba   :  { %6187 = vmatpush.bf16.msrb.mxu1 %v11787_v10  ;;  %v14341_v10 = vld [vmem:[#allocation5 + $0x444] sm:$0xf]  ;;  %v12271_v5 = vor.u32 %v14390_v6, %v12268_v50  ;;  %v12338_v61 = vld [vmem:[#allocation5 + $0x660] sm:$0xf]  ;;  %v12180_v50 = vld [vmem:[#allocation5 + $0x530] sm:$0xf0] }
 0x9bb   :  { %6428 = vmatpush.bf16.msra.mxu3 %v11911_v53  ;;  %v12076_v53 = vld [vmem:[#allocation5 + $0x458] sm:$0xf0]  ;;  %v12322_v11 = vld [vmem:[#allocation5 + $0x640] sm:$0xf] }
 0x9bc   :  { %6454 = vmatpush.bf16.msrb.mxu0 %v11919_v35  ;;  %6664 = vmatpush.bf16.msra.mxu2 %v12035_v27  ;;  %v12194_v35 = vld [vmem:[#allocation5 + $0x540] sm:$0xf]  ;;  %v12071_v27 = vor.u32 %v14341_v10, %v12068_v62  ;;  %v12122_v10 = vld [vmem:[#allocation5 + $0x4a8] sm:$0xf]  ;;  %v14385_v62 = vld [vmem:[#allocation5 + $0x5a4] sm:$0xf] }
 0x9bd   :  { %6188 = vmatmul.bf16.vlgmr.msrb.gmra.mxu1 %v17901_v9  ;;  %v14320_v9 = vld [vmem:[#allocation5 + $0x394] sm:$0xf0]  ;;  %v12195_v31 = vor.u32 %v14375_v32, %v12194_v35  ;;  %v14386_v35 = vld [vmem:[#allocation5 + $0x5ac] sm:$0xf]  ;;  %v12252_v32 = vld [vmem:[#allocation5 + $0x5b8] sm:$0xf0] }
 0x9be   :  { %6434 = vmatpush.bf16.msra.mxu1 %v12027_v41  ;;  %6429 = vmatmul.bf16.vlgmr.msra.gmra.mxu3 %v17907_v39  ;;  %v11979_v47 = vor.u32 %v14320_v9, %v11978_v63  ;;  %v12079_v41 = vor.u32 %v14342_v44, %v12076_v53  ;;  %v12276_v9 = vld [vmem:[#allocation5 + $0x5f0] sm:$0xf0] }
 0x9bf   :  { %6670 = vmatpush.bf16.msrb.mxu3 %v12151_v55  ;;  %6455 = vmatmul.bf16.vlgmr.msrb.gmra.mxu0 %v17907_v39  ;;  %v11930_v55 = vld [vmem:[#allocation5 + $0x328] sm:$0xf]  ;;  %v12244_v53 = vld [vmem:[#allocation5 + $0x5b0] sm:$0xf0] }
 0x9c0   :  { %6696 = vmatpush.bf16.msra.mxu0 %v12159_v25  ;;  %6911 = vmatpush.bf16.msrb.mxu2 %v12275_v14  ;;  %v14308_v25 = vld [vmem:[#allocation5 + $0x334] sm:$0xf0]  ;;  %v14338_v14 = vld [vmem:[#allocation5 + $0x42c] sm:$0xf] }
 0x9c1   :  { %6665 = vmatmul.bf16.vlgmr.msra.gmra.mxu2 %v17913_v42  ;;  %v11931_v28 = vor.u32 %v14308_v25, %v11930_v55  ;;  %v12063_v15 = vor.u32 %v14338_v14, %v12060_v49  ;;  %v12247_v55 = vor.u32 %v14385_v62, %v12244_v53  ;;  %v12255_v25 = vor.u32 %v14386_v35, %v12252_v32  ;;  %v12228_v14 = vld [vmem:[#allocation5 + $0x590] sm:$0xf0]  ;;  %v14382_v49 = vld [vmem:[#allocation5 + $0x58c] sm:$0xf]  ;;  %v14336_v62 = vld [vmem:[#allocation5 + $0x414] sm:$0xf0] }
 0x9c2   :  { %6435 = vmatpush.bf16.msra.mxu1 %v12011_v43  ;;  %v11914_v43 = vld [vmem:[#allocation5 + $0x308] sm:$0xf]  ;;  %v14365_v35 = vld [vmem:[#allocation5 + $0x504] sm:$0xf]  ;;  %v12164_v32 = vld [vmem:[#allocation5 + $0x510] sm:$0xf0] }
 0x9c3   :  { %6671 = vmatpush.bf16.msrb.mxu3 %v12135_v8  ;;  %v14304_v8 = vld [vmem:[#allocation5 + $0x314] sm:$0xf0] }
 0x9c4   :  { %6697 = vmatpush.bf16.msra.mxu0 %v12143_v30  ;;  %6912 = vmatpush.bf16.msrb.mxu2 %v12259_v38  ;;  %v12055_v30 = vor.u32 %v14337_v40, %v12052_v29  ;;  %v14334_v38 = vld [vmem:[#allocation5 + $0x40c] sm:$0xf]  ;;  %v11915_v63 = vor.u32 %v14304_v8, %v11914_v43  ;;  %v12106_v40 = vld [vmem:[#allocation5 + $0x488] sm:$0xf]  ;;  %v12239_v8 = vor.u32 %v14382_v49, %v12236_v20  ;;  %v14425_v49 = vld [vmem:[#allocation5 + $0x6e4] sm:$0xf] }
 0x9c5   :  { %v12047_v18 = vor.u32 %v14334_v38, %v12044_v26  ;;  %v12212_v38 = vld [vmem:[#allocation5 + $0x570] sm:$0xf0]  ;;  %v12220_v26 = vld [vmem:[#allocation5 + $0x578] sm:$0xf0] }
 0x9c6   :  { %6436 = vmatpush.bf16.msra.mxu1 %v11995_v45  ;;  %v12154_v45 = vld [vmem:[#allocation5 + $0x4e8] sm:$0xf] }
 0x9c7   :  { %6672 = vmatpush.bf16.msrb.mxu3 %v12119_v16  ;;  %v14364_v16 = vld [vmem:[#allocation5 + $0x4f4] sm:$0xf0] }
 0x9c8   :  { %6698 = vmatpush.bf16.msra.mxu0 %v12127_v37  ;;  %6913 = vmatpush.bf16.msrb.mxu2 %v12243_v1  ;;  %v14393_v37 = vld [vmem:[#allocation5 + $0x5e4] sm:$0xf]  ;;  %v12284_v1 = vld [vmem:[#allocation5 + $0x5f8] sm:$0xf0] }
 0x9c9   :  { %v12287_v13 = vor.u32 %v14394_v59, %v12284_v1  ;;  %v12339_v59 = vor.u32 %v14411_v2, %v12338_v61  ;;  %v12196_v1 = vld [vmem:[#allocation5 + $0x550] sm:$0xf0]  ;;  %v12407_v61 = vor.u32 %v14425_v49, %v12404_v17  ;;  %v12348_v17 = vld [vmem:[#allocation5 + $0x678] sm:$0xf0] }
 0x9ca   :  { %6437 = vmatpush.bf16.msra.mxu1 %v11979_v47  ;;  %v12155_v47 = vor.u32 %v14364_v16, %v12154_v45  ;;  %v12215_v45 = vor.u32 %v14377_v0, %v12212_v38  ;;  %v14459_v0 = vld [vmem:[#allocation5 + $0x7ec] sm:$0xf0]  ;;  %v12340_v49 = vld [vmem:[#allocation5 + $0x670] sm:$0xf0] }
 0x9cb   :  { %6673 = vmatpush.bf16.msrb.mxu3 %v12103_v56  ;;  %v6748_v56 = vpack.c.b16 %v6747_v21, %v6747_v21 }
 0x9cc   :  { %6699 = vmatpush.bf16.msra.mxu0 %v12111_v58  ;;  %6914 = vmatpush.bf16.msrb.mxu2 %v12227_v22  ;;  %v12279_v58 = vor.u32 %v14393_v37, %v12276_v9  ;;  %v14389_v22 = vld [vmem:[#allocation5 + $0x5c4] sm:$0xf]  ;;  %v12074_v37 = vld [vmem:[#allocation5 + $0x448] sm:$0xf] }
 0x9cd   :  { %v12263_v54 = vor.u32 %v14389_v22, %v12260_v23  ;;  %v14373_v9 = vld [vmem:[#allocation5 + $0x544] sm:$0xf] }
 0x9ce   :  { %6438 = vmatpush.bf16.msra.mxu1 %v11963_v7  ;;  %v14423_v7 = vld [vmem:[#allocation5 + $0x6cc] sm:$0xf0]  ;;  %v14369_v22 = vld [vmem:[#allocation5 + $0x524] sm:$0xf] }
 0x9cf   :  { %6674 = vmatpush.bf16.msrb.mxu3 %v12087_v3  ;;  %v17919_v3 = vrot.slane %v6748_v56, 1  ;;  %v12387_v44 = vor.u32 %v14423_v7, %v12386_v60  ;;  %v14370_v60 = vld [vmem:[#allocation5 + $0x52c] sm:$0xf]  ;;  %v12188_v7 = vld [vmem:[#allocation5 + $0x538] sm:$0xf0] }
 0x9d0   :  { %6700 = vmatpush.bf16.msra.mxu0 %v12095_v51  ;;  %6915 = vmatpush.bf16.msrb.mxu2 %v12211_v24  ;;  %v12139_v51 = vor.u32 %v14360_v34, %v12138_v46  ;;  %v14356_v24 = vld [vmem:[#allocation5 + $0x4b4] sm:$0xf0]  ;;  %v12058_v46 = vld [vmem:[#allocation5 + $0x428] sm:$0xf]  ;;  %v12191_v53 = vor.u32 %v14370_v60, %v12188_v7  ;;  %v14451_v60 = vld [vmem:[#allocation5 + $0x7ac] sm:$0xf0] }
 0x9d1   :  { %v14340_v34 = vld [vmem:[#allocation5 + $0x434] sm:$0xf0] }
 0x9d2   :  { %6439 = vmatpush.bf16.msra.mxu1 %v11947_v19  ;;  %v12370_v19 = vld [vmem:[#allocation5 + $0x6a0] sm:$0xf] }
 0x9d3   :  { %6675 = vmatpush.bf16.msrb.mxu3 %v12071_v27  ;;  %v14419_v27 = vld [vmem:[#allocation5 + $0x6ac] sm:$0xf0] }
 0x9d4   :  { %6701 = vmatpush.bf16.msra.mxu0 %v12079_v41  ;;  %6916 = vmatpush.bf16.msrb.mxu2 %v12195_v31  ;;  %v12123_v41 = vor.u32 %v14356_v24, %v12122_v10  ;;  %v14381_v31 = vld [vmem:[#allocation5 + $0x584] sm:$0xf]  ;;  %v12371_v29 = vor.u32 %v14419_v27, %v12370_v19  ;;  %v12059_v10 = vor.u32 %v14340_v34, %v12058_v46  ;;  %v12042_v24 = vld [vmem:[#allocation5 + $0x408] sm:$0xf]  ;;  %v14366_v19 = vld [vmem:[#allocation5 + $0x50c] sm:$0xf] }
 0x9d5   :  { %v12231_v43 = vor.u32 %v14381_v31, %v12228_v14  ;;  %v14396_v14 = vld [vmem:[#allocation5 + $0x5f4] sm:$0xf0]  ;;  %v12043_v20 = vor.u32 %v14336_v62, %v12042_v24  ;;  %v12372_v34 = vld [vmem:[#allocation5 + $0x6b0] sm:$0xf0] }
 0x9d6   :  { %6440 = vmatpush.bf16.msra.mxu1 %v11931_v28  ;;  %v12356_v62 = vld [vmem:[#allocation5 + $0x690] sm:$0xf0] }
 0x9d7   :  { %6676 = vmatpush.bf16.msrb.mxu3 %v12055_v30  ;;  %v12090_v30 = vld [vmem:[#allocation5 + $0x468] sm:$0xf] }
 0x9d8   :  { %6702 = vmatpush.bf16.msra.mxu0 %v12063_v15  ;;  %6917 = vmatpush.bf16.msrb.mxu2 %v12179_v12  ;;  %v14348_v15 = vld [vmem:[#allocation5 + $0x474] sm:$0xf0]  ;;  %v14378_v12 = vld [vmem:[#allocation5 + $0x56c] sm:$0xf] }
 0x9d9   :  { %v12091_v21 = vor.u32 %v14348_v15, %v12090_v30  ;;  %v12223_v16 = vor.u32 %v14378_v12, %v12220_v26  ;;  %v12530_v15 = vld [vmem:[#allocation5 + $0x7e0] sm:$0xf] }
 0x9da   :  { %6441 = vmatpush.bf16.msra.mxu1 %v11915_v63  ;;  %v14344_v63 = vld [vmem:[#allocation5 + $0x454] sm:$0xf0] }
 0x9db   :  { %6677 = vmatpush.bf16.msrb.mxu3 %v12039_v48  ;;  %v14374_v48 = vld [vmem:[#allocation5 + $0x54c] sm:$0xf] }
 0x9dc   :  { %6703 = vmatpush.bf16.msra.mxu0 %v12047_v18  ;;  %6918 = vmatpush.bf16.msrb.mxu2 %v12163_v52  ;;  %v12204_v18 = vld [vmem:[#allocation5 + $0x558] sm:$0xf0]  ;;  %v14407_v52 = vld [vmem:[#allocation5 + $0x64c] sm:$0xf0] }
 0x9dd   :  { %6442 = vmatmul.bf16.vlgmr.msra.gmra.mxu1 %v17907_v39  ;;  %v14352_v39 = vld [vmem:[#allocation5 + $0x494] sm:$0xf0]  ;;  %v12323_v6 = vor.u32 %v14407_v52, %v12322_v11 }
 0x9de   :  { %6683 = vmatpush.bf16.msrb.mxu1 %v12155_v47  ;;  %6678 = vmatmul.bf16.vlgmr.msrb.gmra.mxu3 %v17913_v42  ;;  %v12107_v28 = vor.u32 %v14352_v39, %v12106_v40  ;;  %v12075_v47 = vor.u32 %v14344_v63, %v12074_v37  ;;  %v5701_v56 = vpop.f32.mrf.mxu1  ;;  %v12531_v37 = vor.u32 %v14459_v0, %v12530_v15  ;;  %v12388_v63 = vld [vmem:[#allocation5 + $0x6d0] sm:$0xf0]  ;;  %v12202_v0 = vld [vmem:[#allocation5 + $0x548] sm:$0xf] }
 0x9df   :  { %6924 = vmatpush.bf16.msra.mxu3 %v12279_v58  ;;  %6704 = vmatmul.bf16.vlgmr.msra.gmra.mxu0 %v17913_v42  ;;  %v12199_v58 = vor.u32 %v14373_v9, %v12196_v1  ;;  %v17927_v23 = vpop.f32.mrf.mxu0  ;;  %v14422_v9 = vld [vmem:[#allocation5 + $0x6cc] sm:$0xf]  ;;  %v12514_v1 = vld [vmem:[#allocation5 + $0x7c0] sm:$0xf] }
 0x9e0   :  { %6950 = vmatpush.bf16.msrb.mxu0 %v12287_v13  ;;  %7165 = vmatpush.bf16.msra.mxu2 %v12403_v33  ;;  %v12207_v13 = vor.u32 %v14374_v48, %v12204_v18  ;;  %v14455_v48 = vld [vmem:[#allocation5 + $0x7cc] sm:$0xf0] }
 0x9e1   :  { %6919 = vmatmul.bf16.vlgmr.msrb.gmra.mxu2 %v17919_v3  ;;  %v12515_v46 = vor.u32 %v14455_v48, %v12514_v1 }
 0x9e2   :  { %6684 = vmatpush.bf16.msrb.mxu1 %v12139_v51  ;;  %v5913_v36 = vpop.f32.mrf.mxu2  ;;  %v12306_v51 = vld [vmem:[#allocation5 + $0x620] sm:$0xf] }
 0x9e3   :  { %6925 = vmatpush.bf16.msra.mxu3 %v12263_v54  ;;  %v17925_v33 = vadd.f32 %v5913_v36, %v5701_v56  ;;  %v14403_v54 = vld [vmem:[#allocation5 + $0x62c] sm:$0xf0]  ;;  %v12250_v56 = vld [vmem:[#allocation5 + $0x5a8] sm:$0xf] }
 0x9e4   :  { %6951 = vmatpush.bf16.msrb.mxu0 %v12271_v5  ;;  %7166 = vmatpush.bf16.msra.mxu2 %v12387_v44  ;;  %v6967_v5 = vld [vmem:[#allocation4 + $0x4] sm:$0x4]  ;;  %v12183_v44 = vor.u32 %v14369_v22, %v12180_v50  ;;  %v12307_v27 = vor.u32 %v14403_v54, %v12306_v51  ;;  %v17929_v31 = vpop.f32.mrf.mxu3  ;;  %v14418_v22 = vld [vmem:[#allocation5 + $0x6ac] sm:$0xf]  ;;  %v12498_v50 = vld [vmem:[#allocation5 + $0x7a0] sm:$0xf] }
 0x9e5   :  { %v7001_v40 = vunpack.c.l.b16 %v6967_v5  ;;  %v12234_v5 = vld [vmem:[#allocation5 + $0x588] sm:$0xf]  ;;  %v12499_v24 = vor.u32 %v14451_v60, %v12498_v50  ;;  %v14368_v50 = vld [vmem:[#allocation5 + $0x514] sm:$0xf0] }
 0x9e6   :  { %6685 = vmatpush.bf16.msrb.mxu1 %v12123_v41  ;;  %v12172_v41 = vld [vmem:[#allocation5 + $0x518] sm:$0xf0] }
 0x9e7   :  { %6926 = vmatpush.bf16.msra.mxu3 %v12247_v55  ;;  %v12290_v55 = vld [vmem:[#allocation5 + $0x600] sm:$0xf]  ;;  %v12175_v30 = vor.u32 %v14366_v19, %v12172_v41  ;;  %v7002_v26 = vpack.c.b16 %v7001_v40, %v7001_v40  ;;  %v14380_v40 = vld [vmem:[#allocation5 + $0x574] sm:$0xf0] }
 0x9e8   :  { %6952 = vmatpush.bf16.msrb.mxu0 %v12255_v25  ;;  %7167 = vmatpush.bf16.msra.mxu2 %v12371_v29  ;;  %v14399_v25 = vld [vmem:[#allocation5 + $0x60c] sm:$0xf0]  ;;  %v12282_v29 = vld [vmem:[#allocation5 + $0x5e8] sm:$0xf] }
 0x9e9   :  { %v12291_v38 = vor.u32 %v14399_v25, %v12290_v55  ;;  %v12283_v12 = vor.u32 %v14396_v14, %v12282_v29  ;;  %v17931_v18 = vrot.slane %v7002_v26, 2  ;;  %v12218_v25 = vld [vmem:[#allocation5 + $0x568] sm:$0xf] }
 0x9ea   :  { %6686 = vmatpush.bf16.msrb.mxu1 %v12107_v28  ;;  %v5915_v39 = vpop.f32.mrf.mxu2  ;;  %v12412_v28 = vld [vmem:[#allocation5 + $0x6f8] sm:$0xf0] }
 0x9eb   :  { %6927 = vmatpush.bf16.msra.mxu3 %v12231_v43  ;;  %v5703_v43 = vpop.f32.mrf.mxu1  ;;  %v12415_v2 = vor.u32 %v14426_v57, %v12412_v28  ;;  %v14409_v39 = vld [vmem:[#allocation5 + $0x664] sm:$0xf]  ;;  %v12466_v28 = vld [vmem:[#allocation5 + $0x760] sm:$0xf] }
 0x9ec   :  { %6953 = vmatpush.bf16.msrb.mxu0 %v12239_v8  ;;  %7168 = vmatpush.bf16.msra.mxu2 %v12355_v4  ;;  %v12167_v8 = vor.u32 %v14365_v35, %v12164_v32  ;;  %v5742_v4 = vpop.f32.mrf.mxu0  ;;  %v5716_v11 = vpop.f32.mrf.mxu3  ;;  %v12482_v35 = vld [vmem:[#allocation5 + $0x780] sm:$0xf]  ;;  %v14447_v32 = vld [vmem:[#allocation5 + $0x78c] sm:$0xf0] }
 0x9ed   :  { %v12483_v14 = vor.u32 %v14447_v32, %v12482_v35  ;;  %v14443_v43 = vld [vmem:[#allocation5 + $0x76c] sm:$0xf0]  ;;  %v14376_v4 = vld [vmem:[#allocation5 + $0x554] sm:$0xf0]  ;;  %v12410_v32 = vld [vmem:[#allocation5 + $0x6e8] sm:$0xf] }
 0x9ee   :  { %6687 = vmatpush.bf16.msrb.mxu1 %v12091_v21  ;;  %v12266_v21 = vld [vmem:[#allocation5 + $0x5c8] sm:$0xf]  ;;  %v14372_v11 = vld [vmem:[#allocation5 + $0x534] sm:$0xf0] }
 0x9ef   :  { %6928 = vmatpush.bf16.msra.mxu3 %v12215_v45  ;;  %v14392_v45 = vld [vmem:[#allocation5 + $0x5d4] sm:$0xf0] }
 0x9f0   :  { %6954 = vmatpush.bf16.msrb.mxu0 %v12223_v16  ;;  %7169 = vmatpush.bf16.msra.mxu2 %v12339_v59  ;;  %v14421_v16 = vld [vmem:[#allocation5 + $0x6c4] sm:$0xf]  ;;  %v12396_v59 = vld [vmem:[#allocation5 + $0x6d8] sm:$0xf0]  ;;  %v12267_v36 = vor.u32 %v14392_v45, %v12266_v21 }
 0x9f1   :  { %v12391_v52 = vor.u32 %v14421_v16, %v12388_v63  ;;  %v12332_v21 = vld [vmem:[#allocation5 + $0x658] sm:$0xf0]  ;;  %v12450_v16 = vld [vmem:[#allocation5 + $0x740] sm:$0xf] }
 0x9f2   :  { %6688 = vmatpush.bf16.msrb.mxu1 %v12075_v47  ;;  %v12399_v47 = vor.u32 %v14422_v9, %v12396_v59  ;;  %v12203_v59 = vor.u32 %v14376_v4, %v12202_v0  ;;  %v14424_v0 = vld [vmem:[#allocation5 + $0x6d4] sm:$0xf0]  ;;  %v14453_v4 = vld [vmem:[#allocation5 + $0x7c4] sm:$0xf] }
 0x9f3   :  { %6929 = vmatpush.bf16.msra.mxu3 %v12199_v58  ;;  %v14388_v58 = vld [vmem:[#allocation5 + $0x5b4] sm:$0xf0] }
 0x9f4   :  { %6955 = vmatpush.bf16.msrb.mxu0 %v12207_v13  ;;  %7170 = vmatpush.bf16.msra.mxu2 %v12323_v6  ;;  %v14417_v13 = vld [vmem:[#allocation5 + $0x6a4] sm:$0xf]  ;;  %v12380_v6 = vld [vmem:[#allocation5 + $0x6b8] sm:$0xf0]  ;;  %v12251_v7 = vor.u32 %v14388_v58, %v12250_v56  ;;  %v14402_v58 = vld [vmem:[#allocation5 + $0x62c] sm:$0xf] }
 0x9f5   :  { %v12375_v51 = vor.u32 %v14417_v13, %v12372_v34  ;;  %v12383_v54 = vor.u32 %v14418_v22, %v12380_v6  ;;  %v12316_v13 = vld [vmem:[#allocation5 + $0x638] sm:$0xf0]  ;;  %v14435_v34 = vld [vmem:[#allocation5 + $0x72c] sm:$0xf0]  ;;  %v12170_v6 = vld [vmem:[#allocation5 + $0x508] sm:$0xf] }
 0x9f6   :  { %6689 = vmatpush.bf16.msrb.mxu1 %v12059_v10  ;;  %v14413_v10 = vld [vmem:[#allocation5 + $0x684] sm:$0xf] }
 0x9f7   :  { %6930 = vmatpush.bf16.msra.mxu3 %v12183_v44  ;;  %v14414_v44 = vld [vmem:[#allocation5 + $0x68c] sm:$0xf]  ;;  %v12359_v41 = vor.u32 %v14413_v10, %v12356_v62  ;;  %v12300_v10 = vld [vmem:[#allocation5 + $0x618] sm:$0xf0]  ;;  %v14431_v62 = vld [vmem:[#allocation5 + $0x70c] sm:$0xf0] }
 0x9f8   :  { %6956 = vmatpush.bf16.msrb.mxu0 %v12191_v53  ;;  %7171 = vmatpush.bf16.msra.mxu2 %v12307_v27  ;;  %v12364_v53 = vld [vmem:[#allocation5 + $0x698] sm:$0xf0] }
 0x9f9   :  { %v12367_v55 = vor.u32 %v14414_v44, %v12364_v53 }
 0x9fa   :  { %6690 = vmatpush.bf16.msrb.mxu1 %v12043_v20  ;;  %v17937_v19 = vpop.f32.mrf.mxu1  ;;  %v14410_v20 = vld [vmem:[#allocation5 + $0x66c] sm:$0xf] }
 0x9fb   :  { %6931 = vmatpush.bf16.msra.mxu3 %v12167_v8  ;;  %v12219_v8 = vor.u32 %v14380_v40, %v12218_v25  ;;  %v12351_v15 = vor.u32 %v14410_v20, %v12348_v17  ;;  %v12532_v25 = vld [vmem:[#allocation5 + $0x7f0] sm:$0xf0]  ;;  %v14458_v40 = vld [vmem:[#allocation5 + $0x7ec] sm:$0xf]  ;;  %v14491_v20 = vld [vmem:[#allocation5 + $0x8ec] sm:$0xf0] }
 0x9fc   :  { %6957 = vmatpush.bf16.msrb.mxu0 %v12175_v30  ;;  %7172 = vmatpush.bf16.msra.mxu2 %v12291_v38  ;;  %v12343_v30 = vor.u32 %v14409_v39, %v12340_v49  ;;  %v14405_v38 = vld [vmem:[#allocation5 + $0x644] sm:$0xf]  ;;  %v12540_v39 = vld [vmem:[#allocation5 + $0x7f8] sm:$0xf0]  ;;  %v12658_v49 = vld [vmem:[#allocation5 + $0x8e0] sm:$0xf] }
 0x9fd   :  { %6691 = vmatmul.bf16.vlgmr.msrb.gmra.mxu1 %v17913_v42  ;;  %v14384_v42 = vld [vmem:[#allocation5 + $0x594] sm:$0xf0] }
 0x9fe   :  { %6937 = vmatpush.bf16.msra.mxu1 %v12283_v12  ;;  %6932 = vmatmul.bf16.vlgmr.msra.gmra.mxu3 %v17919_v3  ;;  %v12235_v27 = vor.u32 %v14384_v42, %v12234_v5  ;;  %v5952_v29 = vpop.f32.mrf.mxu0  ;;  %v12467_v12 = vor.u32 %v14443_v43, %v12466_v28  ;;  %v14398_v5 = vld [vmem:[#allocation5 + $0x60c] sm:$0xf] }
 0x9ff   :  { %7178 = vmatpush.bf16.msrb.mxu3 %v12407_v61  ;;  %6958 = vmatmul.bf16.vlgmr.msrb.gmra.mxu0 %v17919_v3  ;;  %v17940_v57 = vadd.f32 %v5952_v29, %v17927_v23  ;;  %v12324_v61 = vld [vmem:[#allocation5 + $0x650] sm:$0xf0] }
 0xa00   :  { %7204 = vmatpush.bf16.msra.mxu0 %v12415_v2  ;;  %7419 = vmatpush.bf16.msrb.mxu2 %v12531_v37  ;;  %v14406_v2 = vld [vmem:[#allocation5 + $0x64c] sm:$0xf]  ;;  %v14439_v37 = vld [vmem:[#allocation5 + $0x74c] sm:$0xf0]  ;;  %v12327_v1 = vor.u32 %v14405_v38, %v12324_v61  ;;  %v12659_v38 = vor.u32 %v14491_v20, %v12658_v49  ;;  %v12524_v61 = vld [vmem:[#allocation5 + $0x7d8] sm:$0xf0] }
 0xa01   :  { %7173 = vmatmul.bf16.vlgmr.msra.gmra.mxu2 %v17931_v18  ;;  %v5926_v45 = vpop.f32.mrf.mxu3  ;;  %v12335_v48 = vor.u32 %v14406_v2, %v12332_v21  ;;  %v12451_v56 = vor.u32 %v14439_v37, %v12450_v16  ;;  %v12642_v2 = vld [vmem:[#allocation5 + $0x8c0] sm:$0xf]  ;;  %v14487_v21 = vld [vmem:[#allocation5 + $0x8cc] sm:$0xf0]  ;;  %v12330_v49 = vld [vmem:[#allocation5 + $0x648] sm:$0xf] }
 0xa02   :  { %6938 = vmatpush.bf16.msra.mxu1 %v12267_v36  ;;  %v6163_v26 = vpop.f32.mrf.mxu2  ;;  %v17946_v63 = vadd.f32 %v5926_v45, %v17929_v31  ;;  %v5729_v9 = vpop.f32.mrf.mxu1  ;;  %v12186_v36 = vld [vmem:[#allocation5 + $0x528] sm:$0xf]  ;;  %v7221_v31 = vld [vmem:[#allocation4 + $0x4] sm:$0x8]  ;;  %v14408_v20 = vld [vmem:[#allocation5 + $0x654] sm:$0xf0] }
 0xa03   :  { %7179 = vmatpush.bf16.msrb.mxu3 %v12391_v52  ;;  %v17943_v23 = vadd.f32 %v6163_v26, %v17925_v33  ;;  %v14401_v52 = vld [vmem:[#allocation5 + $0x624] sm:$0xf]  ;;  %v12308_v33 = vld [vmem:[#allocation5 + $0x630] sm:$0xf0]  ;;  %v12187_v22 = vor.u32 %v14372_v11, %v12186_v36  ;;  %v7255_v44 = vunpack.c.l.b16 %v7221_v31  ;;  %v14454_v26 = vld [vmem:[#allocation5 + $0x7cc] sm:$0xf]  ;;  %v12643_v36 = vor.u32 %v14487_v21, %v12642_v2 }
 0xa04   :  { %7205 = vmatpush.bf16.msra.mxu0 %v12399_v47  ;;  %7420 = vmatpush.bf16.msrb.mxu2 %v12515_v46  ;;  %v12434_v46 = vld [vmem:[#allocation5 + $0x720] sm:$0xf]  ;;  %v12311_v60 = vor.u32 %v14401_v52, %v12308_v33  ;;  %v12527_v9 = vor.u32 %v14454_v26, %v12524_v61  ;;  %v12500_v11 = vld [vmem:[#allocation5 + $0x7b0] sm:$0xf0]  ;;  %v14450_v52 = vld [vmem:[#allocation5 + $0x7ac] sm:$0xf]  ;;  %v12331_v61 = vor.u32 %v14408_v20, %v12330_v49 }
 0xa05   :  { %v12435_v42 = vor.u32 %v14435_v34, %v12434_v46  ;;  %v7256_v43 = vpack.c.b16 %v7255_v44, %v7255_v44  ;;  %v14483_v33 = vld [vmem:[#allocation5 + $0x8ac] sm:$0xf0]  ;;  %v12362_v34 = vld [vmem:[#allocation5 + $0x688] sm:$0xf]  ;;  %v14445_v31 = vld [vmem:[#allocation5 + $0x784] sm:$0xf] }
 0xa06   :  { %6939 = vmatpush.bf16.msra.mxu1 %v12251_v7  ;;  %v5954_v47 = vpop.f32.mrf.mxu0  ;;  %v12319_v7 = vor.u32 %v14402_v58, %v12316_v13  ;;  %v12346_v44 = vld [vmem:[#allocation5 + $0x668] sm:$0xf]  ;;  %v12644_v49 = vld [vmem:[#allocation5 + $0x8d0] sm:$0xf0]  ;;  %v14486_v20 = vld [vmem:[#allocation5 + $0x8cc] sm:$0xf] }
 0xa07   :  { %7180 = vmatpush.bf16.msrb.mxu3 %v12375_v51  ;;  %v14397_v51 = vld [vmem:[#allocation5 + $0x604] sm:$0xf]  ;;  %v17948_v45 = vrot.slane %v7256_v43, 3  ;;  %v12508_v47 = vld [vmem:[#allocation5 + $0x7b8] sm:$0xf0] }
 0xa08   :  { %7206 = vmatpush.bf16.msra.mxu0 %v12383_v54  ;;  %7421 = vmatpush.bf16.msrb.mxu2 %v12499_v24  ;;  %v12292_v54 = vld [vmem:[#allocation5 + $0x610] sm:$0xf0]  ;;  %v12418_v24 = vld [vmem:[#allocation5 + $0x700] sm:$0xf]  ;;  %v12511_v46 = vor.u32 %v14450_v52, %v12508_v47  ;;  %v12298_v47 = vld [vmem:[#allocation5 + $0x608] sm:$0xf] }
 0xa09   :  { %v5928_v53 = vpop.f32.mrf.mxu3  ;;  %v12295_v29 = vor.u32 %v14397_v51, %v12292_v54  ;;  %v12419_v17 = vor.u32 %v14431_v62, %v12418_v24  ;;  %v12610_v51 = vld [vmem:[#allocation5 + $0x880] sm:$0xf]  ;;  %v14479_v54 = vld [vmem:[#allocation5 + $0x88c] sm:$0xf0] }
 0xa0a   :  { %6940 = vmatpush.bf16.msra.mxu1 %v12235_v27  ;;  %v6165_v35 = vpop.f32.mrf.mxu2  ;;  %v14428_v27 = vld [vmem:[#allocation5 + $0x6f4] sm:$0xf0] }
 0xa0b   :  { %7181 = vmatpush.bf16.msrb.mxu3 %v12359_v41  ;;  %v14457_v41 = vld [vmem:[#allocation5 + $0x7e4] sm:$0xf]  ;;  %v12411_v28 = vor.u32 %v14428_v27, %v12410_v32  ;;  %v14412_v53 = vld [vmem:[#allocation5 + $0x674] sm:$0xf0]  ;;  %v12611_v32 = vor.u32 %v14479_v54, %v12610_v51 }
 0xa0c   :  { %7207 = vmatpush.bf16.msra.mxu0 %v12367_v55  ;;  %7422 = vmatpush.bf16.msrb.mxu2 %v12483_v14  ;;  %v12171_v55 = vor.u32 %v14368_v50, %v12170_v6  ;;  %v12303_v14 = vor.u32 %v14398_v5, %v12300_v10  ;;  %v12484_v6 = vld [vmem:[#allocation5 + $0x790] sm:$0xf0]  ;;  %v14446_v50 = vld [vmem:[#allocation5 + $0x78c] sm:$0xf]  ;;  %v14441_v35 = vld [vmem:[#allocation5 + $0x764] sm:$0xf] }
 0xa0d   :  { %v12487_v10 = vor.u32 %v14445_v31, %v12484_v6  ;;  %v12428_v31 = vld [vmem:[#allocation5 + $0x718] sm:$0xf0]  ;;  %v14463_v6 = vld [vmem:[#allocation5 + $0x80c] sm:$0xf0]  ;;  %v14460_v51 = vld [vmem:[#allocation5 + $0x7f4] sm:$0xf0] }
 0xa0e   :  { %6941 = vmatpush.bf16.msra.mxu1 %v12219_v8  ;;  %v12535_v8 = vor.u32 %v14457_v41, %v12532_v25  ;;  %v12468_v41 = vld [vmem:[#allocation5 + $0x770] sm:$0xf0]  ;;  %v12476_v25 = vld [vmem:[#allocation5 + $0x778] sm:$0xf0]  ;;  %v14489_v54 = vld [vmem:[#allocation5 + $0x8e4] sm:$0xf] }
 0xa0f   :  { %7182 = vmatpush.bf16.msrb.mxu3 %v12343_v30  ;;  %v12543_v30 = vor.u32 %v14458_v40, %v12540_v39  ;;  %v12594_v40 = vld [vmem:[#allocation5 + $0x860] sm:$0xf]  ;;  %v12347_v39 = vor.u32 %v14412_v53, %v12346_v44 }
 0xa10   :  { %7208 = vmatpush.bf16.msra.mxu0 %v12351_v15  ;;  %7423 = vmatpush.bf16.msrb.mxu2 %v12467_v12  ;;  %v12394_v15 = vld [vmem:[#allocation5 + $0x6c8] sm:$0xf]  ;;  %v12516_v12 = vld [vmem:[#allocation5 + $0x7d0] sm:$0xf0] }
 0xa11   :  { %v12395_v16 = vor.u32 %v14424_v0, %v12394_v15  ;;  %v12519_v37 = vor.u32 %v14453_v4, %v12516_v12  ;;  %v12460_v15 = vld [vmem:[#allocation5 + $0x758] sm:$0xf0]  ;;  %v14471_v12 = vld [vmem:[#allocation5 + $0x84c] sm:$0xf0] }
 0xa12   :  { %6942 = vmatpush.bf16.msra.mxu1 %v12203_v59  ;;  %v12378_v59 = vld [vmem:[#allocation5 + $0x6a8] sm:$0xf] }
 0xa13   :  { %7183 = vmatpush.bf16.msrb.mxu3 %v12327_v1  ;;  %v14420_v1 = vld [vmem:[#allocation5 + $0x6b4] sm:$0xf0] }
 0xa14   :  { %7209 = vmatpush.bf16.msra.mxu0 %v12335_v48  ;;  %7424 = vmatpush.bf16.msrb.mxu2 %v12451_v56  ;;  %v14449_v48 = vld [vmem:[#allocation5 + $0x7a4] sm:$0xf]  ;;  %v12626_v56 = vld [vmem:[#allocation5 + $0x8a0] sm:$0xf]  ;;  %v12379_v58 = vor.u32 %v14420_v1, %v12378_v59 }
 0xa15   :  { %v12503_v13 = vor.u32 %v14449_v48, %v12500_v11  ;;  %v14434_v48 = vld [vmem:[#allocation5 + $0x72c] sm:$0xf]  ;;  %v14467_v11 = vld [vmem:[#allocation5 + $0x82c] sm:$0xf0] }
 0xa16   :  { %6943 = vmatpush.bf16.msra.mxu1 %v12187_v22  ;;  %v12627_v22 = vor.u32 %v14483_v33, %v12626_v56  ;;  %v14400_v56 = vld [vmem:[#allocation5 + $0x614] sm:$0xf0] }
 0xa17   :  { %7184 = vmatpush.bf16.msrb.mxu3 %v12311_v60  ;;  %v12492_v60 = vld [vmem:[#allocation5 + $0x798] sm:$0xf0] }
 0xa18   :  { %7210 = vmatpush.bf16.msra.mxu0 %v12319_v7  ;;  %7425 = vmatpush.bf16.msrb.mxu2 %v12435_v42  ;;  %v12495_v24 = vor.u32 %v14446_v50, %v12492_v60 }
 0xa1a   :  { %6944 = vmatpush.bf16.msra.mxu1 %v12171_v55  ;;  %v5939_v7 = vpop.f32.mrf.mxu1  ;;  %v14442_v55 = vld [vmem:[#allocation5 + $0x76c] sm:$0xf] }
 0xa1b   :  { %7185 = vmatpush.bf16.msrb.mxu3 %v12295_v29  ;;  %v17955_v5 = vadd.f32 %v5939_v7, %v17937_v19  ;;  %v14475_v19 = vld [vmem:[#allocation5 + $0x86c] sm:$0xf0]  ;;  %v12471_v29 = vor.u32 %v14441_v35, %v12468_v41  ;;  %v12538_v7 = vld [vmem:[#allocation5 + $0x7e8] sm:$0xf]  ;;  %v12786_v35 = vld [vmem:[#allocation5 + $0x9e0] sm:$0xf] }
 0xa1c   :  { %7211 = vmatpush.bf16.msra.mxu0 %v12303_v14  ;;  %7426 = vmatpush.bf16.msrb.mxu2 %v12419_v17  ;;  %v12479_v14 = vor.u32 %v14442_v55, %v12476_v25  ;;  %v14437_v17 = vld [vmem:[#allocation5 + $0x744] sm:$0xf]  ;;  %v12539_v55 = vor.u32 %v14460_v51, %v12538_v7  ;;  %v12596_v51 = vld [vmem:[#allocation5 + $0x870] sm:$0xf0] }
 0xa1d   :  { %6945 = vmatmul.bf16.vlgmr.msra.gmra.mxu1 %v17919_v3  ;;  %v14416_v3 = vld [vmem:[#allocation5 + $0x694] sm:$0xf0] }
 0xa1e   :  { %7191 = vmatpush.bf16.msrb.mxu1 %v12411_v28  ;;  %7186 = vmatmul.bf16.vlgmr.msrb.gmra.mxu3 %v17931_v18  ;;  %v12363_v42 = vor.u32 %v14416_v3, %v12362_v34  ;;  %v6202_v62 = vpop.f32.mrf.mxu0  ;;  %v12595_v28 = vor.u32 %v14475_v19, %v12594_v40  ;;  %v14430_v34 = vld [vmem:[#allocation5 + $0x70c] sm:$0xf]  ;;  %v12522_v19 = vld [vmem:[#allocation5 + $0x7c8] sm:$0xf] }
 0xa1f   :  { %7432 = vmatpush.bf16.msra.mxu3 %v12535_v8  ;;  %7212 = vmatmul.bf16.vlgmr.msra.gmra.mxu0 %v17931_v18  ;;  %v17958_v27 = vadd.f32 %v6202_v62, %v17940_v57  ;;  %v12452_v57 = vld [vmem:[#allocation5 + $0x750] sm:$0xf0]  ;;  %v12668_v62 = vld [vmem:[#allocation5 + $0x8f8] sm:$0xf0]  ;;  %v12431_v53 = vor.u32 %v14430_v34, %v12428_v31 }
 0xa20   :  { %7458 = vmatpush.bf16.msrb.mxu0 %v12543_v30  ;;  %7668 = vmatpush.bf16.msra.mxu2 %v12659_v38  ;;  %v14438_v30 = vld [vmem:[#allocation5 + $0x74c] sm:$0xf]  ;;  %v12578_v38 = vld [vmem:[#allocation5 + $0x840] sm:$0xf]  ;;  %v12455_v2 = vor.u32 %v14437_v17, %v12452_v57  ;;  %v12652_v17 = vld [vmem:[#allocation5 + $0x8d8] sm:$0xf0] }
 0xa21   :  { %7427 = vmatmul.bf16.vlgmr.msrb.gmra.mxu2 %v17948_v45  ;;  %v6176_v43 = vpop.f32.mrf.mxu3  ;;  %v12463_v21 = vor.u32 %v14438_v30, %v12460_v15  ;;  %v12579_v1 = vor.u32 %v14471_v12, %v12578_v38  ;;  %v12655_v15 = vor.u32 %v14486_v20, %v12652_v17  ;;  %v12506_v38 = vld [vmem:[#allocation5 + $0x7a8] sm:$0xf]  ;;  %v14452_v12 = vld [vmem:[#allocation5 + $0x7b4] sm:$0xf0] }
 0xa22   :  { %7192 = vmatpush.bf16.msrb.mxu1 %v12395_v16  ;;  %v6417_v8 = vpop.f32.mrf.mxu2  ;;  %v17961_v0 = vadd.f32 %v6176_v43, %v17946_v63  ;;  %v5941_v26 = vpop.f32.mrf.mxu1  ;;  %v12314_v16 = vld [vmem:[#allocation5 + $0x628] sm:$0xf]  ;;  %v12436_v63 = vld [vmem:[#allocation5 + $0x730] sm:$0xf0]  ;;  %v14519_v43 = vld [vmem:[#allocation5 + $0x9cc] sm:$0xf0] }
 0xa23   :  { %7433 = vmatpush.bf16.msra.mxu3 %v12519_v37  ;;  %v17964_v4 = vadd.f32 %v6417_v8, %v17943_v23  ;;  %v14404_v37 = vld [vmem:[#allocation5 + $0x634] sm:$0xf0]  ;;  %v12562_v23 = vld [vmem:[#allocation5 + $0x820] sm:$0xf]  ;;  %v14481_v26 = vld [vmem:[#allocation5 + $0x8a4] sm:$0xf] }
 0xa24   :  { %7459 = vmatpush.bf16.msrb.mxu0 %v12527_v9  ;;  %7669 = vmatpush.bf16.msra.mxu2 %v12643_v36  ;;  %v14433_v9 = vld [vmem:[#allocation5 + $0x724] sm:$0xf]  ;;  %v12444_v36 = vld [vmem:[#allocation5 + $0x738] sm:$0xf0]  ;;  %v12315_v52 = vor.u32 %v14404_v37, %v12314_v16  ;;  %v12563_v3 = vor.u32 %v14467_v11, %v12562_v23  ;;  %v17966_v8 = vld [vmem:[#allocation4 + $0x8] sm:$0x1] }
 0xa25   :  { %v12439_v33 = vor.u32 %v14433_v9, %v12436_v63  ;;  %v12636_v16 = vld [vmem:[#allocation5 + $0x8b8] sm:$0xf0]  ;;  %v12754_v37 = vld [vmem:[#allocation5 + $0x9a0] sm:$0xf]  ;;  %v14515_v9 = vld [vmem:[#allocation5 + $0x9ac] sm:$0xf0] }
 0xa26   :  { %7193 = vmatpush.bf16.msrb.mxu1 %v12379_v58  ;;  %v6204_v59 = vpop.f32.mrf.mxu0  ;;  %v12447_v58 = vor.u32 %v14434_v48, %v12444_v36  ;;  %v12490_v48 = vld [vmem:[#allocation5 + $0x788] sm:$0xf]  ;;  %v14477_v36 = vld [vmem:[#allocation5 + $0x884] sm:$0xf]  ;;  %v12755_v23 = vor.u32 %v14515_v9, %v12754_v37  ;;  %v12612_v11 = vld [vmem:[#allocation5 + $0x890] sm:$0xf0] }
 0xa27   :  { %7434 = vmatpush.bf16.msra.mxu3 %v12503_v13  ;;  %v14429_v13 = vld [vmem:[#allocation5 + $0x704] sm:$0xf]  ;;  %v12507_v59 = vor.u32 %v14452_v12, %v12506_v38  ;;  %v12615_v31 = vor.u32 %v14477_v36, %v12612_v11  ;;  %v12564_v12 = vld [vmem:[#allocation5 + $0x830] sm:$0xf0]  ;;  %v12426_v37 = vld [vmem:[#allocation5 + $0x708] sm:$0xf] }
 0xa28   :  { %7460 = vmatpush.bf16.msrb.mxu0 %v12511_v46  ;;  %7670 = vmatpush.bf16.msra.mxu2 %v12627_v22  ;;  %v12420_v46 = vld [vmem:[#allocation5 + $0x710] sm:$0xf0]  ;;  %v12546_v22 = vld [vmem:[#allocation5 + $0x800] sm:$0xf]  ;;  %v14465_v38 = vld [vmem:[#allocation5 + $0x824] sm:$0xf] }
 0xa29   :  { %v6178_v50 = vpop.f32.mrf.mxu3  ;;  %v12423_v44 = vor.u32 %v14429_v13, %v12420_v46  ;;  %v12547_v41 = vor.u32 %v14463_v6, %v12546_v22  ;;  %v12474_v6 = vld [vmem:[#allocation5 + $0x768] sm:$0xf]  ;;  %v14432_v9 = vld [vmem:[#allocation5 + $0x714] sm:$0xf0]  ;;  %v12674_v11 = vld [vmem:[#allocation5 + $0x900] sm:$0xf] }
 0xa2a   :  { %7194 = vmatpush.bf16.msrb.mxu1 %v12363_v42  ;;  %v6419_v60 = vpop.f32.mrf.mxu2  ;;  %v12299_v42 = vor.u32 %v14400_v56, %v12298_v47  ;;  %v12620_v47 = vld [vmem:[#allocation5 + $0x898] sm:$0xf0]  ;;  %v14444_v50 = vld [vmem:[#allocation5 + $0x774] sm:$0xf0] }
 0xa2b   :  { %7435 = vmatpush.bf16.msra.mxu3 %v12487_v10  ;;  %v12660_v10 = vld [vmem:[#allocation5 + $0x8f0] sm:$0xf0]  ;;  %v14473_v60 = vld [vmem:[#allocation5 + $0x864] sm:$0xf] }
 0xa2c   :  { %7461 = vmatpush.bf16.msrb.mxu0 %v12495_v24  ;;  %7671 = vmatpush.bf16.msra.mxu2 %v12611_v32  ;;  %v14490_v24 = vld [vmem:[#allocation5 + $0x8ec] sm:$0xf]  ;;  %v14523_v32 = vld [vmem:[#allocation5 + $0x9ec] sm:$0xf0]  ;;  %v12663_v25 = vor.u32 %v14489_v54, %v12660_v10  ;;  %v12722_v10 = vld [vmem:[#allocation5 + $0x960] sm:$0xf] }
 0xa2d   :  { %v12671_v40 = vor.u32 %v14490_v24, %v12668_v62  ;;  %v14474_v54 = vld [vmem:[#allocation5 + $0x86c] sm:$0xf]  ;;  %v12475_v24 = vor.u32 %v14444_v50, %v12474_v6  ;;  %v12599_v62 = vor.u32 %v14473_v60, %v12596_v51  ;;  %v12796_v50 = vld [vmem:[#allocation5 + $0x9f8] sm:$0xf0]  ;;  %v12914_v51 = vld [vmem:[#allocation5 + $0xae0] sm:$0xf] }
 0xa2e   :  { %7195 = vmatpush.bf16.msrb.mxu1 %v12347_v39  ;;  %v14456_v39 = vld [vmem:[#allocation5 + $0x7d4] sm:$0xf0]  ;;  %v14522_v6 = vld [vmem:[#allocation5 + $0x9ec] sm:$0xf] }
 0xa2f   :  { %7436 = vmatpush.bf16.msra.mxu3 %v12471_v29  ;;  %v14485_v29 = vld [vmem:[#allocation5 + $0x8c4] sm:$0xf]  ;;  %v12523_v57 = vor.u32 %v14456_v39, %v12522_v19 }
 0xa30   :  { %7462 = vmatpush.bf16.msrb.mxu0 %v12479_v14  ;;  %7672 = vmatpush.bf16.msra.mxu2 %v12595_v28  ;;  %v12787_v14 = vor.u32 %v14523_v32, %v12786_v35  ;;  %v12770_v28 = vld [vmem:[#allocation5 + $0x9c0] sm:$0xf]  ;;  %v12647_v30 = vor.u32 %v14485_v29, %v12644_v49  ;;  %v14469_v35 = vld [vmem:[#allocation5 + $0x844] sm:$0xf] }
 0xa31   :  { %v12706_v29 = vld [vmem:[#allocation5 + $0x940] sm:$0xf] }
 0xa32   :  { %7196 = vmatpush.bf16.msrb.mxu1 %v12331_v61  ;;  %v12771_v61 = vor.u32 %v14519_v43, %v12770_v28 }
 0xa33   :  { %7437 = vmatpush.bf16.msra.mxu3 %v12455_v2  ;;  %v12628_v2 = vld [vmem:[#allocation5 + $0x8b0] sm:$0xf0] }
 0xa34   :  { %7463 = vmatpush.bf16.msrb.mxu0 %v12463_v21  ;;  %7673 = vmatpush.bf16.msra.mxu2 %v12579_v1  ;;  %v14482_v21 = vld [vmem:[#allocation5 + $0x8ac] sm:$0xf]  ;;  %v12631_v1 = vor.u32 %v14481_v26, %v12628_v2  ;;  %v12690_v2 = vld [vmem:[#allocation5 + $0x920] sm:$0xf] }
 0xa35   :  { %v12639_v63 = vor.u32 %v14482_v21, %v12636_v16  ;;  %v14466_v26 = vld [vmem:[#allocation5 + $0x82c] sm:$0xf]  ;;  %v14499_v21 = vld [vmem:[#allocation5 + $0x92c] sm:$0xf0]  ;;  %v7724_v16 = vld [vmem:[#allocation4 + $0x8] sm:$0x2] }
 0xa36   :  { %7197 = vmatpush.bf16.msrb.mxu1 %v12315_v52  ;;  %v14478_v52 = vld [vmem:[#allocation5 + $0x88c] sm:$0xf]  ;;  %v12691_v36 = vor.u32 %v14499_v21, %v12690_v2  ;;  %v12618_v21 = vld [vmem:[#allocation5 + $0x888] sm:$0xf] }
 0xa37   :  { %7438 = vmatpush.bf16.msra.mxu3 %v12439_v33  ;;  %v12738_v33 = vld [vmem:[#allocation5 + $0x980] sm:$0xf]  ;;  %v12623_v22 = vor.u32 %v14478_v52, %v12620_v47  ;;  %v14495_v52 = vld [vmem:[#allocation5 + $0x90c] sm:$0xf0]  ;;  %v7758_v47 = vunpack.c.l.b16 %v7724_v16  ;;  %v14509_v16 = vld [vmem:[#allocation5 + $0x984] sm:$0xf] }
 0xa38   :  { %7464 = vmatpush.bf16.msrb.mxu0 %v12447_v58  ;;  %7674 = vmatpush.bf16.msra.mxu2 %v12563_v3  ;;  %v14511_v58 = vld [vmem:[#allocation5 + $0x98c] sm:$0xf0] }
 0xa39   :  { %v12739_v7 = vor.u32 %v14511_v58, %v12738_v33  ;;  %v12666_v33 = vld [vmem:[#allocation5 + $0x8e8] sm:$0xf]  ;;  %v14492_v58 = vld [vmem:[#allocation5 + $0x8f4] sm:$0xf0] }
 0xa3a   :  { %7198 = vmatpush.bf16.msrb.mxu1 %v12299_v42  ;;  %v6189_v56 = vpop.f32.mrf.mxu1  ;;  %v12604_v42 = vld [vmem:[#allocation5 + $0x878] sm:$0xf0] }
 0xa3b   :  { %7439 = vmatpush.bf16.msra.mxu3 %v12423_v44  ;;  %v17973_v13 = vadd.f32 %v6189_v56, %v17955_v5  ;;  %v14507_v5 = vld [vmem:[#allocation5 + $0x96c] sm:$0xf0]  ;;  %v12607_v44 = vor.u32 %v14474_v54, %v12604_v42  ;;  %v12675_v42 = vor.u32 %v14495_v52, %v12674_v11 }
 0xa3c   :  { %7465 = vmatpush.bf16.msrb.mxu0 %v12431_v53  ;;  %7675 = vmatpush.bf16.msra.mxu2 %v12547_v41  ;;  %v6456_v46 = vpop.f32.mrf.mxu0  ;;  %v14440_v53 = vld [vmem:[#allocation5 + $0x754] sm:$0xf0]  ;;  %v12723_v32 = vor.u32 %v14507_v5, %v12722_v10  ;;  %v14555_v54 = vld [vmem:[#allocation5 + $0xaec] sm:$0xf0]  ;;  %v12667_v10 = vor.u32 %v14492_v58, %v12666_v33  ;;  %v7759_v5 = vpack.c.b16 %v7758_v47, %v7758_v47  ;;  %v14505_v58 = vld [vmem:[#allocation5 + $0x964] sm:$0xf] }
 0xa3d   :  { %7199 = vmatmul.bf16.vlgmr.msrb.gmra.mxu1 %v17931_v18  ;;  %v14448_v18 = vld [vmem:[#allocation5 + $0x794] sm:$0xf0]  ;;  %v17976_v3 = vadd.f32 %v6456_v46, %v17958_v27  ;;  %v12458_v27 = vld [vmem:[#allocation5 + $0x748] sm:$0xf]  ;;  %v14521_v46 = vld [vmem:[#allocation5 + $0x9e4] sm:$0xf] }
 0xa3e   :  { %7445 = vmatpush.bf16.msra.mxu1 %v12539_v55  ;;  %7440 = vmatmul.bf16.vlgmr.msra.gmra.mxu3 %v17948_v45  ;;  %v12491_v34 = vor.u32 %v14448_v18, %v12490_v48  ;;  %v12580_v55 = vld [vmem:[#allocation5 + $0x850] sm:$0xf0]  ;;  %v12459_v17 = vor.u32 %v14440_v53, %v12458_v27  ;;  %v14462_v18 = vld [vmem:[#allocation5 + $0x80c] sm:$0xf]  ;;  %v14488_v27 = vld [vmem:[#allocation5 + $0x8d4] sm:$0xf0] }
 0xa3f   :  { %7681 = vmatpush.bf16.msrb.mxu3 %v12663_v25  ;;  %7466 = vmatmul.bf16.vlgmr.msrb.gmra.mxu0 %v17948_v45  ;;  %v14470_v25 = vld [vmem:[#allocation5 + $0x84c] sm:$0xf]  ;;  %v12583_v43 = vor.u32 %v14469_v35, %v12580_v55  ;;  %v12548_v48 = vld [vmem:[#allocation5 + $0x810] sm:$0xf0]  ;;  %v14517_v53 = vld [vmem:[#allocation5 + $0x9c4] sm:$0xf]  ;;  %v12915_v35 = vor.u32 %v14555_v54, %v12914_v51 }
 0xa40   :  { %7707 = vmatpush.bf16.msra.mxu0 %v12671_v40  ;;  %7922 = vmatpush.bf16.msrb.mxu2 %v12787_v14  ;;  %v12588_v40 = vld [vmem:[#allocation5 + $0x858] sm:$0xf0]  ;;  %v14503_v14 = vld [vmem:[#allocation5 + $0x94c] sm:$0xf0]  ;;  %v14476_v33 = vld [vmem:[#allocation5 + $0x874] sm:$0xf0] }
 0xa41   :  { %7676 = vmatmul.bf16.vlgmr.msra.gmra.mxu2 %v17966_v8  ;;  %v6430_v41 = vpop.f32.mrf.mxu3  ;;  %v12780_v55 = vld [vmem:[#allocation5 + $0x9d8] sm:$0xf0]  ;;  %v14472_v51 = vld [vmem:[#allocation5 + $0x854] sm:$0xf0]  ;;  %v14501_v54 = vld [vmem:[#allocation5 + $0x944] sm:$0xf] }
 0xa42   :  { %7446 = vmatpush.bf16.msra.mxu1 %v12523_v57  ;;  %v17979_v19 = vadd.f32 %v6430_v41, %v17961_v0  ;;  %v6191_v49 = vpop.f32.mrf.mxu1  ;;  %v12591_v57 = vor.u32 %v14470_v25, %v12588_v40  ;;  %v12707_v0 = vor.u32 %v14503_v14, %v12706_v29  ;;  %v14518_v41 = vld [vmem:[#allocation5 + $0x9cc] sm:$0xf]  ;;  %v12898_v25 = vld [vmem:[#allocation5 + $0xac0] sm:$0xf]  ;;  %v14551_v40 = vld [vmem:[#allocation5 + $0xacc] sm:$0xf0] }
 0xa43   :  { %7682 = vmatpush.bf16.msrb.mxu3 %v12647_v30  ;;  %v12442_v30 = vld [vmem:[#allocation5 + $0x728] sm:$0xf]  ;;  %v12783_v49 = vor.u32 %v14518_v41, %v12780_v55 }
 0xa44   :  { %7708 = vmatpush.bf16.msra.mxu0 %v12655_v15  ;;  %7923 = vmatpush.bf16.msrb.mxu2 %v12771_v61  ;;  %v6666_v39 = vpop.f32.mrf.mxu2  ;;  %v6458_v28 = vpop.f32.mrf.mxu0  ;;  %v14436_v15 = vld [vmem:[#allocation5 + $0x734] sm:$0xf0]  ;;  %v12572_v61 = vld [vmem:[#allocation5 + $0x838] sm:$0xf0] }
 0xa45   :  { %v17982_v20 = vadd.f32 %v6666_v39, %v17964_v4  ;;  %v12443_v4 = vor.u32 %v14436_v15, %v12442_v30  ;;  %v17984_v39 = vrot.slane %v7759_v5, 1  ;;  %v14484_v28 = vld [vmem:[#allocation5 + $0x8b4] sm:$0xf0]  ;;  %v12756_v30 = vld [vmem:[#allocation5 + $0x9b0] sm:$0xf0] }
 0xa46   :  { %7447 = vmatpush.bf16.msra.mxu1 %v12507_v59  ;;  %v12567_v59 = vor.u32 %v14465_v38, %v12564_v12  ;;  %v14514_v15 = vld [vmem:[#allocation5 + $0x9ac] sm:$0xf]  ;;  %v12764_v38 = vld [vmem:[#allocation5 + $0x9b8] sm:$0xf0]  ;;  %v14547_v12 = vld [vmem:[#allocation5 + $0xaac] sm:$0xf0] }
 0xa47   :  { %7683 = vmatpush.bf16.msrb.mxu3 %v12631_v1  ;;  %v12575_v1 = vor.u32 %v14466_v26, %v12572_v61  ;;  %v12767_v2 = vor.u32 %v14514_v15, %v12764_v38  ;;  %v12708_v5 = vld [vmem:[#allocation5 + $0x950] sm:$0xf0]  ;;  %v14531_v15 = vld [vmem:[#allocation5 + $0xa2c] sm:$0xf0]  ;;  %v7978_v38 = vld [vmem:[#allocation4 + $0x8] sm:$0x4] }
 0xa48   :  { %7709 = vmatpush.bf16.msra.mxu0 %v12639_v63  ;;  %7924 = vmatpush.bf16.msrb.mxu2 %v12755_v23  ;;  %v14461_v63 = vld [vmem:[#allocation5 + $0x804] sm:$0xf]  ;;  %v12556_v23 = vld [vmem:[#allocation5 + $0x818] sm:$0xf0] }
 0xa49   :  { %v6432_v56 = vpop.f32.mrf.mxu3  ;;  %v12551_v60 = vor.u32 %v14461_v63, %v12548_v48  ;;  %v12866_v63 = vld [vmem:[#allocation5 + $0xa80] sm:$0xf]  ;;  %v14543_v48 = vld [vmem:[#allocation5 + $0xa8c] sm:$0xf0] }
 0xa4a   :  { %7448 = vmatpush.bf16.msra.mxu1 %v12491_v34  ;;  %v12602_v56 = vld [vmem:[#allocation5 + $0x868] sm:$0xf] }
 0xa4b   :  { %7684 = vmatpush.bf16.msrb.mxu3 %v12615_v31  ;;  %v12427_v31 = vor.u32 %v14432_v9, %v12426_v37  ;;  %v12740_v37 = vld [vmem:[#allocation5 + $0x990] sm:$0xf0]  ;;  %v14510_v9 = vld [vmem:[#allocation5 + $0x98c] sm:$0xf] }
 0xa4c   :  { %7710 = vmatpush.bf16.msra.mxu0 %v12623_v22  ;;  %7925 = vmatpush.bf16.msrb.mxu2 %v12739_v7  ;;  %v6668_v34 = vpop.f32.mrf.mxu2  ;;  %v12788_v22 = vld [vmem:[#allocation5 + $0x9f0] sm:$0xf0]  ;;  %v12559_v7 = vor.u32 %v14462_v18, %v12556_v23  ;;  %v12743_v52 = vor.u32 %v14509_v16, %v12740_v37  ;;  %v12802_v37 = vld [vmem:[#allocation5 + $0xa00] sm:$0xf] }
 0xa4d   :  { %v12724_v34 = vld [vmem:[#allocation5 + $0x970] sm:$0xf0] }
 0xa4e   :  { %7449 = vmatpush.bf16.msra.mxu1 %v12475_v24  ;;  %v12791_v24 = vor.u32 %v14521_v46, %v12788_v22  ;;  %v12867_v46 = vor.u32 %v14543_v48, %v12866_v63  ;;  %v12732_v22 = vld [vmem:[#allocation5 + $0x978] sm:$0xf0]  ;;  %v12794_v63 = vld [vmem:[#allocation5 + $0x9e8] sm:$0xf]  ;;  %v14524_v48 = vld [vmem:[#allocation5 + $0x9f4] sm:$0xf0] }
 0xa4f   :  { %7685 = vmatpush.bf16.msrb.mxu3 %v12599_v62  ;;  %v12799_v62 = vor.u32 %v14522_v6, %v12796_v50  ;;  %v12850_v6 = vld [vmem:[#allocation5 + $0xa60] sm:$0xf]  ;;  %v12603_v50 = vor.u32 %v14476_v33, %v12602_v56  ;;  %v14554_v56 = vld [vmem:[#allocation5 + $0xaec] sm:$0xf]  ;;  %v12924_v33 = vld [vmem:[#allocation5 + $0xaf8] sm:$0xf0] }
 0xa50   :  { %7711 = vmatpush.bf16.msra.mxu0 %v12607_v44  ;;  %7926 = vmatpush.bf16.msrb.mxu2 %v12723_v32  ;;  %v12650_v44 = vld [vmem:[#allocation5 + $0x8c8] sm:$0xf]  ;;  %v12772_v32 = vld [vmem:[#allocation5 + $0x9d0] sm:$0xf0] }
 0xa51   :  { %v12651_v29 = vor.u32 %v14488_v27, %v12650_v44  ;;  %v12775_v14 = vor.u32 %v14517_v53, %v12772_v32  ;;  %v12834_v53 = vld [vmem:[#allocation5 + $0xa40] sm:$0xf] }
 0xa52   :  { %7450 = vmatpush.bf16.msra.mxu1 %v12459_v17  ;;  %v12634_v17 = vld [vmem:[#allocation5 + $0x8a8] sm:$0xf] }
 0xa53   :  { %7686 = vmatpush.bf16.msrb.mxu3 %v12583_v43  ;;  %v14513_v43 = vld [vmem:[#allocation5 + $0x9a4] sm:$0xf]  ;;  %v12635_v26 = vor.u32 %v14484_v28, %v12634_v17  ;;  %v12692_v28 = vld [vmem:[#allocation5 + $0x930] sm:$0xf0] }
 0xa54   :  { %7712 = vmatpush.bf16.msra.mxu0 %v12591_v57  ;;  %7927 = vmatpush.bf16.msrb.mxu2 %v12707_v0  ;;  %v12899_v57 = vor.u32 %v14551_v40, %v12898_v25  ;;  %v12882_v0 = vld [vmem:[#allocation5 + $0xaa0] sm:$0xf]  ;;  %v12759_v61 = vor.u32 %v14513_v43, %v12756_v30  ;;  %v12711_v40 = vor.u32 %v14501_v54, %v12708_v5  ;;  %v14497_v17 = vld [vmem:[#allocation5 + $0x924] sm:$0xf]  ;;  %v14498_v43 = vld [vmem:[#allocation5 + $0x92c] sm:$0xf] }
 0xa55   :  { %v12818_v30 = vld [vmem:[#allocation5 + $0xa20] sm:$0xf]  ;;  %v12908_v5 = vld [vmem:[#allocation5 + $0xad8] sm:$0xf0] }
 0xa56   :  { %7451 = vmatpush.bf16.msra.mxu1 %v12443_v4  ;;  %v12883_v4 = vor.u32 %v14547_v12, %v12882_v0  ;;  %v12554_v0 = vld [vmem:[#allocation5 + $0x808] sm:$0xf]  ;;  %v14464_v12 = vld [vmem:[#allocation5 + $0x814] sm:$0xf0]  ;;  %v12819_v16 = vor.u32 %v14531_v15, %v12818_v30 }
 0xa57   :  { %7687 = vmatpush.bf16.msrb.mxu3 %v12567_v59  ;;  %v12748_v59 = vld [vmem:[#allocation5 + $0x998] sm:$0xf0]  ;;  %v12746_v15 = vld [vmem:[#allocation5 + $0x988] sm:$0xf] }
 0xa58   :  { %7713 = vmatpush.bf16.msra.mxu0 %v12575_v1  ;;  %7928 = vmatpush.bf16.msrb.mxu2 %v12691_v36  ;;  %v12751_v47 = vor.u32 %v14510_v9, %v12748_v59  ;;  %v14527_v9 = vld [vmem:[#allocation5 + $0xa0c] sm:$0xf0]  ;;  %v8012_v59 = vunpack.c.l.b16 %v7978_v38  ;;  %v14541_v38 = vld [vmem:[#allocation5 + $0xa84] sm:$0xf] }
 0xa5a   :  { %7452 = vmatpush.bf16.msra.mxu1 %v12427_v31  ;;  %v6443_v1 = vpop.f32.mrf.mxu1  ;;  %v14506_v31 = vld [vmem:[#allocation5 + $0x96c] sm:$0xf] }
 0xa5b   :  { %7688 = vmatpush.bf16.msrb.mxu3 %v12551_v60  ;;  %v17991_v18 = vadd.f32 %v6443_v1, %v17973_v13  ;;  %v14539_v13 = vld [vmem:[#allocation5 + $0xa6c] sm:$0xf0]  ;;  %v12727_v60 = vor.u32 %v14505_v58, %v12724_v34  ;;  %v13042_v34 = vld [vmem:[#allocation5 + $0xbe0] sm:$0xf] }
 0xa5c   :  { %7714 = vmatpush.bf16.msra.mxu0 %v12559_v7  ;;  %7929 = vmatpush.bf16.msrb.mxu2 %v12675_v42  ;;  %v6705_v36 = vpop.f32.mrf.mxu0  ;;  %v12735_v7 = vor.u32 %v14506_v31, %v12732_v22  ;;  %v12851_v42 = vor.u32 %v14539_v13, %v12850_v6  ;;  %v14587_v31 = vld [vmem:[#allocation5 + $0xbec] sm:$0xf0]  ;;  %v12803_v22 = vor.u32 %v14527_v9, %v12802_v37 }
 0xa5d   :  { %7453 = vmatmul.bf16.vlgmr.msra.gmra.mxu1 %v17948_v45  ;;  %v14480_v45 = vld [vmem:[#allocation5 + $0x894] sm:$0xf0]  ;;  %v17994_v11 = vadd.f32 %v6705_v36, %v17976_v3  ;;  %v12586_v3 = vld [vmem:[#allocation5 + $0x848] sm:$0xf]  ;;  %v14553_v36 = vld [vmem:[#allocation5 + $0xae4] sm:$0xf]  ;;  %v12795_v6 = vor.u32 %v14524_v48, %v12794_v63  ;;  %v8013_v13 = vpack.c.b16 %v8012_v59, %v8012_v59  ;;  %v13043_v54 = vor.u32 %v14587_v31, %v13042_v34 }
 0xa5e   :  { %7694 = vmatpush.bf16.msrb.mxu1 %v12667_v10  ;;  %7689 = vmatmul.bf16.vlgmr.msrb.gmra.mxu3 %v17966_v8  ;;  %v12619_v23 = vor.u32 %v14480_v45, %v12618_v21  ;;  %v12587_v55 = vor.u32 %v14472_v51, %v12586_v3  ;;  %v12676_v21 = vld [vmem:[#allocation5 + $0x910] sm:$0xf0]  ;;  %v14494_v45 = vld [vmem:[#allocation5 + $0x90c] sm:$0xf]  ;;  %v14520_v3 = vld [vmem:[#allocation5 + $0x9d4] sm:$0xf0] }
 0xa5f   :  { %7935 = vmatpush.bf16.msra.mxu3 %v12791_v24  ;;  %7715 = vmatmul.bf16.vlgmr.msra.gmra.mxu0 %v17966_v8  ;;  %v14502_v24 = vld [vmem:[#allocation5 + $0x94c] sm:$0xf]  ;;  %v14549_v51 = vld [vmem:[#allocation5 + $0xac4] sm:$0xf]  ;;  %v14508_v63 = vld [vmem:[#allocation5 + $0x974] sm:$0xf0] }
 0xa60   :  { %7961 = vmatpush.bf16.msrb.mxu0 %v12799_v62  ;;  %8176 = vmatpush.bf16.msra.mxu2 %v12915_v35  ;;  %v12716_v62 = vld [vmem:[#allocation5 + $0x958] sm:$0xf0]  ;;  %v14535_v35 = vld [vmem:[#allocation5 + $0xa4c] sm:$0xf0]  ;;  %v14537_v48 = vld [vmem:[#allocation5 + $0xa64] sm:$0xf] }
 0xa61   :  { %7930 = vmatmul.bf16.vlgmr.msrb.gmra.mxu2 %v17984_v39  ;;  %v6679_v10 = vpop.f32.mrf.mxu3  ;;  %v14504_v34 = vld [vmem:[#allocation5 + $0x954] sm:$0xf0]  ;;  %v14533_v31 = vld [vmem:[#allocation5 + $0xa44] sm:$0xf] }
 0xa62   :  { %7695 = vmatpush.bf16.msrb.mxu1 %v12651_v29  ;;  %v17997_v44 = vadd.f32 %v6679_v10, %v17979_v19  ;;  %v6445_v32 = vpop.f32.mrf.mxu1  ;;  %v12719_v29 = vor.u32 %v14502_v24, %v12716_v62  ;;  %v12835_v19 = vor.u32 %v14535_v35, %v12834_v53  ;;  %v14550_v10 = vld [vmem:[#allocation5 + $0xacc] sm:$0xf]  ;;  %v13026_v24 = vld [vmem:[#allocation5 + $0xbc0] sm:$0xf]  ;;  %v14583_v62 = vld [vmem:[#allocation5 + $0xbcc] sm:$0xf0] }
 0xa63   :  { %7936 = vmatpush.bf16.msra.mxu3 %v12775_v14  ;;  %v12570_v14 = vld [vmem:[#allocation5 + $0x828] sm:$0xf]  ;;  %v12911_v32 = vor.u32 %v14550_v10, %v12908_v5 }
 0xa64   :  { %7962 = vmatpush.bf16.msrb.mxu0 %v12783_v49  ;;  %8177 = vmatpush.bf16.msra.mxu2 %v12899_v57  ;;  %v6920_v27 = vpop.f32.mrf.mxu2  ;;  %v6707_v25 = vpop.f32.mrf.mxu0  ;;  %v14468_v49 = vld [vmem:[#allocation5 + $0x834] sm:$0xf0]  ;;  %v12700_v57 = vld [vmem:[#allocation5 + $0x938] sm:$0xf0] }
 0xa65   :  { %v18000_v41 = vadd.f32 %v6920_v27, %v17982_v20  ;;  %v12571_v20 = vor.u32 %v14468_v49, %v12570_v14  ;;  %v18002_v27 = vrot.slane %v8013_v13, 2  ;;  %v14516_v25 = vld [vmem:[#allocation5 + $0x9b4] sm:$0xf0]  ;;  %v12884_v14 = vld [vmem:[#allocation5 + $0xab0] sm:$0xf0] }
 0xa66   :  { %7696 = vmatpush.bf16.msrb.mxu1 %v12635_v26  ;;  %v12695_v26 = vor.u32 %v14497_v17, %v12692_v28  ;;  %v14546_v49 = vld [vmem:[#allocation5 + $0xaac] sm:$0xf]  ;;  %v12892_v17 = vld [vmem:[#allocation5 + $0xab8] sm:$0xf0]  ;;  %v14579_v28 = vld [vmem:[#allocation5 + $0xbac] sm:$0xf0] }
 0xa67   :  { %7937 = vmatpush.bf16.msra.mxu3 %v12759_v61  ;;  %v12703_v61 = vor.u32 %v14498_v43, %v12700_v57  ;;  %v12895_v30 = vor.u32 %v14546_v49, %v12892_v17  ;;  %v12836_v13 = vld [vmem:[#allocation5 + $0xa50] sm:$0xf0]  ;;  %v14563_v49 = vld [vmem:[#allocation5 + $0xb2c] sm:$0xf0]  ;;  %v8232_v17 = vld [vmem:[#allocation4 + $0x8] sm:$0x8] }
 0xa68   :  { %7963 = vmatpush.bf16.msrb.mxu0 %v12767_v2  ;;  %8178 = vmatpush.bf16.msra.mxu2 %v12883_v4  ;;  %v14493_v2 = vld [vmem:[#allocation5 + $0x904] sm:$0xf]  ;;  %v12684_v4 = vld [vmem:[#allocation5 + $0x918] sm:$0xf0] }
 0xa69   :  { %v6681_v1 = vpop.f32.mrf.mxu3  ;;  %v12679_v58 = vor.u32 %v14493_v2, %v12676_v21  ;;  %v12994_v2 = vld [vmem:[#allocation5 + $0xb80] sm:$0xf]  ;;  %v14575_v21 = vld [vmem:[#allocation5 + $0xb8c] sm:$0xf0] }
 0xa6a   :  { %7697 = vmatpush.bf16.msrb.mxu1 %v12619_v23  ;;  %v12730_v1 = vld [vmem:[#allocation5 + $0x968] sm:$0xf] }
 0xa6b   :  { %7938 = vmatpush.bf16.msra.mxu3 %v12743_v52  ;;  %v12555_v52 = vor.u32 %v14464_v12, %v12554_v0  ;;  %v12868_v0 = vld [vmem:[#allocation5 + $0xa90] sm:$0xf0]  ;;  %v14542_v12 = vld [vmem:[#allocation5 + $0xa8c] sm:$0xf] }
 0xa6c   :  { %7964 = vmatpush.bf16.msrb.mxu0 %v12751_v47  ;;  %8179 = vmatpush.bf16.msra.mxu2 %v12867_v46  ;;  %v6922_v23 = vpop.f32.mrf.mxu2  ;;  %v12916_v47 = vld [vmem:[#allocation5 + $0xaf0] sm:$0xf0]  ;;  %v12687_v46 = vor.u32 %v14494_v45, %v12684_v4  ;;  %v12871_v9 = vor.u32 %v14541_v38, %v12868_v0  ;;  %v12930_v0 = vld [vmem:[#allocation5 + $0xb00] sm:$0xf] }
 0xa6d   :  { %v12852_v23 = vld [vmem:[#allocation5 + $0xa70] sm:$0xf0] }
 0xa6e   :  { %7698 = vmatpush.bf16.msrb.mxu1 %v12603_v50  ;;  %v12919_v50 = vor.u32 %v14553_v36, %v12916_v47  ;;  %v12995_v36 = vor.u32 %v14575_v21, %v12994_v2  ;;  %v12860_v47 = vld [vmem:[#allocation5 + $0xa78] sm:$0xf0]  ;;  %v12922_v2 = vld [vmem:[#allocation5 + $0xae8] sm:$0xf]  ;;  %v14556_v21 = vld [vmem:[#allocation5 + $0xaf4] sm:$0xf0] }
 0xa6f   :  { %7939 = vmatpush.bf16.msra.mxu3 %v12727_v60  ;;  %v12927_v60 = vor.u32 %v14554_v56, %v12924_v33  ;;  %v12978_v56 = vld [vmem:[#allocation5 + $0xb60] sm:$0xf]  ;;  %v12731_v33 = vor.u32 %v14508_v63, %v12730_v1  ;;  %v14586_v1 = vld [vmem:[#allocation5 + $0xbec] sm:$0xf]  ;;  %v13052_v63 = vld [vmem:[#allocation5 + $0xbf8] sm:$0xf0] }
 0xa70   :  { %7965 = vmatpush.bf16.msrb.mxu0 %v12735_v7  ;;  %8180 = vmatpush.bf16.msra.mxu2 %v12851_v42  ;;  %v12778_v7 = vld [vmem:[#allocation5 + $0x9c8] sm:$0xf]  ;;  %v12900_v42 = vld [vmem:[#allocation5 + $0xad0] sm:$0xf0] }
 0xa71   :  { %v12779_v53 = vor.u32 %v14520_v3, %v12778_v7  ;;  %v12903_v35 = vor.u32 %v14549_v51, %v12900_v42  ;;  %v12962_v51 = vld [vmem:[#allocation5 + $0xb40] sm:$0xf] }
 0xa72   :  { %7699 = vmatpush.bf16.msrb.mxu1 %v12587_v55  ;;  %v12762_v55 = vld [vmem:[#allocation5 + $0x9a8] sm:$0xf] }
 0xa73   :  { %7940 = vmatpush.bf16.msra.mxu3 %v12711_v40  ;;  %v14545_v40 = vld [vmem:[#allocation5 + $0xaa4] sm:$0xf]  ;;  %v12763_v43 = vor.u32 %v14516_v25, %v12762_v55  ;;  %v12820_v25 = vld [vmem:[#allocation5 + $0xa30] sm:$0xf0] }
 0xa74   :  { %7966 = vmatpush.bf16.msrb.mxu0 %v12719_v29  ;;  %8181 = vmatpush.bf16.msra.mxu2 %v12835_v19  ;;  %v13027_v29 = vor.u32 %v14583_v62, %v13026_v24  ;;  %v13010_v19 = vld [vmem:[#allocation5 + $0xba0] sm:$0xf]  ;;  %v12887_v57 = vor.u32 %v14545_v40, %v12884_v14  ;;  %v12839_v62 = vor.u32 %v14533_v31, %v12836_v13  ;;  %v14529_v55 = vld [vmem:[#allocation5 + $0xa24] sm:$0xf]  ;;  %v14530_v40 = vld [vmem:[#allocation5 + $0xa2c] sm:$0xf] }
 0xa75   :  { %v12946_v14 = vld [vmem:[#allocation5 + $0xb20] sm:$0xf]  ;;  %v13036_v13 = vld [vmem:[#allocation5 + $0xbd8] sm:$0xf0] }
 0xa76   :  { %7700 = vmatpush.bf16.msrb.mxu1 %v12571_v20  ;;  %v13011_v20 = vor.u32 %v14579_v28, %v13010_v19  ;;  %v12682_v19 = vld [vmem:[#allocation5 + $0x908] sm:$0xf]  ;;  %v14496_v28 = vld [vmem:[#allocation5 + $0x914] sm:$0xf0]  ;;  %v12947_v38 = vor.u32 %v14563_v49, %v12946_v14 }
 0xa77   :  { %7941 = vmatpush.bf16.msra.mxu3 %v12695_v26  ;;  %v12876_v26 = vld [vmem:[#allocation5 + $0xa98] sm:$0xf0]  ;;  %v12874_v49 = vld [vmem:[#allocation5 + $0xa88] sm:$0xf] }
 0xa78   :  { %7967 = vmatpush.bf16.msrb.mxu0 %v12703_v61  ;;  %8182 = vmatpush.bf16.msra.mxu2 %v12819_v16  ;;  %v12879_v59 = vor.u32 %v14542_v12, %v12876_v26  ;;  %v14559_v12 = vld [vmem:[#allocation5 + $0xb0c] sm:$0xf0]  ;;  %v8266_v26 = vunpack.c.l.b16 %v8232_v17  ;;  %v14573_v17 = vld [vmem:[#allocation5 + $0xb84] sm:$0xf] }
 0xa7a   :  { %7701 = vmatpush.bf16.msrb.mxu1 %v12555_v52  ;;  %v6692_v61 = vpop.f32.mrf.mxu1  ;;  %v14538_v52 = vld [vmem:[#allocation5 + $0xa6c] sm:$0xf] }
 0xa7b   :  { %7942 = vmatpush.bf16.msra.mxu3 %v12679_v58  ;;  %v18009_v45 = vadd.f32 %v6692_v61, %v17991_v18  ;;  %v14571_v18 = vld [vmem:[#allocation5 + $0xb6c] sm:$0xf0]  ;;  %v12855_v58 = vor.u32 %v14537_v48, %v12852_v23  ;;  %v13170_v23 = vld [vmem:[#allocation5 + $0xce0] sm:$0xf] }
 0xa7c   :  { %7968 = vmatpush.bf16.msrb.mxu0 %v12687_v46  ;;  %8183 = vmatpush.bf16.msra.mxu2 %v12803_v22  ;;  %v6959_v16 = vpop.f32.mrf.mxu0  ;;  %v12863_v46 = vor.u32 %v14538_v52, %v12860_v47  ;;  %v12979_v22 = vor.u32 %v14571_v18, %v12978_v56  ;;  %v14619_v52 = vld [vmem:[#allocation5 + $0xcec] sm:$0xf0]  ;;  %v12931_v47 = vor.u32 %v14559_v12, %v12930_v0 }
 0xa7d   :  { %7702 = vmatmul.bf16.vlgmr.msrb.gmra.mxu1 %v17966_v8  ;;  %v14512_v8 = vld [vmem:[#allocation5 + $0x994] sm:$0xf0]  ;;  %v18012_v37 = vadd.f32 %v6959_v16, %v17994_v11  ;;  %v12714_v11 = vld [vmem:[#allocation5 + $0x948] sm:$0xf]  ;;  %v14585_v16 = vld [vmem:[#allocation5 + $0xbe4] sm:$0xf]  ;;  %v12923_v56 = vor.u32 %v14556_v21, %v12922_v2  ;;  %v8267_v18 = vpack.c.b16 %v8266_v26, %v8266_v26  ;;  %v13171_v31 = vor.u32 %v14619_v52, %v13170_v23 }
 0xa7e   :  { %7948 = vmatpush.bf16.msra.mxu1 %v12795_v6  ;;  %7943 = vmatmul.bf16.vlgmr.msra.gmra.mxu3 %v17984_v39  ;;  %v12747_v4 = vor.u32 %v14512_v8, %v12746_v15  ;;  %v12715_v5 = vor.u32 %v14504_v34, %v12714_v11  ;;  %v12804_v15 = vld [vmem:[#allocation5 + $0xa10] sm:$0xf0]  ;;  %v14526_v8 = vld [vmem:[#allocation5 + $0xa0c] sm:$0xf]  ;;  %v14552_v11 = vld [vmem:[#allocation5 + $0xad4] sm:$0xf0] }
 0xa7f   :  { %8189 = vmatpush.bf16.msrb.mxu3 %v12919_v50  ;;  %7969 = vmatmul.bf16.vlgmr.msrb.gmra.mxu0 %v17984_v39  ;;  %v14534_v50 = vld [vmem:[#allocation5 + $0xa4c] sm:$0xf]  ;;  %v14581_v34 = vld [vmem:[#allocation5 + $0xbc4] sm:$0xf]  ;;  %v14540_v2 = vld [vmem:[#allocation5 + $0xa74] sm:$0xf0] }
 0xa80   :  { %8215 = vmatpush.bf16.msra.mxu0 %v12927_v60  ;;  %8430 = vmatpush.bf16.msrb.mxu2 %v13043_v54  ;;  %v12844_v60 = vld [vmem:[#allocation5 + $0xa58] sm:$0xf0]  ;;  %v14567_v54 = vld [vmem:[#allocation5 + $0xb4c] sm:$0xf0]  ;;  %v14569_v21 = vld [vmem:[#allocation5 + $0xb64] sm:$0xf] }
 0xa81   :  { %8184 = vmatmul.bf16.vlgmr.msra.gmra.mxu2 %v18002_v27  ;;  %v6933_v6 = vpop.f32.mrf.mxu3  ;;  %v14536_v23 = vld [vmem:[#allocation5 + $0xa54] sm:$0xf0]  ;;  %v14565_v52 = vld [vmem:[#allocation5 + $0xb44] sm:$0xf] }
 0xa82   :  { %7949 = vmatpush.bf16.msra.mxu1 %v12779_v53  ;;  %v18015_v7 = vadd.f32 %v6933_v6, %v17997_v44  ;;  %v6694_v42 = vpop.f32.mrf.mxu1  ;;  %v12847_v53 = vor.u32 %v14534_v50, %v12844_v60  ;;  %v12963_v44 = vor.u32 %v14567_v54, %v12962_v51  ;;  %v14582_v6 = vld [vmem:[#allocation5 + $0xbcc] sm:$0xf]  ;;  %v13154_v50 = vld [vmem:[#allocation5 + $0xcc0] sm:$0xf]  ;;  %v14615_v60 = vld [vmem:[#allocation5 + $0xccc] sm:$0xf0] }
 0xa83   :  { %8190 = vmatpush.bf16.msrb.mxu3 %v12903_v35  ;;  %v12698_v35 = vld [vmem:[#allocation5 + $0x928] sm:$0xf]  ;;  %v13039_v42 = vor.u32 %v14582_v6, %v13036_v13 }
 0xa84   :  { %8216 = vmatpush.bf16.msra.mxu0 %v12911_v32  ;;  %8431 = vmatpush.bf16.msrb.mxu2 %v13027_v29  ;;  %v7174_v3 = vpop.f32.mrf.mxu2  ;;  %v6961_v24 = vpop.f32.mrf.mxu0  ;;  %v14500_v32 = vld [vmem:[#allocation5 + $0x934] sm:$0xf0]  ;;  %v12828_v29 = vld [vmem:[#allocation5 + $0xa38] sm:$0xf0] }
 0xa85   :  { %v18018_v10 = vadd.f32 %v7174_v3, %v18000_v41  ;;  %v12699_v41 = vor.u32 %v14500_v32, %v12698_v35  ;;  %v18020_v3 = vrot.slane %v8267_v18, 3  ;;  %v14548_v24 = vld [vmem:[#allocation5 + $0xab4] sm:$0xf0]  ;;  %v13012_v35 = vld [vmem:[#allocation5 + $0xbb0] sm:$0xf0] }
 0xa86   :  { %7950 = vmatpush.bf16.msra.mxu1 %v12763_v43  ;;  %v12823_v43 = vor.u32 %v14529_v55, %v12820_v25  ;;  %v14578_v32 = vld [vmem:[#allocation5 + $0xbac] sm:$0xf]  ;;  %v13020_v55 = vld [vmem:[#allocation5 + $0xbb8] sm:$0xf0]  ;;  %v14611_v25 = vld [vmem:[#allocation5 + $0xcac] sm:$0xf0] }
 0xa87   :  { %8191 = vmatpush.bf16.msrb.mxu3 %v12887_v57  ;;  %v12831_v57 = vor.u32 %v14530_v40, %v12828_v29  ;;  %v13023_v14 = vor.u32 %v14578_v32, %v13020_v55  ;;  %v12964_v18 = vld [vmem:[#allocation5 + $0xb50] sm:$0xf0]  ;;  %v14595_v32 = vld [vmem:[#allocation5 + $0xc2c] sm:$0xf0] }
 0xa88   :  { %8217 = vmatpush.bf16.msra.mxu0 %v12895_v30  ;;  %8432 = vmatpush.bf16.msrb.mxu2 %v13011_v20  ;;  %v14525_v30 = vld [vmem:[#allocation5 + $0xa04] sm:$0xf]  ;;  %v12812_v20 = vld [vmem:[#allocation5 + $0xa18] sm:$0xf0] }
 0xa89   :  { %v6935_v61 = vpop.f32.mrf.mxu3  ;;  %v12807_v48 = vor.u32 %v14525_v30, %v12804_v15  ;;  %v13122_v30 = vld [vmem:[#allocation5 + $0xc80] sm:$0xf]  ;;  %v14607_v15 = vld [vmem:[#allocation5 + $0xc8c] sm:$0xf0] }
 0xa8a   :  { %7951 = vmatpush.bf16.msra.mxu1 %v12747_v4  ;;  %v12858_v61 = vld [vmem:[#allocation5 + $0xa68] sm:$0xf] }
 0xa8b   :  { %8192 = vmatpush.bf16.msrb.mxu3 %v12871_v9  ;;  %v12683_v9 = vor.u32 %v14496_v28, %v12682_v19  ;;  %v12996_v19 = vld [vmem:[#allocation5 + $0xb90] sm:$0xf0]  ;;  %v14574_v28 = vld [vmem:[#allocation5 + $0xb8c] sm:$0xf] }
 0xa8c   :  { %8218 = vmatpush.bf16.msra.mxu0 %v12879_v59  ;;  %8433 = vmatpush.bf16.msrb.mxu2 %v12995_v36  ;;  %v7176_v4 = vpop.f32.mrf.mxu2  ;;  %v13044_v59 = vld [vmem:[#allocation5 + $0xbf0] sm:$0xf0]  ;;  %v12815_v36 = vor.u32 %v14526_v8, %v12812_v20  ;;  %v12999_v12 = vor.u32 %v14573_v17, %v12996_v19  ;;  %v12940_v17 = vld [vmem:[#allocation5 + $0xb18] sm:$0xf0]  ;;  %v14591_v19 = vld [vmem:[#allocation5 + $0xc0c] sm:$0xf0] }
 0xa8d   :  { %v12980_v4 = vld [vmem:[#allocation5 + $0xb70] sm:$0xf0] }
 0xa8e   :  { %7952 = vmatpush.bf16.msra.mxu1 %v12731_v33  ;;  %v13047_v33 = vor.u32 %v14585_v16, %v13044_v59  ;;  %v13123_v16 = vor.u32 %v14607_v15, %v13122_v30  ;;  %v12988_v59 = vld [vmem:[#allocation5 + $0xb78] sm:$0xf0]  ;;  %v14617_v30 = vld [vmem:[#allocation5 + $0xce4] sm:$0xf] }
 0xa8f   :  { %8193 = vmatpush.bf16.msrb.mxu3 %v12855_v58  ;;  %v13055_v58 = vor.u32 %v14586_v1, %v13052_v63  ;;  %v13106_v1 = vld [vmem:[#allocation5 + $0xc60] sm:$0xf]  ;;  %v12859_v63 = vor.u32 %v14540_v2, %v12858_v61 }
 0xa90   :  { %8219 = vmatpush.bf16.msra.mxu0 %v12863_v46  ;;  %8434 = vmatpush.bf16.msrb.mxu2 %v12979_v22  ;;  %v12906_v46 = vld [vmem:[#allocation5 + $0xac8] sm:$0xf]  ;;  %v13028_v22 = vld [vmem:[#allocation5 + $0xbd0] sm:$0xf0] }
 0xa91   :  { %v12907_v51 = vor.u32 %v14552_v11, %v12906_v46  ;;  %v13031_v54 = vor.u32 %v14581_v34, %v13028_v22  ;;  %v13090_v34 = vld [vmem:[#allocation5 + $0xc40] sm:$0xf] }
 0xa92   :  { %7953 = vmatpush.bf16.msra.mxu1 %v12715_v5  ;;  %v12890_v5 = vld [vmem:[#allocation5 + $0xaa8] sm:$0xf] }
 0xa93   :  { %8194 = vmatpush.bf16.msrb.mxu3 %v12839_v62  ;;  %v14577_v62 = vld [vmem:[#allocation5 + $0xba4] sm:$0xf]  ;;  %v12891_v40 = vor.u32 %v14548_v24, %v12890_v5  ;;  %v12948_v24 = vld [vmem:[#allocation5 + $0xb30] sm:$0xf0] }
 0xa94   :  { %8220 = vmatpush.bf16.msra.mxu0 %v12847_v53  ;;  %8435 = vmatpush.bf16.msrb.mxu2 %v12963_v44  ;;  %v13155_v53 = vor.u32 %v14615_v60, %v13154_v50  ;;  %v13138_v44 = vld [vmem:[#allocation5 + $0xca0] sm:$0xf]  ;;  %v13015_v29 = vor.u32 %v14577_v62, %v13012_v35  ;;  %v12967_v60 = vor.u32 %v14565_v52, %v12964_v18  ;;  %v14561_v5 = vld [vmem:[#allocation5 + $0xb24] sm:$0xf]  ;;  %v14562_v62 = vld [vmem:[#allocation5 + $0xb2c] sm:$0xf] }
 0xa95   :  { %v13074_v35 = vld [vmem:[#allocation5 + $0xc20] sm:$0xf]  ;;  %v13164_v52 = vld [vmem:[#allocation5 + $0xcd8] sm:$0xf0] }
 0xa96   :  { %7954 = vmatpush.bf16.msra.mxu1 %v12699_v41  ;;  %v13139_v41 = vor.u32 %v14611_v25, %v13138_v44  ;;  %v14528_v44 = vld [vmem:[#allocation5 + $0xa14] sm:$0xf0]  ;;  %v12951_v25 = vor.u32 %v14561_v5, %v12948_v24  ;;  %v18038_v18 = vld [vmem:[#allocation4 + $0xc] sm:$0x1] }
 0xa97   :  { %8195 = vmatpush.bf16.msrb.mxu3 %v12823_v43  ;;  %v13004_v43 = vld [vmem:[#allocation5 + $0xb98] sm:$0xf0] }
 0xa98   :  { %8221 = vmatpush.bf16.msra.mxu0 %v12831_v57  ;;  %8436 = vmatpush.bf16.msrb.mxu2 %v12947_v38  ;;  %v13007_v26 = vor.u32 %v14574_v28, %v13004_v43  ;;  %v13050_v43 = vld [vmem:[#allocation5 + $0xbe8] sm:$0xf] }
 0xa9a   :  { %7955 = vmatpush.bf16.msra.mxu1 %v12683_v9  ;;  %v6946_v57 = vpop.f32.mrf.mxu1  ;;  %v14570_v9 = vld [vmem:[#allocation5 + $0xb6c] sm:$0xf] }
 0xa9b   :  { %8196 = vmatpush.bf16.msrb.mxu3 %v12807_v48  ;;  %v18027_v8 = vadd.f32 %v6946_v57, %v18009_v45  ;;  %v14603_v45 = vld [vmem:[#allocation5 + $0xc6c] sm:$0xf0]  ;;  %v12983_v48 = vor.u32 %v14569_v21, %v12980_v4  ;;  %v14588_v57 = vld [vmem:[#allocation5 + $0xbf4] sm:$0xf0]  ;;  %v13298_v21 = vld [vmem:[#allocation5 + $0xde0] sm:$0xf] }
 0xa9c   :  { %8222 = vmatpush.bf16.msra.mxu0 %v12815_v36  ;;  %8437 = vmatpush.bf16.msrb.mxu2 %v12931_v47  ;;  %v7213_v38 = vpop.f32.mrf.mxu0  ;;  %v12991_v36 = vor.u32 %v14570_v9, %v12988_v59  ;;  %v13107_v47 = vor.u32 %v14603_v45, %v13106_v1  ;;  %v13051_v9 = vor.u32 %v14588_v57, %v13050_v43  ;;  %v13034_v45 = vld [vmem:[#allocation5 + $0xbc8] sm:$0xf]  ;;  %v14601_v43 = vld [vmem:[#allocation5 + $0xc64] sm:$0xf] }
 0xa9d   :  { %7956 = vmatmul.bf16.vlgmr.msra.gmra.mxu1 %v17984_v39  ;;  %v14544_v39 = vld [vmem:[#allocation5 + $0xa94] sm:$0xf0]  ;;  %v18030_v0 = vadd.f32 %v7213_v38, %v18012_v37  ;;  %v12842_v37 = vld [vmem:[#allocation5 + $0xa48] sm:$0xf] }
 0xa9e   :  { %8202 = vmatpush.bf16.msrb.mxu1 %v12923_v56  ;;  %8197 = vmatmul.bf16.vlgmr.msrb.gmra.mxu3 %v18002_v27  ;;  %v12875_v20 = vor.u32 %v14544_v39, %v12874_v49  ;;  %v12843_v13 = vor.u32 %v14536_v23, %v12842_v37  ;;  %v14558_v49 = vld [vmem:[#allocation5 + $0xb0c] sm:$0xf]  ;;  %v13075_v39 = vor.u32 %v14595_v32, %v13074_v35  ;;  %v13156_v37 = vld [vmem:[#allocation5 + $0xcd0] sm:$0xf0] }
 0xa9f   :  { %8443 = vmatpush.bf16.msra.mxu3 %v13047_v33  ;;  %8223 = vmatmul.bf16.vlgmr.msra.gmra.mxu0 %v18002_v27  ;;  %v14566_v33 = vld [vmem:[#allocation5 + $0xb4c] sm:$0xf]  ;;  %v12943_v2 = vor.u32 %v14558_v49, %v12940_v17  ;;  %v13124_v32 = vld [vmem:[#allocation5 + $0xc90] sm:$0xf0] }
 0xaa0   :  { %8469 = vmatpush.bf16.msrb.mxu0 %v13055_v58  ;;  %8679 = vmatpush.bf16.msra.mxu2 %v13171_v31  ;;  %v12972_v58 = vld [vmem:[#allocation5 + $0xb58] sm:$0xf0]  ;;  %v14599_v31 = vld [vmem:[#allocation5 + $0xc4c] sm:$0xf0]  ;;  %v14614_v23 = vld [vmem:[#allocation5 + $0xccc] sm:$0xf] }
 0xaa1   :  { %8438 = vmatmul.bf16.vlgmr.msrb.gmra.mxu2 %v18020_v3  ;;  %v7187_v56 = vpop.f32.mrf.mxu3 }
 0xaa2   :  { %8203 = vmatpush.bf16.msrb.mxu1 %v12907_v51  ;;  %v18033_v46 = vadd.f32 %v7187_v56, %v18015_v7  ;;  %v6948_v22 = vpop.f32.mrf.mxu1  ;;  %v12975_v51 = vor.u32 %v14566_v33, %v12972_v58  ;;  %v13091_v7 = vor.u32 %v14599_v31, %v13090_v34  ;;  %v14647_v56 = vld [vmem:[#allocation5 + $0xdcc] sm:$0xf0]  ;;  %v13018_v34 = vld [vmem:[#allocation5 + $0xba8] sm:$0xf]  ;;  %v14580_v31 = vld [vmem:[#allocation5 + $0xbb4] sm:$0xf0] }
 0xaa3   :  { %8444 = vmatpush.bf16.msra.mxu3 %v13031_v54  ;;  %v12826_v54 = vld [vmem:[#allocation5 + $0xa28] sm:$0xf]  ;;  %v14609_v22 = vld [vmem:[#allocation5 + $0xca4] sm:$0xf]  ;;  %v13019_v5 = vor.u32 %v14580_v31, %v13018_v34  ;;  %v13076_v31 = vld [vmem:[#allocation5 + $0xc30] sm:$0xf0] }
 0xaa4   :  { %8470 = vmatpush.bf16.msrb.mxu0 %v13039_v42  ;;  %8680 = vmatpush.bf16.msra.mxu2 %v13155_v53  ;;  %v7428_v11 = vpop.f32.mrf.mxu2  ;;  %v7215_v50 = vpop.f32.mrf.mxu0  ;;  %v14532_v42 = vld [vmem:[#allocation5 + $0xa34] sm:$0xf0]  ;;  %v12956_v53 = vld [vmem:[#allocation5 + $0xb38] sm:$0xf0]  ;;  %v14593_v34 = vld [vmem:[#allocation5 + $0xc24] sm:$0xf] }
 0xaa5   :  { %v18036_v6 = vadd.f32 %v7428_v11, %v18018_v10  ;;  %v12827_v55 = vor.u32 %v14532_v42, %v12826_v54  ;;  %v12810_v10 = vld [vmem:[#allocation5 + $0xa08] sm:$0xf]  ;;  %v13167_v11 = vor.u32 %v14614_v23, %v13164_v52  ;;  %v13140_v50 = vld [vmem:[#allocation5 + $0xcb0] sm:$0xf0]  ;;  %v13266_v54 = vld [vmem:[#allocation5 + $0xda0] sm:$0xf] }
 0xaa6   :  { %8204 = vmatpush.bf16.msrb.mxu1 %v12891_v40  ;;  %v12959_v40 = vor.u32 %v14562_v62, %v12956_v53  ;;  %v12811_v38 = vor.u32 %v14528_v44, %v12810_v10  ;;  %v14643_v42 = vld [vmem:[#allocation5 + $0xdac] sm:$0xf0]  ;;  %v13002_v62 = vld [vmem:[#allocation5 + $0xb88] sm:$0xf]  ;;  %v14605_v53 = vld [vmem:[#allocation5 + $0xc84] sm:$0xf] }
 0xaa7   :  { %8445 = vmatpush.bf16.msra.mxu3 %v13015_v29  ;;  %v14557_v29 = vld [vmem:[#allocation5 + $0xb04] sm:$0xf]  ;;  %v13267_v35 = vor.u32 %v14643_v42, %v13266_v54  ;;  %v13132_v10 = vld [vmem:[#allocation5 + $0xc98] sm:$0xf0]  ;;  %v13127_v17 = vor.u32 %v14605_v53, %v13124_v32  ;;  %v12938_v54 = vld [vmem:[#allocation5 + $0xb08] sm:$0xf] }
 0xaa8   :  { %8471 = vmatpush.bf16.msrb.mxu0 %v13023_v14  ;;  %8681 = vmatpush.bf16.msra.mxu2 %v13139_v41  ;;  %v12932_v14 = vld [vmem:[#allocation5 + $0xb10] sm:$0xf0]  ;;  %v13058_v41 = vld [vmem:[#allocation5 + $0xc00] sm:$0xf]  ;;  %v14560_v42 = vld [vmem:[#allocation5 + $0xb14] sm:$0xf0] }
 0xaa9   :  { %v7189_v28 = vpop.f32.mrf.mxu3  ;;  %v12935_v61 = vor.u32 %v14557_v29, %v12932_v14  ;;  %v13059_v4 = vor.u32 %v14591_v19, %v13058_v41  ;;  %v12986_v19 = vld [vmem:[#allocation5 + $0xb68] sm:$0xf]  ;;  %v13186_v32 = vld [vmem:[#allocation5 + $0xd00] sm:$0xf] }
 0xaaa   :  { %8205 = vmatpush.bf16.msrb.mxu1 %v12875_v20  ;;  %v13172_v20 = vld [vmem:[#allocation5 + $0xcf0] sm:$0xf0]  ;;  %v14572_v28 = vld [vmem:[#allocation5 + $0xb74] sm:$0xf0] }
 0xaab   :  { %8446 = vmatpush.bf16.msra.mxu3 %v12999_v12  ;;  %v14618_v12 = vld [vmem:[#allocation5 + $0xcec] sm:$0xf]  ;;  %v13175_v59 = vor.u32 %v14617_v30, %v13172_v20  ;;  %v13108_v30 = vld [vmem:[#allocation5 + $0xc70] sm:$0xf0]  ;;  %v13234_v20 = vld [vmem:[#allocation5 + $0xd60] sm:$0xf] }
 0xaac   :  { %8472 = vmatpush.bf16.msrb.mxu0 %v13007_v26  ;;  %8682 = vmatpush.bf16.msra.mxu2 %v13123_v16  ;;  %v7430_v15 = vpop.f32.mrf.mxu2  ;;  %v13180_v26 = vld [vmem:[#allocation5 + $0xcf8] sm:$0xf0]  ;;  %v14651_v16 = vld [vmem:[#allocation5 + $0xdec] sm:$0xf0] }
 0xaad   :  { %v13183_v1 = vor.u32 %v14618_v12, %v13180_v26  ;;  %v14602_v15 = vld [vmem:[#allocation5 + $0xc6c] sm:$0xf]  ;;  %v12987_v12 = vor.u32 %v14572_v28, %v12986_v19  ;;  %v13111_v26 = vor.u32 %v14601_v43, %v13108_v30  ;;  %v13308_v28 = vld [vmem:[#allocation5 + $0xdf8] sm:$0xf0]  ;;  %v13426_v30 = vld [vmem:[#allocation5 + $0xee0] sm:$0xf] }
 0xaae   :  { %8206 = vmatpush.bf16.msrb.mxu1 %v12859_v63  ;;  %v14584_v63 = vld [vmem:[#allocation5 + $0xbd4] sm:$0xf0]  ;;  %v14650_v19 = vld [vmem:[#allocation5 + $0xdec] sm:$0xf] }
 0xaaf   :  { %8447 = vmatpush.bf16.msra.mxu3 %v12983_v48  ;;  %v14613_v48 = vld [vmem:[#allocation5 + $0xcc4] sm:$0xf]  ;;  %v13035_v33 = vor.u32 %v14584_v63, %v13034_v45 }
 0xab0   :  { %8473 = vmatpush.bf16.msrb.mxu0 %v12991_v36  ;;  %8683 = vmatpush.bf16.msra.mxu2 %v13107_v47  ;;  %v13299_v36 = vor.u32 %v14651_v16, %v13298_v21  ;;  %v13282_v47 = vld [vmem:[#allocation5 + $0xdc0] sm:$0xf]  ;;  %v13159_v58 = vor.u32 %v14613_v48, %v13156_v37  ;;  %v14597_v21 = vld [vmem:[#allocation5 + $0xc44] sm:$0xf] }
 0xab1   :  { %v13218_v48 = vld [vmem:[#allocation5 + $0xd40] sm:$0xf] }
 0xab2   :  { %8207 = vmatpush.bf16.msrb.mxu1 %v12843_v13  ;;  %v13283_v13 = vor.u32 %v14647_v56, %v13282_v47 }
 0xab3   :  { %8448 = vmatpush.bf16.msra.mxu3 %v12967_v60  ;;  %v14610_v60 = vld [vmem:[#allocation5 + $0xcac] sm:$0xf] }
 0xab4   :  { %8474 = vmatpush.bf16.msrb.mxu0 %v12975_v51  ;;  %8684 = vmatpush.bf16.msra.mxu2 %v13091_v7  ;;  %v13148_v51 = vld [vmem:[#allocation5 + $0xcb8] sm:$0xf0]  ;;  %v13143_v7 = vor.u32 %v14609_v22, %v13140_v50  ;;  %v14594_v22 = vld [vmem:[#allocation5 + $0xc2c] sm:$0xf]  ;;  %v13202_v50 = vld [vmem:[#allocation5 + $0xd20] sm:$0xf] }
 0xab5   :  { %v13151_v24 = vor.u32 %v14610_v60, %v13148_v51  ;;  %v14627_v60 = vld [vmem:[#allocation5 + $0xd2c] sm:$0xf0]  ;;  %v8735_v51 = vld [vmem:[#allocation4 + $0xc] sm:$0x2] }
 0xab6   :  { %8208 = vmatpush.bf16.msrb.mxu1 %v12827_v55  ;;  %v14606_v55 = vld [vmem:[#allocation5 + $0xc8c] sm:$0xf]  ;;  %v13203_v53 = vor.u32 %v14627_v60, %v13202_v50  ;;  %v13130_v60 = vld [vmem:[#allocation5 + $0xc88] sm:$0xf] }
 0xab7   :  { %8449 = vmatpush.bf16.msra.mxu3 %v12951_v25  ;;  %v13250_v25 = vld [vmem:[#allocation5 + $0xd80] sm:$0xf]  ;;  %v13135_v41 = vor.u32 %v14606_v55, %v13132_v10  ;;  %v14623_v55 = vld [vmem:[#allocation5 + $0xd0c] sm:$0xf0]  ;;  %v8769_v10 = vunpack.c.l.b16 %v8735_v51  ;;  %v14637_v51 = vld [vmem:[#allocation5 + $0xd84] sm:$0xf] }
 0xab8   :  { %8475 = vmatpush.bf16.msrb.mxu0 %v12959_v40  ;;  %8685 = vmatpush.bf16.msra.mxu2 %v13075_v39  ;;  %v14639_v40 = vld [vmem:[#allocation5 + $0xd8c] sm:$0xf0] }
 0xab9   :  { %v13251_v57 = vor.u32 %v14639_v40, %v13250_v25  ;;  %v13178_v25 = vld [vmem:[#allocation5 + $0xce8] sm:$0xf]  ;;  %v14620_v40 = vld [vmem:[#allocation5 + $0xcf4] sm:$0xf0] }
 0xaba   :  { %8209 = vmatpush.bf16.msrb.mxu1 %v12811_v38  ;;  %v7200_v44 = vpop.f32.mrf.mxu1  ;;  %v13116_v38 = vld [vmem:[#allocation5 + $0xc78] sm:$0xf0] }
 0xabb   :  { %8450 = vmatpush.bf16.msra.mxu3 %v12935_v61  ;;  %v18045_v29 = vadd.f32 %v7200_v44, %v18027_v8  ;;  %v14635_v8 = vld [vmem:[#allocation5 + $0xd6c] sm:$0xf0]  ;;  %v13119_v61 = vor.u32 %v14602_v15, %v13116_v38  ;;  %v13187_v38 = vor.u32 %v14623_v55, %v13186_v32 }
 0xabc   :  { %8476 = vmatpush.bf16.msrb.mxu0 %v12943_v2  ;;  %8686 = vmatpush.bf16.msra.mxu2 %v13059_v4  ;;  %v7467_v14 = vpop.f32.mrf.mxu0  ;;  %v14568_v2 = vld [vmem:[#allocation5 + $0xb54] sm:$0xf0]  ;;  %v13235_v16 = vor.u32 %v14635_v8, %v13234_v20  ;;  %v14683_v15 = vld [vmem:[#allocation5 + $0xeec] sm:$0xf0]  ;;  %v13179_v20 = vor.u32 %v14620_v40, %v13178_v25  ;;  %v8770_v8 = vpack.c.b16 %v8769_v10, %v8769_v10  ;;  %v14633_v40 = vld [vmem:[#allocation5 + $0xd64] sm:$0xf] }
 0xabd   :  { %8210 = vmatmul.bf16.vlgmr.msrb.gmra.mxu1 %v18002_v27  ;;  %v14576_v27 = vld [vmem:[#allocation5 + $0xb94] sm:$0xf0]  ;;  %v18048_v39 = vadd.f32 %v7467_v14, %v18030_v0  ;;  %v12970_v0 = vld [vmem:[#allocation5 + $0xb48] sm:$0xf]  ;;  %v14649_v14 = vld [vmem:[#allocation5 + $0xde4] sm:$0xf] }
 0xabe   :  { %8456 = vmatpush.bf16.msra.mxu1 %v13051_v9  ;;  %8451 = vmatmul.bf16.vlgmr.msra.gmra.mxu3 %v18020_v3  ;;  %v13003_v49 = vor.u32 %v14576_v27, %v13002_v62  ;;  %v13092_v9 = vld [vmem:[#allocation5 + $0xc50] sm:$0xf0]  ;;  %v12971_v52 = vor.u32 %v14568_v2, %v12970_v0  ;;  %v14590_v27 = vld [vmem:[#allocation5 + $0xc0c] sm:$0xf]  ;;  %v14616_v0 = vld [vmem:[#allocation5 + $0xcd4] sm:$0xf0] }
 0xabf   :  { %8692 = vmatpush.bf16.msrb.mxu3 %v13175_v59  ;;  %8477 = vmatmul.bf16.vlgmr.msrb.gmra.mxu0 %v18020_v3  ;;  %v14598_v59 = vld [vmem:[#allocation5 + $0xc4c] sm:$0xf]  ;;  %v13095_v56 = vor.u32 %v14597_v21, %v13092_v9  ;;  %v13060_v62 = vld [vmem:[#allocation5 + $0xc10] sm:$0xf0]  ;;  %v14645_v2 = vld [vmem:[#allocation5 + $0xdc4] sm:$0xf]  ;;  %v13427_v21 = vor.u32 %v14683_v15, %v13426_v30 }
 0xac0   :  { %8718 = vmatpush.bf16.msra.mxu0 %v13183_v1  ;;  %8933 = vmatpush.bf16.msrb.mxu2 %v13299_v36  ;;  %v13100_v1 = vld [vmem:[#allocation5 + $0xc58] sm:$0xf0]  ;;  %v14631_v36 = vld [vmem:[#allocation5 + $0xd4c] sm:$0xf0]  ;;  %v14604_v25 = vld [vmem:[#allocation5 + $0xc74] sm:$0xf0] }
 0xac1   :  { %8687 = vmatmul.bf16.vlgmr.msra.gmra.mxu2 %v18038_v18  ;;  %v7441_v4 = vpop.f32.mrf.mxu3  ;;  %v13292_v9 = vld [vmem:[#allocation5 + $0xdd8] sm:$0xf0]  ;;  %v14600_v30 = vld [vmem:[#allocation5 + $0xc54] sm:$0xf0]  ;;  %v14629_v15 = vld [vmem:[#allocation5 + $0xd44] sm:$0xf] }
 0xac2   :  { %8457 = vmatpush.bf16.msra.mxu1 %v13035_v33  ;;  %v18051_v45 = vadd.f32 %v7441_v4, %v18033_v46  ;;  %v7202_v37 = vpop.f32.mrf.mxu1  ;;  %v13103_v33 = vor.u32 %v14598_v59, %v13100_v1  ;;  %v13219_v46 = vor.u32 %v14631_v36, %v13218_v48  ;;  %v14646_v4 = vld [vmem:[#allocation5 + $0xdcc] sm:$0xf]  ;;  %v13410_v59 = vld [vmem:[#allocation5 + $0xec0] sm:$0xf]  ;;  %v14679_v1 = vld [vmem:[#allocation5 + $0xecc] sm:$0xf0] }
 0xac3   :  { %8693 = vmatpush.bf16.msrb.mxu3 %v13159_v58  ;;  %v12954_v58 = vld [vmem:[#allocation5 + $0xb28] sm:$0xf]  ;;  %v13295_v37 = vor.u32 %v14646_v4, %v13292_v9 }
 0xac4   :  { %8719 = vmatpush.bf16.msra.mxu0 %v13167_v11  ;;  %8934 = vmatpush.bf16.msrb.mxu2 %v13283_v13  ;;  %v7677_v63 = vpop.f32.mrf.mxu2  ;;  %v7469_v47 = vpop.f32.mrf.mxu0  ;;  %v14564_v11 = vld [vmem:[#allocation5 + $0xb34] sm:$0xf0]  ;;  %v13084_v13 = vld [vmem:[#allocation5 + $0xc38] sm:$0xf0] }
 0xac5   :  { %v18054_v23 = vadd.f32 %v7677_v63, %v18036_v6  ;;  %v12955_v6 = vor.u32 %v14564_v11, %v12954_v58  ;;  %v18056_v63 = vrot.slane %v8770_v8, 1  ;;  %v14612_v47 = vld [vmem:[#allocation5 + $0xcb4] sm:$0xf0]  ;;  %v13268_v58 = vld [vmem:[#allocation5 + $0xdb0] sm:$0xf0] }
 0xac6   :  { %8458 = vmatpush.bf16.msra.mxu1 %v13019_v5  ;;  %v13079_v5 = vor.u32 %v14593_v34, %v13076_v31  ;;  %v14642_v11 = vld [vmem:[#allocation5 + $0xdac] sm:$0xf]  ;;  %v13276_v34 = vld [vmem:[#allocation5 + $0xdb8] sm:$0xf0]  ;;  %v14675_v31 = vld [vmem:[#allocation5 + $0xeac] sm:$0xf0] }
 0xac7   :  { %8694 = vmatpush.bf16.msrb.mxu3 %v13143_v7  ;;  %v13087_v7 = vor.u32 %v14594_v22, %v13084_v13  ;;  %v13279_v50 = vor.u32 %v14642_v11, %v13276_v34  ;;  %v13220_v8 = vld [vmem:[#allocation5 + $0xd50] sm:$0xf0]  ;;  %v14659_v11 = vld [vmem:[#allocation5 + $0xe2c] sm:$0xf0]  ;;  %v8989_v34 = vld [vmem:[#allocation4 + $0xc] sm:$0x4] }
 0xac8   :  { %8720 = vmatpush.bf16.msra.mxu0 %v13151_v24  ;;  %8935 = vmatpush.bf16.msrb.mxu2 %v13267_v35  ;;  %v14589_v24 = vld [vmem:[#allocation5 + $0xc04] sm:$0xf]  ;;  %v13068_v35 = vld [vmem:[#allocation5 + $0xc18] sm:$0xf0] }
 0xac9   :  { %v7443_v44 = vpop.f32.mrf.mxu3  ;;  %v13063_v43 = vor.u32 %v14589_v24, %v13060_v62  ;;  %v13378_v24 = vld [vmem:[#allocation5 + $0xe80] sm:$0xf]  ;;  %v14671_v62 = vld [vmem:[#allocation5 + $0xe8c] sm:$0xf0] }
 0xaca   :  { %8459 = vmatpush.bf16.msra.mxu1 %v13003_v49  ;;  %v13114_v44 = vld [vmem:[#allocation5 + $0xc68] sm:$0xf] }
 0xacb   :  { %8695 = vmatpush.bf16.msrb.mxu3 %v13127_v17  ;;  %v12939_v17 = vor.u32 %v14560_v42, %v12938_v54  ;;  %v13252_v54 = vld [vmem:[#allocation5 + $0xd90] sm:$0xf0]  ;;  %v14638_v42 = vld [vmem:[#allocation5 + $0xd8c] sm:$0xf] }
 0xacc   :  { %8721 = vmatpush.bf16.msra.mxu0 %v13135_v41  ;;  %8936 = vmatpush.bf16.msrb.mxu2 %v13251_v57  ;;  %v7679_v49 = vpop.f32.mrf.mxu2  ;;  %v13300_v41 = vld [vmem:[#allocation5 + $0xdf0] sm:$0xf0]  ;;  %v13071_v57 = vor.u32 %v14590_v27, %v13068_v35  ;;  %v13255_v55 = vor.u32 %v14637_v51, %v13252_v54  ;;  %v13314_v54 = vld [vmem:[#allocation5 + $0xe00] sm:$0xf] }
 0xacd   :  { %v13236_v49 = vld [vmem:[#allocation5 + $0xd70] sm:$0xf0] }
 0xace   :  { %8460 = vmatpush.bf16.msra.mxu1 %v12987_v12  ;;  %v13303_v12 = vor.u32 %v14649_v14, %v13300_v41  ;;  %v13379_v14 = vor.u32 %v14671_v62, %v13378_v24  ;;  %v13244_v41 = vld [vmem:[#allocation5 + $0xd78] sm:$0xf0]  ;;  %v13306_v24 = vld [vmem:[#allocation5 + $0xde8] sm:$0xf]  ;;  %v14652_v62 = vld [vmem:[#allocation5 + $0xdf4] sm:$0xf0] }
 0xacf   :  { %8696 = vmatpush.bf16.msrb.mxu3 %v13111_v26  ;;  %v13311_v26 = vor.u32 %v14650_v19, %v13308_v28  ;;  %v13362_v19 = vld [vmem:[#allocation5 + $0xe60] sm:$0xf]  ;;  %v13115_v28 = vor.u32 %v14604_v25, %v13114_v44  ;;  %v14682_v44 = vld [vmem:[#allocation5 + $0xeec] sm:$0xf]  ;;  %v13436_v25 = vld [vmem:[#allocation5 + $0xef8] sm:$0xf0] }
 0xad0   :  { %8722 = vmatpush.bf16.msra.mxu0 %v13119_v61  ;;  %8937 = vmatpush.bf16.msrb.mxu2 %v13235_v16  ;;  %v13162_v61 = vld [vmem:[#allocation5 + $0xcc8] sm:$0xf]  ;;  %v13284_v16 = vld [vmem:[#allocation5 + $0xdd0] sm:$0xf0] }
 0xad1   :  { %v13163_v48 = vor.u32 %v14616_v0, %v13162_v61  ;;  %v13287_v36 = vor.u32 %v14645_v2, %v13284_v16  ;;  %v13346_v2 = vld [vmem:[#allocation5 + $0xe40] sm:$0xf] }
 0xad2   :  { %8461 = vmatpush.bf16.msra.mxu1 %v12971_v52  ;;  %v13146_v52 = vld [vmem:[#allocation5 + $0xca8] sm:$0xf] }
 0xad3   :  { %8697 = vmatpush.bf16.msrb.mxu3 %v13095_v56  ;;  %v14641_v56 = vld [vmem:[#allocation5 + $0xda4] sm:$0xf]  ;;  %v13147_v22 = vor.u32 %v14612_v47, %v13146_v52  ;;  %v13204_v47 = vld [vmem:[#allocation5 + $0xd30] sm:$0xf0] }
 0xad4   :  { %8723 = vmatpush.bf16.msra.mxu0 %v13103_v33  ;;  %8938 = vmatpush.bf16.msrb.mxu2 %v13219_v46  ;;  %v13411_v33 = vor.u32 %v14679_v1, %v13410_v59  ;;  %v13394_v46 = vld [vmem:[#allocation5 + $0xea0] sm:$0xf]  ;;  %v13271_v13 = vor.u32 %v14641_v56, %v13268_v58  ;;  %v13223_v1 = vor.u32 %v14629_v15, %v13220_v8  ;;  %v14625_v52 = vld [vmem:[#allocation5 + $0xd24] sm:$0xf]  ;;  %v14626_v56 = vld [vmem:[#allocation5 + $0xd2c] sm:$0xf] }
 0xad5   :  { %v13330_v58 = vld [vmem:[#allocation5 + $0xe20] sm:$0xf]  ;;  %v13420_v8 = vld [vmem:[#allocation5 + $0xed8] sm:$0xf0] }
 0xad6   :  { %8462 = vmatpush.bf16.msra.mxu1 %v12955_v6  ;;  %v13395_v6 = vor.u32 %v14675_v31, %v13394_v46  ;;  %v13066_v46 = vld [vmem:[#allocation5 + $0xc08] sm:$0xf]  ;;  %v14592_v31 = vld [vmem:[#allocation5 + $0xc14] sm:$0xf0]  ;;  %v13331_v51 = vor.u32 %v14659_v11, %v13330_v58 }
 0xad7   :  { %8698 = vmatpush.bf16.msrb.mxu3 %v13079_v5  ;;  %v13260_v5 = vld [vmem:[#allocation5 + $0xd98] sm:$0xf0]  ;;  %v13258_v11 = vld [vmem:[#allocation5 + $0xd88] sm:$0xf] }
 0xad8   :  { %8724 = vmatpush.bf16.msra.mxu0 %v13087_v7  ;;  %8939 = vmatpush.bf16.msrb.mxu2 %v13203_v53  ;;  %v13263_v10 = vor.u32 %v14638_v42, %v13260_v5  ;;  %v14655_v42 = vld [vmem:[#allocation5 + $0xe0c] sm:$0xf0]  ;;  %v9023_v5 = vunpack.c.l.b16 %v8989_v34  ;;  %v14669_v34 = vld [vmem:[#allocation5 + $0xe84] sm:$0xf] }
 0xada   :  { %8463 = vmatpush.bf16.msra.mxu1 %v12939_v17  ;;  %v7454_v7 = vpop.f32.mrf.mxu1  ;;  %v14634_v17 = vld [vmem:[#allocation5 + $0xd6c] sm:$0xf] }
 0xadb   :  { %8699 = vmatpush.bf16.msrb.mxu3 %v13063_v43  ;;  %v18063_v27 = vadd.f32 %v7454_v7, %v18045_v29  ;;  %v14667_v29 = vld [vmem:[#allocation5 + $0xe6c] sm:$0xf0]  ;;  %v13239_v43 = vor.u32 %v14633_v40, %v13236_v49  ;;  %v13554_v49 = vld [vmem:[#allocation5 + $0xfe0] sm:$0xf] }
 0xadc   :  { %8725 = vmatpush.bf16.msra.mxu0 %v13071_v57  ;;  %8940 = vmatpush.bf16.msrb.mxu2 %v13187_v38  ;;  %v7716_v53 = vpop.f32.mrf.mxu0  ;;  %v13247_v57 = vor.u32 %v14634_v17, %v13244_v41  ;;  %v13363_v38 = vor.u32 %v14667_v29, %v13362_v19  ;;  %v14715_v17 = vld [vmem:[#allocation5 + $0xfec] sm:$0xf0]  ;;  %v13315_v41 = vor.u32 %v14655_v42, %v13314_v54 }
 0xadd   :  { %8464 = vmatmul.bf16.vlgmr.msra.gmra.mxu1 %v18020_v3  ;;  %v14608_v3 = vld [vmem:[#allocation5 + $0xc94] sm:$0xf0]  ;;  %v18066_v32 = vadd.f32 %v7716_v53, %v18048_v39  ;;  %v13098_v39 = vld [vmem:[#allocation5 + $0xc48] sm:$0xf]  ;;  %v14681_v53 = vld [vmem:[#allocation5 + $0xee4] sm:$0xf]  ;;  %v13307_v19 = vor.u32 %v14652_v62, %v13306_v24  ;;  %v9024_v29 = vpack.c.b16 %v9023_v5, %v9023_v5  ;;  %v13555_v15 = vor.u32 %v14715_v17, %v13554_v49 }
 0xade   :  { %8705 = vmatpush.bf16.msrb.mxu1 %v13179_v20  ;;  %8700 = vmatmul.bf16.vlgmr.msrb.gmra.mxu3 %v18038_v18  ;;  %v13131_v35 = vor.u32 %v14608_v3, %v13130_v60  ;;  %v13099_v9 = vor.u32 %v14600_v30, %v13098_v39  ;;  %v13188_v60 = vld [vmem:[#allocation5 + $0xd10] sm:$0xf0]  ;;  %v14622_v3 = vld [vmem:[#allocation5 + $0xd0c] sm:$0xf]  ;;  %v14648_v39 = vld [vmem:[#allocation5 + $0xdd4] sm:$0xf0] }
 0xadf   :  { %8946 = vmatpush.bf16.msra.mxu3 %v13303_v12  ;;  %8726 = vmatmul.bf16.vlgmr.msra.gmra.mxu0 %v18038_v18  ;;  %v14630_v12 = vld [vmem:[#allocation5 + $0xd4c] sm:$0xf]  ;;  %v14677_v30 = vld [vmem:[#allocation5 + $0xec4] sm:$0xf]  ;;  %v14636_v24 = vld [vmem:[#allocation5 + $0xd74] sm:$0xf0] }
 0xae0   :  { %8972 = vmatpush.bf16.msrb.mxu0 %v13311_v26  ;;  %9187 = vmatpush.bf16.msra.mxu2 %v13427_v21  ;;  %v13228_v26 = vld [vmem:[#allocation5 + $0xd58] sm:$0xf0]  ;;  %v14663_v21 = vld [vmem:[#allocation5 + $0xe4c] sm:$0xf0]  ;;  %v14665_v62 = vld [vmem:[#allocation5 + $0xe64] sm:$0xf] }
 0xae1   :  { %8941 = vmatmul.bf16.vlgmr.msrb.gmra.mxu2 %v18056_v63  ;;  %v7690_v20 = vpop.f32.mrf.mxu3  ;;  %v14632_v49 = vld [vmem:[#allocation5 + $0xd54] sm:$0xf0]  ;;  %v14661_v17 = vld [vmem:[#allocation5 + $0xe44] sm:$0xf] }
 0xae2   :  { %8706 = vmatpush.bf16.msrb.mxu1 %v13163_v48  ;;  %v18069_v61 = vadd.f32 %v7690_v20, %v18051_v45  ;;  %v7456_v16 = vpop.f32.mrf.mxu1  ;;  %v13231_v48 = vor.u32 %v14630_v12, %v13228_v26  ;;  %v13347_v45 = vor.u32 %v14663_v21, %v13346_v2  ;;  %v14678_v20 = vld [vmem:[#allocation5 + $0xecc] sm:$0xf]  ;;  %v13538_v12 = vld [vmem:[#allocation5 + $0xfc0] sm:$0xf]  ;;  %v14711_v26 = vld [vmem:[#allocation5 + $0xfcc] sm:$0xf0] }
 0xae3   :  { %8947 = vmatpush.bf16.msra.mxu3 %v13287_v36  ;;  %v13082_v36 = vld [vmem:[#allocation5 + $0xc28] sm:$0xf]  ;;  %v13423_v16 = vor.u32 %v14678_v20, %v13420_v8 }
 0xae4   :  { %8973 = vmatpush.bf16.msrb.mxu0 %v13295_v37  ;;  %9188 = vmatpush.bf16.msra.mxu2 %v13411_v33  ;;  %v7931_v0 = vpop.f32.mrf.mxu2  ;;  %v7718_v59 = vpop.f32.mrf.mxu0  ;;  %v14596_v37 = vld [vmem:[#allocation5 + $0xc34] sm:$0xf0]  ;;  %v13212_v33 = vld [vmem:[#allocation5 + $0xd38] sm:$0xf0] }
 0xae5   :  { %v18072_v4 = vadd.f32 %v7931_v0, %v18054_v23  ;;  %v13083_v23 = vor.u32 %v14596_v37, %v13082_v36  ;;  %v18074_v0 = vrot.slane %v9024_v29, 2  ;;  %v14644_v59 = vld [vmem:[#allocation5 + $0xdb4] sm:$0xf0]  ;;  %v13396_v36 = vld [vmem:[#allocation5 + $0xeb0] sm:$0xf0] }
 0xae6   :  { %8707 = vmatpush.bf16.msrb.mxu1 %v13147_v22  ;;  %v13207_v22 = vor.u32 %v14625_v52, %v13204_v47  ;;  %v14674_v37 = vld [vmem:[#allocation5 + $0xeac] sm:$0xf]  ;;  %v13404_v52 = vld [vmem:[#allocation5 + $0xeb8] sm:$0xf0]  ;;  %v14707_v47 = vld [vmem:[#allocation5 + $0xfac] sm:$0xf0] }
 0xae7   :  { %8948 = vmatpush.bf16.msra.mxu3 %v13271_v13  ;;  %v13215_v13 = vor.u32 %v14626_v56, %v13212_v33  ;;  %v13407_v58 = vor.u32 %v14674_v37, %v13404_v52  ;;  %v13348_v29 = vld [vmem:[#allocation5 + $0xe50] sm:$0xf0]  ;;  %v13458_v37 = vld [vmem:[#allocation5 + $0xf20] sm:$0xf]  ;;  %v14691_v52 = vld [vmem:[#allocation5 + $0xf2c] sm:$0xf0] }
 0xae8   :  { %8974 = vmatpush.bf16.msrb.mxu0 %v13279_v50  ;;  %9189 = vmatpush.bf16.msra.mxu2 %v13395_v6  ;;  %v14621_v50 = vld [vmem:[#allocation5 + $0xd04] sm:$0xf]  ;;  %v13196_v6 = vld [vmem:[#allocation5 + $0xd18] sm:$0xf0] }
 0xae9   :  { %v7692_v7 = vpop.f32.mrf.mxu3  ;;  %v13191_v40 = vor.u32 %v14621_v50, %v13188_v60  ;;  %v13506_v50 = vld [vmem:[#allocation5 + $0xf80] sm:$0xf]  ;;  %v14703_v60 = vld [vmem:[#allocation5 + $0xf8c] sm:$0xf0] }
 0xaea   :  { %8708 = vmatpush.bf16.msrb.mxu1 %v13131_v35  ;;  %v13242_v7 = vld [vmem:[#allocation5 + $0xd68] sm:$0xf] }
 0xaeb   :  { %8949 = vmatpush.bf16.msra.mxu3 %v13255_v55  ;;  %v13067_v55 = vor.u32 %v14592_v31, %v13066_v46  ;;  %v13380_v46 = vld [vmem:[#allocation5 + $0xe90] sm:$0xf0]  ;;  %v14670_v31 = vld [vmem:[#allocation5 + $0xe8c] sm:$0xf] }
 0xaec   :  { %8975 = vmatpush.bf16.msrb.mxu0 %v13263_v10  ;;  %9190 = vmatpush.bf16.msra.mxu2 %v13379_v14  ;;  %v7933_v35 = vpop.f32.mrf.mxu2  ;;  %v13428_v10 = vld [vmem:[#allocation5 + $0xef0] sm:$0xf0]  ;;  %v13199_v14 = vor.u32 %v14622_v3, %v13196_v6  ;;  %v13383_v42 = vor.u32 %v14669_v34, %v13380_v46  ;;  %v13324_v46 = vld [vmem:[#allocation5 + $0xe18] sm:$0xf0] }
 0xaed   :  { %v13364_v35 = vld [vmem:[#allocation5 + $0xe70] sm:$0xf0] }
 0xaee   :  { %8709 = vmatpush.bf16.msrb.mxu1 %v13115_v28  ;;  %v13431_v28 = vor.u32 %v14681_v53, %v13428_v10  ;;  %v13507_v53 = vor.u32 %v14703_v60, %v13506_v50  ;;  %v13372_v10 = vld [vmem:[#allocation5 + $0xe78] sm:$0xf0]  ;;  %v13434_v50 = vld [vmem:[#allocation5 + $0xee8] sm:$0xf]  ;;  %v14684_v60 = vld [vmem:[#allocation5 + $0xef4] sm:$0xf0] }
 0xaef   :  { %8950 = vmatpush.bf16.msra.mxu3 %v13239_v43  ;;  %v13439_v43 = vor.u32 %v14682_v44, %v13436_v25  ;;  %v13490_v44 = vld [vmem:[#allocation5 + $0xf60] sm:$0xf]  ;;  %v13243_v25 = vor.u32 %v14636_v24, %v13242_v7  ;;  %v14714_v7 = vld [vmem:[#allocation5 + $0xfec] sm:$0xf]  ;;  %v13564_v24 = vld [vmem:[#allocation5 + $0xff8] sm:$0xf0] }
 0xaf0   :  { %8976 = vmatpush.bf16.msrb.mxu0 %v13247_v57  ;;  %9191 = vmatpush.bf16.msra.mxu2 %v13363_v38  ;;  %v13290_v57 = vld [vmem:[#allocation5 + $0xdc8] sm:$0xf]  ;;  %v13412_v38 = vld [vmem:[#allocation5 + $0xed0] sm:$0xf0] }
 0xaf1   :  { %v13291_v2 = vor.u32 %v14648_v39, %v13290_v57  ;;  %v13415_v21 = vor.u32 %v14677_v30, %v13412_v38  ;;  %v13474_v30 = vld [vmem:[#allocation5 + $0xf40] sm:$0xf] }
 0xaf2   :  { %8710 = vmatpush.bf16.msrb.mxu1 %v13099_v9  ;;  %v13274_v9 = vld [vmem:[#allocation5 + $0xda8] sm:$0xf] }
 0xaf3   :  { %8951 = vmatpush.bf16.msra.mxu3 %v13223_v1  ;;  %v14673_v1 = vld [vmem:[#allocation5 + $0xea4] sm:$0xf]  ;;  %v13275_v56 = vor.u32 %v14644_v59, %v13274_v9  ;;  %v13332_v59 = vld [vmem:[#allocation5 + $0xe30] sm:$0xf0] }
 0xaf4   :  { %8977 = vmatpush.bf16.msrb.mxu0 %v13231_v48  ;;  %9192 = vmatpush.bf16.msra.mxu2 %v13347_v45  ;;  %v13539_v48 = vor.u32 %v14711_v26, %v13538_v12  ;;  %v13522_v45 = vld [vmem:[#allocation5 + $0xfa0] sm:$0xf]  ;;  %v13399_v33 = vor.u32 %v14673_v1, %v13396_v36  ;;  %v13210_v12 = vld [vmem:[#allocation5 + $0xd28] sm:$0xf]  ;;  %v14657_v9 = vld [vmem:[#allocation5 + $0xe24] sm:$0xf] }
 0xaf5   :  { %v14658_v1 = vld [vmem:[#allocation5 + $0xe2c] sm:$0xf]  ;;  %v9243_v36 = vld [vmem:[#allocation4 + $0xc] sm:$0x8] }
 0xaf6   :  { %8711 = vmatpush.bf16.msrb.mxu1 %v13083_v23  ;;  %v13523_v23 = vor.u32 %v14707_v47, %v13522_v45  ;;  %v13194_v45 = vld [vmem:[#allocation5 + $0xd08] sm:$0xf]  ;;  %v14624_v47 = vld [vmem:[#allocation5 + $0xd14] sm:$0xf0]  ;;  %v9277_v34 = vunpack.c.l.b16 %v9243_v36 }
 0xaf7   :  { %8952 = vmatpush.bf16.msra.mxu3 %v13207_v22  ;;  %v13388_v22 = vld [vmem:[#allocation5 + $0xe98] sm:$0xf0] }
 0xaf8   :  { %8978 = vmatpush.bf16.msrb.mxu0 %v13215_v13  ;;  %9193 = vmatpush.bf16.msra.mxu2 %v13331_v51  ;;  %v13391_v5 = vor.u32 %v14670_v31, %v13388_v22  ;;  %v13442_v31 = vld [vmem:[#allocation5 + $0xf00] sm:$0xf]  ;;  %v14687_v22 = vld [vmem:[#allocation5 + $0xf0c] sm:$0xf0] }
 0xafa   :  { %8712 = vmatpush.bf16.msrb.mxu1 %v13067_v55  ;;  %v7703_v13 = vpop.f32.mrf.mxu1  ;;  %v14666_v55 = vld [vmem:[#allocation5 + $0xe6c] sm:$0xf] }
 0xafb   :  { %8953 = vmatpush.bf16.msra.mxu3 %v13191_v40  ;;  %v18081_v3 = vadd.f32 %v7703_v13, %v18063_v27  ;;  %v14699_v27 = vld [vmem:[#allocation5 + $0xf6c] sm:$0xf0]  ;;  %v13367_v40 = vor.u32 %v14665_v62, %v13364_v35  ;;  %v9278_v35 = vpack.c.b16 %v9277_v34, %v9277_v34 }
 0xafc   :  { %8979 = vmatpush.bf16.msrb.mxu0 %v13199_v14  ;;  %9194 = vmatpush.bf16.msra.mxu2 %v13315_v41  ;;  %v7970_v51 = vpop.f32.mrf.mxu0  ;;  %v13375_v14 = vor.u32 %v14666_v55, %v13372_v10  ;;  %v13491_v41 = vor.u32 %v14699_v27, %v13490_v44  ;;  %v13443_v55 = vor.u32 %v14687_v22, %v13442_v31  ;;  %v14664_v31 = vld [vmem:[#allocation5 + $0xe54] sm:$0xf0]  ;;  %v14693_v22 = vld [vmem:[#allocation5 + $0xf44] sm:$0xf] }
 0xafd   :  { %8713 = vmatmul.bf16.vlgmr.msrb.gmra.mxu1 %v18038_v18  ;;  %v14640_v18 = vld [vmem:[#allocation5 + $0xd94] sm:$0xf0]  ;;  %v18084_v54 = vadd.f32 %v7970_v51, %v18066_v32  ;;  %v13226_v32 = vld [vmem:[#allocation5 + $0xd48] sm:$0xf]  ;;  %v14713_v51 = vld [vmem:[#allocation5 + $0xfe4] sm:$0xf]  ;;  %v13435_v10 = vor.u32 %v14684_v60, %v13434_v50  ;;  %v13567_v27 = vor.u32 %v14714_v7, %v13564_v24 }
 0xafe   :  { %8959 = vmatpush.bf16.msra.mxu1 %v13307_v19  ;;  %8954 = vmatmul.bf16.vlgmr.msra.gmra.mxu3 %v18056_v63  ;;  %v13259_v6 = vor.u32 %v14640_v18, %v13258_v11  ;;  %v13227_v8 = vor.u32 %v14632_v49, %v13226_v32  ;;  %v13316_v11 = vld [vmem:[#allocation5 + $0xe10] sm:$0xf0]  ;;  %v14654_v18 = vld [vmem:[#allocation5 + $0xe0c] sm:$0xf]  ;;  %v13484_v60 = vld [vmem:[#allocation5 + $0xf58] sm:$0xf0] }
 0xaff   :  { %9200 = vmatpush.bf16.msrb.mxu3 %v13431_v28  ;;  %8980 = vmatmul.bf16.vlgmr.msrb.gmra.mxu0 %v18056_v63  ;;  %v14662_v28 = vld [vmem:[#allocation5 + $0xe4c] sm:$0xf]  ;;  %v13540_v32 = vld [vmem:[#allocation5 + $0xfd0] sm:$0xf0] }
 0xb00   :  { %9226 = vmatpush.bf16.msra.mxu0 %v13439_v43  ;;  %9441 = vmatpush.bf16.msrb.mxu2 %v13555_v15  ;;  %v13356_v43 = vld [vmem:[#allocation5 + $0xe58] sm:$0xf0]  ;;  %v14695_v15 = vld [vmem:[#allocation5 + $0xf4c] sm:$0xf0]  ;;  %v14710_v49 = vld [vmem:[#allocation5 + $0xfcc] sm:$0xf] }
 0xb01   :  { %9195 = vmatmul.bf16.vlgmr.msra.gmra.mxu2 %v18074_v0  ;;  %v7944_v19 = vpop.f32.mrf.mxu3  ;;  %v14694_v50 = vld [vmem:[#allocation5 + $0xf4c] sm:$0xf] }
 0xb02   :  { %8960 = vmatpush.bf16.msra.mxu1 %v13291_v2  ;;  %v18087_v57 = vadd.f32 %v7944_v19, %v18069_v61  ;;  %v7705_v38 = vpop.f32.mrf.mxu1  ;;  %v13351_v2 = vor.u32 %v14661_v17, %v13348_v29  ;;  %v13475_v61 = vor.u32 %v14695_v15, %v13474_v30  ;;  %v13548_v17 = vld [vmem:[#allocation5 + $0xfd8] sm:$0xf0]  ;;  %v14705_v30 = vld [vmem:[#allocation5 + $0xfa4] sm:$0xf]  ;;  %v13524_v15 = vld [vmem:[#allocation5 + $0xfb0] sm:$0xf0] }
 0xb03   :  { %9201 = vmatpush.bf16.msrb.mxu3 %v13415_v21  ;;  %v13359_v21 = vor.u32 %v14662_v28, %v13356_v43  ;;  %v13551_v28 = vor.u32 %v14710_v49, %v13548_v17  ;;  %v13402_v43 = vld [vmem:[#allocation5 + $0xea8] sm:$0xf]  ;;  %v14706_v38 = vld [vmem:[#allocation5 + $0xfac] sm:$0xf]  ;;  %v14685_v49 = vld [vmem:[#allocation5 + $0xf04] sm:$0xf] }
 0xb04   :  { %9227 = vmatpush.bf16.msra.mxu0 %v13423_v16  ;;  %9442 = vmatpush.bf16.msrb.mxu2 %v13539_v48  ;;  %v8185_v39 = vpop.f32.mrf.mxu2  ;;  %v7972_v26 = vpop.f32.mrf.mxu0  ;;  %v14628_v16 = vld [vmem:[#allocation5 + $0xd34] sm:$0xf0]  ;;  %v13340_v48 = vld [vmem:[#allocation5 + $0xe38] sm:$0xf0]  ;;  %v13444_v17 = vld [vmem:[#allocation5 + $0xf10] sm:$0xf0] }
 0xb05   :  { %v18090_v20 = vadd.f32 %v8185_v39, %v18072_v4  ;;  %v13211_v4 = vor.u32 %v14628_v16, %v13210_v12  ;;  %v14676_v39 = vld [vmem:[#allocation5 + $0xeb4] sm:$0xf0]  ;;  %v13527_v26 = vor.u32 %v14705_v30, %v13524_v15 }
 0xb06   :  { %8961 = vmatpush.bf16.msra.mxu1 %v13275_v56  ;;  %v13335_v56 = vor.u32 %v14657_v9, %v13332_v59  ;;  %v13403_v12 = vor.u32 %v14676_v39, %v13402_v43  ;;  %v14672_v16 = vld [vmem:[#allocation5 + $0xe94] sm:$0xf0]  ;;  %v14701_v9 = vld [vmem:[#allocation5 + $0xf84] sm:$0xf]  ;;  %v13508_v59 = vld [vmem:[#allocation5 + $0xf90] sm:$0xf0] }
 0xb07   :  { %9202 = vmatpush.bf16.msrb.mxu3 %v13399_v33  ;;  %v13343_v33 = vor.u32 %v14658_v1, %v13340_v48  ;;  %v13562_v43 = vld [vmem:[#allocation5 + $0xfe8] sm:$0xf]  ;;  %v14716_v39 = vld [vmem:[#allocation5 + $0xff4] sm:$0xf0] }
 0xb08   :  { %9228 = vmatpush.bf16.msra.mxu0 %v13407_v58  ;;  %9443 = vmatpush.bf16.msrb.mxu2 %v13523_v23  ;;  %v14653_v58 = vld [vmem:[#allocation5 + $0xe04] sm:$0xf]  ;;  %v13459_v23 = vor.u32 %v14691_v52, %v13458_v37 }
 0xb09   :  { %v7946_v13 = vpop.f32.mrf.mxu3  ;;  %v13319_v62 = vor.u32 %v14653_v58, %v13316_v11  ;;  %v13492_v58 = vld [vmem:[#allocation5 + $0xf70] sm:$0xf0]  ;;  %v14698_v11 = vld [vmem:[#allocation5 + $0xf6c] sm:$0xf] }
 0xb0a   :  { %8962 = vmatpush.bf16.msra.mxu1 %v13259_v6 }
 0xb0b   :  { %9203 = vmatpush.bf16.msrb.mxu3 %v13383_v42  ;;  %v13195_v42 = vor.u32 %v14624_v47, %v13194_v45  ;;  %v13370_v47 = vld [vmem:[#allocation5 + $0xe68] sm:$0xf] }
 0xb0c   :  { %9229 = vmatpush.bf16.msra.mxu0 %v13391_v5  ;;  %9444 = vmatpush.bf16.msrb.mxu2 %v13507_v53  ;;  %v8187_v6 = vpop.f32.mrf.mxu2  ;;  %v13556_v5 = vld [vmem:[#allocation5 + $0xff0] sm:$0xf0]  ;;  %v13327_v53 = vor.u32 %v14654_v18, %v13324_v46  ;;  %v13500_v18 = vld [vmem:[#allocation5 + $0xf78] sm:$0xf0]  ;;  %v13354_v46 = vld [vmem:[#allocation5 + $0xe48] sm:$0xf] }
 0xb0d   :  { %v13559_v44 = vor.u32 %v14713_v51, %v13556_v5  ;;  %v13355_v7 = vor.u32 %v14664_v31, %v13354_v46  ;;  %v13466_v31 = vld [vmem:[#allocation5 + $0xf28] sm:$0xf] }
 0xb0e   :  { %8963 = vmatpush.bf16.msra.mxu1 %v13243_v25  ;;  %v13418_v25 = vld [vmem:[#allocation5 + $0xec8] sm:$0xf] }
 0xb0f   :  { %9204 = vmatpush.bf16.msrb.mxu3 %v13367_v40  ;;  %v14680_v40 = vld [vmem:[#allocation5 + $0xed4] sm:$0xf0] }
 0xb10   :  { %9230 = vmatpush.bf16.msra.mxu0 %v13375_v14  ;;  %9445 = vmatpush.bf16.msrb.mxu2 %v13491_v41  ;;  %v14709_v14 = vld [vmem:[#allocation5 + $0xfc4] sm:$0xf]  ;;  %v18092_v41 = vrot.slane %v9278_v35, 3  ;;  %v13419_v19 = vor.u32 %v14680_v40, %v13418_v25  ;;  %v13338_v35 = vld [vmem:[#allocation5 + $0xe28] sm:$0xf] }
 0xb11   :  { %v13543_v29 = vor.u32 %v14709_v14, %v13540_v32  ;;  %v13468_v25 = vld [vmem:[#allocation5 + $0xf38] sm:$0xf0]  ;;  %v14656_v32 = vld [vmem:[#allocation5 + $0xe14] sm:$0xf0] }
 0xb12   :  { %8964 = vmatpush.bf16.msra.mxu1 %v13227_v8  ;;  %v13532_v8 = vld [vmem:[#allocation5 + $0xfb8] sm:$0xf0] }
 0xb13   :  { %9205 = vmatpush.bf16.msrb.mxu3 %v13351_v2  ;;  %v13535_v2 = vor.u32 %v14706_v38, %v13532_v8  ;;  %v13447_v38 = vor.u32 %v14685_v49, %v13444_v17 }
 0xb14   :  { %9231 = vmatpush.bf16.msra.mxu0 %v13359_v21  ;;  %9446 = vmatpush.bf16.msrb.mxu2 %v13475_v61  ;;  %v13386_v21 = vld [vmem:[#allocation5 + $0xe88] sm:$0xf]  ;;  %v13516_v61 = vld [vmem:[#allocation5 + $0xf98] sm:$0xf0] }
 0xb15   :  { %v13387_v37 = vor.u32 %v14672_v16, %v13386_v21  ;;  %v13530_v16 = vld [vmem:[#allocation5 + $0xfa8] sm:$0xf] }
 0xb16   :  { %8965 = vmatpush.bf16.msra.mxu1 %v13211_v4  ;;  %v13511_v4 = vor.u32 %v14701_v9, %v13508_v59  ;;  %v14708_v9 = vld [vmem:[#allocation5 + $0xfb4] sm:$0xf0] }
 0xb17   :  { %9206 = vmatpush.bf16.msrb.mxu3 %v13335_v56  ;;  %v14668_v56 = vld [vmem:[#allocation5 + $0xe74] sm:$0xf0]  ;;  %v13531_v59 = vor.u32 %v14708_v9, %v13530_v16 }
 0xb18   :  { %9232 = vmatpush.bf16.msra.mxu0 %v13343_v33  ;;  %9447 = vmatpush.bf16.msrb.mxu2 %v13459_v23  ;;  %v14697_v33 = vld [vmem:[#allocation5 + $0xf64] sm:$0xf]  ;;  %v13371_v34 = vor.u32 %v14668_v56, %v13370_v47  ;;  %v13503_v23 = vor.u32 %v14698_v11, %v13500_v18  ;;  %v13498_v47 = vld [vmem:[#allocation5 + $0xf68] sm:$0xf] }
 0xb1a   :  { %8966 = vmatpush.bf16.msra.mxu1 %v13195_v42  ;;  %v7957_v1 = vpop.f32.mrf.mxu1 }
 0xb1b   :  { %9207 = vmatpush.bf16.msrb.mxu3 %v13319_v62  ;;  %v18099_v48 = vadd.f32 %v7957_v1, %v18081_v3  ;;  %v13495_v3 = vor.u32 %v14697_v33, %v13492_v58  ;;  %v13482_v33 = vld [vmem:[#allocation5 + $0xf48] sm:$0xf]  ;;  %v14696_v58 = vld [vmem:[#allocation5 + $0xf54] sm:$0xf0] }
 0xb1c   :  { %9233 = vmatpush.bf16.msra.mxu0 %v13327_v53  ;;  %9448 = vmatpush.bf16.msrb.mxu2 %v13443_v55  ;;  %v8224_v36 = vpop.f32.mrf.mxu0  ;;  %v13487_v53 = vor.u32 %v14694_v50, %v13484_v60  ;;  %v14660_v55 = vld [vmem:[#allocation5 + $0xe34] sm:$0xf0]  ;;  %v13483_v46 = vor.u32 %v14696_v58, %v13482_v33 }
 0xb1d   :  { %8967 = vmatmul.bf16.vlgmr.msra.gmra.mxu1 %v18056_v63  ;;  %v14702_v63 = vld [vmem:[#allocation5 + $0xf8c] sm:$0xf]  ;;  %v18102_v52 = vadd.f32 %v8224_v36, %v18084_v54  ;;  %v13476_v54 = vld [vmem:[#allocation5 + $0xf50] sm:$0xf0] }
 0xb1e   :  { %9213 = vmatpush.bf16.msrb.mxu1 %v13435_v10  ;;  %9208 = vmatmul.bf16.vlgmr.msrb.gmra.mxu3 %v18074_v0  ;;  %v13519_v45 = vor.u32 %v14702_v63, %v13516_v61  ;;  %v13479_v62 = vor.u32 %v14693_v22, %v13476_v54  ;;  %v14689_v10 = vld [vmem:[#allocation5 + $0xf24] sm:$0xf]  ;;  %v13514_v63 = vld [vmem:[#allocation5 + $0xf88] sm:$0xf]  ;;  %v14704_v61 = vld [vmem:[#allocation5 + $0xf94] sm:$0xf0] }
 0xb1f   :  { %9454 = vmatpush.bf16.msra.mxu3 %v13559_v44  ;;  %9234 = vmatmul.bf16.vlgmr.msra.gmra.mxu0 %v18074_v0  ;;  %v13460_v44 = vld [vmem:[#allocation5 + $0xf30] sm:$0xf0]  ;;  %v14692_v22 = vld [vmem:[#allocation5 + $0xf34] sm:$0xf0] }
 0xb20   :  { %9480 = vmatpush.bf16.msrb.mxu0 %v13567_v27  ;;  %9449 = vmatmul.bf16.vlgmr.msrb.gmra.mxu2 %v18092_v41  ;;  %v14690_v27 = vld [vmem:[#allocation5 + $0xf2c] sm:$0xf]  ;;  %v13463_v40 = vor.u32 %v14689_v10, %v13460_v44  ;;  %v14688_v54 = vld [vmem:[#allocation5 + $0xf14] sm:$0xf0] }
 0xb21   :  { %v8198_v13 = vpop.f32.mrf.mxu3  ;;  %v13471_v14 = vor.u32 %v14690_v27, %v13468_v25 }
 0xb22   :  { %9214 = vmatpush.bf16.msrb.mxu1 %v13419_v19  ;;  %v18105_v51 = vadd.f32 %v8198_v13, %v18087_v57  ;;  %v7959_v42 = vpop.f32.mrf.mxu1  ;;  %v13339_v57 = vor.u32 %v14660_v55, %v13338_v35  ;;  %v14686_v19 = vld [vmem:[#allocation5 + $0xf0c] sm:$0xf]  ;;  %v13450_v13 = vld [vmem:[#allocation5 + $0xf08] sm:$0xf] }
 0xb23   :  { %9455 = vmatpush.bf16.msra.mxu3 %v13543_v29  ;;  %v13452_v29 = vld [vmem:[#allocation5 + $0xf18] sm:$0xf0] }
 0xb24   :  { %9481 = vmatpush.bf16.msrb.mxu0 %v13551_v28  ;;  %v8439_v6 = vpop.f32.mrf.mxu2  ;;  %v8226_v24 = vpop.f32.mrf.mxu0  ;;  %v13455_v8 = vor.u32 %v14686_v19, %v13452_v29 }
 0xb25   :  { %v18108_v5 = vadd.f32 %v8439_v6, %v18090_v20  ;;  %v13322_v20 = vld [vmem:[#allocation5 + $0xe08] sm:$0xf]  ;;  %v13451_v6 = vor.u32 %v14688_v54, %v13450_v13 }
 0xb26   :  { %9215 = vmatpush.bf16.msrb.mxu1 %v13403_v12  ;;  %v13323_v15 = vor.u32 %v14656_v32, %v13322_v20  ;;  %v13563_v12 = vor.u32 %v14716_v39, %v13562_v43 }
 0xb27   :  { %9456 = vmatpush.bf16.msra.mxu3 %v13527_v26  ;;  %v13546_v26 = vld [vmem:[#allocation5 + $0xfc8] sm:$0xf] }
 0xb28   :  { %9482 = vmatpush.bf16.msrb.mxu0 %v13535_v2  ;;  %v14712_v2 = vld [vmem:[#allocation5 + $0xfd4] sm:$0xf0] }
 0xb29   :  { %v8200_v28 = vpop.f32.mrf.mxu3  ;;  %v13547_v21 = vor.u32 %v14712_v2, %v13546_v26 }
 0xb2a   :  { %9216 = vmatpush.bf16.msrb.mxu1 %v13387_v37 }
 0xb2b   :  { %9457 = vmatpush.bf16.msra.mxu3 %v13511_v4  ;;  %v13515_v4 = vor.u32 %v14704_v61, %v13514_v63 }
 0xb2c   :  { %9483 = vmatpush.bf16.msrb.mxu0 %v13519_v45  ;;  %v8441_v30 = vpop.f32.mrf.mxu2 }
 0xb2e   :  { %9217 = vmatpush.bf16.msrb.mxu1 %v13371_v34 }
 0xb2f   :  { %9458 = vmatpush.bf16.msra.mxu3 %v13495_v3 }
 0xb30   :  { %9484 = vmatpush.bf16.msrb.mxu0 %v13503_v23 }
 0xb32   :  { %9218 = vmatpush.bf16.msrb.mxu1 %v13355_v7 }
 0xb33   :  { %9459 = vmatpush.bf16.msra.mxu3 %v13479_v62 }
 0xb34   :  { %9485 = vmatpush.bf16.msrb.mxu0 %v13487_v53 }
 0xb36   :  { %9219 = vmatpush.bf16.msrb.mxu1 %v13339_v57 }
 0xb37   :  { %9460 = vmatpush.bf16.msra.mxu3 %v13463_v40 }
 0xb38   :  { %9486 = vmatpush.bf16.msrb.mxu0 %v13471_v14 }
 0xb3a   :  { %9220 = vmatpush.bf16.msrb.mxu1 %v13323_v15  ;;  %v8211_v1 = vpop.f32.mrf.mxu1 }
 0xb3b   :  { %9461 = vmatpush.bf16.msra.mxu3 %v13447_v38  ;;  %v8230_v36 = vadd.f32 %v8211_v1, %v18099_v48  ;;  %v9497_v1 = vld [vmem:[#allocation23] sm:$0xf] }
 0xb3c   :  { %9487 = vmatpush.bf16.msrb.mxu0 %v13455_v8  ;;  %v8478_v37 = vpop.f32.mrf.mxu0  ;;  %v9502_v33 = vperm.slane %v9497_v1, 3 }
 0xb3d   :  { %9221 = vmatmul.bf16.vlgmr.msrb.gmra.mxu1 %v18074_v0  ;;  %v8485_v45 = vadd.f32 %v8478_v37, %v18102_v52  ;;  %v14700_v0 = vld [vmem:[#allocation5 + $0xf74] sm:$0xf0]  ;;  %v13467_v52 = vor.u32 %v14692_v22, %v13466_v31  ;;  %v9500_v37 = vperm.slane %v9497_v1, 1 }
 0xb3e   :  { %9467 = vmatpush.bf16.msra.mxu1 %v13563_v12  ;;  %9462 = vmatmul.bf16.vlgmr.msra.gmra.mxu3 %v18092_v41  ;;  %v13499_v56 = vor.u32 %v14700_v0, %v13498_v47 }
 0xb3f   :  { %9488 = vmatmul.bf16.vlgmr.msrb.gmra.mxu0 %v18092_v41 }
 0xb41   :  { %v8452_v11 = vpop.f32.mrf.mxu3 }
 0xb42   :  { %9468 = vmatpush.bf16.msra.mxu1 %v13547_v21  ;;  %v8483_v18 = vadd.f32 %v8452_v11, %v18105_v51  ;;  %v8213_v3 = vpop.f32.mrf.mxu1 }
 0xb44   :  { %v8688_v34 = vpop.f32.mrf.mxu2  ;;  %v8480_v48 = vpop.f32.mrf.mxu0 }
 0xb45   :  { %v8731_v23 = vadd.f32 %v8688_v34, %v18108_v5  ;;  %v9501_v34 = vperm.slane %v9497_v1, 2 }
 0xb46   :  { %9469 = vmatpush.bf16.msra.mxu1 %v13531_v59 }
 0xb49   :  { %v8454_v50 = vpop.f32.mrf.mxu3 }
 0xb4a   :  { %9470 = vmatpush.bf16.msra.mxu1 %v13515_v4 }
 0xb4c   :  { %v8690_v60 = vpop.f32.mrf.mxu2 }
 0xb4e   :  { %9471 = vmatpush.bf16.msra.mxu1 %v13499_v56 }
 0xb52   :  { %9472 = vmatpush.bf16.msra.mxu1 %v13483_v46 }
 0xb56   :  { %9473 = vmatpush.bf16.msra.mxu1 %v13467_v52 }
 0xb5a   :  { %9474 = vmatpush.bf16.msra.mxu1 %v13451_v6  ;;  %v8465_v51 = vpop.f32.mrf.mxu1 }
 0xb5b   :  { %v8484_v42 = vadd.f32 %v8465_v51, %v8230_v36  ;;  %v15335_v51 = vmov 512.0  }
 0xb5c   :  { %v8727_v7 = vpop.f32.mrf.mxu0  ;;  %14928 = vrcp.f32 %v15335_v51 }
 0xb5d   :  { %9475 = vmatmul.bf16.vlgmr.msra.gmra.mxu1 %v18092_v41  ;;  %v8734_v24 = vadd.f32 %v8727_v7, %v8485_v45  ;;  %v9499_v45 = vperm.slane %v9497_v1, 0 }
 0xb61   :  { %v8701_v5 = vpop.f32.mrf.mxu3 }
 0xb62   :  { %v8732_v62 = vadd.f32 %v8701_v5, %v8483_v18  ;;  %v8467_v35 = vpop.f32.mrf.mxu1 }
 0xb64   :  { %v8942_v53 = vpop.f32.mrf.mxu2  ;;  %v8729_v10 = vpop.f32.mrf.mxu0 }
 0xb65   :  { %v8985_v55 = vadd.f32 %v8942_v53, %v8731_v23 }
 0xb69   :  { %v8703_v44 = vpop.f32.mrf.mxu3 }
 0xb6c   :  { %v8944_v27 = vpop.f32.mrf.mxu2 }
 0xb7a   :  { %v8714_v25 = vpop.f32.mrf.mxu1 }
 0xb7b   :  { %v8733_v57 = vadd.f32 %v8714_v25, %v8484_v42  ;;  %v14929_v42 = vpop.eup %14928 }
 0xb7c   :  { %v8981_v40 = vpop.f32.mrf.mxu0  ;;  %v9522_v7 = vmul.f32 512.0, %v14929_v42  ;;  %vm9526_vm1 = vweird.f32 %v14929_v42 }
 0xb7d   :  { %v8988_v14 = vadd.f32 %v8981_v40, %v8734_v24 }
 0xb7e   :  { %v9523_v24 = vsub.f32 1.0, %v9522_v7 }
 0xb80   :  { %v9524_v5 = vmul.f32 %v14929_v42, %v9523_v24 }
 0xb81   :  { %v8955_v20 = vpop.f32.mrf.mxu3 }
 0xb82   :  { %v8986_v32 = vadd.f32 %v8955_v20, %v8732_v62  ;;  %v8716_v41 = vpop.f32.mrf.mxu1  ;;  %v9525_v62 = vadd.f32 %v14929_v42, %v9524_v5 }
 0xb84   :  { %v9196_v49 = vpop.f32.mrf.mxu2  ;;  %v8983_v19 = vpop.f32.mrf.mxu0  ;;  %v9527_v53 = vsel %vm9526_vm1, %v14929_v42, %v9525_v62 }
 0xb85   :  { %v9239_v17 = vadd.f32 %v9196_v49, %v8985_v55 }
 0xb89   :  { %v8957_v29 = vpop.f32.mrf.mxu3 }
 0xb8c   :  { %v9198_v28 = vpop.f32.mrf.mxu2 }
 0xb9a   :  { %v8968_v43 = vpop.f32.mrf.mxu1 }
 0xb9b   :  { %v8987_v47 = vadd.f32 %v8968_v43, %v8733_v57 }
 0xb9c   :  { %v9235_v39 = vpop.f32.mrf.mxu0 }
 0xb9d   :  { %v9242_v0 = vadd.f32 %v9235_v39, %v8988_v14 }
 0xba1   :  { %v9209_v30 = vpop.f32.mrf.mxu3 }
 0xba2   :  { %v8970_v38 = vpop.f32.mrf.mxu1  ;;  %v9240_v61 = vadd.f32 %v9209_v30, %v8986_v32 }
 0xba3   :  { %v9450_v15 = vpop.f32.mrf.mxu2 }
 0xba4   :  { %v9237_v8 = vpop.f32.mrf.mxu0  ;;  %v9493_v4 = vadd.f32 %v9450_v15, %v9239_v17 }
 0xba6   :  { %v9507_v58 = vadd.f32 %v9499_v45, %v9493_v4 }
 0xba8   :  { %v9512_v48 = vsel %vm9511_vm4, %v9507_v58, 0.0 }
 0xba9   :  { %v9211_v12 = vpop.f32.mrf.mxu3 }
 0xbab   :  { %v9452_v26 = vpop.f32.mrf.mxu2 }
 0xbac   :  { %v9562_v26 = vld [vmem:[%s18225_s12] sm:$0xf] }
 0xbba   :  { %v9222_v2 = vpop.f32.mrf.mxu1 }
 0xbbb   :  { %v9241_v11 = vadd.f32 %v9222_v2, %v8987_v47  ;;  %v9576_v2 = vld [vmem:[%s18226_s13] sm:$0xf] }
 0xbbc   :  { %v9489_v21 = vpop.f32.mrf.mxu0  ;;  %v9578_v1 = vperm.slane %v9576_v2, 0  ;;  %v9581_v4 = vperm.slane %v9576_v2, 3 }
 0xbbd   :  { %v9496_v18 = vadd.f32 %v9489_v21, %v9242_v0 }
 0xbbf   :  { %v9510_v31 = vadd.f32 %v9502_v33, %v9496_v18 }
 0xbc1   :  { %v9463_v16 = vpop.f32.mrf.mxu3  ;;  %v9517_v50 = vsel %vm9511_vm4, %v9510_v31, 0.0 }
 0xbc2   :  { %v9224_v9 = vpop.f32.mrf.mxu1  ;;  %v9494_v36 = vadd.f32 %v9463_v16, %v9240_v61  ;;  %v9564_v16 = vperm.slane %v9562_v26, 0  ;;  %v9567_v61 = vperm.slane %v9562_v26, 3 }
 0xbc4   :  { %v9491_v59 = vpop.f32.mrf.mxu0  ;;  %v9508_v56 = vadd.f32 %v9500_v37, %v9494_v36  ;;  %v9579_v36 = vperm.slane %v9576_v2, 1  ;;  %v9580_v37 = vperm.slane %v9576_v2, 2 }
 0xbc5   :  { %v9565_v59 = vperm.slane %v9562_v26, 1 }
 0xbc6   :  { %v9513_v23 = vsel %vm9511_vm4, %v9508_v56, 0.0 }
 0xbc7   :  { %v9514_v52 = vadd.f32 %v9513_v23, %v9512_v48 }
 0xbc9   :  { %v9465_v63 = vpop.f32.mrf.mxu3 }
 0xbca   :  { %v9566_v63 = vperm.slane %v9562_v26, 2 }
 0xbda   :  { %v9476_v3 = vpop.f32.mrf.mxu1 }
 0xbdb   :  { %v9495_v46 = vadd.f32 %v9476_v3, %v9241_v11 }
 0xbdd   :  { %v9509_v22 = vadd.f32 %v9501_v34, %v9495_v46 }
 0xbdf   :  { %v9515_v13 = vsel %vm9511_vm4, %v9509_v22, 0.0 }
 0xbe0   :  { %v9516_v54 = vadd.f32 %v9515_v13, %v9514_v52 }
 0xbe2   :  { %v9478_v60 = vpop.f32.mrf.mxu1  ;;  %v9518_v6 = vadd.f32 %v9517_v50, %v9516_v54 }
 0xbe4   :  { %9519 = vadd.xlane.f32.xlu0 %v9518_v6 }
 0xc57   :  { %v9520_v35 = vpop.xlane.xlu0 %9519 }
 0xc58   :  { %v9528_v55 = vmul.f32 %v9527_v53, %v9520_v35 }
 0xc5a   :  { %v9529_v10 = vsub.f32 %v9507_v58, %v9528_v55  ;;  %v9530_v44 = vsub.f32 %v9508_v56, %v9528_v55  ;;  %v9531_v27 = vsub.f32 %v9509_v22, %v9528_v55  ;;  %v9532_v25 = vsub.f32 %v9510_v31, %v9528_v55 }
 0xc5c   :  { %v9533_v57 = vmul.f32 %v9529_v10, %v9529_v10  ;;  %v9534_v40 = vmul.f32 %v9530_v44, %v9530_v44  ;;  %v9535_v14 = vmul.f32 %v9531_v27, %v9531_v27  ;;  %v9536_v20 = vmul.f32 %v9532_v25, %v9532_v25 }
 0xc5e   :  { %v9537_v32 = vsel %vm9511_vm4, %v9533_v57, 0.0  ;;  %v9538_v49 = vsel %vm9511_vm4, %v9534_v40, 0.0  ;;  %v9540_v17 = vsel %vm9511_vm4, %v9535_v14, 0.0  ;;  %v9542_v29 = vsel %vm9511_vm4, %v9536_v20, 0.0 }
 0xc5f   :  { %v9539_v41 = vadd.f32 %v9538_v49, %v9537_v32 }
 0xc61   :  { %v9541_v19 = vadd.f32 %v9540_v17, %v9539_v41 }
 0xc63   :  { %v9543_v28 = vadd.f32 %v9542_v29, %v9541_v19 }
 0xc65   :  { %9544 = vadd.xlane.f32.xlu0 %v9543_v28 }
 0xcd8   :  { %v9545_v43 = vpop.xlane.xlu0 %9544 }
 0xcd9   :  { %v9546_v39 = vmul.f32 %v9545_v43, %v9527_v53 }
 0xcdb   :  { %v9547_v30 = vadd.f32 1e-05, %v9546_v39 }
 0xcdd   :  { %14930 = vrsqrt.f32 %v9547_v30  ;;  %vm9554_vm15 = vweird.f32 %v9547_v30 }
 0xce3   :  { %v14931_v15 = vpop.eup %14930 }
 0xce4   :  { %v9549_v38 = vmul.f32 %v14931_v15, %v9547_v30  ;;  %vm9555_vm6 = vweird.f32 %v14931_v15 }
 0xce5   :  { %vm9556_vm7 = vmor %vm9554_vm15, %vm9555_vm6 }
 0xce6   :  { %v9550_v8 = vmul.f32 %v14931_v15, %v9549_v38 }
 0xce8   :  { %v9551_v12 = vmul.f32 0.5, %v9550_v8 }
 0xcea   :  { %v9552_v21 = vsub.f32 1.5, %v9551_v12 }
 0xcec   :  { %v9553_v9 = vmul.f32 %v14931_v15, %v9552_v21 }
 0xcee   :  { %v9557_v45 = vsel %vm9556_vm7, %v14931_v15, %v9553_v9 }
 0xcef   :  { %v9558_v47 = vmul.f32 %v9557_v45, %v9529_v10  ;;  %v9559_v0 = vmul.f32 %v9557_v45, %v9530_v44  ;;  %v9560_v56 = vmul.f32 %v9557_v45, %v9531_v27  ;;  %v9561_v33 = vmul.f32 %v9557_v45, %v9532_v25 }
 0xcf1   :  { %v9572_v58 = vmul.f32 %v9564_v16, %v9558_v47  ;;  %v9573_v11 = vmul.f32 %v9565_v59, %v9559_v0  ;;  %v9574_v18 = vmul.f32 %v9566_v63, %v9560_v56  ;;  %v9575_v34 = vmul.f32 %v9567_v61, %v9561_v33 }
 0xcf3   :  { %v18132_v3 = vadd.f32 %v9578_v1, %v9572_v58  ;;  %v18134_v23 = vadd.f32 %v9579_v36, %v9573_v11  ;;  %v18136_v46 = vadd.f32 %v9580_v37, %v9574_v18  ;;  %v18138_v48 = vadd.f32 %v9581_v4, %v9575_v34 }
 0xcf5   :  { %v13568_v31 = vmul.f32 -1.442695, %v18132_v3  ;;  %v13569_v22 = vmul.f32 -1.442695, %v18134_v23  ;;  %v13570_v52 = vmul.f32 -1.442695, %v18136_v46 }
 0xcf6   :  { %v13571_v13 = vmul.f32 -1.442695, %v18138_v48 }
 0xcf7   :  { %14932 = vpow2.f32 %v13568_v31 }
 0xcf8   :  { %14934 = vpow2.f32 %v13569_v22 }
 0xcf9   :  { %14936 = vpow2.f32 %v13570_v52 }
 0xcfa   :  { %14938 = vpow2.f32 %v13571_v13 }
 0xcfd   :  { %v14933_v54 = vpop.eup %14932 }
 0xcfe   :  { %v14935_v50 = vpop.eup %14934  ;;  %v9602_v60 = vadd.f32 1.0, %v14933_v54 }
 0xcff   :  { %v14937_v6 = vpop.eup %14936  ;;  %v9603_v51 = vadd.f32 1.0, %v14935_v50 }
 0xd00   :  { %v14939_v42 = vpop.eup %14938  ;;  %v9604_v7 = vadd.f32 1.0, %v14937_v6  ;;  %14940 = vrcp.f32 %v9602_v60  ;;  %v9615_v5 = vand.u32 2147483647, %v9602_v60  ;;  %v9617_v62 = vand.u32 2147483648, %v9602_v60 }
 0xd01   :  { %v9605_v24 = vadd.f32 1.0, %v14939_v42  ;;  %14942 = vrcp.f32 %v9603_v51  ;;  %vm9611_vm10 = vweird.f32 %v9602_v60  ;;  %vm9626_vm5 = vweird.f32 %v9603_v51 }
 0xd02   :  { %14944 = vrcp.f32 %v9604_v7  ;;  %v9630_v27 = vand.u32 2147483647, %v9603_v51  ;;  %v9632_v25 = vand.u32 2147483648, %v9603_v51  ;;  %vm18144_vm2 = vcmp.eq.f32.partialorder %v9615_v5, 8.507059e+37 }
 0xd03   :  { %14946 = vrcp.f32 %v9605_v24  ;;  %v9618_v14 = vor.u32 1.1754944e-38, %v9617_v62  ;;  %vm9641_vm11 = vweird.f32 %v9604_v7  ;;  %v9645_v41 = vand.u32 2147483647, %v9604_v7 }
 0xd04   :  { %v9647_v17 = vand.u32 2147483648, %v9604_v7  ;;  %vm18148_vm8 = vcmp.eq.f32.partialorder %v9630_v27, 8.507059e+37  ;;  %v9633_v30 = vor.u32 1.1754944e-38, %v9632_v25  ;;  %vm9656_vm12 = vweird.f32 %v9605_v24 }
 0xd05   :  { %v9660_v26 = vand.u32 2147483647, %v9605_v24  ;;  %v9662_v2 = vand.u32 2147483648, %v9605_v24  ;;  %vm9646_vm15 = vcmp.eq.f32.partialorder %v9645_v41, 8.507059e+37 }
 0xd06   :  { %v14941_v53 = vpop.eup %14940  ;;  %v9648_v61 = vor.u32 1.1754944e-38, %v9647_v17 }
 0xd07   :  { %v14943_v35 = vpop.eup %14942  ;;  %v9607_v55 = vmul.f32 %v14941_v53, %v9602_v60  ;;  %vm9612_vm14 = vweird.f32 %v14941_v53  ;;  %v9663_v47 = vor.u32 1.1754944e-38, %v9662_v2 }
 0xd08   :  { %v14945_v10 = vpop.eup %14944  ;;  %v9622_v44 = vmul.f32 %v14943_v35, %v9603_v51  ;;  %vm9627_vm13 = vweird.f32 %v14943_v35  ;;  %vm9613_vm9 = vmor %vm9611_vm10, %vm9612_vm14  ;;  %vm9661_vm10 = vcmp.eq.f32.partialorder %v9660_v26, 8.507059e+37 }
 0xd09   :  { %v9608_v57 = vsub.f32 1.0, %v9607_v55  ;;  %v9637_v20 = vmul.f32 %v14945_v10, %v9604_v7  ;;  %v14947_v32 = vpop.eup %14946  ;;  %vm9642_vm3 = vweird.f32 %v14945_v10  ;;  %vm9628_vm0 = vmor %vm9626_vm5, %vm9627_vm13 }
 0xd0a   :  { %v9623_v49 = vsub.f32 1.0, %v9622_v44  ;;  %v9652_v28 = vmul.f32 %v14947_v32, %v9605_v24  ;;  %vm9657_vm1 = vweird.f32 %v14947_v32  ;;  %vm9643_vm6 = vmor %vm9641_vm11, %vm9642_vm3 }
 0xd0b   :  { %v9609_v19 = vmul.f32 %v14941_v53, %v9608_v57  ;;  %v9638_v29 = vsub.f32 1.0, %v9637_v20  ;;  %vm9658_vm7 = vmor %vm9656_vm12, %vm9657_vm1 }
 0xd0c   :  { %v9624_v43 = vmul.f32 %v14943_v35, %v9623_v49  ;;  %v9653_v8 = vsub.f32 1.0, %v9652_v28 }
 0xd0d   :  { %v9610_v15 = vadd.f32 %v14941_v53, %v9609_v19  ;;  %v9639_v38 = vmul.f32 %v14945_v10, %v9638_v29 }
 0xd0e   :  { %v9625_v12 = vadd.f32 %v14943_v35, %v9624_v43  ;;  %v9654_v9 = vmul.f32 %v14947_v32, %v9653_v8 }
 0xd0f   :  { %v9614_v21 = vsel %vm9613_vm9, %v14941_v53, %v9610_v15  ;;  %v9640_v16 = vadd.f32 %v14945_v10, %v9639_v38 }
 0xd10   :  { %v9619_v59 = vsel %vm18144_vm2, %v9618_v14, %v9614_v21  ;;  %v9629_v63 = vsel %vm9628_vm0, %v14943_v35, %v9625_v12  ;;  %v9655_v37 = vadd.f32 %v14947_v32, %v9654_v9 }
 0xd11   :  { %v9634_v1 = vsel %vm18148_vm8, %v9633_v30, %v9629_v63  ;;  %v9644_v36 = vsel %vm9643_vm6, %v14945_v10, %v9640_v16  ;;  %v18160_v4 = vmul.f32 %v9619_v59, %v18132_v3 }
 0xd12   :  { %v9649_v45 = vsel %vm9646_vm15, %v9648_v61, %v9644_v36  ;;  %v18164_v0 = vmul.f32 %v9634_v1, %v18134_v23  ;;  %v9659_v56 = vsel %vm9658_vm7, %v14947_v32, %v9655_v37 }
 0xd13   :  { %v18167_v33 = vmul.f32 %v9649_v45, %v18136_v46  ;;  %v9664_v58 = vsel %vm9661_vm10, %v9663_v47, %v9659_v56 }
 0xd14   :  { %v18170_v11 = vmul.f32 %v9664_v58, %v18138_v48 }
 0xd15   :  { %15310 = dma.done.wait [#allocation7 + $0x1], 16384 }
 0xd16   :  { %15311 = vsyncadd [#allocation7 + $0x1], 4294950912  ;;  %v13686_v18 = vld [vmem:[#allocation6 + $0xe0] sm:$0xf]  ;;  %v14747_v34 = vld [vmem:[#allocation6 + $0xec] sm:$0xf0] }
 0xd17   :  { %v13814_v3 = vld [vmem:[#allocation6 + $0x1e0] sm:$0xf]  ;;  %v13687_v31 = vor.u32 %v14747_v34, %v13686_v18  ;;  %v14779_v22 = vld [vmem:[#allocation6 + $0x1ec] sm:$0xf0]  ;;  %vm10720_vm3 = vcmask 1045508   ;;  %s15336_s12 = smov [#allocation26]  }
 0xd18   :  { %v13942_v52 = vld [vmem:[#allocation6 + $0x2e0] sm:$0xf]  ;;  %v14811_v13 = vld [vmem:[#allocation6 + $0x2ec] sm:$0xf0]  ;;  %v13815_v23 = vor.u32 %v14779_v22, %v13814_v3  ;;  %s10730_s13 = sshll.u32 %s15336_s12, 4  ;;  %s10732_s24 = sshll.u32 %s18229_s16, 4  ;;  %s10731_s13 = int_to_ptr.vmem [resolvable:$true] %s10730_s13  ;;  %s10733_s24 = int_to_ptr.hbm [resolvable:$true] %s10732_s24 }
 0xd19   :  { %v13943_v54 = vor.u32 %v14811_v13, %v13942_v52  ;;  %v13670_v50 = vld [vmem:[#allocation6 + $0xc0] sm:$0xf]  ;;  %v14743_v60 = vld [vmem:[#allocation6 + $0xcc] sm:$0xf0]  ;;  %10456 = vmatpush.bf16.msra.mxu2 %v13687_v31  ;;  %vm18675_vm9 = vcmask 1043456  }
 0xd1a   :  { %v13798_v6 = vld [vmem:[#allocation6 + $0x1c0] sm:$0xf]  ;;  %v13671_v46 = vor.u32 %v14743_v60, %v13670_v50  ;;  %v14775_v51 = vld [vmem:[#allocation6 + $0x1cc] sm:$0xf0]  ;;  %10469 = vmatpush.bf16.msrb.mxu3 %v13815_v23 }
 0xd1b   :  { %v14070_v42 = vld [vmem:[#allocation6 + $0x3e0] sm:$0xf]  ;;  %v14843_v48 = vld [vmem:[#allocation6 + $0x3ec] sm:$0xf0]  ;;  %10482 = vmatpush.bf16.msrb.mxu1 %v13943_v54  ;;  %v13799_v7 = vor.u32 %v14775_v51, %v13798_v6 }
 0xd1c   :  { %v14071_v24 = vor.u32 %v14843_v48, %v14070_v42  ;;  %v13926_v5 = vld [vmem:[#allocation6 + $0x2c0] sm:$0xf]  ;;  %v14807_v62 = vld [vmem:[#allocation6 + $0x2cc] sm:$0xf0] }
 0xd1d   :  { %v13654_v53 = vld [vmem:[#allocation6 + $0xa0] sm:$0xf]  ;;  %v13927_v35 = vor.u32 %v14807_v62, %v13926_v5  ;;  %v14739_v55 = vld [vmem:[#allocation6 + $0xac] sm:$0xf0]  ;;  %10457 = vmatpush.bf16.msra.mxu2 %v13671_v46 }
 0xd1e   :  { %v13782_v10 = vld [vmem:[#allocation6 + $0x1a0] sm:$0xf]  ;;  %v14771_v44 = vld [vmem:[#allocation6 + $0x1ac] sm:$0xf0]  ;;  %10495 = vmatpush.bf16.msra.mxu0 %v14071_v24  ;;  %v13655_v40 = vor.u32 %v14739_v55, %v13654_v53  ;;  %10470 = vmatpush.bf16.msrb.mxu3 %v13799_v7 }
 0xd1f   :  { %v14054_v27 = vld [vmem:[#allocation6 + $0x3c0] sm:$0xf]  ;;  %v14839_v25 = vld [vmem:[#allocation6 + $0x3cc] sm:$0xf0]  ;;  %10483 = vmatpush.bf16.msrb.mxu1 %v13927_v35  ;;  %v13783_v41 = vor.u32 %v14771_v44, %v13782_v10 }
 0xd20   :  { %v13910_v57 = vld [vmem:[#allocation6 + $0x2a0] sm:$0xf]  ;;  %v14055_v14 = vor.u32 %v14839_v25, %v14054_v27  ;;  %v14803_v20 = vld [vmem:[#allocation6 + $0x2ac] sm:$0xf0] }
 0xd21   :  { %v13638_v32 = vld [vmem:[#allocation6 + $0x80] sm:$0xf]  ;;  %v14735_v49 = vld [vmem:[#allocation6 + $0x8c] sm:$0xf0]  ;;  %v13911_v17 = vor.u32 %v14803_v20, %v13910_v57  ;;  %10458 = vmatpush.bf16.msra.mxu2 %v13655_v40  ;;  %v14745_v57 = vld [vmem:[#allocation6 + $0xe4] sm:$0xf] }
 0xd22   :  { %v13766_v19 = vld [vmem:[#allocation6 + $0x180] sm:$0xf]  ;;  %v14767_v29 = vld [vmem:[#allocation6 + $0x18c] sm:$0xf0]  ;;  %10496 = vmatpush.bf16.msra.mxu0 %v14055_v14  ;;  %v13639_v38 = vor.u32 %v14735_v49, %v13638_v32  ;;  %10471 = vmatpush.bf16.msrb.mxu3 %v13783_v41  ;;  %v13688_v40 = vld [vmem:[#allocation6 + $0xf0] sm:$0xf0] }
 0xd23   :  { %v14038_v28 = vld [vmem:[#allocation6 + $0x3a0] sm:$0xf]  ;;  %v14835_v43 = vld [vmem:[#allocation6 + $0x3ac] sm:$0xf0]  ;;  %10484 = vmatpush.bf16.msrb.mxu1 %v13911_v17  ;;  %v13767_v26 = vor.u32 %v14767_v29, %v13766_v19  ;;  %v14777_v14 = vld [vmem:[#allocation6 + $0x1e4] sm:$0xf] }
 0xd24   :  { %v13894_v39 = vld [vmem:[#allocation6 + $0x280] sm:$0xf]  ;;  %v14799_v30 = vld [vmem:[#allocation6 + $0x28c] sm:$0xf0]  ;;  %v14039_v15 = vor.u32 %v14835_v43, %v14038_v28  ;;  %v13816_v20 = vld [vmem:[#allocation6 + $0x1f0] sm:$0xf0] }
 0xd25   :  { %v14022_v8 = vld [vmem:[#allocation6 + $0x380] sm:$0xf]  ;;  %v14831_v12 = vld [vmem:[#allocation6 + $0x38c] sm:$0xf0]  ;;  %v13895_v2 = vor.u32 %v14799_v30, %v13894_v39  ;;  %10459 = vmatpush.bf16.msra.mxu2 %v13639_v38  ;;  %v14809_v17 = vld [vmem:[#allocation6 + $0x2e4] sm:$0xf]  ;;  %v13691_v30 = vor.u32 %v14745_v57, %v13688_v40 }
 0xd26   :  { %v13622_v21 = vld [vmem:[#allocation6 + $0x60] sm:$0xf]  ;;  %v14731_v16 = vld [vmem:[#allocation6 + $0x6c] sm:$0xf0]  ;;  %10497 = vmatpush.bf16.msra.mxu0 %v14039_v15  ;;  %v14023_v1 = vor.u32 %v14831_v12, %v14022_v8  ;;  %10472 = vmatpush.bf16.msrb.mxu3 %v13767_v26  ;;  %v13944_v29 = vld [vmem:[#allocation6 + $0x2f0] sm:$0xf0]  ;;  %v13819_v8 = vor.u32 %v14777_v14, %v13816_v20 }
 0xd27   :  { %v13750_v9 = vld [vmem:[#allocation6 + $0x160] sm:$0xf]  ;;  %v14763_v59 = vld [vmem:[#allocation6 + $0x16c] sm:$0xf0]  ;;  %v13623_v36 = vor.u32 %v14731_v16, %v13622_v21  ;;  %10485 = vmatpush.bf16.msrb.mxu1 %v13895_v2  ;;  %v14841_v15 = vld [vmem:[#allocation6 + $0x3e4] sm:$0xf]  ;;  %v13947_v21 = vor.u32 %v14809_v17, %v13944_v29 }
 0xd28   :  { %v13878_v63 = vld [vmem:[#allocation6 + $0x260] sm:$0xf]  ;;  %v14795_v61 = vld [vmem:[#allocation6 + $0x26c] sm:$0xf0]  ;;  %v13751_v47 = vor.u32 %v14763_v59, %v13750_v9  ;;  %v14072_v38 = vld [vmem:[#allocation6 + $0x3f0] sm:$0xf0] }
 0xd29   :  { %v14006_v37 = vld [vmem:[#allocation6 + $0x360] sm:$0xf]  ;;  %v14827_v45 = vld [vmem:[#allocation6 + $0x36c] sm:$0xf0]  ;;  %v13879_v56 = vor.u32 %v14795_v61, %v13878_v63  ;;  %10460 = vmatpush.bf16.msra.mxu2 %v13623_v36  ;;  %v14741_v26 = vld [vmem:[#allocation6 + $0xc4] sm:$0xf]  ;;  %v14075_v63 = vor.u32 %v14841_v15, %v14072_v38  ;;  %v18174_v36 = vpack.c.bf16 %v18160_v4, %v18160_v4 }
 0xd2a   :  { %v13606_v58 = vld [vmem:[#allocation6 + $0x40] sm:$0xf]  ;;  %v14727_v18 = vld [vmem:[#allocation6 + $0x4c] sm:$0xf0]  ;;  %10498 = vmatpush.bf16.msra.mxu0 %v14023_v1  ;;  %v14007_v52 = vor.u32 %v14827_v45, %v14006_v37  ;;  %10473 = vmatpush.bf16.msrb.mxu3 %v13751_v47  ;;  %v13672_v2 = vld [vmem:[#allocation6 + $0xd0] sm:$0xf0] }
 0xd2b   :  { %v13734_v34 = vld [vmem:[#allocation6 + $0x140] sm:$0xf]  ;;  %v14759_v3 = vld [vmem:[#allocation6 + $0x14c] sm:$0xf0]  ;;  %v13607_v13 = vor.u32 %v14727_v18, %v13606_v58  ;;  %10486 = vmatpush.bf16.msrb.mxu1 %v13879_v56  ;;  %v14773_v9 = vld [vmem:[#allocation6 + $0x1c4] sm:$0xf]  ;;  %v13675_v37 = vor.u32 %v14741_v26, %v13672_v2  ;;  %v18178_v56 = vpack.c.bf16 %v18164_v0, %v18164_v0 }
 0xd2c   :  { %v13862_v31 = vld [vmem:[#allocation6 + $0x240] sm:$0xf]  ;;  %v14791_v22 = vld [vmem:[#allocation6 + $0x24c] sm:$0xf0]  ;;  %v13735_v50 = vor.u32 %v14759_v3, %v13734_v34  ;;  %v13800_v59 = vld [vmem:[#allocation6 + $0x1d0] sm:$0xf0]  ;;  %v18182_v3 = vpack.c.bf16 %v18167_v33, %v18167_v33 }
 0xd2d   :  { %v13990_v23 = vld [vmem:[#allocation6 + $0x340] sm:$0xf]  ;;  %v14823_v54 = vld [vmem:[#allocation6 + $0x34c] sm:$0xf0]  ;;  %v13863_v60 = vor.u32 %v14791_v22, %v13862_v31  ;;  %10461 = vmatpush.bf16.msra.mxu2 %v13607_v13  ;;  %v14805_v61 = vld [vmem:[#allocation6 + $0x2c4] sm:$0xf]  ;;  %v13803_v58 = vor.u32 %v14773_v9, %v13800_v59 }
 0xd2e   :  { %v13590_v6 = vld [vmem:[#allocation6 + $0x20] sm:$0xf]  ;;  %v14723_v46 = vld [vmem:[#allocation6 + $0x2c] sm:$0xf0]  ;;  %10499 = vmatpush.bf16.msra.mxu0 %v14007_v52  ;;  %v13991_v24 = vor.u32 %v14823_v54, %v13990_v23  ;;  %10474 = vmatpush.bf16.msrb.mxu3 %v13735_v50  ;;  %v13928_v1 = vld [vmem:[#allocation6 + $0x2d0] sm:$0xf0]  ;;  %v18186_v52 = vpack.c.bf16 %v18170_v11, %v18170_v11 }
 0xd2f   :  { %v13718_v51 = vld [vmem:[#allocation6 + $0x120] sm:$0xf]  ;;  %v14755_v42 = vld [vmem:[#allocation6 + $0x12c] sm:$0xf0]  ;;  %v13591_v62 = vor.u32 %v14723_v46, %v13590_v6  ;;  %10487 = vmatpush.bf16.msrb.mxu1 %v13863_v60  ;;  %v14837_v45 = vld [vmem:[#allocation6 + $0x3c4] sm:$0xf]  ;;  %v13931_v4 = vor.u32 %v14805_v61, %v13928_v1 }
 0xd30   :  { %v13846_v48 = vld [vmem:[#allocation6 + $0x220] sm:$0xf]  ;;  %v14787_v7 = vld [vmem:[#allocation6 + $0x22c] sm:$0xf0]  ;;  %v13719_v10 = vor.u32 %v14755_v42, %v13718_v51  ;;  %v14056_v47 = vld [vmem:[#allocation6 + $0x3d0] sm:$0xf0] }
 0xd31   :  { %v13574_v5 = vld [vmem:[#allocation6] sm:$0xf]  ;;  %v14719_v53 = vld [vmem:[#allocation6 + $0xc] sm:$0xf0]  ;;  %v13847_v44 = vor.u32 %v14787_v7, %v13846_v48  ;;  %10462 = vmatpush.bf16.msra.mxu2 %v13591_v62  ;;  %v14737_v18 = vld [vmem:[#allocation6 + $0xa4] sm:$0xf]  ;;  %v14059_v0 = vor.u32 %v14837_v45, %v14056_v47 }
 0xd32   :  { %v13974_v35 = vld [vmem:[#allocation6 + $0x320] sm:$0xf]  ;;  %v14819_v55 = vld [vmem:[#allocation6 + $0x32c] sm:$0xf0]  ;;  %10500 = vmatpush.bf16.msra.mxu0 %v13991_v24  ;;  %v13575_v19 = vor.u32 %v14719_v53, %v13574_v5  ;;  %10475 = vmatpush.bf16.msrb.mxu3 %v13719_v10  ;;  %v13656_v34 = vld [vmem:[#allocation6 + $0xb0] sm:$0xf0] }
 0xd33   :  { %v13702_v27 = vld [vmem:[#allocation6 + $0x100] sm:$0xf]  ;;  %v14751_v25 = vld [vmem:[#allocation6 + $0x10c] sm:$0xf0]  ;;  %v13975_v32 = vor.u32 %v14819_v55, %v13974_v35  ;;  %10488 = vmatpush.bf16.msrb.mxu1 %v13847_v44  ;;  %v14769_v31 = vld [vmem:[#allocation6 + $0x1a4] sm:$0xf]  ;;  %v13659_v54 = vor.u32 %v14737_v18, %v13656_v34 }
 0xd34   :  { %v13830_v49 = vld [vmem:[#allocation6 + $0x200] sm:$0xf]  ;;  %v14783_v41 = vld [vmem:[#allocation6 + $0x20c] sm:$0xf0]  ;;  %v13703_v39 = vor.u32 %v14751_v25, %v13702_v27  ;;  %v13784_v22 = vld [vmem:[#allocation6 + $0x1b0] sm:$0xf0] }
 0xd35   :  { %v13958_v28 = vld [vmem:[#allocation6 + $0x300] sm:$0xf]  ;;  %v14815_v43 = vld [vmem:[#allocation6 + $0x30c] sm:$0xf0]  ;;  %v13831_v12 = vor.u32 %v14783_v41, %v13830_v49  ;;  %10463 = vmatpush.bf16.msra.mxu2 %v13575_v19  ;;  %v14801_v13 = vld [vmem:[#allocation6 + $0x2a4] sm:$0xf]  ;;  %v13787_v60 = vor.u32 %v14769_v31, %v13784_v22 }
 0xd36   :  { %10501 = vmatpush.bf16.msra.mxu0 %v13975_v32  ;;  %v13959_v16 = vor.u32 %v14815_v43, %v13958_v28  ;;  %10476 = vmatpush.bf16.msrb.mxu3 %v13703_v39  ;;  %v13912_v23 = vld [vmem:[#allocation6 + $0x2b0] sm:$0xf0]  ;;  %v14833_v50 = vld [vmem:[#allocation6 + $0x3a4] sm:$0xf] }
 0xd37   :  { %10489 = vmatpush.bf16.msrb.mxu1 %v13831_v12  ;;  %v14040_v33 = vld [vmem:[#allocation6 + $0x3b0] sm:$0xf0]  ;;  %v14733_v6 = vld [vmem:[#allocation6 + $0x84] sm:$0xf]  ;;  %v13915_v11 = vor.u32 %v14801_v13, %v13912_v23  ;;  %v14748_v13 = vld [vmem:[#allocation6 + $0xf4] sm:$0xf0] }
 0xd38   :  { %10464 = vmatmul.bf16.vlgmr.msra.gmra.mxu2 %v18174_v36  ;;  %v13640_v46 = vld [vmem:[#allocation6 + $0x90] sm:$0xf0]  ;;  %v14765_v51 = vld [vmem:[#allocation6 + $0x184] sm:$0xf]  ;;  %v14043_v48 = vor.u32 %v14833_v50, %v14040_v33  ;;  %v13822_v23 = vld [vmem:[#allocation6 + $0x1e8] sm:$0xf] }
 0xd39   :  { %10508 = vmatpush.bf16.msrb.mxu2 %v13691_v30  ;;  %10477 = vmatmul.bf16.vlgmr.msrb.gmra.mxu3 %v18178_v56  ;;  %v13768_v42 = vld [vmem:[#allocation6 + $0x190] sm:$0xf0]  ;;  %v14797_v7 = vld [vmem:[#allocation6 + $0x284] sm:$0xf]  ;;  %v13643_v5 = vor.u32 %v14733_v6, %v13640_v46  ;;  %v14780_v50 = vld [vmem:[#allocation6 + $0x1f4] sm:$0xf0] }
 0xd3a   :  { %10521 = vmatpush.bf16.msra.mxu3 %v13819_v8  ;;  %10502 = vmatpush.bf16.msra.mxu0 %v13959_v16  ;;  %v13896_v24 = vld [vmem:[#allocation6 + $0x290] sm:$0xf0]  ;;  %v14829_v62 = vld [vmem:[#allocation6 + $0x384] sm:$0xf]  ;;  %v13771_v35 = vor.u32 %v14765_v51, %v13768_v42  ;;  %v13950_v46 = vld [vmem:[#allocation6 + $0x2e8] sm:$0xf] }
 0xd3b   :  { %10534 = vmatpush.bf16.msra.mxu1 %v13947_v21  ;;  %v14024_v53 = vld [vmem:[#allocation6 + $0x390] sm:$0xf0]  ;;  %v14729_v55 = vld [vmem:[#allocation6 + $0x64] sm:$0xf]  ;;  %v13899_v44 = vor.u32 %v14797_v7, %v13896_v24  ;;  %v13678_v24 = vld [vmem:[#allocation6 + $0xc8] sm:$0xf] }
 0xd3c   :  { %10490 = vmatmul.bf16.vlgmr.msrb.gmra.mxu1 %v18182_v3  ;;  %v13624_v10 = vld [vmem:[#allocation6 + $0x70] sm:$0xf0]  ;;  %v14761_v27 = vld [vmem:[#allocation6 + $0x164] sm:$0xf]  ;;  %v14027_v57 = vor.u32 %v14829_v62, %v14024_v53  ;;  %v14744_v53 = vld [vmem:[#allocation6 + $0xd4] sm:$0xf0] }
 0xd3d   :  { %10509 = vmatpush.bf16.msrb.mxu2 %v13675_v37  ;;  %10503 = vmatmul.bf16.vlgmr.msra.gmra.mxu0 %v18186_v52  ;;  %v13752_v25 = vld [vmem:[#allocation6 + $0x170] sm:$0xf0]  ;;  %v14793_v40 = vld [vmem:[#allocation6 + $0x264] sm:$0xf]  ;;  %v13627_v20 = vor.u32 %v14729_v55, %v13624_v10  ;;  %v14844_v55 = vld [vmem:[#allocation6 + $0x3f4] sm:$0xf0] }
 0xd3e   :  { %10547 = vmatpush.bf16.msrb.mxu0 %v14075_v63  ;;  %10522 = vmatpush.bf16.msra.mxu3 %v13803_v58  ;;  %v13880_v14 = vld [vmem:[#allocation6 + $0x270] sm:$0xf0]  ;;  %v14825_v32 = vld [vmem:[#allocation6 + $0x364] sm:$0xf]  ;;  %v13755_v41 = vor.u32 %v14761_v27, %v13752_v25  ;;  %v14776_v27 = vld [vmem:[#allocation6 + $0x1d4] sm:$0xf0] }
 0xd3f   :  { %10535 = vmatpush.bf16.msra.mxu1 %v13931_v4  ;;  %v14008_v49 = vld [vmem:[#allocation6 + $0x370] sm:$0xf0]  ;;  %v14725_v17 = vld [vmem:[#allocation6 + $0x44] sm:$0xf]  ;;  %v13883_v29 = vor.u32 %v14793_v40, %v13880_v14  ;;  %v14808_v40 = vld [vmem:[#allocation6 + $0x2d4] sm:$0xf0]  ;;  %v13679_v14 = vor.u32 %v14744_v53, %v13678_v24 }
 0xd40   :  { %v13608_v19 = vld [vmem:[#allocation6 + $0x50] sm:$0xf0]  ;;  %v14757_v28 = vld [vmem:[#allocation6 + $0x144] sm:$0xf]  ;;  %v14011_v39 = vor.u32 %v14825_v32, %v14008_v49  ;;  %v13662_v32 = vld [vmem:[#allocation6 + $0xa8] sm:$0xf] }
 0xd41   :  { %10510 = vmatpush.bf16.msrb.mxu2 %v13659_v54  ;;  %v13736_v43 = vld [vmem:[#allocation6 + $0x150] sm:$0xf0]  ;;  %v14789_v30 = vld [vmem:[#allocation6 + $0x244] sm:$0xf]  ;;  %v13611_v38 = vor.u32 %v14725_v17, %v13608_v19  ;;  %v14062_v17 = vld [vmem:[#allocation6 + $0x3c8] sm:$0xf] }
 0xd42   :  { %10548 = vmatpush.bf16.msrb.mxu0 %v14059_v0  ;;  %10523 = vmatpush.bf16.msra.mxu3 %v13787_v60  ;;  %v13864_v15 = vld [vmem:[#allocation6 + $0x250] sm:$0xf0]  ;;  %v14821_v8 = vld [vmem:[#allocation6 + $0x344] sm:$0xf]  ;;  %v13739_v26 = vor.u32 %v14757_v28, %v13736_v43  ;;  %v13694_v0 = vld [vmem:[#allocation6 + $0xe8] sm:$0xf] }
 0xd43   :  { %10536 = vmatpush.bf16.msra.mxu1 %v13915_v11  ;;  %v13992_v12 = vld [vmem:[#allocation6 + $0x350] sm:$0xf0]  ;;  %v14721_v2 = vld [vmem:[#allocation6 + $0x24] sm:$0xf]  ;;  %v13867_v16 = vor.u32 %v14789_v30, %v13864_v15  ;;  %v14812_v11 = vld [vmem:[#allocation6 + $0x2f4] sm:$0xf0]  ;;  %v13695_v42 = vor.u32 %v14748_v13, %v13694_v0 }
 0xd44   :  { %v13592_v21 = vld [vmem:[#allocation6 + $0x30] sm:$0xf0]  ;;  %v14753_v9 = vld [vmem:[#allocation6 + $0x124] sm:$0xf]  ;;  %v13995_v63 = vor.u32 %v14821_v8, %v13992_v12  ;;  %v13951_v10 = vor.u32 %v14812_v11, %v13950_v46  ;;  %v14840_v19 = vld [vmem:[#allocation6 + $0x3d4] sm:$0xf0] }
 0xd45   :  { %10511 = vmatpush.bf16.msrb.mxu2 %v13643_v5  ;;  %v13720_v59 = vld [vmem:[#allocation6 + $0x130] sm:$0xf0]  ;;  %v14785_v61 = vld [vmem:[#allocation6 + $0x224] sm:$0xf]  ;;  %v13595_v37 = vor.u32 %v14721_v2, %v13592_v21  ;;  %v13823_v5 = vor.u32 %v14780_v50, %v13822_v23  ;;  %v13790_v28 = vld [vmem:[#allocation6 + $0x1a8] sm:$0xf] }
 0xd46   :  { %10549 = vmatpush.bf16.msrb.mxu0 %v14043_v48  ;;  %10524 = vmatpush.bf16.msra.mxu3 %v13771_v35  ;;  %v13848_v1 = vld [vmem:[#allocation6 + $0x230] sm:$0xf0]  ;;  %v14717_v45 = vld [vmem:[#allocation6 + $0x4] sm:$0xf]  ;;  %v13723_v18 = vor.u32 %v14753_v9, %v13720_v59  ;;  %v14078_v35 = vld [vmem:[#allocation6 + $0x3e8] sm:$0xf] }
 0xd47   :  { %10537 = vmatpush.bf16.msra.mxu1 %v13899_v44  ;;  %v14817_v47 = vld [vmem:[#allocation6 + $0x324] sm:$0xf]  ;;  %v13976_v58 = vld [vmem:[#allocation6 + $0x330] sm:$0xf0]  ;;  %v13851_v22 = vor.u32 %v14785_v61, %v13848_v1  ;;  %v13806_v44 = vld [vmem:[#allocation6 + $0x1c8] sm:$0xf] }
 0xd48   :  { %v13576_v34 = vld [vmem:[#allocation6 + $0x10] sm:$0xf0]  ;;  %v14749_v4 = vld [vmem:[#allocation6 + $0x104] sm:$0xf]  ;;  %v13979_v54 = vor.u32 %v14817_v47, %v13976_v58  ;;  %v13807_v49 = vor.u32 %v14776_v27, %v13806_v44  ;;  %v14772_v43 = vld [vmem:[#allocation6 + $0x1b4] sm:$0xf0] }
 0xd49   :  { %10512 = vmatpush.bf16.msrb.mxu2 %v13627_v20  ;;  %v13704_v31 = vld [vmem:[#allocation6 + $0x110] sm:$0xf0]  ;;  %v14781_v33 = vld [vmem:[#allocation6 + $0x204] sm:$0xf]  ;;  %v13579_v6 = vor.u32 %v14717_v45, %v13576_v34  ;;  %v14079_v20 = vor.u32 %v14844_v55, %v14078_v35  ;;  %v14804_v30 = vld [vmem:[#allocation6 + $0x2b4] sm:$0xf0]  ;;  %v13791_v12 = vor.u32 %v14772_v43, %v13790_v28 }
 0xd4a   :  { %10550 = vmatpush.bf16.msrb.mxu0 %v14027_v57  ;;  %10525 = vmatpush.bf16.msra.mxu3 %v13755_v41  ;;  %v13832_v60 = vld [vmem:[#allocation6 + $0x210] sm:$0xf0]  ;;  %v13707_v51 = vor.u32 %v14749_v4, %v13704_v31  ;;  %v14813_v48 = vld [vmem:[#allocation6 + $0x304] sm:$0xf]  ;;  %v13934_v57 = vld [vmem:[#allocation6 + $0x2c8] sm:$0xf] }
 0xd4b   :  { %10538 = vmatpush.bf16.msra.mxu1 %v13883_v29  ;;  %v13960_v7 = vld [vmem:[#allocation6 + $0x310] sm:$0xf0]  ;;  %v13835_v62 = vor.u32 %v14781_v33, %v13832_v60  ;;  %v14740_v41 = vld [vmem:[#allocation6 + $0xb4] sm:$0xf0]  ;;  %v13935_v29 = vor.u32 %v14808_v40, %v13934_v57  ;;  %v13646_v8 = vld [vmem:[#allocation6 + $0x88] sm:$0xf] }
 0xd4c   :  { %v13963_v25 = vor.u32 %v14813_v48, %v13960_v7  ;;  %v13663_v15 = vor.u32 %v14740_v41, %v13662_v32  ;;  %v14046_v2 = vld [vmem:[#allocation6 + $0x3a8] sm:$0xf]  ;;  %v14836_v21 = vld [vmem:[#allocation6 + $0x3b4] sm:$0xf0] }
 0xd4d   :  { %10513 = vmatpush.bf16.msrb.mxu2 %v13611_v38  ;;  %v14063_v38 = vor.u32 %v14840_v19, %v14062_v17  ;;  %v13774_v9 = vld [vmem:[#allocation6 + $0x188] sm:$0xf]  ;;  %v14768_v59 = vld [vmem:[#allocation6 + $0x194] sm:$0xf0] }
 0xd4e   :  { %10551 = vmatpush.bf16.msrb.mxu0 %v14011_v39  ;;  %10526 = vmatpush.bf16.msra.mxu3 %v13739_v26  ;;  %v13918_v39 = vld [vmem:[#allocation6 + $0x2a8] sm:$0xf]  ;;  %v14736_v26 = vld [vmem:[#allocation6 + $0x94] sm:$0xf0]  ;;  %v13775_v47 = vor.u32 %v14768_v59, %v13774_v9 }
 0xd4f   :  { %10539 = vmatpush.bf16.msra.mxu1 %v13867_v16  ;;  %v13919_v16 = vor.u32 %v14804_v30, %v13918_v39  ;;  %v14800_v61 = vld [vmem:[#allocation6 + $0x294] sm:$0xf0]  ;;  %v13647_v1 = vor.u32 %v14736_v26, %v13646_v8  ;;  %v13630_v45 = vld [vmem:[#allocation6 + $0x68] sm:$0xf]  ;;  %v14746_v39 = vld [vmem:[#allocation6 + $0xec] sm:$0xf] }
 0xd50   :  { %v14732_v58 = vld [vmem:[#allocation6 + $0x74] sm:$0xf0]  ;;  %v13758_v31 = vld [vmem:[#allocation6 + $0x168] sm:$0xf]  ;;  %v13696_v30 = vld [vmem:[#allocation6 + $0xf8] sm:$0xf0] }
 0xd51   :  { %10514 = vmatpush.bf16.msrb.mxu2 %v13595_v37  ;;  %v14047_v37 = vor.u32 %v14836_v21, %v14046_v2  ;;  %v14832_v34 = vld [vmem:[#allocation6 + $0x394] sm:$0xf0]  ;;  %v13886_v0 = vld [vmem:[#allocation6 + $0x268] sm:$0xf]  ;;  %v13631_v23 = vor.u32 %v14732_v58, %v13630_v45  ;;  %v14810_v21 = vld [vmem:[#allocation6 + $0x2ec] sm:$0xf]  ;;  %v13699_v59 = vor.u32 %v14746_v39, %v13696_v30 }
 0xd52   :  { %10552 = vmatpush.bf16.msrb.mxu0 %v13995_v63  ;;  %10527 = vmatpush.bf16.msra.mxu3 %v13723_v18  ;;  %v13902_v63 = vld [vmem:[#allocation6 + $0x288] sm:$0xf]  ;;  %v14796_v13 = vld [vmem:[#allocation6 + $0x274] sm:$0xf0]  ;;  %v14842_v58 = vld [vmem:[#allocation6 + $0x3ec] sm:$0xf] }
 0xd53   :  { %10540 = vmatpush.bf16.msra.mxu1 %v13851_v22  ;;  %v14030_v18 = vld [vmem:[#allocation6 + $0x388] sm:$0xf]  ;;  %v13903_v4 = vor.u32 %v14800_v61, %v13902_v63  ;;  %v14764_v22 = vld [vmem:[#allocation6 + $0x174] sm:$0xf0]  ;;  %v13887_v11 = vor.u32 %v14796_v13, %v13886_v0  ;;  %v14806_v0 = vld [vmem:[#allocation6 + $0x2cc] sm:$0xf] }
 0xd54   :  { %v13614_v50 = vld [vmem:[#allocation6 + $0x48] sm:$0xf]  ;;  %v13759_v33 = vor.u32 %v14764_v22, %v13758_v31  ;;  %v14728_v60 = vld [vmem:[#allocation6 + $0x54] sm:$0xf0]  ;;  %v13808_v31 = vld [vmem:[#allocation6 + $0x1d8] sm:$0xf0] }
 0xd55   :  { %10515 = vmatpush.bf16.msrb.mxu2 %v13579_v6  ;;  %v14014_v6 = vld [vmem:[#allocation6 + $0x368] sm:$0xf]  ;;  %v14828_v46 = vld [vmem:[#allocation6 + $0x374] sm:$0xf0]  ;;  %v13615_v24 = vor.u32 %v14728_v60, %v13614_v50  ;;  %v13936_v13 = vld [vmem:[#allocation6 + $0x2d8] sm:$0xf0] }
 0xd56   :  { %10553 = vmatpush.bf16.msrb.mxu0 %v13979_v54  ;;  %10528 = vmatpush.bf16.msra.mxu3 %v13707_v51  ;;  %v14031_v54 = vor.u32 %v14832_v34, %v14030_v18  ;;  %v13742_v51 = vld [vmem:[#allocation6 + $0x148] sm:$0xf]  ;;  %v14792_v7 = vld [vmem:[#allocation6 + $0x254] sm:$0xf0]  ;;  %v14080_v18 = vld [vmem:[#allocation6 + $0x3f8] sm:$0xf0] }
 0xd57   :  { %10541 = vmatpush.bf16.msra.mxu1 %v13835_v62  ;;  %v13870_v48 = vld [vmem:[#allocation6 + $0x248] sm:$0xf]  ;;  %v14724_v35 = vld [vmem:[#allocation6 + $0x34] sm:$0xf0]  ;;  %v14738_v50 = vld [vmem:[#allocation6 + $0xac] sm:$0xf] }
 0xd58   :  { %10516 = vmatmul.bf16.vlgmr.msrb.gmra.mxu2 %v18174_v36  ;;  %v13598_v62 = vld [vmem:[#allocation6 + $0x28] sm:$0xf]  ;;  %v13871_v44 = vor.u32 %v14792_v7, %v13870_v48  ;;  %v14788_v40 = vld [vmem:[#allocation6 + $0x234] sm:$0xf0]  ;;  %v13664_v60 = vld [vmem:[#allocation6 + $0xb8] sm:$0xf0] }
 0xd59   :  { %10560 = vmatpush.bf16.msra.mxu2 %v13695_v42  ;;  %10529 = vmatmul.bf16.vlgmr.msra.gmra.mxu3 %v18178_v56  ;;  %v14760_v42 = vld [vmem:[#allocation6 + $0x154] sm:$0xf0]  ;;  %v13998_v55 = vld [vmem:[#allocation6 + $0x348] sm:$0xf]  ;;  %v14802_v48 = vld [vmem:[#allocation6 + $0x2ac] sm:$0xf] }
 0xd5a   :  { %10573 = vmatpush.bf16.msrb.mxu3 %v13823_v5  ;;  %10554 = vmatpush.bf16.msrb.mxu0 %v13963_v25  ;;  %v14015_v5 = vor.u32 %v14828_v46, %v14014_v6  ;;  %v13743_v53 = vor.u32 %v14760_v42, %v13742_v51  ;;  %v13726_v27 = vld [vmem:[#allocation6 + $0x128] sm:$0xf]  ;;  %v14756_v25 = vld [vmem:[#allocation6 + $0x134] sm:$0xf0]  ;;  %v14838_v6 = vld [vmem:[#allocation6 + $0x3cc] sm:$0xf] }
 0xd5b   :  { %10586 = vmatpush.bf16.msrb.mxu1 %v13951_v10  ;;  %v14824_v10 = vld [vmem:[#allocation6 + $0x354] sm:$0xf0]  ;;  %v13854_v57 = vld [vmem:[#allocation6 + $0x228] sm:$0xf]  ;;  %v13727_v17 = vor.u32 %v14756_v25, %v13726_v27  ;;  %v14064_v46 = vld [vmem:[#allocation6 + $0x3d8] sm:$0xf0] }
 0xd5c   :  { %10542 = vmatmul.bf16.vlgmr.msra.gmra.mxu1 %v18182_v3  ;;  %v13582_v32 = vld [vmem:[#allocation6 + $0x8] sm:$0xf]  ;;  %v14752_v19 = vld [vmem:[#allocation6 + $0x114] sm:$0xf0]  ;;  %v13855_v43 = vor.u32 %v14788_v40, %v13854_v57  ;;  %v14770_v51 = vld [vmem:[#allocation6 + $0x1ac] sm:$0xf] }
 0xd5d   :  { %10561 = vmatpush.bf16.msra.mxu2 %v13679_v14  ;;  %10555 = vmatmul.bf16.vlgmr.msrb.gmra.mxu0 %v18186_v52  ;;  %v13599_v14 = vor.u32 %v14724_v35, %v13598_v62  ;;  %v13710_v41 = vld [vmem:[#allocation6 + $0x108] sm:$0xf]  ;;  %v14820_v28 = vld [vmem:[#allocation6 + $0x334] sm:$0xf0]  ;;  %v13792_v42 = vld [vmem:[#allocation6 + $0x1b8] sm:$0xf0] }
 0xd5e   :  { %10599 = vmatpush.bf16.msra.mxu0 %v14079_v20  ;;  %10574 = vmatpush.bf16.msrb.mxu3 %v13807_v49  ;;  %v13999_v20 = vor.u32 %v14824_v10, %v13998_v55  ;;  %v14720_v49 = vld [vmem:[#allocation6 + $0x14] sm:$0xf0]  ;;  %v13838_v8 = vld [vmem:[#allocation6 + $0x208] sm:$0xf]  ;;  %v13711_v9 = vor.u32 %v14752_v19, %v13710_v41  ;;  %v13920_v7 = vld [vmem:[#allocation6 + $0x2b8] sm:$0xf0] }
 0xd5f   :  { %10587 = vmatpush.bf16.msrb.mxu1 %v13935_v29  ;;  %v13982_v29 = vld [vmem:[#allocation6 + $0x328] sm:$0xf]  ;;  %v13583_v26 = vor.u32 %v14720_v49, %v13582_v32  ;;  %v14816_v61 = vld [vmem:[#allocation6 + $0x314] sm:$0xf0]  ;;  %v14734_v62 = vld [vmem:[#allocation6 + $0x8c] sm:$0xf] }
 0xd60   :  { %v13983_v2 = vor.u32 %v14820_v28, %v13982_v29  ;;  %v13966_v63 = vld [vmem:[#allocation6 + $0x308] sm:$0xf]  ;;  %v13648_v35 = vld [vmem:[#allocation6 + $0x98] sm:$0xf0]  ;;  %v14834_v55 = vld [vmem:[#allocation6 + $0x3ac] sm:$0xf] }
 0xd61   :  { %10562 = vmatpush.bf16.msra.mxu2 %v13663_v15  ;;  %v14778_v15 = vld [vmem:[#allocation6 + $0x1ec] sm:$0xf]  ;;  %v13967_v22 = vor.u32 %v14816_v61, %v13966_v63  ;;  %v14048_v10 = vld [vmem:[#allocation6 + $0x3b8] sm:$0xf0] }
 0xd62   :  { %10600 = vmatpush.bf16.msra.mxu0 %v14063_v38  ;;  %10575 = vmatpush.bf16.msrb.mxu3 %v13791_v12  ;;  %v13824_v38 = vld [vmem:[#allocation6 + $0x1f8] sm:$0xf0]  ;;  %v14784_v12 = vld [vmem:[#allocation6 + $0x214] sm:$0xf0]  ;;  %v14766_v27 = vld [vmem:[#allocation6 + $0x18c] sm:$0xf] }
 0xd63   :  { %10588 = vmatpush.bf16.msrb.mxu1 %v13919_v16  ;;  %v13952_v16 = vld [vmem:[#allocation6 + $0x2f8] sm:$0xf0]  ;;  %v13839_v45 = vor.u32 %v14784_v12, %v13838_v8  ;;  %v14798_v57 = vld [vmem:[#allocation6 + $0x28c] sm:$0xf] }
 0xd64   :  { %v13955_v34 = vor.u32 %v14810_v21, %v13952_v16  ;;  %v13776_v25 = vld [vmem:[#allocation6 + $0x198] sm:$0xf0]  ;;  %v14730_v32 = vld [vmem:[#allocation6 + $0x6c] sm:$0xf] }
 0xd65   :  { %10563 = vmatpush.bf16.msra.mxu2 %v13647_v1  ;;  %v14742_v1 = vld [vmem:[#allocation6 + $0xcc] sm:$0xf]  ;;  %v13904_v40 = vld [vmem:[#allocation6 + $0x298] sm:$0xf0]  ;;  %v13779_v49 = vor.u32 %v14766_v27, %v13776_v25 }
 0xd66   :  { %10601 = vmatpush.bf16.msra.mxu0 %v14047_v37  ;;  %10576 = vmatpush.bf16.msrb.mxu3 %v13775_v47  ;;  %v13827_v37 = vor.u32 %v14778_v15, %v13824_v38  ;;  %v13680_v47 = vld [vmem:[#allocation6 + $0xd8] sm:$0xf0]  ;;  %v13907_v29 = vor.u32 %v14798_v57, %v13904_v40  ;;  %v14762_v28 = vld [vmem:[#allocation6 + $0x16c] sm:$0xf] }
 0xd67   :  { %10589 = vmatpush.bf16.msrb.mxu1 %v13903_v4  ;;  %v14774_v4 = vld [vmem:[#allocation6 + $0x1cc] sm:$0xf]  ;;  %v13632_v41 = vld [vmem:[#allocation6 + $0x78] sm:$0xf0] }
 0xd68   :  { %v14032_v19 = vld [vmem:[#allocation6 + $0x398] sm:$0xf0]  ;;  %v14794_v39 = vld [vmem:[#allocation6 + $0x26c] sm:$0xf]  ;;  %v13635_v15 = vor.u32 %v14730_v32, %v13632_v41 }
 0xd69   :  { %10564 = vmatpush.bf16.msra.mxu2 %v13631_v23  ;;  %v13683_v23 = vor.u32 %v14742_v1, %v13680_v47  ;;  %v13888_v30 = vld [vmem:[#allocation6 + $0x278] sm:$0xf0]  ;;  %v14726_v8 = vld [vmem:[#allocation6 + $0x4c] sm:$0xf] }
 0xd6a   :  { %10602 = vmatpush.bf16.msra.mxu0 %v14031_v54  ;;  %10577 = vmatpush.bf16.msrb.mxu3 %v13759_v33  ;;  %v14083_v54 = vor.u32 %v14842_v58, %v14080_v18  ;;  %v13811_v33 = vor.u32 %v14774_v4, %v13808_v31  ;;  %v14016_v21 = vld [vmem:[#allocation6 + $0x378] sm:$0xf0]  ;;  %v13891_v16 = vor.u32 %v14794_v39, %v13888_v30  ;;  %v14790_v63 = vld [vmem:[#allocation6 + $0x24c] sm:$0xf] }
 0xd6b   :  { %10590 = vmatpush.bf16.msrb.mxu1 %v13887_v11  ;;  %v13939_v11 = vor.u32 %v14806_v0, %v13936_v13  ;;  %v13872_v61 = vld [vmem:[#allocation6 + $0x258] sm:$0xf0]  ;;  %v14822_v18 = vld [vmem:[#allocation6 + $0x34c] sm:$0xf] }
 0xd6c   :  { %v13600_v58 = vld [vmem:[#allocation6 + $0x38] sm:$0xf0]  ;;  %v13875_v4 = vor.u32 %v14790_v63, %v13872_v61  ;;  %v14754_v31 = vld [vmem:[#allocation6 + $0x12c] sm:$0xf] }
 0xd6d   :  { %10565 = vmatpush.bf16.msra.mxu2 %v13615_v24  ;;  %v13667_v24 = vor.u32 %v14738_v50, %v13664_v60  ;;  %v14786_v0 = vld [vmem:[#allocation6 + $0x22c] sm:$0xf]  ;;  %v13856_v13 = vld [vmem:[#allocation6 + $0x238] sm:$0xf0] }
 0xd6e   :  { %10603 = vmatpush.bf16.msra.mxu0 %v14015_v5  ;;  %10578 = vmatpush.bf16.msrb.mxu3 %v13743_v53  ;;  %v14067_v5 = vor.u32 %v14838_v6, %v14064_v46  ;;  %v13795_v53 = vor.u32 %v14770_v51, %v13792_v42  ;;  %v14718_v50 = vld [vmem:[#allocation6 + $0xc] sm:$0xf]  ;;  %v13584_v60 = vld [vmem:[#allocation6 + $0x18] sm:$0xf0] }
 0xd6f   :  { %10591 = vmatpush.bf16.msrb.mxu1 %v13871_v44  ;;  %v13923_v44 = vor.u32 %v14802_v48, %v13920_v7  ;;  %v14818_v6 = vld [vmem:[#allocation6 + $0x32c] sm:$0xf]  ;;  %v13984_v46 = vld [vmem:[#allocation6 + $0x338] sm:$0xf0] }
 0xd70   :  { %v14750_v51 = vld [vmem:[#allocation6 + $0x10c] sm:$0xf]  ;;  %v13712_v42 = vld [vmem:[#allocation6 + $0x118] sm:$0xf0] }
 0xd71   :  { %10566 = vmatpush.bf16.msra.mxu2 %v13599_v14  ;;  %v13651_v14 = vor.u32 %v14734_v62, %v13648_v35  ;;  %v14782_v48 = vld [vmem:[#allocation6 + $0x20c] sm:$0xf]  ;;  %v13840_v7 = vld [vmem:[#allocation6 + $0x218] sm:$0xf0]  ;;  %v13715_v62 = vor.u32 %v14750_v51, %v13712_v42 }
 0xd72   :  { %10604 = vmatpush.bf16.msra.mxu0 %v13999_v20  ;;  %10579 = vmatpush.bf16.msrb.mxu3 %v13727_v17  ;;  %v14051_v20 = vor.u32 %v14834_v55, %v14048_v10  ;;  %v14830_v17 = vld [vmem:[#allocation6 + $0x38c] sm:$0xf]  ;;  %v13968_v35 = vld [vmem:[#allocation6 + $0x318] sm:$0xf0]  ;;  %v13843_v55 = vor.u32 %v14782_v48, %v13840_v7 }
 0xd73   :  { %10592 = vmatpush.bf16.msrb.mxu1 %v13855_v43  ;;  %v13760_v43 = vld [vmem:[#allocation6 + $0x178] sm:$0xf0]  ;;  %v14035_v38 = vor.u32 %v14830_v17, %v14032_v19 }
 0xd74   :  { %v13763_v12 = vor.u32 %v14762_v28, %v13760_v43 }
 0xd75   :  { %10567 = vmatpush.bf16.msra.mxu2 %v13583_v26  ;;  %v13616_v26 = vld [vmem:[#allocation6 + $0x58] sm:$0xf0] }
 0xd76   :  { %10605 = vmatpush.bf16.msra.mxu0 %v13983_v2  ;;  %10580 = vmatpush.bf16.msrb.mxu3 %v13711_v9  ;;  %v14826_v2 = vld [vmem:[#allocation6 + $0x36c] sm:$0xf]  ;;  %v13619_v1 = vor.u32 %v14726_v8, %v13616_v26 }
 0xd77   :  { %10593 = vmatpush.bf16.msrb.mxu1 %v13839_v45  ;;  %v14758_v9 = vld [vmem:[#allocation6 + $0x14c] sm:$0xf] }
 0xd78   :  { %10568 = vmatmul.bf16.vlgmr.msra.gmra.mxu2 %v18174_v36  ;;  %v14722_v45 = vld [vmem:[#allocation6 + $0x2c] sm:$0xf] }
 0xd79   :  { %10612 = vmatpush.bf16.msrb.mxu2 %v13699_v59  ;;  %10581 = vmatmul.bf16.vlgmr.msrb.gmra.mxu3 %v18178_v56  ;;  %v13744_v59 = vld [vmem:[#allocation6 + $0x158] sm:$0xf0] }
 0xd7a   :  { %10625 = vmatpush.bf16.msra.mxu3 %v13827_v37  ;;  %10606 = vmatpush.bf16.msra.mxu0 %v13967_v22  ;;  %v14019_v37 = vor.u32 %v14826_v2, %v14016_v21  ;;  %v13747_v47 = vor.u32 %v14758_v9, %v13744_v59  ;;  %v13728_v22 = vld [vmem:[#allocation6 + $0x138] sm:$0xf0] }
 0xd7b   :  { %10638 = vmatpush.bf16.msra.mxu1 %v13955_v34  ;;  %v14000_v34 = vld [vmem:[#allocation6 + $0x358] sm:$0xf0] }
 0xd7c   :  { %10594 = vmatmul.bf16.vlgmr.msrb.gmra.mxu1 %v18182_v3 }
 0xd7d   :  { %10613 = vmatpush.bf16.msrb.mxu2 %v13683_v23  ;;  %10607 = vmatmul.bf16.vlgmr.msra.gmra.mxu0 %v18186_v52  ;;  %v13603_v23 = vor.u32 %v14722_v45, %v13600_v58 }
 0xd7e   :  { %10651 = vmatpush.bf16.msrb.mxu0 %v14083_v54  ;;  %10626 = vmatpush.bf16.msra.mxu3 %v13811_v33  ;;  %v14003_v54 = vor.u32 %v14822_v18, %v14000_v34  ;;  %v13731_v33 = vor.u32 %v14754_v31, %v13728_v22 }
 0xd7f   :  { %10639 = vmatpush.bf16.msra.mxu1 %v13939_v11  ;;  %v13859_v11 = vor.u32 %v14786_v0, %v13856_v13 }
 0xd81   :  { %10614 = vmatpush.bf16.msrb.mxu2 %v13667_v24  ;;  %v13587_v24 = vor.u32 %v14718_v50, %v13584_v60 }
 0xd82   :  { %10652 = vmatpush.bf16.msrb.mxu0 %v14067_v5  ;;  %10627 = vmatpush.bf16.msra.mxu3 %v13795_v53  ;;  %v13987_v5 = vor.u32 %v14818_v6, %v13984_v46  ;;  %v14814_v53 = vld [vmem:[#allocation6 + $0x30c] sm:$0xf] }
 0xd83   :  { %10640 = vmatpush.bf16.msra.mxu1 %v13923_v44  ;;  %v13971_v10 = vor.u32 %v14814_v53, %v13968_v35  ;;  %v9806_v44 = vld [vmem:[#allocation25] sm:$0xf] }
 0xd84   :  { %v9808_v25 = vperm.slane %v9806_v44, 0  ;;  %v9810_v63 = vperm.slane %v9806_v44, 2  ;;  %v9811_v31 = vperm.slane %v9806_v44, 3 }
 0xd85   :  { %10615 = vmatpush.bf16.msrb.mxu2 %v13651_v14 }
 0xd86   :  { %10653 = vmatpush.bf16.msrb.mxu0 %v14051_v20  ;;  %10628 = vmatpush.bf16.msra.mxu3 %v13779_v49 }
 0xd87   :  { %10641 = vmatpush.bf16.msra.mxu1 %v13907_v29 }
 0xd89   :  { %10616 = vmatpush.bf16.msrb.mxu2 %v13635_v15 }
 0xd8a   :  { %10654 = vmatpush.bf16.msrb.mxu0 %v14035_v38  ;;  %10629 = vmatpush.bf16.msra.mxu3 %v13763_v12 }
 0xd8b   :  { %10642 = vmatpush.bf16.msra.mxu1 %v13891_v16  ;;  %v9809_v16 = vperm.slane %v9806_v44, 1 }
 0xd8d   :  { %10617 = vmatpush.bf16.msrb.mxu2 %v13619_v1 }
 0xd8e   :  { %10655 = vmatpush.bf16.msrb.mxu0 %v14019_v37  ;;  %10630 = vmatpush.bf16.msra.mxu3 %v13747_v47 }
 0xd8f   :  { %10643 = vmatpush.bf16.msra.mxu1 %v13875_v4 }
 0xd91   :  { %10618 = vmatpush.bf16.msrb.mxu2 %v13603_v23 }
 0xd92   :  { %10656 = vmatpush.bf16.msrb.mxu0 %v14003_v54  ;;  %10631 = vmatpush.bf16.msra.mxu3 %v13731_v33 }
 0xd93   :  { %10644 = vmatpush.bf16.msra.mxu1 %v13859_v11 }
 0xd95   :  { %10619 = vmatpush.bf16.msrb.mxu2 %v13587_v24 }
 0xd96   :  { %10657 = vmatpush.bf16.msrb.mxu0 %v13987_v5  ;;  %10632 = vmatpush.bf16.msra.mxu3 %v13715_v62 }
 0xd97   :  { %10645 = vmatpush.bf16.msra.mxu1 %v13843_v55 }
 0xd98   :  { %10620 = vmatmul.bf16.vlgmr.msrb.gmra.mxu2 %v18174_v36 }
 0xd99   :  { %10633 = vmatmul.bf16.vlgmr.msra.gmra.mxu3 %v18178_v56 }
 0xd9a   :  { %10658 = vmatpush.bf16.msrb.mxu0 %v13971_v10  ;;  %10646 = vmatmul.bf16.vlgmr.msra.gmra.mxu1 %v18182_v3 }
 0xd9d   :  { %10659 = vmatmul.bf16.vlgmr.msrb.gmra.mxu0 %v18186_v52 }
 0xdb9   :  { %v10491_v27 = vpop.f32.mrf.mxu1 }
 0xdba   :  { %v10504_v57 = vpop.f32.mrf.mxu0 }
 0xdbb   :  { %v10465_v40 = vpop.f32.mrf.mxu2 }
 0xdbc   :  { %v10466_v14 = vadd.f32 %v10465_v40, %v9808_v25  ;;  %v10478_v20 = vpop.f32.mrf.mxu3 }
 0xdbe   :  { %v10479_v32 = vadd.f32 %v10478_v20, %v10466_v14 }
 0xdc0   :  { %v10492_v41 = vadd.f32 %v10491_v27, %v10479_v32 }
 0xdc1   :  { %v10493_v49 = vpop.f32.mrf.mxu1 }
 0xdc2   :  { %v10506_v17 = vpop.f32.mrf.mxu0  ;;  %v10505_v19 = vadd.f32 %v10504_v57, %v10492_v41 }
 0xdc3   :  { %v10467_v36 = vpop.f32.mrf.mxu2 }
 0xdc4   :  { %v10480_v29 = vpop.f32.mrf.mxu3 }
 0xdd9   :  { %v10543_v56 = vpop.f32.mrf.mxu1 }
 0xdda   :  { %v10556_v28 = vpop.f32.mrf.mxu0 }
 0xddb   :  { %v10517_v43 = vpop.f32.mrf.mxu2 }
 0xddc   :  { %v10530_v3 = vpop.f32.mrf.mxu3  ;;  %v10518_v61 = vadd.f32 %v10517_v43, %v9809_v16 }
 0xdde   :  { %v10531_v37 = vadd.f32 %v10530_v3, %v10518_v61 }
 0xde0   :  { %v10544_v47 = vadd.f32 %v10543_v56, %v10531_v37 }
 0xde1   :  { %v10545_v39 = vpop.f32.mrf.mxu1 }
 0xde2   :  { %v10558_v52 = vpop.f32.mrf.mxu0  ;;  %v10557_v18 = vadd.f32 %v10556_v28, %v10544_v47 }
 0xde3   :  { %v10519_v30 = vpop.f32.mrf.mxu2 }
 0xde4   :  { %v10532_v15 = vpop.f32.mrf.mxu3  ;;  %14948 = vtanh.f32 %v10557_v18 }
 0xde5   :  { %14950 = vtanh.f32 %v10505_v19 }
 0xdea   :  { %v14949_v33 = vpop.eup %14948 }
 0xdeb   :  { %v14951_v6 = vpop.eup %14950  ;;  %v10669_v48 = vmul.f32 %v14949_v33, %v14949_v33 }
 0xdec   :  { %v10668_v24 = vmul.f32 %v14951_v6, %v14951_v6 }
 0xded   :  { %v10673_v62 = vsel %vm9511_vm4, %v10669_v48, 0.0 }
 0xdee   :  { %v10672_v53 = vsel %vm9511_vm4, %v10668_v24, 0.0 }
 0xdef   :  { %v10674_v10 = vadd.f32 %v10673_v62, %v10672_v53 }
 0xdf9   :  { %v10595_v38 = vpop.f32.mrf.mxu1 }
 0xdfa   :  { %v10608_v8 = vpop.f32.mrf.mxu0 }
 0xdfb   :  { %v10569_v12 = vpop.f32.mrf.mxu2 }
 0xdfc   :  { %v10582_v26 = vpop.f32.mrf.mxu3  ;;  %v10570_v1 = vadd.f32 %v10569_v12, %v9810_v63 }
 0xdfe   :  { %v10583_v45 = vadd.f32 %v10582_v26, %v10570_v1 }
 0xe00   :  { %v10596_v58 = vadd.f32 %v10595_v38, %v10583_v45 }
 0xe01   :  { %v10597_v2 = vpop.f32.mrf.mxu1 }
 0xe02   :  { %v10610_v21 = vpop.f32.mrf.mxu0  ;;  %v10609_v4 = vadd.f32 %v10608_v8, %v10596_v58 }
 0xe03   :  { %v10571_v9 = vpop.f32.mrf.mxu2 }
 0xe04   :  { %v10584_v59 = vpop.f32.mrf.mxu3  ;;  %14952 = vtanh.f32 %v10609_v4 }
 0xe0a   :  { %v14953_v11 = vpop.eup %14952 }
 0xe0b   :  { %v10670_v5 = vmul.f32 %v14953_v11, %v14953_v11 }
 0xe0d   :  { %v10675_v35 = vsel %vm9511_vm4, %v10670_v5, 0.0 }
 0xe0e   :  { %v10676_v27 = vadd.f32 %v10675_v35, %v10674_v10 }
 0xe17   :  { %v10647_v34 = vpop.f32.mrf.mxu1 }
 0xe1a   :  { %v10660_v22 = vpop.f32.mrf.mxu0 }
 0xe1b   :  { %v10621_v0 = vpop.f32.mrf.mxu2 }
 0xe1c   :  { %v10622_v13 = vadd.f32 %v10621_v0, %v9811_v31  ;;  %v10634_v23 = vpop.f32.mrf.mxu3 }
 0xe1e   :  { %v10635_v54 = vadd.f32 %v10634_v23, %v10622_v13 }
 0xe1f   :  { %v10649_v50 = vpop.f32.mrf.mxu1 }
 0xe20   :  { %v10648_v60 = vadd.f32 %v10647_v34, %v10635_v54 }
 0xe22   :  { %v10662_v46 = vpop.f32.mrf.mxu0  ;;  %v10661_v51 = vadd.f32 %v10660_v22, %v10648_v60 }
 0xe23   :  { %v10623_v42 = vpop.f32.mrf.mxu2 }
 0xe24   :  { %14954 = vtanh.f32 %v10661_v51  ;;  %v10636_v7 = vpop.f32.mrf.mxu3 }
 0xe2a   :  { %v14955_v55 = vpop.eup %14954 }
 0xe2b   :  { %v10671_v44 = vmul.f32 %v14955_v55, %v14955_v55 }
 0xe2d   :  { %v10677_v25 = vsel %vm9511_vm4, %v10671_v44, 0.0 }
 0xe2e   :  { %v10678_v57 = vadd.f32 %v10677_v25, %v10676_v27 }
 0xe30   :  { %10679 = vadd.xlane.f32.xlu0 %v10678_v57 }
 0xea3   :  { %v10680_v40 = vpop.xlane.xlu0 %10679 }
 0xea4   :  { %14956 = vrsqrt.f32 %v10680_v40  ;;  %vm10688_vm5 = vcmp.eq.f32.partialorder %v10680_v40, inf  ;;  %v10691_v36 = vand.u32 2147483648, %v10680_v40  ;;  %vm10690_vm2 = vcmp.eq.f32.partialorder %v10680_v40, 0.0 }
 0xeaa   :  { %v14957_v14 = vpop.eup %14956 }
 0xeab   :  { %v10682_v20 = vmul.f32 %v14957_v14, %v10680_v40 }
 0xead   :  { %v10683_v32 = vmul.f32 %v14957_v14, %v10682_v20 }
 0xeaf   :  { %v10684_v49 = vmul.f32 0.5, %v10683_v32 }
 0xeb1   :  { %v10685_v41 = vsub.f32 1.5, %v10684_v49 }
 0xeb3   :  { %v10686_v17 = vmul.f32 %v14957_v14, %v10685_v41 }
 0xeb5   :  { %v10687_v19 = vmul.f32 %v10686_v17, %v10680_v40 }
 0xeb7   :  { %v10689_v29 = vsel %vm10688_vm5, %v10680_v40, %v10687_v19 }
 0xeb8   :  { %v10692_v56 = vsel %vm10690_vm2, %v10691_v36, %v10689_v29 }
 0xeb9   :  { %v10693_v28 = vmax.f32 %v10692_v56, 1e-12 }
 0xebb   :  { %14958 = vrcp.f32 %v10693_v28  ;;  %v10705_v52 = vand.u32 2147483648, %v10693_v28  ;;  %v10703_v15 = vand.u32 2147483647, %v10693_v28  ;;  %vm10699_vm14 = vweird.f32 %v10693_v28 }
 0xebd   :  { %v10706_v8 = vor.u32 1.1754944e-38, %v10705_v52  ;;  %vm10704_vm8 = vcmp.eq.f32.partialorder %v10703_v15, 8.507059e+37 }
 0xec1   :  { %v14959_v43 = vpop.eup %14958 }
 0xec2   :  { %v10695_v3 = vmul.f32 %v14959_v43, %v10693_v28  ;;  %vm10700_vm11 = vweird.f32 %v14959_v43 }
 0xec3   :  { %vm10701_vm13 = vmor %vm10699_vm14, %vm10700_vm11 }
 0xec4   :  { %v10696_v39 = vsub.f32 1.0, %v10695_v3 }
 0xec6   :  { %v10697_v30 = vmul.f32 %v14959_v43, %v10696_v39 }
 0xec8   :  { %v10698_v38 = vadd.f32 %v14959_v43, %v10697_v30 }
 0xeca   :  { %v10702_v12 = vsel %vm10701_vm13, %v14959_v43, %v10698_v38 }
 0xecb   :  { %v10707_v26 = vsel %vm10704_vm8, %v10706_v8, %v10702_v12 }
 0xecc   :  { %v10709_v2 = vmul.f32 %v14949_v33, %v10707_v26  ;;  %v10710_v21 = vmul.f32 %v14953_v11, %v10707_v26  ;;  %v10711_v16 = vmul.f32 %v14955_v55, %v10707_v26  ;;  %v10708_v9 = vmul.f32 %v14951_v6, %v10707_v26 }
 0xece   :  { %v10716_v59 = vrot.slane %v10709_v2, 6  ;;  %v10717_v63 = vrot.slane %v10710_v21, 4  ;;  %v10718_v61 = vrot.slane %v10711_v16, 2 }
 0xed0   :  { %v10719_v1 = vsel %vm9511_vm4, %v10708_v9, %v10716_v59  ;;  %v10721_v37 = vsel %vm10720_vm3, %v10717_v63, %v10718_v61 }
 0xed1   :  { %v10722_v45 = vsel %vm18675_vm9, %v10719_v1, %v10721_v37 }
 0xed2   :  { %10724 = vst [vmem:[#allocation26] sm:$0xff] %v10722_v45 }
 0xed3   :  { %10735 = dma.vmem_to_hbm [thread:$0]  %s10731_s13, 128, %s10733_s24, [#allocation10]  }
 0xed4   :  { %15312 = dma.done.wait [#allocation10], 128  }
 0xed5   :  { %15313 = vsyncadd [#allocation10], 4294967168 }
 0xed6   :  { %10740 = vsyncpa [#allocation9], 1 }
 0xed7   :  { %10741 = vsyncpa [#allocation12], 1 }
 0xed8   :  { %10742 = vsyncpa [#allocation15], 1 }
 0xed9   :  { %10743 = vsyncpa [#allocation18], 1 }
 0xeda   :  { %10744 = vsyncpa [#allocation21], 1 }
 0xedb   :  { %10745 = vsyncpa [#allocation24], 1 }
 0xedc   :  { %10746 = vsyncpa [#allocation10], 1 }
 0xedd   :  { %10747 = vsyncmov [#allocation7] }
 0xee0   :  { %s10748_s16 = vpop.sfrf %10747 }
 0xee1   :  { %p14084_p0 = scmp.ne.s32.totalorder %s10748_s16, 0 }
 0xee3   :  { %10752 = shalt.err (%p14084_p0)  }
 0xee4   :  { %10754 = vsyncmov [#allocation7 + $0x1] }
 0xee7   :  { %s10755_s25 = vpop.sfrf %10754 }
 0xee8   :  { %p14085_p1 = scmp.ne.s32.totalorder %s10755_s25, 0 }
 0xeea   :  { %10759 = shalt.err (%p14085_p1)  }

</bundles_post_ra>
